<compile_context>
chip_gen: v5e
topology: v5e:2x2
jax: 0.10.0
libtpu: 0.0.40
codegen_flags: <defaults>
</compile_context>

<pallas_src>
import functools
import numpy as np
import jax
import jax.numpy as jnp
from jax.experimental import pallas as pl
from jax.experimental.pallas import tpu as pltpu

LANES = 128


def _round_up(v, m):
    return ((v + m - 1) // m) * m


# ---------------------------------------------------------------------------
# Pallas kernel: 3x3 conv (stride 1, pad 1) + bias + relu.
# 9 accumulated dots (one per tap) -- no im2col concat, peak VMEM ~ 1 tile.
# Output is bf16, lane-dense (Cout pre-padded to 128).
# ---------------------------------------------------------------------------
def _conv3x3_kernel(x_ref, w_ref, b_ref, o_ref, *, H, W, Cin):
    acc = jnp.zeros((H * W, w_ref.shape[-1]), jnp.float32)
    t = 0
    for dy in range(3):
        for dx in range(3):
            tap = x_ref[0, dy:dy + H, dx:dx + W, :].reshape(H * W, Cin)
            acc = acc + jnp.dot(tap, w_ref[t],
                                preferred_element_type=jnp.float32)
            t += 1
    acc = jnp.maximum(acc + b_ref[...], 0.0)
    o_ref[...] = acc.astype(o_ref.dtype)


def conv3x3(x_pad_bf16, wp, bp):
    """x_pad_bf16: [N, H+2, W+2, Cin] bf16 (halo padded);
       wp: [9, Cin, Coutp] bf16; bp: [1, Coutp] f32.
       Returns [N*H*W, Coutp] bf16 (relu applied)."""
    N, Hp2, Wp2, Cin = x_pad_bf16.shape
    H, W = Hp2 - 2, Wp2 - 2
    Coutp = wp.shape[-1]
    assert Coutp % LANES == 0
    # TODO(synk): at real backbone sizes tile the grid over rows (haloed row
    # blocks) so a single image block does not blow past v7x's 64 MiB VMEM.
    return pl.pallas_call(
        functools.partial(_conv3x3_kernel, H=H, W=W, Cin=Cin),
        out_shape=jax.ShapeDtypeStruct((N * H * W, Coutp), jnp.bfloat16),
        grid=(N,),
        in_specs=[
            pl.BlockSpec((1, Hp2, Wp2, Cin), lambda n: (n, 0, 0, 0)),
            pl.BlockSpec(wp.shape, lambda n: (0, 0, 0)),
            pl.BlockSpec(bp.shape, lambda n: (0, 0)),
        ],
        out_specs=pl.BlockSpec((H * W, Coutp), lambda n: (n, 0)),
        compiler_params=pltpu.CompilerParams(
            dimension_semantics=("parallel",)),
    )(x_pad_bf16, wp, bp)


# ---------------------------------------------------------------------------
# Pallas kernel: fused RPN = conv3x3 + relu + 1x1 [loc | score] matmul.
# The relu'd mid feature map stays in VMEM (no HBM round trip).
# ---------------------------------------------------------------------------
def _rpn_kernel(f_ref, wr_ref, br_ref, wo_ref, bo_ref, o_ref, *, H, W, C):
    acc = jnp.zeros((H * W, wr_ref.shape[-1]), jnp.float32)
    t = 0
    for dy in range(3):
        for dx in range(3):
            tap = f_ref[0, dy:dy + H, dx:dx + W, :].reshape(H * W, C)
            acc = acc + jnp.dot(tap, wr_ref[t],
                                preferred_element_type=jnp.float32)
            t += 1
    mid = jnp.maximum(acc + br_ref[...], 0.0).astype(jnp.bfloat16)
    o_ref[...] = (jnp.dot(mid, wo_ref[...],
                          preferred_element_type=jnp.float32) + bo_ref[...])


def rpn_fused(feat_pad_bf16, wr, br, wo, bo):
    """feat_pad_bf16: [N, H+2, W+2, Cp] bf16; wr: [9, Cp, Mp] bf16;
       br: [1, Mp] f32; wo: [Mp, Np] bf16; bo: [1, Np] f32.
       Returns [N*H*W, Np] f32 (fused loc|score logits, lane-dense)."""
    N, Hp2, Wp2, C = feat_pad_bf16.shape
    H, W = Hp2 - 2, Wp2 - 2
    Np_ = wo.shape[-1]
    assert Np_ % LANES == 0
    return pl.pallas_call(
        functools.partial(_rpn_kernel, H=H, W=W, C=C),
        out_shape=jax.ShapeDtypeStruct((N * H * W, Np_), jnp.float32),
        grid=(N,),
        in_specs=[
            pl.BlockSpec((1, Hp2, Wp2, C), lambda n: (n, 0, 0, 0)),
            pl.BlockSpec(wr.shape, lambda n: (0, 0, 0)),
            pl.BlockSpec(br.shape, lambda n: (0, 0)),
            pl.BlockSpec(wo.shape, lambda n: (0, 0)),
            pl.BlockSpec(bo.shape, lambda n: (0, 0)),
        ],
        out_specs=pl.BlockSpec((H * W, Np_), lambda n: (n, 0)),
        compiler_params=pltpu.CompilerParams(
            dimension_semantics=("parallel",)),
    )(feat_pad_bf16, wr, br, wo, bo)


# ---------------------------------------------------------------------------
# Pallas kernel: fused detection head  fc1 -> relu -> fc2 -> relu -> [loc|score]
# ---------------------------------------------------------------------------
def _head_kernel(x_ref, w1_ref, b1_ref, w2_ref, b2_ref, w3_ref, b3_ref, o_ref):
    h = jnp.dot(x_ref[...], w1_ref[...],
                preferred_element_type=jnp.float32) + b1_ref[...]
    h = jnp.maximum(h, 0.0).astype(jnp.bfloat16)
    h = jnp.dot(h, w2_ref[...],
                preferred_element_type=jnp.float32) + b2_ref[...]
    h = jnp.maximum(h, 0.0).astype(jnp.bfloat16)
    o_ref[...] = jnp.dot(h, w3_ref[...],
                         preferred_element_type=jnp.float32) + b3_ref[...]


def head_fused(pooled_bf16, w1, b1, w2, b2, w3, b3):
    """pooled_bf16: [R, K] bf16 (K multiple of 128); returns [R, Np] f32."""
    R, K = pooled_bf16.shape
    Np_ = w3.shape[-1]
    assert K % LANES == 0 and Np_ % LANES == 0 and K == w1.shape[0]
    tm = min(128, _round_up(R, 8))
    Rp = _round_up(R, tm)
    if Rp != R:
        pooled_bf16 = jnp.pad(pooled_bf16, ((0, Rp - R), (0, 0)))
    out = pl.pallas_call(
        _head_kernel,
        out_shape=jax.ShapeDtypeStruct((Rp, Np_), jnp.float32),
        grid=(Rp // tm,),
        in_specs=[
            pl.BlockSpec((tm, K), lambda i: (i, 0)),
            pl.BlockSpec(w1.shape, lambda i: (0, 0)),
            pl.BlockSpec(b1.shape, lambda i: (0, 0)),
            pl.BlockSpec(w2.shape, lambda i: (0, 0)),
            pl.BlockSpec(b2.shape, lambda i: (0, 0)),
            pl.BlockSpec(w3.shape, lambda i: (0, 0)),
            pl.BlockSpec(b3.shape, lambda i: (0, 0)),
        ],
        out_specs=pl.BlockSpec((tm, Np_), lambda i: (i, 0)),
        compiler_params=pltpu.CompilerParams(
            dimension_semantics=("parallel",)),
    )(pooled_bf16, w1, b1, w2, b2, w3, b3)
    return out[:R]


# ---------------------------------------------------------------------------
# RPN utilities (JAX glue around the Pallas hot paths)
# ---------------------------------------------------------------------------
def loc2bbox(src_bbox, loc):
    h = src_bbox[:, 2] - src_bbox[:, 0]
    w = src_bbox[:, 3] - src_bbox[:, 1]
    cy = src_bbox[:, 0] + 0.5 * h
    cx = src_bbox[:, 1] + 0.5 * w
    dy, dx, dh, dw = loc[:, 0], loc[:, 1], loc[:, 2], loc[:, 3]
    ncy = dy * h + cy
    ncx = dx * w + cx
    nh = jnp.exp(dh) * h
    nw = jnp.exp(dw) * w
    return jnp.stack(
        [ncy - 0.5 * nh, ncx - 0.5 * nw, ncy + 0.5 * nh, ncx + 0.5 * nw], axis=1)


def generate_anchors(H, W, feat_stride=1, base_size=4,
                     ratios=(0.5, 1.0, 2.0), scales=(2.0,)):
    anchor_base = []
    for r in ratios:
        for s in scales:
            h = base_size * s * np.sqrt(r)
            w = base_size * s * np.sqrt(1.0 / r)
            anchor_base.append([-h / 2.0, -w / 2.0, h / 2.0, w / 2.0])
    anchor_base = np.asarray(anchor_base, np.float32)                  # [A,4]
    sy, sx = np.meshgrid(np.arange(H) * feat_stride,
                         np.arange(W) * feat_stride, indexing="ij")
    shifts = np.stack([sy.ravel(), sx.ravel(), sy.ravel(), sx.ravel()], axis=1)
    anchors = shifts[:, None, :] + anchor_base[None, :, :]             # [HW,A,4]
    return jnp.asarray(anchors.reshape(-1, 4), jnp.float32)


def roi_align(feat_flat, rois, roi_indices, H, W, out_size=7):
    """Single-sample bilinear RoI-Align via one flat-index gather.
    feat_flat: [N*H*W, C] (C may include zero-padded channels).
    Returns [R, out_size*out_size*C] f32."""
    # TODO(synk): torchvision RoIPool max-pools variable-size bins; replaced by
    # bilinear single-sample RoI-Align. The jnp.take gather stays in XLA here;
    # move it into a Pallas kernel (scalar-prefetched bin indices) once
    # H*W*C / RoI counts make the gather a dominant cost.
    R = rois.shape[0]
    C = feat_flat.shape[-1]
    S = out_size
    y1, x1, y2, x2 = rois[:, 0], rois[:, 1], rois[:, 2], rois[:, 3]
    grid = (jnp.arange(S, dtype=jnp.float32) + 0.5) / S
    ys = jnp.clip(y1[:, None] + grid[None, :] * (y2 - y1)[:, None], 0.0, H - 1.0)
    xs = jnp.clip(x1[:, None] + grid[None, :] * (x2 - x1)[:, None], 0.0, W - 1.0)
    y0f = jnp.floor(ys)
    x0f = jnp.floor(xs)
    y0 = y0f.astype(jnp.int32)
    x0 = x0f.astype(jnp.int32)
    y1i = jnp.minimum(y0 + 1, H - 1)
    x1i = jnp.minimum(x0 + 1, W - 1)
    wy = (ys - y0f)[:, :, None]                                        # [R,S,1]
    wx = (xs - x0f)[:, None, :]                                        # [R,1,S]
    base = (roi_indices.astype(jnp.int32) * (H * W))[:, None, None]    # [R,1,1]

    def gather(yi, xi):
        idx = base + yi[:, :, None] * W + xi[:, None, :]               # [R,S,S]
        return jnp.take(feat_flat, idx.reshape(-1), axis=0
                        ).reshape(R, S, S, C).astype(jnp.float32)

    v00 = gather(y0, x0)
    v01 = gather(y0, x1i)
    v10 = gather(y1i, x0)
    v11 = gather(y1i, x1i)
    w00 = ((1.0 - wy) * (1.0 - wx))[..., None]
    w01 = ((1.0 - wy) * wx)[..., None]
    w10 = (wy * (1.0 - wx))[..., None]
    w11 = (wy * wx)[..., None]
    val = v00 * w00 + v01 * w01 + v10 * w10 + v11 * w11                # [R,S,S,C]
    return val.reshape(R, S * S * C)


# ---------------------------------------------------------------------------
# FasterRCNN forward
# ---------------------------------------------------------------------------
class FasterRCNNPallas:
    def __init__(self, key, in_ch=4, feat_ch=16, mid_ch=16,
                 n_anchor=3, n_class=4, roi_size=7, fc_hidden=32,
                 rois_per_image=16):
        self.n_class = n_class
        self.n_anchor = n_anchor
        self.roi_size = roi_size
        self.rois_per_image = rois_per_image
        ks = jax.random.split(key, 16)
        s = 0.05
        # extractor: one 3x3 conv + relu
        w_ext = jax.random.normal(ks[0], (feat_ch, in_ch, 3, 3), jnp.float32) * s
        b_ext = jax.random.normal(ks[1], (feat_ch,), jnp.float32) * s
        # rpn: 3x3 conv + relu, then 1x1 loc / 1x1 score convs
        w_rpn = jax.random.normal(ks[2], (mid_ch, feat_ch, 3, 3), jnp.float32) * s
        b_rpn = jax.random.normal(ks[3], (mid_ch,), jnp.float32) * s
        w_loc = jax.random.normal(ks[4], (n_anchor * 4, mid_ch, 1, 1), jnp.float32) * s
        b_loc = jax.random.normal(ks[5], (n_anchor * 4,), jnp.float32) * s
        w_sco = jax.random.normal(ks[6], (n_anchor * 2, mid_ch, 1, 1), jnp.float32) * s
        b_sco = jax.random.normal(ks[7], (n_anchor * 2,), jnp.float32) * s
        # head: fc -> relu -> fc -> relu -> (cls_loc, score)
        fc_in = roi_size * roi_size * feat_ch
        w_fc1 = jax.random.normal(ks[8], (fc_in, fc_hidden), jnp.float32) * s
        b_fc1 = jax.random.normal(ks[9], (fc_hidden,), jnp.float32) * s
        w_fc2 = jax.random.normal(ks[10], (fc_hidden, fc_hidden), jnp.float32) * s
        b_fc2 = jax.random.normal(ks[11], (fc_hidden,), jnp.float32) * s
        w_cls_loc = jax.random.normal(ks[12], (fc_hidden, n_class * 4), jnp.float32) * s
        b_cls_loc = jax.random.normal(ks[13], (n_class * 4,), jnp.float32) * s
        w_score = jax.random.normal(ks[14], (fc_hidden, n_class), jnp.float32) * s
        b_score = jax.random.normal(ks[15], (n_class,), jnp.float32) * s

        # ---- pre-pack / pre-pad all weights ONCE (bf16 for the MXU) ----
        # Conv weights: OIHW -> [9, cin_pad, cout_pad] (tap-major); zero padding
        # in cout + zero bias padding keeps padded channels exactly 0 after relu,
        # so downstream zero-padded weight rows make the padding a no-op.
        def pack3x3(w_oihw, cin_pad, cout_pad):
            cout, cin = w_oihw.shape[0], w_oihw.shape[1]
            w = jnp.transpose(w_oihw, (2, 3, 1, 0)).reshape(9, cin, cout)
            w = jnp.pad(w, ((0, 0), (0, cin_pad - cin), (0, cout_pad - cout)))
            return w.astype(jnp.bfloat16)

        def pad_bias(b, n_pad):
            return jnp.pad(b, (0, n_pad - b.shape[0])).reshape(1, -1).astype(jnp.float32)

        self.w_ext_p = pack3x3(w_ext, cin_pad=in_ch, cout_pad=LANES)   # [9,4,128]
        self.b_ext_p = pad_bias(b_ext, LANES)
        self.w_rpn_p = pack3x3(w_rpn, cin_pad=LANES, cout_pad=LANES)   # [9,128,128]
        self.b_rpn_p = pad_bias(b_rpn, LANES)

        # fused RPN 1x1 convs: [mid_pad, 128] with [loc | score] columns.
        a6 = n_anchor * 6
        self.rpn_out_dim = a6
        w_rpno = jnp.concatenate(
            [w_loc.reshape(n_anchor * 4, mid_ch).T,
             w_sco.reshape(n_anchor * 2, mid_ch).T], axis=1)            # [mid, A*6]
        self.w_rpno_p = jnp.pad(
            w_rpno, ((0, LANES - mid_ch), (0, LANES - a6))).astype(jnp.bfloat16)
        self.b_rpno_p = pad_bias(jnp.concatenate([b_loc, b_sco]), LANES)

        # fused head: fc1 -> relu -> fc2 -> relu -> [cls_loc | score].
        # fc1 rows re-laid out for the (S, S, 128-channel) pooled layout.
        w1 = w_fc1.reshape(roi_size, roi_size, feat_ch, fc_hidden)
        w1 = jnp.pad(w1, ((0, 0), (0, 0),
                          (0, LANES - feat_ch), (0, LANES - fc_hidden)))
        self.w_fc1_p = w1.reshape(roi_size * roi_size * LANES, LANES).astype(jnp.bfloat16)
        self.b_fc1_p = pad_bias(b_fc1, LANES)
        self.w_fc2_p = jnp.pad(
            w_fc2, ((0, LANES - fc_hidden), (0, LANES - fc_hidden))).astype(jnp.bfloat16)
        self.b_fc2_p = pad_bias(b_fc2, LANES)
        w_out = jnp.concatenate([w_cls_loc, w_score], axis=1)           # [32, 20]
        self.w_out_p = jnp.pad(
            w_out, ((0, LANES - fc_hidden), (0, LANES - n_class * 5))).astype(jnp.bfloat16)
        self.b_out_p = pad_bias(jnp.concatenate([b_cls_loc, b_score]), LANES)

    def __call__(self, x_nchw, scale=1.0):
        N, C, H, W = x_nchw.shape
        A = self.n_anchor
        K = self.rois_per_image

        # ---- 1. feature extraction (bf16 activations, lane-dense output) ----
        x = jnp.transpose(x_nchw, (0, 2, 3, 1)).astype(jnp.bfloat16)     # NCHW -> NHWC
        x_pad = jnp.pad(x, ((0, 0), (1, 1), (1, 1), (0, 0)))             # halo
        feat2d = conv3x3(x_pad, self.w_ext_p, self.b_ext_p)              # [N*H*W, 128] bf16
        feat = feat2d.reshape(N, H, W, LANES)

        # ---- 2. RPN: conv3x3+relu fused with the 1x1 [loc|score] matmul ----
        # TODO(synk): the halo pad of feat is one extra XLA round trip; at real
        # shapes write the extractor output directly into a pre-padded buffer.
        feat_pad = jnp.pad(feat, ((0, 0), (1, 1), (1, 1), (0, 0)))
        rpn_out = rpn_fused(feat_pad, self.w_rpn_p, self.b_rpn_p,
                            self.w_rpno_p, self.b_rpno_p)                # [N*H*W, 128] f32
        rpn_locs = rpn_out[:, :A * 4].reshape(N, H * W * A, 4)
        rpn_scores = rpn_out[:, A * 4:A * 6].reshape(N, H * W * A, 2)

        anchors = generate_anchors(H, W)                                 # [HW*A, 4]
        # softmax is monotone in (fg - bg) logit -> rank on the difference.
        fg_logit = rpn_scores[..., 1] - rpn_scores[..., 0]               # [N, HW*A]

        # proposal layer: decode + clip + top-K per image (vmapped).
        # TODO(synk): per-class NMS of the original proposal layer is skipped
        # (data-dependent variable-length output); plain top-K is used instead.
        clip_max = jnp.array([H, W, H, W], jnp.float32)

        def propose(locs_n, logit_n):
            boxes = loc2bbox(anchors, locs_n)
            boxes = jnp.clip(boxes, 0.0, clip_max)
            _, top = jax.lax.top_k(logit_n, K)
            return boxes[top]

        rois = jax.vmap(propose)(rpn_locs, fg_logit).reshape(N * K, 4)   # [N*K, 4]
        roi_indices = jnp.repeat(jnp.arange(N, dtype=jnp.int32), K)      # [N*K]

        # ---- 3. RoI pooling + fused head ----
        pooled = roi_align(feat2d, rois, roi_indices, H, W,
                           self.roi_size).astype(jnp.bfloat16)           # [R, 49*128]
        head_out = head_fused(pooled, self.w_fc1_p, self.b_fc1_p,
                              self.w_fc2_p, self.b_fc2_p,
                              self.w_out_p, self.b_out_p)                # [R, 128]
        final_locs = head_out[:, :self.n_class * 4]                      # [R, n_class*4]
        final_scores = head_out[:, self.n_class * 4:self.n_class * 5]    # [R, n_class]

        return final_locs, final_scores, rois, roi_indices


if __name__ == "__main__":
    key = jax.random.PRNGKey(0)
    k_param, k_x = jax.random.split(key)
    model = FasterRCNNPallas(k_param)

    x = jax.random.normal(k_x, (2, 4, 16, 16), jnp.float32)              # NCHW input
    fwd = jax.jit(model.__call__)
    final_locs, final_scores, rois, roi_indices = fwd(x)
    jax.block_until_ready((final_locs, final_scores, rois, roi_indices))

    assert final_locs.shape == (32, 16)
    assert final_scores.shape == (32, 4)
    assert rois.shape == (32, 4)
    assert roi_indices.shape == (32,)
    assert np.all(np.isfinite(np.asarray(final_locs)))
    assert np.all(np.isfinite(np.asarray(final_scores)))
    print("KERNEL_OK")
</pallas_src>

<mosaic_0001>
module attributes {stable_mosaic.version = 11 : i64} {
  func.func @_conv3x3_kernel(%arg0: i32, %arg1: memref<1x18x18x4xbf16, #tpu.memory_space<vmem>>, %arg2: memref<9x4x128xbf16, #tpu.memory_space<vmem>>, %arg3: memref<1x128xf32, #tpu.memory_space<vmem>>, %arg4: memref<256x128xbf16, #tpu.memory_space<vmem>>) attributes {dimension_semantics = [#tpu.dimension_semantics<parallel>], iteration_bounds = array<i64: 2>, scalar_prefetch = 0 : i64, scratch_operands = 0 : i64, tpu.core_type = #tpu.core_type<tc>, window_params = [{transform_indices = @transform_0, window_bounds = array<i64: 1, 18, 18, 4>}, {pipeline_mode = #tpu.pipeline_mode<synchronous>, transform_indices = @transform_1, window_bounds = array<i64: 9, 4, 128>}, {pipeline_mode = #tpu.pipeline_mode<synchronous>, transform_indices = @transform_2, window_bounds = array<i64: 1, 128>}, {transform_indices = @transform_3, window_bounds = array<i64: 256, 128>}]} {
    %cst = arith.constant 0.000000e+00 : f32
    %0 = vector.broadcast %cst : f32 to vector<256x128xf32>
    %c0 = arith.constant 0 : index
    %c0_0 = arith.constant 0 : index
    %c0_1 = arith.constant 0 : index
    %c0_2 = arith.constant 0 : index
    %1 = vector.load %arg1[%c0, %c0_0, %c0_1, %c0_2] : memref<1x18x18x4xbf16, #tpu.memory_space<vmem>>, vector<1x16x16x4xbf16>
    %2 = vector.shape_cast %1 : vector<1x16x16x4xbf16> to vector<16x16x4xbf16>
    %3 = vector.shape_cast %2 : vector<16x16x4xbf16> to vector<256x4xbf16>
    %c0_3 = arith.constant 0 : index
    %c0_4 = arith.constant 0 : index
    %c0_5 = arith.constant 0 : index
    %4 = vector.load %arg2[%c0_3, %c0_4, %c0_5] : memref<9x4x128xbf16, #tpu.memory_space<vmem>>, vector<1x4x128xbf16>
    %5 = vector.shape_cast %4 : vector<1x4x128xbf16> to vector<4x128xbf16>
    %cst_6 = arith.constant dense<0.000000e+00> : vector<256x128xf32>
    %6 = tpu.matmul %3, %5, %cst_6 {dimension_numbers = #tpu.dot_dimension_numbers<[1], [0], [0], [1], [0, 0, 1, 1], [], []>} : vector<256x4xbf16>, vector<4x128xbf16>, vector<256x128xf32> -> vector<256x128xf32>
    %7 = arith.addf %0, %6 : vector<256x128xf32>
    %c0_7 = arith.constant 0 : index
    %c0_8 = arith.constant 0 : index
    %c1 = arith.constant 1 : index
    %c0_9 = arith.constant 0 : index
    %8 = vector.load %arg1[%c0_7, %c0_8, %c1, %c0_9] : memref<1x18x18x4xbf16, #tpu.memory_space<vmem>>, vector<1x16x16x4xbf16>
    %9 = vector.shape_cast %8 : vector<1x16x16x4xbf16> to vector<16x16x4xbf16>
    %10 = vector.shape_cast %9 : vector<16x16x4xbf16> to vector<256x4xbf16>
    %c1_10 = arith.constant 1 : index
    %c0_11 = arith.constant 0 : index
    %c0_12 = arith.constant 0 : index
    %11 = vector.load %arg2[%c1_10, %c0_11, %c0_12] : memref<9x4x128xbf16, #tpu.memory_space<vmem>>, vector<1x4x128xbf16>
    %12 = vector.shape_cast %11 : vector<1x4x128xbf16> to vector<4x128xbf16>
    %cst_13 = arith.constant dense<0.000000e+00> : vector<256x128xf32>
    %13 = tpu.matmul %10, %12, %cst_13 {dimension_numbers = #tpu.dot_dimension_numbers<[1], [0], [0], [1], [0, 0, 1, 1], [], []>} : vector<256x4xbf16>, vector<4x128xbf16>, vector<256x128xf32> -> vector<256x128xf32>
    %14 = arith.addf %7, %13 : vector<256x128xf32>
    %c0_14 = arith.constant 0 : index
    %c0_15 = arith.constant 0 : index
    %c2 = arith.constant 2 : index
    %c0_16 = arith.constant 0 : index
    %15 = vector.load %arg1[%c0_14, %c0_15, %c2, %c0_16] : memref<1x18x18x4xbf16, #tpu.memory_space<vmem>>, vector<1x16x16x4xbf16>
    %16 = vector.shape_cast %15 : vector<1x16x16x4xbf16> to vector<16x16x4xbf16>
    %17 = vector.shape_cast %16 : vector<16x16x4xbf16> to vector<256x4xbf16>
    %c2_17 = arith.constant 2 : index
    %c0_18 = arith.constant 0 : index
    %c0_19 = arith.constant 0 : index
    %18 = vector.load %arg2[%c2_17, %c0_18, %c0_19] : memref<9x4x128xbf16, #tpu.memory_space<vmem>>, vector<1x4x128xbf16>
    %19 = vector.shape_cast %18 : vector<1x4x128xbf16> to vector<4x128xbf16>
    %cst_20 = arith.constant dense<0.000000e+00> : vector<256x128xf32>
    %20 = tpu.matmul %17, %19, %cst_20 {dimension_numbers = #tpu.dot_dimension_numbers<[1], [0], [0], [1], [0, 0, 1, 1], [], []>} : vector<256x4xbf16>, vector<4x128xbf16>, vector<256x128xf32> -> vector<256x128xf32>
    %21 = arith.addf %14, %20 : vector<256x128xf32>
    %c0_21 = arith.constant 0 : index
    %c1_22 = arith.constant 1 : index
    %c0_23 = arith.constant 0 : index
    %c0_24 = arith.constant 0 : index
    %22 = vector.load %arg1[%c0_21, %c1_22, %c0_23, %c0_24] : memref<1x18x18x4xbf16, #tpu.memory_space<vmem>>, vector<1x16x16x4xbf16>
    %23 = vector.shape_cast %22 : vector<1x16x16x4xbf16> to vector<16x16x4xbf16>
    %24 = vector.shape_cast %23 : vector<16x16x4xbf16> to vector<256x4xbf16>
    %c3 = arith.constant 3 : index
    %c0_25 = arith.constant 0 : index
    %c0_26 = arith.constant 0 : index
    %25 = vector.load %arg2[%c3, %c0_25, %c0_26] : memref<9x4x128xbf16, #tpu.memory_space<vmem>>, vector<1x4x128xbf16>
    %26 = vector.shape_cast %25 : vector<1x4x128xbf16> to vector<4x128xbf16>
    %cst_27 = arith.constant dense<0.000000e+00> : vector<256x128xf32>
    %27 = tpu.matmul %24, %26, %cst_27 {dimension_numbers = #tpu.dot_dimension_numbers<[1], [0], [0], [1], [0, 0, 1, 1], [], []>} : vector<256x4xbf16>, vector<4x128xbf16>, vector<256x128xf32> -> vector<256x128xf32>
    %28 = arith.addf %21, %27 : vector<256x128xf32>
    %c0_28 = arith.constant 0 : index
    %c1_29 = arith.constant 1 : index
    %c1_30 = arith.constant 1 : index
    %c0_31 = arith.constant 0 : index
    %29 = vector.load %arg1[%c0_28, %c1_29, %c1_30, %c0_31] : memref<1x18x18x4xbf16, #tpu.memory_space<vmem>>, vector<1x16x16x4xbf16>
    %30 = vector.shape_cast %29 : vector<1x16x16x4xbf16> to vector<16x16x4xbf16>
    %31 = vector.shape_cast %30 : vector<16x16x4xbf16> to vector<256x4xbf16>
    %c4 = arith.constant 4 : index
    %c0_32 = arith.constant 0 : index
    %c0_33 = arith.constant 0 : index
    %32 = vector.load %arg2[%c4, %c0_32, %c0_33] : memref<9x4x128xbf16, #tpu.memory_space<vmem>>, vector<1x4x128xbf16>
    %33 = vector.shape_cast %32 : vector<1x4x128xbf16> to vector<4x128xbf16>
    %cst_34 = arith.constant dense<0.000000e+00> : vector<256x128xf32>
    %34 = tpu.matmul %31, %33, %cst_34 {dimension_numbers = #tpu.dot_dimension_numbers<[1], [0], [0], [1], [0, 0, 1, 1], [], []>} : vector<256x4xbf16>, vector<4x128xbf16>, vector<256x128xf32> -> vector<256x128xf32>
    %35 = arith.addf %28, %34 : vector<256x128xf32>
    %c0_35 = arith.constant 0 : index
    %c1_36 = arith.constant 1 : index
    %c2_37 = arith.constant 2 : index
    %c0_38 = arith.constant 0 : index
    %36 = vector.load %arg1[%c0_35, %c1_36, %c2_37, %c0_38] : memref<1x18x18x4xbf16, #tpu.memory_space<vmem>>, vector<1x16x16x4xbf16>
    %37 = vector.shape_cast %36 : vector<1x16x16x4xbf16> to vector<16x16x4xbf16>
    %38 = vector.shape_cast %37 : vector<16x16x4xbf16> to vector<256x4xbf16>
    %c5 = arith.constant 5 : index
    %c0_39 = arith.constant 0 : index
    %c0_40 = arith.constant 0 : index
    %39 = vector.load %arg2[%c5, %c0_39, %c0_40] : memref<9x4x128xbf16, #tpu.memory_space<vmem>>, vector<1x4x128xbf16>
    %40 = vector.shape_cast %39 : vector<1x4x128xbf16> to vector<4x128xbf16>
    %cst_41 = arith.constant dense<0.000000e+00> : vector<256x128xf32>
    %41 = tpu.matmul %38, %40, %cst_41 {dimension_numbers = #tpu.dot_dimension_numbers<[1], [0], [0], [1], [0, 0, 1, 1], [], []>} : vector<256x4xbf16>, vector<4x128xbf16>, vector<256x128xf32> -> vector<256x128xf32>
    %42 = arith.addf %35, %41 : vector<256x128xf32>
    %c0_42 = arith.constant 0 : index
    %c2_43 = arith.constant 2 : index
    %c0_44 = arith.constant 0 : index
    %c0_45 = arith.constant 0 : index
    %43 = vector.load %arg1[%c0_42, %c2_43, %c0_44, %c0_45] : memref<1x18x18x4xbf16, #tpu.memory_space<vmem>>, vector<1x16x16x4xbf16>
    %44 = vector.shape_cast %43 : vector<1x16x16x4xbf16> to vector<16x16x4xbf16>
    %45 = vector.shape_cast %44 : vector<16x16x4xbf16> to vector<256x4xbf16>
    %c6 = arith.constant 6 : index
    %c0_46 = arith.constant 0 : index
    %c0_47 = arith.constant 0 : index
    %46 = vector.load %arg2[%c6, %c0_46, %c0_47] : memref<9x4x128xbf16, #tpu.memory_space<vmem>>, vector<1x4x128xbf16>
    %47 = vector.shape_cast %46 : vector<1x4x128xbf16> to vector<4x128xbf16>
    %cst_48 = arith.constant dense<0.000000e+00> : vector<256x128xf32>
    %48 = tpu.matmul %45, %47, %cst_48 {dimension_numbers = #tpu.dot_dimension_numbers<[1], [0], [0], [1], [0, 0, 1, 1], [], []>} : vector<256x4xbf16>, vector<4x128xbf16>, vector<256x128xf32> -> vector<256x128xf32>
    %49 = arith.addf %42, %48 : vector<256x128xf32>
    %c0_49 = arith.constant 0 : index
    %c2_50 = arith.constant 2 : index
    %c1_51 = arith.constant 1 : index
    %c0_52 = arith.constant 0 : index
    %50 = vector.load %arg1[%c0_49, %c2_50, %c1_51, %c0_52] : memref<1x18x18x4xbf16, #tpu.memory_space<vmem>>, vector<1x16x16x4xbf16>
    %51 = vector.shape_cast %50 : vector<1x16x16x4xbf16> to vector<16x16x4xbf16>
    %52 = vector.shape_cast %51 : vector<16x16x4xbf16> to vector<256x4xbf16>
    %c7 = arith.constant 7 : index
    %c0_53 = arith.constant 0 : index
    %c0_54 = arith.constant 0 : index
    %53 = vector.load %arg2[%c7, %c0_53, %c0_54] : memref<9x4x128xbf16, #tpu.memory_space<vmem>>, vector<1x4x128xbf16>
    %54 = vector.shape_cast %53 : vector<1x4x128xbf16> to vector<4x128xbf16>
    %cst_55 = arith.constant dense<0.000000e+00> : vector<256x128xf32>
    %55 = tpu.matmul %52, %54, %cst_55 {dimension_numbers = #tpu.dot_dimension_numbers<[1], [0], [0], [1], [0, 0, 1, 1], [], []>} : vector<256x4xbf16>, vector<4x128xbf16>, vector<256x128xf32> -> vector<256x128xf32>
    %56 = arith.addf %49, %55 : vector<256x128xf32>
    %c0_56 = arith.constant 0 : index
    %c2_57 = arith.constant 2 : index
    %c2_58 = arith.constant 2 : index
    %c0_59 = arith.constant 0 : index
    %57 = vector.load %arg1[%c0_56, %c2_57, %c2_58, %c0_59] : memref<1x18x18x4xbf16, #tpu.memory_space<vmem>>, vector<1x16x16x4xbf16>
    %58 = vector.shape_cast %57 : vector<1x16x16x4xbf16> to vector<16x16x4xbf16>
    %59 = vector.shape_cast %58 : vector<16x16x4xbf16> to vector<256x4xbf16>
    %c8 = arith.constant 8 : index
    %c0_60 = arith.constant 0 : index
    %c0_61 = arith.constant 0 : index
    %60 = vector.load %arg2[%c8, %c0_60, %c0_61] : memref<9x4x128xbf16, #tpu.memory_space<vmem>>, vector<1x4x128xbf16>
    %61 = vector.shape_cast %60 : vector<1x4x128xbf16> to vector<4x128xbf16>
    %cst_62 = arith.constant dense<0.000000e+00> : vector<256x128xf32>
    %62 = tpu.matmul %59, %61, %cst_62 {dimension_numbers = #tpu.dot_dimension_numbers<[1], [0], [0], [1], [0, 0, 1, 1], [], []>} : vector<256x4xbf16>, vector<4x128xbf16>, vector<256x128xf32> -> vector<256x128xf32>
    %63 = arith.addf %56, %62 : vector<256x128xf32>
    %c0_63 = arith.constant 0 : index
    %c0_64 = arith.constant 0 : index
    %64 = vector.load %arg3[%c0_63, %c0_64] : memref<1x128xf32, #tpu.memory_space<vmem>>, vector<1x128xf32>
    %65 = vector.broadcast %64 : vector<1x128xf32> to vector<256x128xf32>
    %66 = arith.addf %63, %65 : vector<256x128xf32>
    %cst_65 = arith.constant 0.000000e+00 : f32
    %67 = vector.broadcast %cst_65 : f32 to vector<256x128xf32>
    %68 = arith.maximumf %66, %67 : vector<256x128xf32>
    %69 = arith.truncf %68 : vector<256x128xf32> to vector<256x128xbf16>
    %c0_66 = arith.constant 0 : index
    %c0_67 = arith.constant 0 : index
    %70 = vector.load %arg4[%c0_66, %c0_67] : memref<256x128xbf16, #tpu.memory_space<vmem>>, vector<256x128xbf16>
    tpu.vector_store %arg4[%c0_66, %c0_67], %69 {strides = array<i32>} : memref<256x128xbf16, #tpu.memory_space<vmem>>, vector<256x128xbf16>,
    return
  }
  func.func @transform_0(%arg0: i32) -> (i32, i32, i32, i32) {
    %c0_i32 = arith.constant 0 : i32
    %c0_i32_0 = arith.constant 0 : i32
    %c0_i32_1 = arith.constant 0 : i32
    %c0_i32_2 = arith.constant 0 : i32
    return %arg0, %c0_i32, %c0_i32_0, %c0_i32_1 : i32, i32, i32, i32
  }
  func.func @transform_1(%arg0: i32) -> (i32, i32, i32) {
    %c0_i32 = arith.constant 0 : i32
    %c0_i32_0 = arith.constant 0 : i32
    %c0_i32_1 = arith.constant 0 : i32
    %c0_i32_2 = arith.constant 0 : i32
    return %c0_i32, %c0_i32_0, %c0_i32_1 : i32, i32, i32
  }
  func.func @transform_2(%arg0: i32) -> (i32, i32) {
    %c0_i32 = arith.constant 0 : i32
    %c0_i32_0 = arith.constant 0 : i32
    %c0_i32_1 = arith.constant 0 : i32
    return %c0_i32, %c0_i32_0 : i32, i32
  }
  func.func @transform_3(%arg0: i32) -> (i32, i32) {
    %c0_i32 = arith.constant 0 : i32
    %c0_i32_0 = arith.constant 0 : i32
    return %arg0, %c0_i32 : i32, i32
  }
}

module attributes {stable_mosaic.version = 11 : i64} {
  func.func @_rpn_kernel(%arg0: i32, %arg1: memref<1x18x18x128xbf16, #tpu.memory_space<vmem>>, %arg2: memref<9x128x128xbf16, #tpu.memory_space<vmem>>, %arg3: memref<1x128xf32, #tpu.memory_space<vmem>>, %arg4: memref<128x128xbf16, #tpu.memory_space<vmem>>, %arg5: memref<1x128xf32, #tpu.memory_space<vmem>>, %arg6: memref<256x128xf32, #tpu.memory_space<vmem>>) attributes {dimension_semantics = [#tpu.dimension_semantics<parallel>], iteration_bounds = array<i64: 2>, scalar_prefetch = 0 : i64, scratch_operands = 0 : i64, tpu.core_type = #tpu.core_type<tc>, window_params = [{transform_indices = @transform_0, window_bounds = array<i64: 1, 18, 18, 128>}, {pipeline_mode = #tpu.pipeline_mode<synchronous>, transform_indices = @transform_1, window_bounds = array<i64: 9, 128, 128>}, {pipeline_mode = #tpu.pipeline_mode<synchronous>, transform_indices = @transform_2, window_bounds = array<i64: 1, 128>}, {pipeline_mode = #tpu.pipeline_mode<synchronous>, transform_indices = @transform_3, window_bounds = array<i64: 128, 128>}, {pipeline_mode = #tpu.pipeline_mode<synchronous>, transform_indices = @transform_4, window_bounds = array<i64: 1, 128>}, {transform_indices = @transform_5, window_bounds = array<i64: 256, 128>}]} {
    %cst = arith.constant 0.000000e+00 : f32
    %0 = vector.broadcast %cst : f32 to vector<256x128xf32>
    %c0 = arith.constant 0 : index
    %c0_0 = arith.constant 0 : index
    %c0_1 = arith.constant 0 : index
    %c0_2 = arith.constant 0 : index
    %1 = vector.load %arg1[%c0, %c0_0, %c0_1, %c0_2] : memref<1x18x18x128xbf16, #tpu.memory_space<vmem>>, vector<1x16x16x128xbf16>
    %2 = vector.shape_cast %1 : vector<1x16x16x128xbf16> to vector<16x16x128xbf16>
    %3 = vector.shape_cast %2 : vector<16x16x128xbf16> to vector<256x128xbf16>
    %c0_3 = arith.constant 0 : index
    %c0_4 = arith.constant 0 : index
    %c0_5 = arith.constant 0 : index
    %4 = vector.load %arg2[%c0_3, %c0_4, %c0_5] : memref<9x128x128xbf16, #tpu.memory_space<vmem>>, vector<1x128x128xbf16>
    %5 = vector.shape_cast %4 : vector<1x128x128xbf16> to vector<128x128xbf16>
    %cst_6 = arith.constant dense<0.000000e+00> : vector<256x128xf32>
    %6 = tpu.matmul %3, %5, %cst_6 {dimension_numbers = #tpu.dot_dimension_numbers<[1], [0], [0], [1], [0, 0, 1, 1], [], []>} : vector<256x128xbf16>, vector<128x128xbf16>, vector<256x128xf32> -> vector<256x128xf32>
    %7 = arith.addf %0, %6 : vector<256x128xf32>
    %c0_7 = arith.constant 0 : index
    %c0_8 = arith.constant 0 : index
    %c1 = arith.constant 1 : index
    %c0_9 = arith.constant 0 : index
    %8 = vector.load %arg1[%c0_7, %c0_8, %c1, %c0_9] : memref<1x18x18x128xbf16, #tpu.memory_space<vmem>>, vector<1x16x16x128xbf16>
    %9 = vector.shape_cast %8 : vector<1x16x16x128xbf16> to vector<16x16x128xbf16>
    %10 = vector.shape_cast %9 : vector<16x16x128xbf16> to vector<256x128xbf16>
    %c1_10 = arith.constant 1 : index
    %c0_11 = arith.constant 0 : index
    %c0_12 = arith.constant 0 : index
    %11 = vector.load %arg2[%c1_10, %c0_11, %c0_12] : memref<9x128x128xbf16, #tpu.memory_space<vmem>>, vector<1x128x128xbf16>
    %12 = vector.shape_cast %11 : vector<1x128x128xbf16> to vector<128x128xbf16>
    %cst_13 = arith.constant dense<0.000000e+00> : vector<256x128xf32>
    %13 = tpu.matmul %10, %12, %cst_13 {dimension_numbers = #tpu.dot_dimension_numbers<[1], [0], [0], [1], [0, 0, 1, 1], [], []>} : vector<256x128xbf16>, vector<128x128xbf16>, vector<256x128xf32> -> vector<256x128xf32>
    %14 = arith.addf %7, %13 : vector<256x128xf32>
    %c0_14 = arith.constant 0 : index
    %c0_15 = arith.constant 0 : index
    %c2 = arith.constant 2 : index
    %c0_16 = arith.constant 0 : index
    %15 = vector.load %arg1[%c0_14, %c0_15, %c2, %c0_16] : memref<1x18x18x128xbf16, #tpu.memory_space<vmem>>, vector<1x16x16x128xbf16>
    %16 = vector.shape_cast %15 : vector<1x16x16x128xbf16> to vector<16x16x128xbf16>
    %17 = vector.shape_cast %16 : vector<16x16x128xbf16> to vector<256x128xbf16>
    %c2_17 = arith.constant 2 : index
    %c0_18 = arith.constant 0 : index
    %c0_19 = arith.constant 0 : index
    %18 = vector.load %arg2[%c2_17, %c0_18, %c0_19] : memref<9x128x128xbf16, #tpu.memory_space<vmem>>, vector<1x128x128xbf16>
    %19 = vector.shape_cast %18 : vector<1x128x128xbf16> to vector<128x128xbf16>
    %cst_20 = arith.constant dense<0.000000e+00> : vector<256x128xf32>
    %20 = tpu.matmul %17, %19, %cst_20 {dimension_numbers = #tpu.dot_dimension_numbers<[1], [0], [0], [1], [0, 0, 1, 1], [], []>} : vector<256x128xbf16>, vector<128x128xbf16>, vector<256x128xf32> -> vector<256x128xf32>
    %21 = arith.addf %14, %20 : vector<256x128xf32>
    %c0_21 = arith.constant 0 : index
    %c1_22 = arith.constant 1 : index
    %c0_23 = arith.constant 0 : index
    %c0_24 = arith.constant 0 : index
    %22 = vector.load %arg1[%c0_21, %c1_22, %c0_23, %c0_24] : memref<1x18x18x128xbf16, #tpu.memory_space<vmem>>, vector<1x16x16x128xbf16>
    %23 = vector.shape_cast %22 : vector<1x16x16x128xbf16> to vector<16x16x128xbf16>
    %24 = vector.shape_cast %23 : vector<16x16x128xbf16> to vector<256x128xbf16>
    %c3 = arith.constant 3 : index
    %c0_25 = arith.constant 0 : index
    %c0_26 = arith.constant 0 : index
    %25 = vector.load %arg2[%c3, %c0_25, %c0_26] : memref<9x128x128xbf16, #tpu.memory_space<vmem>>, vector<1x128x128xbf16>
    %26 = vector.shape_cast %25 : vector<1x128x128xbf16> to vector<128x128xbf16>
    %cst_27 = arith.constant dense<0.000000e+00> : vector<256x128xf32>
    %27 = tpu.matmul %24, %26, %cst_27 {dimension_numbers = #tpu.dot_dimension_numbers<[1], [0], [0], [1], [0, 0, 1, 1], [], []>} : vector<256x128xbf16>, vector<128x128xbf16>, vector<256x128xf32> -> vector<256x128xf32>
    %28 = arith.addf %21, %27 : vector<256x128xf32>
    %c0_28 = arith.constant 0 : index
    %c1_29 = arith.constant 1 : index
    %c1_30 = arith.constant 1 : index
    %c0_31 = arith.constant 0 : index
    %29 = vector.load %arg1[%c0_28, %c1_29, %c1_30, %c0_31] : memref<1x18x18x128xbf16, #tpu.memory_space<vmem>>, vector<1x16x16x128xbf16>
    %30 = vector.shape_cast %29 : vector<1x16x16x128xbf16> to vector<16x16x128xbf16>
    %31 = vector.shape_cast %30 : vector<16x16x128xbf16> to vector<256x128xbf16>
    %c4 = arith.constant 4 : index
    %c0_32 = arith.constant 0 : index
    %c0_33 = arith.constant 0 : index
    %32 = vector.load %arg2[%c4, %c0_32, %c0_33] : memref<9x128x128xbf16, #tpu.memory_space<vmem>>, vector<1x128x128xbf16>
    %33 = vector.shape_cast %32 : vector<1x128x128xbf16> to vector<128x128xbf16>
    %cst_34 = arith.constant dense<0.000000e+00> : vector<256x128xf32>
    %34 = tpu.matmul %31, %33, %cst_34 {dimension_numbers = #tpu.dot_dimension_numbers<[1], [0], [0], [1], [0, 0, 1, 1], [], []>} : vector<256x128xbf16>, vector<128x128xbf16>, vector<256x128xf32> -> vector<256x128xf32>
    %35 = arith.addf %28, %34 : vector<256x128xf32>
    %c0_35 = arith.constant 0 : index
    %c1_36 = arith.constant 1 : index
    %c2_37 = arith.constant 2 : index
    %c0_38 = arith.constant 0 : index
    %36 = vector.load %arg1[%c0_35, %c1_36, %c2_37, %c0_38] : memref<1x18x18x128xbf16, #tpu.memory_space<vmem>>, vector<1x16x16x128xbf16>
    %37 = vector.shape_cast %36 : vector<1x16x16x128xbf16> to vector<16x16x128xbf16>
    %38 = vector.shape_cast %37 : vector<16x16x128xbf16> to vector<256x128xbf16>
    %c5 = arith.constant 5 : index
    %c0_39 = arith.constant 0 : index
    %c0_40 = arith.constant 0 : index
    %39 = vector.load %arg2[%c5, %c0_39, %c0_40] : memref<9x128x128xbf16, #tpu.memory_space<vmem>>, vector<1x128x128xbf16>
    %40 = vector.shape_cast %39 : vector<1x128x128xbf16> to vector<128x128xbf16>
    %cst_41 = arith.constant dense<0.000000e+00> : vector<256x128xf32>
    %41 = tpu.matmul %38, %40, %cst_41 {dimension_numbers = #tpu.dot_dimension_numbers<[1], [0], [0], [1], [0, 0, 1, 1], [], []>} : vector<256x128xbf16>, vector<128x128xbf16>, vector<256x128xf32> -> vector<256x128xf32>
    %42 = arith.addf %35, %41 : vector<256x128xf32>
    %c0_42 = arith.constant 0 : index
    %c2_43 = arith.constant 2 : index
    %c0_44 = arith.constant 0 : index
    %c0_45 = arith.constant 0 : index
    %43 = vector.load %arg1[%c0_42, %c2_43, %c0_44, %c0_45] : memref<1x18x18x128xbf16, #tpu.memory_space<vmem>>, vector<1x16x16x128xbf16>
    %44 = vector.shape_cast %43 : vector<1x16x16x128xbf16> to vector<16x16x128xbf16>
    %45 = vector.shape_cast %44 : vector<16x16x128xbf16> to vector<256x128xbf16>
    %c6 = arith.constant 6 : index
    %c0_46 = arith.constant 0 : index
    %c0_47 = arith.constant 0 : index
    %46 = vector.load %arg2[%c6, %c0_46, %c0_47] : memref<9x128x128xbf16, #tpu.memory_space<vmem>>, vector<1x128x128xbf16>
    %47 = vector.shape_cast %46 : vector<1x128x128xbf16> to vector<128x128xbf16>
    %cst_48 = arith.constant dense<0.000000e+00> : vector<256x128xf32>
    %48 = tpu.matmul %45, %47, %cst_48 {dimension_numbers = #tpu.dot_dimension_numbers<[1], [0], [0], [1], [0, 0, 1, 1], [], []>} : vector<256x128xbf16>, vector<128x128xbf16>, vector<256x128xf32> -> vector<256x128xf32>
    %49 = arith.addf %42, %48 : vector<256x128xf32>
    %c0_49 = arith.constant 0 : index
    %c2_50 = arith.constant 2 : index
    %c1_51 = arith.constant 1 : index
    %c0_52 = arith.constant 0 : index
    %50 = vector.load %arg1[%c0_49, %c2_50, %c1_51, %c0_52] : memref<1x18x18x128xbf16, #tpu.memory_space<vmem>>, vector<1x16x16x128xbf16>
    %51 = vector.shape_cast %50 : vector<1x16x16x128xbf16> to vector<16x16x128xbf16>
    %52 = vector.shape_cast %51 : vector<16x16x128xbf16> to vector<256x128xbf16>
    %c7 = arith.constant 7 : index
    %c0_53 = arith.constant 0 : index
    %c0_54 = arith.constant 0 : index
    %53 = vector.load %arg2[%c7, %c0_53, %c0_54] : memref<9x128x128xbf16, #tpu.memory_space<vmem>>, vector<1x128x128xbf16>
    %54 = vector.shape_cast %53 : vector<1x128x128xbf16> to vector<128x128xbf16>
    %cst_55 = arith.constant dense<0.000000e+00> : vector<256x128xf32>
    %55 = tpu.matmul %52, %54, %cst_55 {dimension_numbers = #tpu.dot_dimension_numbers<[1], [0], [0], [1], [0, 0, 1, 1], [], []>} : vector<256x128xbf16>, vector<128x128xbf16>, vector<256x128xf32> -> vector<256x128xf32>
    %56 = arith.addf %49, %55 : vector<256x128xf32>
    %c0_56 = arith.constant 0 : index
    %c2_57 = arith.constant 2 : index
    %c2_58 = arith.constant 2 : index
    %c0_59 = arith.constant 0 : index
    %57 = vector.load %arg1[%c0_56, %c2_57, %c2_58, %c0_59] : memref<1x18x18x128xbf16, #tpu.memory_space<vmem>>, vector<1x16x16x128xbf16>
    %58 = vector.shape_cast %57 : vector<1x16x16x128xbf16> to vector<16x16x128xbf16>
    %59 = vector.shape_cast %58 : vector<16x16x128xbf16> to vector<256x128xbf16>
    %c8 = arith.constant 8 : index
    %c0_60 = arith.constant 0 : index
    %c0_61 = arith.constant 0 : index
    %60 = vector.load %arg2[%c8, %c0_60, %c0_61] : memref<9x128x128xbf16, #tpu.memory_space<vmem>>, vector<1x128x128xbf16>
    %61 = vector.shape_cast %60 : vector<1x128x128xbf16> to vector<128x128xbf16>
    %cst_62 = arith.constant dense<0.000000e+00> : vector<256x128xf32>
    %62 = tpu.matmul %59, %61, %cst_62 {dimension_numbers = #tpu.dot_dimension_numbers<[1], [0], [0], [1], [0, 0, 1, 1], [], []>} : vector<256x128xbf16>, vector<128x128xbf16>, vector<256x128xf32> -> vector<256x128xf32>
    %63 = arith.addf %56, %62 : vector<256x128xf32>
    %c0_63 = arith.constant 0 : index
    %c0_64 = arith.constant 0 : index
    %64 = vector.load %arg3[%c0_63, %c0_64] : memref<1x128xf32, #tpu.memory_space<vmem>>, vector<1x128xf32>
    %65 = vector.broadcast %64 : vector<1x128xf32> to vector<256x128xf32>
    %66 = arith.addf %63, %65 : vector<256x128xf32>
    %cst_65 = arith.constant 0.000000e+00 : f32
    %67 = vector.broadcast %cst_65 : f32 to vector<256x128xf32>
    %68 = arith.maximumf %66, %67 : vector<256x128xf32>
    %69 = arith.truncf %68 : vector<256x128xf32> to vector<256x128xbf16>
    %c0_66 = arith.constant 0 : index
    %c0_67 = arith.constant 0 : index
    %70 = vector.load %arg4[%c0_66, %c0_67] : memref<128x128xbf16, #tpu.memory_space<vmem>>, vector<128x128xbf16>
    %cst_68 = arith.constant dense<0.000000e+00> : vector<256x128xf32>
    %71 = tpu.matmul %69, %70, %cst_68 {dimension_numbers = #tpu.dot_dimension_numbers<[1], [0], [0], [1], [0, 0, 1, 1], [], []>} : vector<256x128xbf16>, vector<128x128xbf16>, vector<256x128xf32> -> vector<256x128xf32>
    %c0_69 = arith.constant 0 : index
    %c0_70 = arith.constant 0 : index
    %72 = vector.load %arg5[%c0_69, %c0_70] : memref<1x128xf32, #tpu.memory_space<vmem>>, vector<1x128xf32>
    %73 = vector.broadcast %72 : vector<1x128xf32> to vector<256x128xf32>
    %74 = arith.addf %71, %73 : vector<256x128xf32>
    %c0_71 = arith.constant 0 : index
    %c0_72 = arith.constant 0 : index
    %75 = vector.load %arg6[%c0_71, %c0_72] : memref<256x128xf32, #tpu.memory_space<vmem>>, vector<256x128xf32>
    tpu.vector_store %arg6[%c0_71, %c0_72], %74 {strides = array<i32>} : memref<256x128xf32, #tpu.memory_space<vmem>>, vector<256x128xf32>,
    return
  }
  func.func @transform_0(%arg0: i32) -> (i32, i32, i32, i32) {
    %c0_i32 = arith.constant 0 : i32
    %c0_i32_0 = arith.constant 0 : i32
    %c0_i32_1 = arith.constant 0 : i32
    %c0_i32_2 = arith.constant 0 : i32
    return %arg0, %c0_i32, %c0_i32_0, %c0_i32_1 : i32, i32, i32, i32
  }
  func.func @transform_1(%arg0: i32) -> (i32, i32, i32) {
    %c0_i32 = arith.constant 0 : i32
    %c0_i32_0 = arith.constant 0 : i32
    %c0_i32_1 = arith.constant 0 : i32
    %c0_i32_2 = arith.constant 0 : i32
    return %c0_i32, %c0_i32_0, %c0_i32_1 : i32, i32, i32
  }
  func.func @transform_2(%arg0: i32) -> (i32, i32) {
    %c0_i32 = arith.constant 0 : i32
    %c0_i32_0 = arith.constant 0 : i32
    %c0_i32_1 = arith.constant 0 : i32
    return %c0_i32, %c0_i32_0 : i32, i32
  }
  func.func @transform_3(%arg0: i32) -> (i32, i32) {
    %c0_i32 = arith.constant 0 : i32
    %c0_i32_0 = arith.constant 0 : i32
    %c0_i32_1 = arith.constant 0 : i32
    return %c0_i32, %c0_i32_0 : i32, i32
  }
  func.func @transform_4(%arg0: i32) -> (i32, i32) {
    %c0_i32 = arith.constant 0 : i32
    %c0_i32_0 = arith.constant 0 : i32
    %c0_i32_1 = arith.constant 0 : i32
    return %c0_i32, %c0_i32_0 : i32, i32
  }
  func.func @transform_5(%arg0: i32) -> (i32, i32) {
    %c0_i32 = arith.constant 0 : i32
    %c0_i32_0 = arith.constant 0 : i32
    return %arg0, %c0_i32 : i32, i32
  }
}

module attributes {stable_mosaic.version = 11 : i64} {
  func.func @_head_kernel(%arg0: i32, %arg1: memref<32x6272xbf16, #tpu.memory_space<vmem>>, %arg2: memref<6272x128xbf16, #tpu.memory_space<vmem>>, %arg3: memref<1x128xf32, #tpu.memory_space<vmem>>, %arg4: memref<128x128xbf16, #tpu.memory_space<vmem>>, %arg5: memref<1x128xf32, #tpu.memory_space<vmem>>, %arg6: memref<128x128xbf16, #tpu.memory_space<vmem>>, %arg7: memref<1x128xf32, #tpu.memory_space<vmem>>, %arg8: memref<32x128xf32, #tpu.memory_space<vmem>>) attributes {dimension_semantics = [#tpu.dimension_semantics<parallel>], iteration_bounds = array<i64: 1>, scalar_prefetch = 0 : i64, scratch_operands = 0 : i64, tpu.core_type = #tpu.core_type<tc>, window_params = [{transform_indices = @transform_0, window_bounds = array<i64: 32, 6272>}, {pipeline_mode = #tpu.pipeline_mode<synchronous>, transform_indices = @transform_1, window_bounds = array<i64: 6272, 128>}, {pipeline_mode = #tpu.pipeline_mode<synchronous>, transform_indices = @transform_2, window_bounds = array<i64: 1, 128>}, {pipeline_mode = #tpu.pipeline_mode<synchronous>, transform_indices = @transform_3, window_bounds = array<i64: 128, 128>}, {pipeline_mode = #tpu.pipeline_mode<synchronous>, transform_indices = @transform_4, window_bounds = array<i64: 1, 128>}, {pipeline_mode = #tpu.pipeline_mode<synchronous>, transform_indices = @transform_5, window_bounds = array<i64: 128, 128>}, {pipeline_mode = #tpu.pipeline_mode<synchronous>, transform_indices = @transform_6, window_bounds = array<i64: 1, 128>}, {transform_indices = @transform_7, window_bounds = array<i64: 32, 128>}]} {
    %c0 = arith.constant 0 : index
    %c0_0 = arith.constant 0 : index
    %0 = vector.load %arg1[%c0, %c0_0] : memref<32x6272xbf16, #tpu.memory_space<vmem>>, vector<32x6272xbf16>
    %c0_1 = arith.constant 0 : index
    %c0_2 = arith.constant 0 : index
    %1 = vector.load %arg2[%c0_1, %c0_2] : memref<6272x128xbf16, #tpu.memory_space<vmem>>, vector<6272x128xbf16>
    %cst = arith.constant dense<0.000000e+00> : vector<32x128xf32>
    %2 = tpu.matmul %0, %1, %cst {dimension_numbers = #tpu.dot_dimension_numbers<[1], [0], [0], [1], [0, 0, 1, 1], [], []>} : vector<32x6272xbf16>, vector<6272x128xbf16>, vector<32x128xf32> -> vector<32x128xf32>
    %c0_3 = arith.constant 0 : index
    %c0_4 = arith.constant 0 : index
    %3 = vector.load %arg3[%c0_3, %c0_4] : memref<1x128xf32, #tpu.memory_space<vmem>>, vector<1x128xf32>
    %4 = vector.broadcast %3 : vector<1x128xf32> to vector<32x128xf32>
    %5 = arith.addf %2, %4 : vector<32x128xf32>
    %cst_5 = arith.constant 0.000000e+00 : f32
    %6 = vector.broadcast %cst_5 : f32 to vector<32x128xf32>
    %7 = arith.maximumf %5, %6 : vector<32x128xf32>
    %8 = arith.truncf %7 : vector<32x128xf32> to vector<32x128xbf16>
    %c0_6 = arith.constant 0 : index
    %c0_7 = arith.constant 0 : index
    %9 = vector.load %arg4[%c0_6, %c0_7] : memref<128x128xbf16, #tpu.memory_space<vmem>>, vector<128x128xbf16>
    %cst_8 = arith.constant dense<0.000000e+00> : vector<32x128xf32>
    %10 = tpu.matmul %8, %9, %cst_8 {dimension_numbers = #tpu.dot_dimension_numbers<[1], [0], [0], [1], [0, 0, 1, 1], [], []>} : vector<32x128xbf16>, vector<128x128xbf16>, vector<32x128xf32> -> vector<32x128xf32>
    %c0_9 = arith.constant 0 : index
    %c0_10 = arith.constant 0 : index
    %11 = vector.load %arg5[%c0_9, %c0_10] : memref<1x128xf32, #tpu.memory_space<vmem>>, vector<1x128xf32>
    %12 = vector.broadcast %11 : vector<1x128xf32> to vector<32x128xf32>
    %13 = arith.addf %10, %12 : vector<32x128xf32>
    %cst_11 = arith.constant 0.000000e+00 : f32
    %14 = vector.broadcast %cst_11 : f32 to vector<32x128xf32>
    %15 = arith.maximumf %13, %14 : vector<32x128xf32>
    %16 = arith.truncf %15 : vector<32x128xf32> to vector<32x128xbf16>
    %c0_12 = arith.constant 0 : index
    %c0_13 = arith.constant 0 : index
    %17 = vector.load %arg6[%c0_12, %c0_13] : memref<128x128xbf16, #tpu.memory_space<vmem>>, vector<128x128xbf16>
    %cst_14 = arith.constant dense<0.000000e+00> : vector<32x128xf32>
    %18 = tpu.matmul %16, %17, %cst_14 {dimension_numbers = #tpu.dot_dimension_numbers<[1], [0], [0], [1], [0, 0, 1, 1], [], []>} : vector<32x128xbf16>, vector<128x128xbf16>, vector<32x128xf32> -> vector<32x128xf32>
    %c0_15 = arith.constant 0 : index
    %c0_16 = arith.constant 0 : index
    %19 = vector.load %arg7[%c0_15, %c0_16] : memref<1x128xf32, #tpu.memory_space<vmem>>, vector<1x128xf32>
    %20 = vector.broadcast %19 : vector<1x128xf32> to vector<32x128xf32>
    %21 = arith.addf %18, %20 : vector<32x128xf32>
    %c0_17 = arith.constant 0 : index
    %c0_18 = arith.constant 0 : index
    %22 = vector.load %arg8[%c0_17, %c0_18] : memref<32x128xf32, #tpu.memory_space<vmem>>, vector<32x128xf32>
    tpu.vector_store %arg8[%c0_17, %c0_18], %21 {strides = array<i32>} : memref<32x128xf32, #tpu.memory_space<vmem>>, vector<32x128xf32>,
    return
  }
  func.func @transform_0(%arg0: i32) -> (i32, i32) {
    %c0_i32 = arith.constant 0 : i32
    %c0_i32_0 = arith.constant 0 : i32
    return %arg0, %c0_i32 : i32, i32
  }
  func.func @transform_1(%arg0: i32) -> (i32, i32) {
    %c0_i32 = arith.constant 0 : i32
    %c0_i32_0 = arith.constant 0 : i32
    %c0_i32_1 = arith.constant 0 : i32
    return %c0_i32, %c0_i32_0 : i32, i32
  }
  func.func @transform_2(%arg0: i32) -> (i32, i32) {
    %c0_i32 = arith.constant 0 : i32
    %c0_i32_0 = arith.constant 0 : i32
    %c0_i32_1 = arith.constant 0 : i32
    return %c0_i32, %c0_i32_0 : i32, i32
  }
  func.func @transform_3(%arg0: i32) -> (i32, i32) {
    %c0_i32 = arith.constant 0 : i32
    %c0_i32_0 = arith.constant 0 : i32
    %c0_i32_1 = arith.constant 0 : i32
    return %c0_i32, %c0_i32_0 : i32, i32
  }
  func.func @transform_4(%arg0: i32) -> (i32, i32) {
    %c0_i32 = arith.constant 0 : i32
    %c0_i32_0 = arith.constant 0 : i32
    %c0_i32_1 = arith.constant 0 : i32
    return %c0_i32, %c0_i32_0 : i32, i32
  }
  func.func @transform_5(%arg0: i32) -> (i32, i32) {
    %c0_i32 = arith.constant 0 : i32
    %c0_i32_0 = arith.constant 0 : i32
    %c0_i32_1 = arith.constant 0 : i32
    return %c0_i32, %c0_i32_0 : i32, i32
  }
  func.func @transform_6(%arg0: i32) -> (i32, i32) {
    %c0_i32 = arith.constant 0 : i32
    %c0_i32_0 = arith.constant 0 : i32
    %c0_i32_1 = arith.constant 0 : i32
    return %c0_i32, %c0_i32_0 : i32, i32
  }
  func.func @transform_7(%arg0: i32) -> (i32, i32) {
    %c0_i32 = arith.constant 0 : i32
    %c0_i32_0 = arith.constant 0 : i32
    return %arg0, %c0_i32 : i32, i32
  }
}

</mosaic_0001>

<bundles_post_ra>
// kernel: a_call__.3
= control target key start
LH: loop header
LB: loop body
LE: loop exit
PB: predicated region body
PF: predicated region fallthrough
CT: control target
= control target key end

     0   :  { %8 = vsyncpa [#allocation3], 0  ;;  %s6639_s0 = inlined_call_operand.vmem [shape: bf16[2,18,18,4], index: 0, kind: input, shape index: {}]   ;;  %s6640_s1 = inlined_call_operand.hbm [shape: bf16[9,4,128], index: 1, kind: input, shape index: {}]   ;;  %s6641_s2 = inlined_call_operand.hbm [shape: f32[1,128], index: 2, kind: input, shape index: {}]   ;;  %s6642_s3 = inlined_call_operand.vmem [shape: bf16[512,128], index: 3, kind: output, shape index: {}]  }
   0x1   :  { %9 = vsyncpa [#allocation5], 0  ;;  %s5247_s12 = smov 0  }
   0x2 LB: > { %s125_s15 = sshll.u32 %s6640_s1, 4  ;;  %s5256_s16 = sadd.s32 4294967295, %s5221_s12   ;;  %s5221_s12 = sphi %s5247_s12, %s15_s12   ;;  %s126_s15 = int_to_ptr.hbm [resolvable:$true] %s125_s15 }
   0x3   : > { %p4328_p0 = scmp.ge.s32.totalorder %s5221_s12, 1  ;;  %p114_p1 = scmp.lt.s32.totalorder %s5221_s12, 3 }
   0x4   : > { %p5078_p2 = scmp.eq.s32.totalorder %s5256_s16, 0  ;;  %s5223_s18 = smov [#allocation2]  }
   0x5   : > { %p5261_p3 = pnand %p4328_p0, %p114_p1  ;;  %s127_s19 = sshll.u32 %s5223_s18, 4  ;;  %s128_s19 = int_to_ptr.vmem [resolvable:$true] %s127_s19 }
   0x6   : > { %s140_s22 = sshll.u32 %s6641_s2, 4  ;;  %s5224_s23 = smov [#allocation4]   ;;  %s141_s22 = int_to_ptr.hbm [resolvable:$true] %s140_s22 }
   0x7   : > { %p5071_p4 = pneg %p5261_p3  ;;  %s142_s24 = sshll.u32 %s5224_s23, 4  ;;  %s143_s24 = int_to_ptr.vmem [resolvable:$true] %s142_s24 }
   0x8   : > { %s5225_s25 = smov 32   ;;  %s5226_s26 = smov 2  }
   0x9   : > { %p5072_p5 = pnand %p5078_p2, %p5071_p4  ;;  %163 = sbr.rel (%p5261_p3) target bundleno = 768 (0x300), region = 32 }
   0xb   : > { %5074 = dma.hbm_to_vmem [thread:$0]  (!%p5072_p5), %s126_s15, 288, %s128_s19, [#allocation3], %s5225_s25, %s5225_s25, %s5226_s26  }
   0xc   : > { %5077 = dma.hbm_to_vmem [thread:$0]  (!%p5072_p5), %s141_s22, 16, %s143_s24, [#allocation5]  }
   0xe   : > { %5212 = dma.done.wait (%p5078_p2), [#allocation3], 288  }
   0xf   : > { %5214 = vsyncadd (%p5078_p2), [#allocation3], 4294967008 }
  0x10   : > { %5216 = dma.done.wait (%p5078_p2), [#allocation5], 16  }
  0x11   : > { %5218 = vsyncadd (%p5078_p2), [#allocation5], 4294967280  ;;  %p193_p6 = scmp.lt.s32.totalorder %s5256_s16, 1  ;;  %vm740_vm0 = vcmask 1041408   ;;  %vm254_vm1 = vsmask.f32 3328 }
  0x12   : > { %vm255_vm2 = vsmask.f32 7440  ;;  %v642_v0 = vld [vmem:[#allocation2 + $0x2] sm:$0x3]  ;;  %v1217_v52 = vld [vmem:[#allocation2 + $0x4] sm:$0x3] }
  0x13   : > { %s194_s27 = scalar_select %p193_p6, %s5256_s16, 1  ;;  %v742_v3 = vsel %vm740_vm0, %v642_v0, 0  ;;  %vm5300_vm3 = vmor %vm254_vm1, %vm255_vm2  ;;  %vm691_vm4 = vcmask 31744   ;;  %vm1101_vm5 = vcmask 1042432   ;;  %vm1102_vm6 = vcmask 1046532  }
  0x14   : > { %5059 = vmatpush.bf16.msra.mxu1 %v742_v3  ;;  %5060 = vmatpush.bf16.msra.mxu2 %v742_v3  ;;  %vm5471_vm7 = vmor %vm1101_vm5, %vm1102_vm6  ;;  %s4336_s5 = sshll.u32 %s5256_s16, 5 }
  0x15   : > { %s5062_s28 = smul.u32 216, %s194_s27  ;;  %5061 = vmatpush.bf16.msra.mxu3 %v742_v3  ;;  %751 = vmatpush.bf16.msra.mxu0 %v742_v3  ;;  %p6332_p7 = scmp.lt.s32.totalorder %s4336_s5, 63 }
  0x17   : > { %s5287_s4 = scalar_lea.vmem %s6639_s0, %s5062_s28  ;;  %s6654_s5 = smov (!%p6332_p7, %s4336_s5), 63 }
  0x18   : > { %v213_v1 = vld [vmem:[%s5287_s4 + $0x30] sm:$0xf]  ;;  %v214_v2 = vld [vmem:[%s5287_s4 + $0x34] sm:$0xf]  ;;  %v242_v4 = vld [vmem:[%s5287_s4 + $0x38] sm:$0x1] }
  0x19   : > { %v354_v5 = vshrl.u32 %v213_v1, 16  ;;  %v357_v6 = vshll.u32 %v213_v1, 16  ;;  %v363_v7 = vshll.u32 %v214_v2, 16  ;;  %v367_v8 = vshrl.u32 %v214_v2, 16  ;;  %v221_v10 = vld [vmem:[%s5287_s4 + $0x60] sm:$0xf] }
  0x1a   : > { %v373_v9 = vshll.u32 %v242_v4, 16  ;;  %v222_v11 = vld [vmem:[%s5287_s4 + $0x64] sm:$0xf]  ;;  %v246_v15 = vld [vmem:[%s5287_s4 + $0x68] sm:$0x1]  ;;  %v450_v16 = vshrl.u32 %v221_v10, 16 }
  0x1b   : > { %v356_v12 = vrot.slane %v354_v5, 4  ;;  %v359_v13 = vrot.slane %v357_v6, 5  ;;  %v365_v14 = vrot.slane %v363_v7, 5  ;;  %v369_v17 = vrot.slane %v367_v8, 4  ;;  %v229_v20 = vld [vmem:[%s5287_s4 + $0x90] sm:$0xf] }
  0x1c   : > { %v453_v18 = vshll.u32 %v221_v10, 16  ;;  %v459_v19 = vshll.u32 %v222_v11, 16  ;;  %v452_v22 = vrot.slane %v450_v16, 4  ;;  %v463_v23 = vshrl.u32 %v222_v11, 16  ;;  %v230_v25 = vld [vmem:[%s5287_s4 + $0x94] sm:$0xf] }
  0x1d   : > { %v360_v21 = vor.u32 %v359_v13, %v356_v12  ;;  %v469_v24 = vshll.u32 %v246_v15, 16  ;;  %v370_v27 = vor.u32 %v369_v17, %v365_v14  ;;  %v375_v28 = vrot.slane %v373_v9, 5  ;;  %v250_v41 = vld [vmem:[%s5287_s4 + $0x98] sm:$0x1]  ;;  %v205_v56 = vld [vmem:[%s5287_s4] sm:$0xf] }
  0x1e   : > { %v455_v29 = vrot.slane %v453_v18, 5  ;;  %v461_v30 = vrot.slane %v459_v19, 5  ;;  %v465_v32 = vrot.slane %v463_v23, 4  ;;  %v546_v34 = vshrl.u32 %v229_v20, 16  ;;  %v5313_v57 = vld [vmem:[%s5287_s4 + $0x4] sm:$0xf] }
  0x1f   : > { %v361_v31 = vrot.slane %v360_v21, 4  ;;  %v471_v33 = vrot.slane %v469_v24, 5  ;;  %v371_v35 = vrot.slane %v370_v27, 4  ;;  %v549_v37 = vshll.u32 %v229_v20, 16  ;;  %v5318_v62 = vld [vmem:[%s5287_s4 + $0x8] sm:$0x1] }
  0x20   : > { %v456_v36 = vor.u32 %v455_v29, %v452_v22  ;;  %v555_v38 = vshll.u32 %v230_v25, 16  ;;  %v466_v40 = vor.u32 %v465_v32, %v461_v30  ;;  %v548_v42 = vrot.slane %v546_v34, 4  ;;  %v1472_v11 = vld [vmem:[#allocation2 + $0x6] sm:$0x3]  ;;  %v237_v12 = vld [vmem:[#allocation2] sm:$0x3] }
  0x21   : > { %v366_v39 = vsel %vm5300_vm3, %v361_v31, %v365_v14  ;;  %v559_v43 = vshrl.u32 %v230_v25, 16  ;;  %v376_v44 = vsel %vm5300_vm3, %v371_v35, %v375_v28  ;;  %v551_v47 = vrot.slane %v549_v37, 5  ;;  %v2158_v17 = vld [vmem:[#allocation2 + $0x8] sm:$0x3]  ;;  %v215_v18 = vld [vmem:[%s5287_s4 + $0x3c] sm:$0xf] }
  0x22   : > { %v651_v45 = vunpack.c.l.b16 %v366_v39  ;;  %v457_v46 = vrot.slane %v456_v36, 4  ;;  %v652_v48 = vunpack.c.l.b16 %v376_v44  ;;  %v467_v49 = vrot.slane %v466_v40, 4  ;;  %v5332_v22 = vld [vmem:[%s5287_s4 + $0x40] sm:$0xf]  ;;  %v243_v23 = vld [vmem:[%s5287_s4 + $0x44] sm:$0x1] }
  0x23   : > { %v557_v50 = vrot.slane %v555_v38, 5  ;;  %v561_v51 = vrot.slane %v559_v43, 4  ;;  %v552_v54 = vor.u32 %v551_v47, %v548_v42  ;;  %v565_v55 = vshll.u32 %v250_v41, 16  ;;  %v223_v29 = vld [vmem:[%s5287_s4 + $0x6c] sm:$0xf]  ;;  %s4337_s7 = sshll.u32 %s6654_s5, 2 }
  0x24   : > { %v462_v53 = vsel %vm5300_vm3, %v457_v46, %v461_v30  ;;  %v679_v58 = vpack.c.b16 %v652_v48, %v651_v45  ;;  %v472_v59 = vsel %vm5300_vm3, %v467_v49, %v471_v33  ;;  %v1315_v2 = vsel %vm740_vm0, %v1217_v52, 0  ;;  %v224_v41 = vld [vmem:[%s5287_s4 + $0x70] sm:$0xf]  ;;  %v247_v47 = vld [vmem:[%s5287_s4 + $0x74] sm:$0x1]  ;;  %s6373_s10 = scalar_lea.vmem %s6642_s3, %s4337_s7 }
  0x25   : > { %v659_v60 = vunpack.c.l.b16 %v462_v53  ;;  %v562_v61 = vor.u32 %v561_v51, %v557_v50  ;;  %v660_v63 = vunpack.c.l.b16 %v472_v59  ;;  %v553_v0 = vrot.slane %v552_v54, 4  ;;  %1324 = vmatpush.bf16.msrb.mxu2 %v1315_v2  ;;  %v232_v2 = vld [vmem:[%s5287_s4 + $0xa0] sm:$0xf] }
  0x26   : > { %v567_v1 = vrot.slane %v565_v55, 5  ;;  %4342 = vmatmul.msk.bf16.vlgmr.msra.gmra.mxu1 %vm691_vm4, %v679_v58  ;;  %v258_v4 = vshrl.u32 %v205_v56, 16  ;;  %v261_v5 = vshll.u32 %v205_v56, 16  ;;  %v267_v6 = vshll.u32 %v5313_v57, 16  ;;  %v231_v56 = vld [vmem:[%s5287_s4 + $0x9c] sm:$0xf] }
  0x27   : > { %v563_v3 = vrot.slane %v562_v61, 4  ;;  %v683_v7 = vpack.c.b16 %v660_v63, %v659_v60  ;;  %v558_v8 = vsel %vm5300_vm3, %v553_v0, %v557_v50  ;;  %v271_v9 = vshrl.u32 %v5313_v57, 16 }
  0x28   : > { %v277_v10 = vshll.u32 %v5318_v62, 16  ;;  %v667_v14 = vunpack.c.l.b16 %v558_v8  ;;  %v260_v15 = vrot.slane %v258_v4, 4  ;;  %v263_v16 = vrot.slane %v261_v5, 5 }
  0x29   : > { %v568_v13 = vsel %vm5300_vm3, %v563_v3, %v567_v1  ;;  %4346 = vmatmul.msk.bf16.vlgmr.msra.gmra.mxu2 %vm691_vm4, %v683_v7  ;;  %v269_v20 = vrot.slane %v267_v6, 5  ;;  %v273_v21 = vrot.slane %v271_v9, 4  ;;  %v1602_v27 = vsel %vm740_vm0, %v1472_v11, 0 }
  0x2a   : > { %v668_v19 = vunpack.c.l.b16 %v568_v13  ;;  %v264_v24 = vor.u32 %v263_v16, %v260_v15  ;;  %v279_v25 = vrot.slane %v277_v10, 5  ;;  %v962_v28 = vsel %vm740_vm0, %v237_v12, 0  ;;  %1611 = vmatpush.bf16.msrb.mxu3 %v1602_v27  ;;  %v251_v10 = vld [vmem:[%s5287_s4 + $0xa4] sm:$0x1] }
  0x2b   : > { %v274_v31 = vor.u32 %v273_v21, %v269_v20  ;;  %971 = vmatpush.bf16.msrb.mxu1 %v962_v28  ;;  %v2256_v32 = vsel %vm740_vm0, %v2158_v17, 0  ;;  %v378_v33 = vshrl.u32 %v215_v18, 16  ;;  %v381_v35 = vshll.u32 %v215_v18, 16 }
  0x2c   : > { %v687_v30 = vpack.c.b16 %v668_v19, %v667_v14  ;;  %v265_v34 = vrot.slane %v264_v24, 4  ;;  %2265 = vmatpush.bf16.msrb.mxu0 %v2256_v32  ;;  %v387_v36 = vshll.u32 %v5332_v22, 16  ;;  %v391_v37 = vshrl.u32 %v5332_v22, 16 }
  0x2d   : > { %v275_v38 = vrot.slane %v274_v31, 4  ;;  %v380_v39 = vrot.slane %v378_v33, 4  ;;  %v397_v40 = vshll.u32 %v243_v23, 16  ;;  %v474_v42 = vshrl.u32 %v223_v29, 16  ;;  %v5363_v31 = vld [vmem:[%s5287_s4 + $0x14] sm:$0x1] }
  0x2e   : > { %4350 = vmatmul.msk.bf16.vlgmr.msra.gmra.mxu3 %vm691_vm4, %v687_v30  ;;  %v270_v43 = vsel %vm5300_vm3, %v265_v34, %v269_v20  ;;  %v383_v44 = vrot.slane %v381_v35, 5  ;;  %v389_v45 = vrot.slane %v387_v36, 5  ;;  %v393_v46 = vrot.slane %v391_v37, 4  ;;  %v207_v20 = vld [vmem:[%s5287_s4 + $0xc] sm:$0xf] }
  0x2f   : > { %v280_v48 = vsel %vm5300_vm3, %v275_v38, %v279_v25  ;;  %v643_v49 = vunpack.c.l.b16 %v270_v43  ;;  %v399_v50 = vrot.slane %v397_v40, 5  ;;  %v476_v51 = vrot.slane %v474_v42, 4  ;;  %v5360_v30 = vld [vmem:[%s5287_s4 + $0x10] sm:$0xf] }
  0x30   : > { %v644_v52 = vunpack.c.l.b16 %v280_v48  ;;  %v384_v53 = vor.u32 %v383_v44, %v380_v39  ;;  %v394_v54 = vor.u32 %v393_v46, %v389_v45  ;;  %v477_v55 = vshll.u32 %v223_v29, 16  ;;  %v217_v44 = vld [vmem:[%s5287_s4 + $0x48] sm:$0xf] }
  0x31   : > { %v483_v58 = vshll.u32 %v224_v41, 16  ;;  %v487_v59 = vshrl.u32 %v224_v41, 16  ;;  %v493_v60 = vshll.u32 %v247_v47, 16  ;;  %v570_v6 = vshrl.u32 %v231_v56, 16 }
  0x32   : > { %v675_v61 = vpack.c.b16 %v644_v52, %v643_v49  ;;  %v385_v63 = vrot.slane %v384_v53, 4  ;;  %v395_v0 = vrot.slane %v394_v54, 4  ;;  %v479_v1 = vrot.slane %v477_v55, 5  ;;  %v5375_v49 = vld [vmem:[%s5287_s4 + $0x4c] sm:$0xf] }
  0x33   : > { %v485_v3 = vrot.slane %v483_v58, 5  ;;  %v489_v4 = vrot.slane %v487_v59, 4  ;;  %v495_v5 = vrot.slane %v493_v60, 5  ;;  %v573_v11 = vshll.u32 %v231_v56, 16  ;;  %v5378_v54 = vld [vmem:[%s5287_s4 + $0x50] sm:$0x1] }
  0x34   : > { %4338 = vmatmul.msk.bf16.vlgmr.msra.gmra.mxu0 %vm691_vm4, %v675_v61  ;;  %v390_v7 = vsel %vm5300_vm3, %v385_v63, %v389_v45  ;;  %v400_v8 = vsel %vm5300_vm3, %v395_v0, %v399_v50  ;;  %v480_v9 = vor.u32 %v479_v1, %v476_v51  ;;  %v572_v15 = vrot.slane %v570_v6, 4  ;;  %v225_v1 = vld [vmem:[%s5287_s4 + $0x78] sm:$0xf] }
  0x35   : > { %v653_v12 = vunpack.c.l.b16 %v390_v7  ;;  %v654_v13 = vunpack.c.l.b16 %v400_v8  ;;  %v490_v14 = vor.u32 %v489_v4, %v485_v3  ;;  %v575_v17 = vrot.slane %v573_v11, 5 }
  0x36   : > { %v481_v16 = vrot.slane %v480_v9, 4  ;;  %v579_v18 = vshll.u32 %v232_v2, 16  ;;  %v583_v19 = vshrl.u32 %v232_v2, 16  ;;  %v589_v24 = vshll.u32 %v251_v10, 16  ;;  %v226_v10 = vld [vmem:[%s5287_s4 + $0x7c] sm:$0xf] }
  0x37   : > { %v680_v21 = vpack.c.b16 %v654_v13, %v653_v12  ;;  %v491_v23 = vrot.slane %v490_v14, 4  ;;  %v576_v27 = vor.u32 %v575_v17, %v572_v15  ;;  %v282_v35 = vshrl.u32 %v207_v20, 16  ;;  %v248_v14 = vld [vmem:[%s5287_s4 + $0x80] sm:$0x1] }
  0x38   : > { %v486_v25 = vsel %vm5300_vm3, %v481_v16, %v485_v3  ;;  %v581_v28 = vrot.slane %v579_v18, 5  ;;  %v585_v29 = vrot.slane %v583_v19, 4  ;;  %v591_v34 = vrot.slane %v589_v24, 5 }
  0x39   : > { %4343 = vmatmul.msk.bf16.gmra.mxu1 %vm691_vm4, %v680_v21  ;;  %v496_v32 = vsel %vm5300_vm3, %v491_v23, %v495_v5  ;;  %v661_v33 = vunpack.c.l.b16 %v486_v25  ;;  %v577_v37 = vrot.slane %v576_v27, 4  ;;  %v285_v39 = vshll.u32 %v207_v20, 16 }
  0x3a   : > { %v662_v36 = vunpack.c.l.b16 %v496_v32  ;;  %v586_v38 = vor.u32 %v585_v29, %v581_v28  ;;  %v284_v40 = vrot.slane %v282_v35, 4  ;;  %v291_v41 = vshll.u32 %v5360_v30, 16  ;;  %v233_v32 = vld [vmem:[%s5287_s4 + $0xa8] sm:$0xf] }
  0x3b   : > { %v295_v42 = vshrl.u32 %v5360_v30, 16  ;;  %v301_v43 = vshll.u32 %v5363_v31, 16  ;;  %v582_v46 = vsel %vm5300_vm3, %v577_v37, %v581_v28  ;;  %v287_v48 = vrot.slane %v285_v39, 5 }
  0x3c   : > { %v684_v45 = vpack.c.b16 %v662_v36, %v661_v33  ;;  %v587_v47 = vrot.slane %v586_v38, 4  ;;  %v669_v50 = vunpack.c.l.b16 %v582_v46  ;;  %v293_v51 = vrot.slane %v291_v41, 5  ;;  %v234_v36 = vld [vmem:[%s5287_s4 + $0xac] sm:$0xf]  ;;  %v252_v41 = vld [vmem:[%s5287_s4 + $0xb0] sm:$0x1] }
  0x3d   : > { %v297_v52 = vrot.slane %v295_v42, 4  ;;  %v303_v53 = vrot.slane %v301_v43, 5  ;;  %v288_v56 = vor.u32 %v287_v48, %v284_v40  ;;  %v402_v58 = vshrl.u32 %v217_v44, 16 }
  0x3e   : > { %4347 = vmatmul.msk.bf16.gmra.mxu2 %vm691_vm4, %v684_v45  ;;  %v592_v55 = vsel %vm5300_vm3, %v587_v47, %v591_v34  ;;  %v405_v59 = vshll.u32 %v217_v44, 16  ;;  %v411_v63 = vshll.u32 %v5375_v49, 16  ;;  %v415_v0 = vshrl.u32 %v5375_v49, 16 }
  0x3f   : > { %v670_v60 = vunpack.c.l.b16 %v592_v55  ;;  %v298_v61 = vor.u32 %v297_v52, %v293_v51  ;;  %v289_v2 = vrot.slane %v288_v56, 4  ;;  %v404_v3 = vrot.slane %v402_v58, 4  ;;  %v209_v56 = vld [vmem:[%s5287_s4 + $0x18] sm:$0xf] }
  0x40   : > { %v407_v4 = vrot.slane %v405_v59, 5  ;;  %v421_v5 = vshll.u32 %v5378_v54, 16  ;;  %v413_v8 = vrot.slane %v411_v63, 5  ;;  %v417_v9 = vrot.slane %v415_v0, 4  ;;  %v5406_v63 = vld [vmem:[%s5287_s4 + $0x1c] sm:$0xf] }
  0x41   : > { %v688_v6 = vpack.c.b16 %v670_v60, %v669_v50  ;;  %v299_v7 = vrot.slane %v298_v61, 4  ;;  %v294_v11 = vsel %vm5300_vm3, %v289_v2, %v293_v51  ;;  %v498_v15 = vshrl.u32 %v225_v1, 16 }
  0x42   : > { %v408_v12 = vor.u32 %v407_v4, %v404_v3  ;;  %v423_v13 = vrot.slane %v421_v5, 5  ;;  %v645_v17 = vunpack.c.l.b16 %v294_v11  ;;  %v418_v18 = vor.u32 %v417_v9, %v413_v8  ;;  %v5410_v3 = vld [vmem:[%s5287_s4 + $0x20] sm:$0x1] }
  0x43   : > { %4351 = vmatmul.msk.bf16.gmra.mxu3 %vm691_vm4, %v688_v6  ;;  %v304_v16 = vsel %vm5300_vm3, %v299_v7, %v303_v53  ;;  %v501_v19 = vshll.u32 %v225_v1, 16  ;;  %v500_v23 = vrot.slane %v498_v15, 4  ;;  %v507_v24 = vshll.u32 %v226_v10, 16 }
  0x44   : > { %v646_v20 = vunpack.c.l.b16 %v304_v16  ;;  %v409_v21 = vrot.slane %v408_v12, 4  ;;  %v419_v25 = vrot.slane %v418_v18, 4  ;;  %v511_v28 = vshrl.u32 %v226_v10, 16  ;;  %v219_v16 = vld [vmem:[%s5287_s4 + $0x54] sm:$0xf] }
  0x45   : > { %v503_v27 = vrot.slane %v501_v19, 5  ;;  %v517_v29 = vshll.u32 %v248_v14, 16  ;;  %v509_v35 = vrot.slane %v507_v24, 5  ;;  %v594_v44 = vshrl.u32 %v233_v32, 16 }
  0x46   : > { %v676_v33 = vpack.c.b16 %v646_v20, %v645_v17  ;;  %v414_v34 = vsel %vm5300_vm3, %v409_v21, %v413_v8  ;;  %v424_v37 = vsel %vm5300_vm3, %v419_v25, %v423_v13  ;;  %v513_v40 = vrot.slane %v511_v28, 4  ;;  %v5421_v21 = vld [vmem:[%s5287_s4 + $0x58] sm:$0xf] }
  0x47   : > { %v655_v38 = vunpack.c.l.b16 %v414_v34  ;;  %v504_v39 = vor.u32 %v503_v27, %v500_v23  ;;  %v656_v42 = vunpack.c.l.b16 %v424_v37  ;;  %v519_v43 = vrot.slane %v517_v29, 5  ;;  %v5424_v23 = vld [vmem:[%s5287_s4 + $0x5c] sm:$0x1] }
  0x48   : > { %4339 = vmatmul.msk.bf16.gmra.mxu0 %vm691_vm4, %v676_v33  ;;  %v597_v45 = vshll.u32 %v233_v32, 16  ;;  %v514_v47 = vor.u32 %v513_v40, %v509_v35  ;;  %v603_v48 = vshll.u32 %v234_v36, 16  ;;  %v607_v50 = vshrl.u32 %v234_v36, 16 }
  0x49   : > { %v505_v46 = vrot.slane %v504_v39, 4  ;;  %v681_v51 = vpack.c.b16 %v656_v42, %v655_v38  ;;  %v596_v52 = vrot.slane %v594_v44, 4  ;;  %v613_v55 = vshll.u32 %v252_v41, 16  ;;  %v227_v39 = vld [vmem:[%s5287_s4 + $0x84] sm:$0xf] }
  0x4a   : > { %v599_v53 = vrot.slane %v597_v45, 5  ;;  %v515_v59 = vrot.slane %v514_v47, 4  ;;  %v605_v60 = vrot.slane %v603_v48, 5  ;;  %v609_v61 = vrot.slane %v607_v50, 4  ;;  %v228_v44 = vld [vmem:[%s5287_s4 + $0x88] sm:$0xf] }
  0x4b   : > { %v510_v58 = vsel %vm5300_vm3, %v505_v46, %v509_v35  ;;  %4344 = vmatmul.msk.bf16.gmra.mxu1 %vm691_vm4, %v681_v51  ;;  %v615_v2 = vrot.slane %v613_v55, 5  ;;  %v306_v6 = vshrl.u32 %v209_v56, 16  ;;  %v309_v7 = vshll.u32 %v209_v56, 16  ;;  %v249_v50 = vld [vmem:[%s5287_s4 + $0x8c] sm:$0x1] }
  0x4c   : > { %v663_v0 = vunpack.c.l.b16 %v510_v58  ;;  %v600_v1 = vor.u32 %v599_v53, %v596_v52  ;;  %v520_v4 = vsel %vm5300_vm3, %v515_v59, %v519_v43  ;;  %v610_v5 = vor.u32 %v609_v61, %v605_v60 }
  0x4d   : > { %v664_v8 = vunpack.c.l.b16 %v520_v4  ;;  %v315_v10 = vshll.u32 %v5406_v63, 16  ;;  %v319_v11 = vshrl.u32 %v5406_v63, 16  ;;  %v308_v13 = vrot.slane %v306_v6, 4  ;;  %v235_v4 = vld [vmem:[%s5287_s4 + $0xb4] sm:$0xf] }
  0x4e   : > { %v601_v9 = vrot.slane %v600_v1, 4  ;;  %v611_v12 = vrot.slane %v610_v5, 4  ;;  %v311_v14 = vrot.slane %v309_v7, 5  ;;  %v325_v15 = vshll.u32 %v5410_v3, 16 }
  0x4f   : > { %v685_v17 = vpack.c.b16 %v664_v8, %v663_v0  ;;  %v317_v19 = vrot.slane %v315_v10, 5  ;;  %v321_v20 = vrot.slane %v319_v11, 4  ;;  %v426_v33 = vshrl.u32 %v219_v16, 16 }
  0x50   : > { %v606_v18 = vsel %vm5300_vm3, %v601_v9, %v605_v60  ;;  %v616_v24 = vsel %vm5300_vm3, %v611_v12, %v615_v2  ;;  %v312_v27 = vor.u32 %v311_v14, %v308_v13  ;;  %v327_v28 = vrot.slane %v325_v15, 5  ;;  %v236_v9 = vld [vmem:[%s5287_s4 + $0xb8] sm:$0xf]  ;;  %v253_v13 = vld [vmem:[%s5287_s4 + $0xbc] sm:$0x1] }
  0x51   : > { %v671_v25 = vunpack.c.l.b16 %v606_v18  ;;  %4348 = vmatmul.msk.bf16.gmra.mxu2 %vm691_vm4, %v685_v17  ;;  %v672_v29 = vunpack.c.l.b16 %v616_v24  ;;  %v322_v32 = vor.u32 %v321_v20, %v317_v19  ;;  %v429_v34 = vshll.u32 %v219_v16, 16 }
  0x52   : > { %v313_v35 = vrot.slane %v312_v27, 4  ;;  %v435_v36 = vshll.u32 %v5421_v21, 16  ;;  %v439_v37 = vshrl.u32 %v5421_v21, 16  ;;  %v445_v38 = vshll.u32 %v5424_v23, 16 }
  0x53   : > { %v689_v40 = vpack.c.b16 %v672_v29, %v671_v25  ;;  %v323_v41 = vrot.slane %v322_v32, 4  ;;  %v428_v42 = vrot.slane %v426_v33, 4  ;;  %v431_v43 = vrot.slane %v429_v34, 5  ;;  %v211_v32 = vld [vmem:[%s5287_s4 + $0x24] sm:$0xf] }
  0x54   : > { %v318_v45 = vsel %vm5300_vm3, %v313_v35, %v317_v19  ;;  %v437_v46 = vrot.slane %v435_v36, 5  ;;  %v441_v47 = vrot.slane %v439_v37, 4  ;;  %v447_v48 = vrot.slane %v445_v38, 5  ;;  %v5450_v37 = vld [vmem:[%s5287_s4 + $0x28] sm:$0xf] }
  0x55   : > { %4352 = vmatmul.msk.bf16.gmra.mxu3 %vm691_vm4, %v689_v40  ;;  %v328_v51 = vsel %vm5300_vm3, %v323_v41, %v327_v28  ;;  %v647_v52 = vunpack.c.l.b16 %v318_v45  ;;  %v432_v53 = vor.u32 %v431_v43, %v428_v42  ;;  %v522_v55 = vshrl.u32 %v227_v39, 16  ;;  %v5456_v42 = vld [vmem:[%s5287_s4 + $0x2c] sm:$0x1] }
  0x56   : > { %v648_v56 = vunpack.c.l.b16 %v328_v51  ;;  %v442_v58 = vor.u32 %v441_v47, %v437_v46  ;;  %v525_v59 = vshll.u32 %v227_v39, 16  ;;  %v531_v60 = vshll.u32 %v228_v44, 16 }
  0x57   : > { %v433_v61 = vrot.slane %v432_v53, 4  ;;  %v524_v0 = vrot.slane %v522_v55, 4  ;;  %v535_v1 = vshrl.u32 %v228_v44, 16  ;;  %v541_v2 = vshll.u32 %v249_v50, 16 }
  0x58   : > { %v677_v5 = vpack.c.b16 %v648_v56, %v647_v52  ;;  %v443_v6 = vrot.slane %v442_v58, 4  ;;  %v527_v7 = vrot.slane %v525_v59, 5  ;;  %v533_v8 = vrot.slane %v531_v60, 5  ;;  %v1053_v56 = vld [vmem:[%s5287_s4] sm:$0xe] }
  0x59   : > { %v438_v10 = vsel %vm5300_vm3, %v433_v61, %v437_v46  ;;  %v537_v11 = vrot.slane %v535_v1, 4  ;;  %v543_v12 = vrot.slane %v541_v2, 5  ;;  %v618_v17 = vshrl.u32 %v235_v4, 16 }
  0x5a   : > { %4340 = vmatmul.msk.bf16.gmra.mxu0 %vm691_vm4, %v677_v5  ;;  %v448_v14 = vsel %vm5300_vm3, %v443_v6, %v447_v48  ;;  %v657_v15 = vunpack.c.l.b16 %v438_v10  ;;  %v528_v16 = vor.u32 %v527_v7, %v524_v0  ;;  %v621_v20 = vshll.u32 %v235_v4, 16  ;;  %v4578_v0 = vld [vmem:[%s5287_s4 + $0xc] sm:$0xf] }
  0x5b   : > { %v658_v18 = vunpack.c.l.b16 %v448_v14  ;;  %v538_v19 = vor.u32 %v537_v11, %v533_v8  ;;  %v627_v24 = vshll.u32 %v236_v9, 16  ;;  %v620_v27 = vrot.slane %v618_v17, 4  ;;  %v2811_v5 = vld [vmem:[#allocation2 + $0xc] sm:$0x3] }
  0x5c   : > { %v529_v25 = vrot.slane %v528_v16, 4  ;;  %v631_v28 = vshrl.u32 %v236_v9, 16  ;;  %v637_v29 = vshll.u32 %v253_v13, 16  ;;  %v623_v35 = vrot.slane %v621_v20, 5  ;;  %v4579_v16 = vld [vmem:[%s5287_s4 + $0x10] sm:$0xf] }
  0x5d   : > { %v682_v33 = vpack.c.b16 %v658_v18, %v657_v15  ;;  %v539_v34 = vrot.slane %v538_v19, 4  ;;  %v629_v36 = vrot.slane %v627_v24, 5  ;;  %v1109_v38 = vrot.slane %v5318_v62, 5 }
  0x5e   : > { %v534_v39 = vsel %vm5300_vm3, %v529_v25, %v533_v8  ;;  %v633_v40 = vrot.slane %v631_v28, 4  ;;  %v639_v41 = vrot.slane %v637_v29, 5  ;;  %v624_v45 = vor.u32 %v623_v35, %v620_v27  ;;  %v4580_v29 = vld [vmem:[%s5287_s4 + $0x14] sm:$0x1] }
  0x5f   : > { %4345 = vmatmul.msk.bf16.gmra.mxu1 %vm691_vm4, %v682_v33  ;;  %v544_v43 = vsel %vm5300_vm3, %v539_v34, %v543_v12  ;;  %v665_v44 = vunpack.c.l.b16 %v534_v39  ;;  %v330_v46 = vshrl.u32 %v211_v32, 16  ;;  %v333_v62 = vshll.u32 %v211_v32, 16 }
  0x60   : > { %v666_v47 = vunpack.c.l.b16 %v544_v43  ;;  %v634_v48 = vor.u32 %v633_v40, %v629_v36  ;;  %v339_v50 = vshll.u32 %v5450_v37, 16  ;;  %v625_v51 = vrot.slane %v624_v45, 4  ;;  %v2556_v45 = vld [vmem:[#allocation2 + $0xa] sm:$0x3] }
  0x61   : > { %v332_v52 = vrot.slane %v330_v46, 4  ;;  %v343_v53 = vshrl.u32 %v5450_v37, 16  ;;  %v349_v55 = vshll.u32 %v5456_v42, 16  ;;  %v335_v60 = vrot.slane %v333_v62, 5  ;;  %v4916_v46 = vld [vmem:[%s5287_s4] sm:$0xff] }
  0x62   : > { %v686_v58 = vpack.c.b16 %v666_v47, %v665_v44  ;;  %v635_v59 = vrot.slane %v634_v48, 4  ;;  %v341_v61 = vrot.slane %v339_v50, 5  ;;  %v630_v1 = vsel %vm5300_vm3, %v625_v51, %v629_v36  ;;  %v3497_v44 = vld [vmem:[#allocation2 + $0xe] sm:$0x3]  ;;  %v3895_v62 = vld [vmem:[#allocation2 + $0x10] sm:$0x3] }
  0x63   : > { %v345_v2 = vrot.slane %v343_v53, 4  ;;  %v351_v4 = vrot.slane %v349_v55, 5  ;;  %v673_v7 = vunpack.c.l.b16 %v630_v1  ;;  %v336_v8 = vor.u32 %v335_v60, %v332_v52  ;;  %v4581_v60 = vld [vmem:[%s5287_s4 + $0x18] sm:$0xf] }
  0x64   : > { %4349 = vmatmul.msk.bf16.gmra.mxu2 %vm691_vm4, %v686_v58  ;;  %v640_v6 = vsel %vm5300_vm3, %v635_v59, %v639_v41  ;;  %v4434_v12 = vrot.slane %v1053_v56, 9  ;;  %v1106_v13 = vrot.slane %v5313_v57, 5  ;;  %v2941_v15 = vsel %vm740_vm0, %v2811_v5, 0 }
  0x65   : > { %v674_v9 = vunpack.c.l.b16 %v640_v6  ;;  %v346_v10 = vor.u32 %v345_v2, %v341_v61  ;;  %v337_v14 = vrot.slane %v336_v8, 4  ;;  %v1774_v17 = vshrl.u32 %v4578_v0, 16  ;;  %2950 = vmatpush.bf16.msra.mxu2 %v2941_v15 }
  0x66   : > { %v1777_v18 = vshll.u32 %v4578_v0, 16  ;;  %v1107_v24 = vsel %vm5471_vm7, %v4434_v12, %v1106_v13  ;;  %v1108_v25 = vrot.slane %v1106_v13, 4  ;;  %v1783_v36 = vshll.u32 %v4579_v16, 16  ;;  %v4582_v0 = vld [vmem:[%s5287_s4 + $0x1c] sm:$0xf] }
  0x67   : > { %v690_v19 = vpack.c.b16 %v674_v9, %v673_v7  ;;  %v347_v20 = vrot.slane %v346_v10, 4  ;;  %v342_v27 = vsel %vm5300_vm3, %v337_v14, %v341_v61  ;;  %v1218_v28 = vunpack.c.l.b16 %v1107_v24  ;;  %v4932_v10 = vld [vmem:[%s5287_s4 + $0xc] sm:$0xff] }
  0x68   : > { %v1776_v57 = vrot.slane %v1774_v17, 4  ;;  %v1779_v32 = vrot.slane %v1777_v18, 5  ;;  %v649_v34 = vunpack.c.l.b16 %v342_v27  ;;  %v1110_v35 = vsel %vm5471_vm7, %v1108_v25, %v1109_v38 }
  0x69   : > { %4353 = vmatmul.msk.bf16.gmra.mxu3 %vm691_vm4, %v690_v19  ;;  %v352_v33 = vsel %vm5300_vm3, %v347_v20, %v351_v4  ;;  %v1219_v40 = vunpack.c.l.b16 %v1110_v35  ;;  %v1787_v43 = vshrl.u32 %v4579_v16, 16  ;;  %v1785_v47 = vrot.slane %v1783_v36, 5  ;;  %v1054_v4 = vld [vmem:[%s5287_s4 + $0xc] sm:$0xe]  ;;  %v4583_v20 = vld [vmem:[%s5287_s4 + $0x20] sm:$0x1] }
  0x6a   : > { %v650_v39 = vunpack.c.l.b16 %v352_v33  ;;  %v1780_v41 = vor.u32 %v1779_v32, %v1776_v57  ;;  %v1793_v48 = vshll.u32 %v4580_v29, 16  ;;  %v3595_v53 = vsel %vm740_vm0, %v3497_v44, 0  ;;  %v1055_v44 = vld [vmem:[%s5287_s4 + $0x18] sm:$0xe] }
  0x6b   : > { %v1250_v51 = vpack.c.b16 %v1219_v40, %v1218_v28  ;;  %v1789_v52 = vrot.slane %v1787_v43, 4  ;;  %v2654_v38 = vsel %vm740_vm0, %v2556_v45, 0  ;;  %3604 = vmatpush.bf16.msra.mxu3 %v3595_v53  ;;  %v3993_v58 = vsel %vm740_vm0, %v3895_v62, 0 }
  0x6c   : > { %v678_v50 = vpack.c.b16 %v650_v39, %v649_v34  ;;  %v1781_v55 = vrot.slane %v1780_v41, 4  ;;  %v1795_v59 = vrot.slane %v1793_v48, 5  ;;  %4002 = vmatpush.bf16.msra.mxu0 %v3993_v58  ;;  %2663 = vmatpush.bf16.msra.mxu1 %v2654_v38  ;;  %v1113_v1 = vrot.slane %v5360_v30, 5  ;;  %v4584_v39 = vld [vmem:[%s5287_s4 + $0x24] sm:$0xf] }
  0x6d   : > { %v1790_v56 = vor.u32 %v1789_v52, %v1785_v47  ;;  %v1798_v5 = vshrl.u32 %v4581_v60, 16  ;;  %v1801_v7 = vshll.u32 %v4581_v60, 16  ;;  %v1807_v8 = vshll.u32 %v4582_v0, 16  ;;  %v4585_v41 = vld [vmem:[%s5287_s4 + $0x28] sm:$0xf] }
  0x6e   : > { %4341 = vmatmul.msk.bf16.gmra.mxu0 %vm691_vm4, %v678_v50  ;;  %v1786_v2 = vsel %vm5300_vm3, %v1781_v55, %v1785_v47  ;;  %v1811_v9 = vshrl.u32 %v4582_v0, 16  ;;  %v4435_v12 = vrot.slane %v1054_v4, 9  ;;  %v1115_v13 = vrot.slane %v1113_v1, 4 }
  0x6f   : > { %4418 = vmatmul.msk.bf16.vlgmr.msrb.gmra.mxu1 %vm691_vm4, %v4916_v46  ;;  %v1791_v61 = vrot.slane %v1790_v56, 4  ;;  %v1116_v30 = vrot.slane %v5363_v31, 5  ;;  %v2159_v14 = vunpack.c.l.b16 %v1786_v2  ;;  %v1800_v16 = vrot.slane %v1798_v5, 4  ;;  %v4917_v31 = vld [vmem:[%s5287_s4 + $0xc] sm:$0xff] }
  0x70   : > { %v1803_v17 = vrot.slane %v1801_v7, 5  ;;  %v1809_v18 = vrot.slane %v1807_v8, 5  ;;  %v1813_v19 = vrot.slane %v1811_v9, 4  ;;  %v1114_v24 = vsel %vm5471_vm7, %v4435_v12, %v1113_v1 }
  0x71   : > { %v1796_v6 = vsel %vm5300_vm3, %v1791_v61, %v1795_v59  ;;  %v1117_v25 = vsel %vm5471_vm7, %v1115_v13, %v1116_v30  ;;  %v1817_v57 = vshll.u32 %v4583_v20, 16  ;;  %v1220_v32 = vunpack.c.l.b16 %v1114_v24  ;;  %v4586_v61 = vld [vmem:[%s5287_s4 + $0x2c] sm:$0x1]  ;;  %v4587_v13 = vld [vmem:[%s5287_s4 + $0x30] sm:$0xf] }
  0x72   : > { %v2160_v15 = vunpack.c.l.b16 %v1796_v6  ;;  %v1804_v28 = vor.u32 %v1803_v17, %v1800_v16  ;;  %v1814_v29 = vor.u32 %v1813_v19, %v1809_v18  ;;  %v1221_v33 = vunpack.c.l.b16 %v1117_v25  ;;  %v1056_v17 = vld [vmem:[%s5287_s4 + $0x24] sm:$0xe] }
  0x73   : > { %v1819_v36 = vrot.slane %v1817_v57, 5  ;;  %v1120_v43 = vrot.slane %v5406_v63, 5  ;;  %v1822_v45 = vshrl.u32 %v4584_v39, 16  ;;  %v1825_v46 = vshll.u32 %v4584_v39, 16 }
  0x74   : > { %4450 = vmatmul.msk.bf16.vlgmr.msrb.gmra.mxu2 %vm691_vm4, %v1250_v51  ;;  %v2191_v27 = vpack.c.b16 %v2160_v15, %v2159_v14  ;;  %v1805_v34 = vrot.slane %v1804_v28, 4  ;;  %v1815_v35 = vrot.slane %v1814_v29, 4  ;;  %v1251_v40 = vpack.c.b16 %v1221_v33, %v1220_v32  ;;  %v4933_v51 = vld [vmem:[%s5287_s4 + $0x18] sm:$0xff]  ;;  %v4588_v14 = vld [vmem:[%s5287_s4 + $0x34] sm:$0xf] }
  0x75   : > { %v1831_v62 = vshll.u32 %v4585_v41, 16  ;;  %v1835_v50 = vshrl.u32 %v4585_v41, 16  ;;  %v4436_v52 = vrot.slane %v1055_v44, 9  ;;  %v1122_v53 = vrot.slane %v1120_v43, 4 }
  0x76   : > { %v1810_v47 = vsel %vm5300_vm3, %v1805_v34, %v1809_v18  ;;  %v1820_v48 = vsel %vm5300_vm3, %v1815_v35, %v1819_v36  ;;  %v1123_v63 = vrot.slane %v5410_v3, 5  ;;  %v1824_v56 = vrot.slane %v1822_v45, 4  ;;  %v4918_v3 = vld [vmem:[%s5287_s4 + $0x18] sm:$0xff] }
  0x77   : > { %v2161_v38 = vunpack.c.l.b16 %v1810_v47  ;;  %v2162_v55 = vunpack.c.l.b16 %v1820_v48  ;;  %v1827_v58 = vrot.slane %v1825_v46, 5  ;;  %v1833_v59 = vrot.slane %v1831_v62, 5  ;;  %v4589_v36 = vld [vmem:[%s5287_s4 + $0x38] sm:$0x1]  ;;  %v4590_v48 = vld [vmem:[%s5287_s4 + $0x3c] sm:$0xf] }
  0x78   : > { %v1837_v60 = vrot.slane %v1835_v50, 4  ;;  %v1121_v0 = vsel %vm5471_vm7, %v4436_v52, %v1120_v43  ;;  %v1124_v1 = vsel %vm5471_vm7, %v1122_v53, %v1123_v63  ;;  %v1841_v6 = vshll.u32 %v4586_v61, 16  ;;  %v4591_v62 = vld [vmem:[%s5287_s4 + $0x40] sm:$0xf]  ;;  %v5095_v63 = vld [vmem:[%s5287_s4 + $0x34] sm:$0xf] }
  0x79   : > { %4562 = vmatmul.msk.bf16.vlgmr.msrb.gmra.mxu3 %vm691_vm4, %v4932_v10  ;;  %v2192_v2 = vpack.c.b16 %v2162_v55, %v2161_v38  ;;  %v1828_v4 = vor.u32 %v1827_v58, %v1824_v56  ;;  %v1222_v7 = vunpack.c.l.b16 %v1121_v0  ;;  %v1223_v8 = vunpack.c.l.b16 %v1124_v1  ;;  %v1057_v55 = vld [vmem:[%s5287_s4 + $0x30] sm:$0xe] }
  0x7a   : > { %v1838_v5 = vor.u32 %v1837_v60, %v1833_v59  ;;  %v1843_v12 = vrot.slane %v1841_v6, 5  ;;  %v1127_v15 = vrot.slane %v5450_v37, 5  ;;  %v1846_v18 = vshrl.u32 %v4587_v13, 16  ;;  %v4935_v6 = vld [vmem:[%s5287_s4 + $0x30] sm:$0xff] }
  0x7b   : > { %v1829_v9 = vrot.slane %v1828_v4, 4  ;;  %v1252_v30 = vpack.c.b16 %v1223_v8, %v1222_v7  ;;  %v1849_v20 = vshll.u32 %v4587_v13, 16  ;;  %v1855_v24 = vshll.u32 %v4588_v14, 16 }
  0x7c   : > { %v1839_v10 = vrot.slane %v1838_v5, 4  ;;  %v1859_v25 = vshrl.u32 %v4588_v14, 16  ;;  %v1129_v28 = vrot.slane %v1127_v15, 4  ;;  %v1130_v37 = vrot.slane %v5456_v42, 5  ;;  %v4919_v42 = vld [vmem:[%s5287_s4 + $0x24] sm:$0xff] }
  0x7d   : > { %v1834_v16 = vsel %vm5300_vm3, %v1829_v9, %v1833_v59  ;;  %v1848_v32 = vrot.slane %v1846_v18, 4  ;;  %v1851_v33 = vrot.slane %v1849_v20, 5  ;;  %v1857_v34 = vrot.slane %v1855_v24, 5  ;;  %v4920_v20 = vld [vmem:[%s5287_s4 + $0x30] sm:$0xff] }
  0x7e   : > { %4626 = vmatmul.msk.bf16.vlgmr.msrb.gmra.mxu0 %vm691_vm4, %v2191_v27  ;;  %v1844_v19 = vsel %vm5300_vm3, %v1839_v10, %v1843_v12  ;;  %v4934_v27 = vld [vmem:[%s5287_s4 + $0x24] sm:$0xff]  ;;  %v2163_v29 = vunpack.c.l.b16 %v1834_v16  ;;  %v1861_v35 = vrot.slane %v1859_v25, 4  ;;  %v1865_v45 = vshll.u32 %v4589_v36, 16 }
  0x7f   : > { %4419 = vmatmul.msk.bf16.gmra.mxu1 %vm691_vm4, %v4917_v31  ;;  %v4437_v31 = vrot.slane %v1056_v17, 9  ;;  %v2164_v57 = vunpack.c.l.b16 %v1844_v19  ;;  %v1852_v43 = vor.u32 %v1851_v33, %v1848_v32  ;;  %v1134_v38 = vrot.slane %v5095_v63, 5  ;;  %v4594_v32 = vld [vmem:[%s5287_s4 + $0x4c] sm:$0xf] }
  0x80   : > { %v1862_v44 = vor.u32 %v1861_v35, %v1857_v34  ;;  %v1867_v52 = vrot.slane %v1865_v45, 5  ;;  %v1870_v56 = vshrl.u32 %v4590_v48, 16  ;;  %v1873_v58 = vshll.u32 %v4590_v48, 16 }
  0x81   : > { %v1128_v39 = vsel %vm5471_vm7, %v4437_v31, %v1127_v15  ;;  %v2193_v41 = vpack.c.b16 %v2164_v57, %v2163_v29  ;;  %v1853_v50 = vrot.slane %v1852_v43, 4  ;;  %v1879_v59 = vshll.u32 %v4591_v62, 16  ;;  %v4593_v57 = vld [vmem:[%s5287_s4 + $0x48] sm:$0xf] }
  0x82   : > { %v1224_v46 = vunpack.c.l.b16 %v1128_v39  ;;  %v1883_v60 = vshrl.u32 %v4591_v62, 16  ;;  %v1136_v4 = vrot.slane %v1134_v38, 4  ;;  %v1872_v7 = vrot.slane %v1870_v56, 4 }
  0x83   : > { %v1858_v0 = vsel %vm5300_vm3, %v1853_v50, %v1857_v34  ;;  %v1875_v8 = vrot.slane %v1873_v58, 5  ;;  %v1881_v9 = vrot.slane %v1879_v59, 5  ;;  %v1897_v43 = vshll.u32 %v4593_v57, 16  ;;  %v4595_v58 = vld [vmem:[%s5287_s4 + $0x50] sm:$0x1] }
  0x84   : > { %4451 = vmatmul.msk.bf16.gmra.mxu2 %vm691_vm4, %v1251_v40  ;;  %v1131_v40 = vsel %vm5471_vm7, %v1129_v28, %v1130_v37  ;;  %v1885_v10 = vrot.slane %v1883_v60, 4  ;;  %v2165_v12 = vunpack.c.l.b16 %v1858_v0  ;;  %v1907_v45 = vshrl.u32 %v4594_v32, 16 }
  0x85   : > { %v1225_v47 = vunpack.c.l.b16 %v1131_v40  ;;  %v1876_v16 = vor.u32 %v1875_v8, %v1872_v7  ;;  %v1141_v40 = vrot.slane %v5332_v22, 5 }
  0x86   : > { %v1886_v17 = vor.u32 %v1885_v10, %v1881_v9  ;;  %v1909_v56 = vrot.slane %v1907_v45, 4 }
  0x87   : > { %v1253_v53 = vpack.c.b16 %v1225_v47, %v1224_v46  ;;  %v1877_v28 = vrot.slane %v1876_v16, 4  ;;  %v4936_v47 = vld [vmem:[%s5287_s4 + $0x3c] sm:$0xff]  ;;  %v4597_v16 = vld [vmem:[%s5287_s4 + $0x58] sm:$0xf] }
  0x88   : > { %v1887_v37 = vrot.slane %v1886_v17, 4  ;;  %v1148_v17 = vrot.slane %v5375_v49, 5 }
  0x89   : > { %4563 = vmatmul.msk.bf16.gmra.mxu3 %vm691_vm4, %v4933_v51  ;;  %v1863_v51 = vrot.slane %v1862_v44, 4  ;;  %v1882_v35 = vsel %vm5300_vm3, %v1877_v28, %v1881_v9  ;;  %v1903_v44 = vshll.u32 %v4594_v32, 16  ;;  %v1927_v28 = vshll.u32 %v4597_v16, 16 }
  0x8a   : > { %v2167_v46 = vunpack.c.l.b16 %v1882_v35  ;;  %v1151_v35 = vrot.slane %v5378_v54, 5 }
  0x8b   : > { %v1868_v1 = vsel %vm5300_vm3, %v1863_v51, %v1867_v52  ;;  %v1143_v51 = vrot.slane %v1141_v40, 4  ;;  %v5097_v52 = vld [vmem:[%s5287_s4 + $0x44] sm:$0x1] }
  0x8c   : > { %v2166_v13 = vunpack.c.l.b16 %v1868_v1 }
  0x8e   : > { %4627 = vmatmul.msk.bf16.gmra.mxu0 %vm691_vm4, %v2192_v2  ;;  %v4438_v2 = vrot.slane %v1057_v55, 9  ;;  %v2194_v19 = vpack.c.b16 %v2166_v13, %v2165_v12  ;;  %v1905_v55 = vrot.slane %v1903_v44, 5 }
  0x8f   : > { %4420 = vmatmul.msk.bf16.gmra.mxu1 %vm691_vm4, %v4918_v3  ;;  %v5096_v3 = vld [vmem:[%s5287_s4 + $0x38] sm:$0x1] }
  0x90   : > { %v1137_v5 = vrot.slane %v5096_v3, 5  ;;  %v1135_v14 = vsel %vm5471_vm7, %v4438_v2, %v1134_v38  ;;  %v1899_v38 = vrot.slane %v1897_v43, 5  ;;  %v1913_v3 = vshll.u32 %v4595_v58, 16  ;;  %v4599_v58 = vld [vmem:[%s5287_s4 + $0x60] sm:$0xf] }
  0x91   : > { %v1226_v25 = vunpack.c.l.b16 %v1135_v14  ;;  %v1929_v43 = vrot.slane %v1927_v28, 5  ;;  %v1158_v28 = vrot.slane %v5424_v23, 5 }
  0x92   : > { %v1138_v15 = vsel %vm5471_vm7, %v1136_v4, %v1137_v5  ;;  %v1910_v4 = vor.u32 %v1909_v56, %v1905_v55  ;;  %v1915_v12 = vrot.slane %v1913_v3, 5 }
  0x94   : > { %4452 = vmatmul.msk.bf16.gmra.mxu2 %vm691_vm4, %v1252_v30  ;;  %v4592_v30 = vld [vmem:[%s5287_s4 + $0x44] sm:$0x1]  ;;  %v1911_v10 = vrot.slane %v1910_v4, 4 }
  0x95   : > { %v1889_v18 = vshll.u32 %v4592_v30, 16 }
  0x97   : > { %v1891_v29 = vrot.slane %v1889_v18, 5 }
  0x99   : > { %4564 = vmatmul.msk.bf16.gmra.mxu3 %vm691_vm4, %v4934_v27  ;;  %v1227_v27 = vunpack.c.l.b16 %v1138_v15  ;;  %v1892_v36 = vsel %vm5300_vm3, %v1887_v37, %v1891_v29  ;;  %v4596_v15 = vld [vmem:[%s5287_s4 + $0x54] sm:$0xf]  ;;  %v1931_v37 = vshrl.u32 %v4597_v16, 16 }
  0x9a   : > { %v2168_v48 = vunpack.c.l.b16 %v1892_v36 }
  0x9b   : > { %v1254_v34 = vpack.c.b16 %v1227_v27, %v1226_v25  ;;  %v1918_v25 = vshrl.u32 %v4596_v15, 16  ;;  %v1921_v27 = vshll.u32 %v4596_v15, 16  ;;  %v1933_v44 = vrot.slane %v1931_v37, 4 }
  0x9c   : > { %v2195_v0 = vpack.c.b16 %v2168_v48, %v2167_v46  ;;  %v4598_v46 = vld [vmem:[%s5287_s4 + $0x5c] sm:$0x1] }
  0x9e   : > { %4628 = vmatmul.msk.bf16.gmra.mxu0 %vm691_vm4, %v2193_v41  ;;  %v1058_v41 = vld [vmem:[%s5287_s4 + $0x3c] sm:$0xe] }
  0x9f   : > { %4421 = vmatmul.msk.bf16.gmra.mxu1 %vm691_vm4, %v4919_v42  ;;  %v1894_v42 = vshrl.u32 %v4593_v57, 16  ;;  %v4439_v50 = vrot.slane %v1058_v41, 9  ;;  %v4937_v57 = vld [vmem:[%s5287_s4 + $0x48] sm:$0xff]  ;;  %v1920_v41 = vrot.slane %v1918_v25, 4  ;;  %v4938_v25 = vld [vmem:[%s5287_s4 + $0x54] sm:$0xff] }
  0xa1   : > { %v1896_v22 = vrot.slane %v1894_v42, 4  ;;  %v1142_v59 = vsel %vm5471_vm7, %v4439_v50, %v1141_v40  ;;  %v1923_v42 = vrot.slane %v1921_v27, 5 }
  0xa2   : > { %v1228_v7 = vunpack.c.l.b16 %v1142_v59  ;;  %v4600_v59 = vld [vmem:[%s5287_s4 + $0x64] sm:$0xf] }
  0xa3   : > { %v5558_v61 = vpop.f32.mrf.mxu1  ;;  %v1900_v2 = vor.u32 %v1899_v38, %v1896_v22  ;;  %v1937_v22 = vshll.u32 %v4598_v46, 16  ;;  %v4923_v46 = vld [vmem:[%s5287_s4 + $0x54] sm:$0xff] }
  0xa4   : > { %4453 = vmatmul.msk.bf16.gmra.mxu2 %vm691_vm4, %v1253_v53  ;;  %v1144_v53 = vrot.slane %v5097_v52, 5  ;;  %v1924_v52 = vor.u32 %v1923_v42, %v1920_v41 }
  0xa5   : > { %v1901_v9 = vrot.slane %v1900_v2, 4  ;;  %v1939_v4 = vrot.slane %v1937_v22, 5 }
  0xa6   : > { %v1145_v60 = vsel %vm5471_vm7, %v1143_v51, %v1144_v53  ;;  %v4922_v51 = vld [vmem:[%s5287_s4 + $0x48] sm:$0xff]  ;;  %v1934_v53 = vor.u32 %v1933_v44, %v1929_v43 }
  0xa7   : > { %v1229_v8 = vunpack.c.l.b16 %v1145_v60  ;;  %v1906_v18 = vsel %vm5300_vm3, %v1901_v9, %v1905_v55  ;;  %v1155_v9 = vrot.slane %v5421_v21, 5 }
  0xa8   : > { %v2169_v36 = vunpack.c.l.b16 %v1906_v18  ;;  %v1935_v2 = vrot.slane %v1934_v53, 4 }
  0xa9   : > { %4565 = vmatmul.msk.bf16.gmra.mxu3 %vm691_vm4, %v4935_v6  ;;  %v4921_v6 = vld [vmem:[%s5287_s4 + $0x3c] sm:$0xff]  ;;  %v1255_v30 = vpack.c.b16 %v1229_v8, %v1228_v7  ;;  %v1945_v7 = vshll.u32 %v4599_v58, 16  ;;  %v1951_v8 = vshll.u32 %v4600_v59, 16  ;;  %v1157_v27 = vrot.slane %v1155_v9, 4 }
  0xaa   : > { %v1940_v16 = vsel %vm5300_vm3, %v1935_v2, %v1939_v4  ;;  %v5098_v4 = vld [vmem:[%s5287_s4 + $0x64] sm:$0xf] }
  0xab   : > { %v5574_v24 = vpop.f32.mrf.mxu1  ;;  %v1159_v42 = vsel %vm5471_vm7, %v1157_v27, %v1158_v28 }
  0xac   : > { %v5576_v31 = vpop.f32.mrf.mxu2 }
  0xae   : > { %4629 = vmatmul.msk.bf16.gmra.mxu0 %vm691_vm4, %v2194_v19  ;;  %v1916_v19 = vsel %vm5300_vm3, %v1911_v10, %v1915_v12  ;;  %v1955_v10 = vshrl.u32 %v4600_v59, 16 }
  0xaf   : > { %4422 = vmatmul.msk.bf16.gmra.mxu1 %vm691_vm4, %v4920_v20  ;;  %v1059_v20 = vld [vmem:[%s5287_s4 + $0x48] sm:$0xe]  ;;  %v2170_v40 = vunpack.c.l.b16 %v1916_v19  ;;  %v1947_v19 = vrot.slane %v1945_v7, 5  ;;  %v1061_v7 = vld [vmem:[%s5287_s4 + $0x60] sm:$0xe] }
  0xb0   : > { %v4440_v49 = vrot.slane %v1059_v20, 9  ;;  %v1953_v20 = vrot.slane %v1951_v8, 5  ;;  %v1957_v37 = vrot.slane %v1955_v10, 4 }
  0xb1   : > { %v5582_v33 = vpop.f32.mrf.mxu0  ;;  %v5588_v39 = vpop.f32.mrf.mxu3  ;;  %v2196_v54 = vpack.c.b16 %v2170_v40, %v2169_v36 }
  0xb2   : > { %v1958_v23 = vor.u32 %v1957_v37, %v1953_v20 }
  0xb4   : > { %4454 = vmatmul.msk.bf16.gmra.mxu2 %vm691_vm4, %v1254_v34  ;;  %v5597_v63 = vpop.f32.mrf.mxu2  ;;  %v1150_v34 = vrot.slane %v1148_v17, 4  ;;  %v1959_v53 = vrot.slane %v1958_v23, 4 }
  0xb6   : > { %v5594_v62 = vpop.f32.mrf.mxu1  ;;  %v1152_v48 = vsel %vm5471_vm7, %v1150_v34, %v1151_v35  ;;  %v4601_v34 = vld [vmem:[%s5287_s4 + $0x68] sm:$0x1] }
  0xb7   : > { %v1231_v55 = vunpack.c.l.b16 %v1152_v48 }
  0xb9   : > { %4566 = vmatmul.msk.bf16.gmra.mxu3 %vm691_vm4, %v4936_v47  ;;  %v5605_v1 = vpop.f32.mrf.mxu0  ;;  %v5607_v5 = vpop.f32.mrf.mxu3  ;;  %v1149_v47 = vsel %vm5471_vm7, %v4440_v49, %v1148_v17  ;;  %v2172_v49 = vunpack.c.l.b16 %v1940_v16 }
  0xba   : > { %v1230_v38 = vunpack.c.l.b16 %v1149_v47 }
  0xbc   : > { %v1256_v3 = vpack.c.b16 %v1231_v55, %v1230_v38  ;;  %v4602_v38 = vld [vmem:[%s5287_s4 + $0x6c] sm:$0xf]  ;;  %v4603_v55 = vld [vmem:[%s5287_s4 + $0x70] sm:$0xf] }
  0xbd   : > { %v1966_v8 = vshrl.u32 %v4602_v38, 16  ;;  %v1975_v10 = vshll.u32 %v4603_v55, 16 }
  0xbe   : > { %4630 = vmatmul.msk.bf16.gmra.mxu0 %vm691_vm4, %v2195_v0  ;;  %v5611_v13 = vpop.f32.mrf.mxu1  ;;  %v1925_v0 = vrot.slane %v1924_v52, 4 }
  0xbf   : > { %4423 = vmatmul.msk.bf16.gmra.mxu1 %vm691_vm4, %v4921_v6  ;;  %v1942_v6 = vshrl.u32 %v4599_v58, 16  ;;  %v1968_v28 = vrot.slane %v1966_v8, 4  ;;  %v4606_v8 = vld [vmem:[%s5287_s4 + $0x7c] sm:$0xf] }
  0xc0   : > { %v1930_v15 = vsel %vm5300_vm3, %v1925_v0, %v1929_v43  ;;  %v1961_v43 = vshll.u32 %v4601_v34, 16 }
  0xc1   : > { %v5614_v14 = vpop.f32.mrf.mxu2  ;;  %v1944_v18 = vrot.slane %v1942_v6, 4 }
  0xc2   : > { %v1963_v22 = vrot.slane %v1961_v43, 5 }
  0xc3   : > { %v1948_v40 = vor.u32 %v1947_v19, %v1944_v18  ;;  %v4939_v19 = vld [vmem:[%s5287_s4 + $0x60] sm:$0xff] }
  0xc4   : > { %4455 = vmatmul.msk.bf16.gmra.mxu2 %vm691_vm4, %v1255_v30  ;;  %v1060_v30 = vld [vmem:[%s5287_s4 + $0x54] sm:$0xe]  ;;  %v1964_v2 = vsel %vm5300_vm3, %v1959_v53, %v1963_v22 }
  0xc5   : > { %v5624_v29 = vpop.f32.mrf.mxu0  ;;  %v4441_v21 = vrot.slane %v1060_v30, 9  ;;  %v1949_v52 = vrot.slane %v1948_v40, 4  ;;  %v1979_v30 = vshrl.u32 %v4603_v55, 16  ;;  %v4604_v40 = vld [vmem:[%s5287_s4 + $0x74] sm:$0x1] }
  0xc6   : > { %v5628_v32 = vpop.f32.mrf.mxu3 }
  0xc7   : > { %v1156_v41 = vsel %vm5471_vm7, %v4441_v21, %v1155_v9  ;;  %v1954_v0 = vsel %vm5300_vm3, %v1949_v52, %v1953_v20  ;;  %v1969_v9 = vshll.u32 %v4602_v38, 16  ;;  %v4442_v21 = vrot.slane %v1061_v7, 9  ;;  %v4605_v7 = vld [vmem:[%s5287_s4 + $0x78] sm:$0xf] }
  0xc8   : > { %v5631_v45 = vpop.f32.mrf.mxu1  ;;  %v1232_v48 = vunpack.c.l.b16 %v1156_v41  ;;  %v2173_v20 = vunpack.c.l.b16 %v1954_v0 }
  0xc9   : > { %4567 = vmatmul.msk.bf16.gmra.mxu3 %vm691_vm4, %v4937_v57  ;;  %v5639_v50 = vpop.f32.mrf.mxu2  ;;  %v2171_v57 = vunpack.c.l.b16 %v1930_v15  ;;  %v5099_v15 = vld [vmem:[%s5287_s4 + $0x68] sm:$0x1]  ;;  %v1971_v37 = vrot.slane %v1969_v9, 5  ;;  %v5100_v9 = vld [vmem:[%s5287_s4 + $0x70] sm:$0xf] }
  0xca   : > { %v1165_v16 = vrot.slane %v5099_v15, 5  ;;  %v1062_v15 = vld [vmem:[%s5287_s4 + $0x6c] sm:$0xe] }
  0xcb   : > { %v2197_v44 = vpack.c.b16 %v2172_v49, %v2171_v57  ;;  %v1977_v57 = vrot.slane %v1975_v10, 5  ;;  %v1981_v49 = vrot.slane %v1979_v30, 4  ;;  %v1972_v43 = vor.u32 %v1971_v37, %v1968_v28  ;;  %v5101_v37 = vld [vmem:[%s5287_s4 + $0x74] sm:$0x1] }
  0xcc   : > { %v1169_v10 = vrot.slane %v5100_v9, 5 }
  0xcd   : > { %v5642_v56 = vpop.f32.mrf.mxu0 }
  0xce   : > { %4631 = vmatmul.msk.bf16.gmra.mxu0 %vm691_vm4, %v2196_v54  ;;  %v5647_v60 = vpop.f32.mrf.mxu3  ;;  %v1233_v54 = vunpack.c.l.b16 %v1159_v42 }
  0xcf   : > { %4424 = vmatmul.msk.bf16.gmra.mxu1 %vm691_vm4, %v4922_v51 }
  0xd0   : > { %v5651_v12 = vpop.f32.mrf.mxu1  ;;  %v1257_v58 = vpack.c.b16 %v1233_v54, %v1232_v48  ;;  %v4924_v54 = vld [vmem:[%s5287_s4 + $0x60] sm:$0xff] }
  0xd4   : > { %4456 = vmatmul.msk.bf16.gmra.mxu2 %vm691_vm4, %v1256_v3  ;;  %v5659_v17 = vpop.f32.mrf.mxu2  ;;  %v1162_v3 = vrot.slane %v5098_v4, 5 }
  0xd6   : > { %v1164_v27 = vrot.slane %v1162_v3, 4  ;;  %v1163_v41 = vsel %vm5471_vm7, %v4442_v21, %v1162_v3  ;;  %v2003_v21 = vshrl.u32 %v4606_v8, 16 }
  0xd7   : > { %v5664_v35 = vpop.f32.mrf.mxu0  ;;  %v1234_v22 = vunpack.c.l.b16 %v1163_v41  ;;  %v4443_v41 = vrot.slane %v1062_v15, 9 }
  0xd8   : > { %v5666_v36 = vpop.f32.mrf.mxu3  ;;  %v1166_v42 = vsel %vm5471_vm7, %v1164_v27, %v1165_v16 }
  0xd9   : > { %4568 = vmatmul.msk.bf16.gmra.mxu3 %vm691_vm4, %v4938_v25  ;;  %v2174_v25 = vunpack.c.l.b16 %v1964_v2  ;;  %v1235_v38 = vunpack.c.l.b16 %v1166_v42  ;;  %v1171_v42 = vrot.slane %v1169_v10, 4 }
  0xdb   : > { %v2198_v23 = vpack.c.b16 %v2174_v25, %v2173_v20  ;;  %v1258_v3 = vpack.c.b16 %v1235_v38, %v1234_v22  ;;  %v1993_v20 = vshll.u32 %v4605_v7, 16  ;;  %v1999_v25 = vshll.u32 %v4606_v8, 16 }
  0xdc   : > { %v5674_v47 = vpop.f32.mrf.mxu1  ;;  %v5676_v51 = vpop.f32.mrf.mxu2  ;;  %v2005_v22 = vrot.slane %v2003_v21, 4 }
  0xde   : > { %4632 = vmatmul.msk.bf16.gmra.mxu0 %vm691_vm4, %v2197_v44  ;;  %v1982_v44 = vor.u32 %v1981_v49, %v1977_v57  ;;  %v1172_v49 = vrot.slane %v5101_v37, 5 }
  0xdf   : > { %4425 = vmatmul.msk.bf16.gmra.mxu1 %vm691_vm4, %v4923_v46  ;;  %v5682_v59 = vpop.f32.mrf.mxu0  ;;  %v1985_v46 = vshll.u32 %v4604_v40, 16  ;;  %v4940_v40 = vld [vmem:[%s5287_s4 + $0x6c] sm:$0xff] }
  0xe0   : > { %v5689_v6 = vpop.f32.mrf.mxu3  ;;  %v1983_v0 = vrot.slane %v1982_v44, 4 }
  0xe1   : > { %v1987_v2 = vrot.slane %v1985_v46, 5 }
  0xe4   : > { %4457 = vmatmul.msk.bf16.gmra.mxu2 %vm691_vm4, %v1257_v58  ;;  %v5694_v18 = vpop.f32.mrf.mxu1  ;;  %v1973_v58 = vrot.slane %v1972_v43, 4 }
  0xe6   : > { %v1978_v30 = vsel %vm5300_vm3, %v1973_v58, %v1977_v57  ;;  %v4607_v58 = vld [vmem:[%s5287_s4 + $0x80] sm:$0x1] }
  0xe7   : > { %v5697_v34 = vpop.f32.mrf.mxu2 }
  0xe9   : > { %4569 = vmatmul.msk.bf16.gmra.mxu3 %vm691_vm4, %v4939_v19  ;;  %v1990_v19 = vshrl.u32 %v4605_v7, 16  ;;  %v4925_v7 = vld [vmem:[%s5287_s4 + $0x6c] sm:$0xff] }
  0xeb   : > { %v5705_v48 = vpop.f32.mrf.mxu0  ;;  %v1992_v46 = vrot.slane %v1990_v19, 4 }
  0xec   : > { %v5708_v52 = vpop.f32.mrf.mxu3  ;;  %v973_v53 = vpop.f32.mrf.mxu1 }
  0xed   : > { %v974_v55 = vadd.f32 %v973_v53, %v5582_v33  ;;  %v1988_v33 = vsel %vm5300_vm3, %v1983_v0, %v1987_v2  ;;  %v2001_v53 = vrot.slane %v1999_v25, 5  ;;  %v1170_v0 = vsel %vm5471_vm7, %v4443_v41, %v1169_v10 }
  0xee   : > { %4633 = vmatmul.msk.bf16.gmra.mxu0 %vm691_vm4, %v2198_v23  ;;  %v2175_v23 = vunpack.c.l.b16 %v1978_v30  ;;  %v2176_v43 = vunpack.c.l.b16 %v1988_v33  ;;  %v2009_v30 = vshll.u32 %v4607_v58, 16 }
  0xef   : > { %v5712_v4 = vpop.f32.mrf.mxu2  ;;  %4426 = vmatmul.msk.bf16.gmra.mxu1 %vm691_vm4, %v4924_v54  ;;  %v1995_v54 = vrot.slane %v1993_v20, 5  ;;  %v2006_v9 = vor.u32 %v2005_v22, %v2001_v53 }
  0xf0   : > { %v2199_v2 = vpack.c.b16 %v2176_v43, %v2175_v23  ;;  %v2011_v37 = vrot.slane %v2009_v30, 5  ;;  %v4609_v23 = vld [vmem:[%s5287_s4 + $0x88] sm:$0xf]  ;;  %v5102_v43 = vld [vmem:[%s5287_s4 + $0x7c] sm:$0xf] }
  0xf1   : > { %v1996_v8 = vor.u32 %v1995_v54, %v1992_v46  ;;  %v1063_v46 = vld [vmem:[%s5287_s4 + $0x78] sm:$0xe] }
  0xf3   : > { %v5723_v16 = vpop.f32.mrf.mxu0  ;;  %v1997_v21 = vrot.slane %v1996_v8, 4 }
  0xf4   : > { %v5725_v27 = vpop.f32.mrf.mxu3  ;;  %4458 = vmatmul.msk.bf16.gmra.mxu2 %vm691_vm4, %v1258_v3  ;;  %v975_v28 = vpop.f32.mrf.mxu1 }
  0xf5   : > { %v976_v57 = vadd.f32 %v975_v28, %v5605_v1  ;;  %v1173_v1 = vsel %vm5471_vm7, %v1171_v42, %v1172_v49  ;;  %v2007_v28 = vrot.slane %v2006_v9, 4  ;;  %v4608_v49 = vld [vmem:[%s5287_s4 + $0x84] sm:$0xf]  ;;  %v4941_v9 = vld [vmem:[%s5287_s4 + $0x78] sm:$0xff] }
  0xf6   : > { %v1237_v19 = vunpack.c.l.b16 %v1173_v1  ;;  %v2017_v54 = vshll.u32 %v4608_v49, 16  ;;  %v2027_v1 = vshrl.u32 %v4609_v23, 16 }
  0xf7   : > { %v1326_v44 = vpop.f32.mrf.mxu2  ;;  %v2012_v58 = vsel %vm5300_vm3, %v2007_v28, %v2011_v37 }
  0xf8   : > { %v1406_v38 = vadd.f32 %v1326_v44, %v974_v55  ;;  %v1236_v55 = vunpack.c.l.b16 %v1170_v0  ;;  %v1176_v44 = vrot.slane %v5102_v43, 5  ;;  %v2023_v0 = vshll.u32 %v4609_v23, 16 }
  0xf9   : > { %4570 = vmatmul.msk.bf16.gmra.mxu3 %vm691_vm4, %v4940_v40  ;;  %v2029_v28 = vrot.slane %v2027_v1, 4 }
  0xfa   : > { %v1259_v42 = vpack.c.b16 %v1237_v19, %v1236_v55 }
  0xfb   : > { %v2267_v3 = vpop.f32.mrf.mxu0 }
  0xfc   : > { %v1613_v33 = vpop.f32.mrf.mxu3  ;;  %v978_v15 = vpop.f32.mrf.mxu1 }
  0xfd   : > { %v1693_v20 = vadd.f32 %v1613_v33, %v1406_v38  ;;  %v979_v10 = vadd.f32 %v978_v15, %v5624_v29  ;;  %v2014_v29 = vshrl.u32 %v4608_v49, 16  ;;  %v2002_v38 = vsel %vm5300_vm3, %v1997_v21, %v2001_v53 }
  0xfe   : > { %4634 = vmatmul.msk.bf16.gmra.mxu0 %vm691_vm4, %v2199_v2  ;;  %v5103_v2 = vld [vmem:[%s5287_s4 + $0x80] sm:$0x1]  ;;  %v4444_v33 = vrot.slane %v1063_v46, 9  ;;  %v1178_v15 = vrot.slane %v1176_v44, 4  ;;  %v2177_v55 = vunpack.c.l.b16 %v2002_v38  ;;  %v2178_v53 = vunpack.c.l.b16 %v2012_v58 }
  0xff   : > { %v1328_v25 = vpop.f32.mrf.mxu2  ;;  %4427 = vmatmul.msk.bf16.gmra.mxu1 %vm691_vm4, %v4925_v7  ;;  %v5742_v40 = vadd.f32 %v2267_v3, %v1693_v20  ;;  %v1179_v3 = vrot.slane %v5103_v2, 5  ;;  %v2016_v19 = vrot.slane %v2014_v29, 4  ;;  %v2019_v20 = vrot.slane %v2017_v54, 5  ;;  %v4926_v29 = vld [vmem:[%s5287_s4 + $0x78] sm:$0xff] }
 0x100   : > { %v1407_v41 = vadd.f32 %v1328_v25, %v976_v57  ;;  %v2025_v21 = vrot.slane %v2023_v0, 5  ;;  %v2200_v23 = vpack.c.b16 %v2178_v53, %v2177_v55  ;;  %v4612_v55 = vld [vmem:[%s5287_s4 + $0x94] sm:$0xf]  ;;  %v5104_v53 = vld [vmem:[%s5287_s4 + $0x88] sm:$0xf] }
 0x101   : > { %v2020_v43 = vor.u32 %v2019_v20, %v2016_v19  ;;  %v1183_v19 = vrot.slane %v5104_v53, 5  ;;  %v1064_v20 = vld [vmem:[%s5287_s4 + $0x84] sm:$0xe] }
 0x102   : > { %v2030_v54 = vor.u32 %v2029_v28, %v2025_v21 }
 0x103   : > { %v2269_v22 = vpop.f32.mrf.mxu0  ;;  %v2021_v2 = vrot.slane %v2020_v43, 4 }
 0x104   : > { %v1615_v57 = vpop.f32.mrf.mxu3  ;;  %4459 = vmatmul.msk.bf16.gmra.mxu2 %vm691_vm4, %v1259_v42  ;;  %v980_v7 = vpop.f32.mrf.mxu1  ;;  %v4610_v42 = vld [vmem:[%s5287_s4 + $0x8c] sm:$0x1] }
 0x105   : > { %v1694_v8 = vadd.f32 %v1615_v57, %v1407_v41  ;;  %v981_v30 = vadd.f32 %v980_v7, %v5642_v56  ;;  %v1177_v41 = vsel %vm5471_vm7, %v4444_v33, %v1176_v44  ;;  %v1180_v56 = vsel %vm5471_vm7, %v1178_v15, %v1179_v3 }
 0x106   : > { %v2033_v38 = vshll.u32 %v4610_v42, 16  ;;  %v1239_v0 = vunpack.c.l.b16 %v1180_v56  ;;  %v2031_v57 = vrot.slane %v2030_v54, 4  ;;  %v2051_v56 = vshrl.u32 %v4612_v55, 16  ;;  %v4942_v54 = vld [vmem:[%s5287_s4 + $0x84] sm:$0xff] }
 0x107   : > { %v1331_v25 = vpop.f32.mrf.mxu2  ;;  %v5755_v37 = vadd.f32 %v2269_v22, %v1694_v8  ;;  %v4611_v8 = vld [vmem:[%s5287_s4 + $0x90] sm:$0xf] }
 0x108   : > { %v1408_v49 = vadd.f32 %v1331_v25, %v979_v10  ;;  %v1238_v10 = vunpack.c.l.b16 %v1177_v41  ;;  %v2035_v7 = vrot.slane %v2033_v38, 5  ;;  %v2038_v25 = vshrl.u32 %v4611_v8, 16 }
 0x109   : > { %4571 = vmatmul.msk.bf16.gmra.mxu3 %vm691_vm4, %v4941_v9  ;;  %v2041_v42 = vshll.u32 %v4611_v8, 16  ;;  %v2047_v41 = vshll.u32 %v4612_v55, 16  ;;  %v4445_v38 = vrot.slane %v1064_v20, 9 }
 0x10a   : > { %v1260_v15 = vpack.c.b16 %v1239_v0, %v1238_v10  ;;  %v2040_v0 = vrot.slane %v2038_v25, 4 }
 0x10b   : > { %v2272_v46 = vpop.f32.mrf.mxu0 }
 0x10c   : > { %v1618_v58 = vpop.f32.mrf.mxu3  ;;  %v983_v22 = vpop.f32.mrf.mxu1 }
 0x10d   : > { %v1695_v1 = vadd.f32 %v1618_v58, %v1408_v49  ;;  %v984_v44 = vadd.f32 %v983_v22, %v5664_v35  ;;  %v2026_v35 = vsel %vm5300_vm3, %v2021_v2, %v2025_v21  ;;  %v2036_v49 = vsel %vm5300_vm3, %v2031_v57, %v2035_v7 }
 0x10e   : > { %4635 = vmatmul.msk.bf16.gmra.mxu0 %vm691_vm4, %v2200_v23  ;;  %v5105_v23 = vld [vmem:[%s5287_s4 + $0x8c] sm:$0x1]  ;;  %v1185_v58 = vrot.slane %v1183_v19, 4  ;;  %v2179_v22 = vunpack.c.l.b16 %v2026_v35  ;;  %v2180_v10 = vunpack.c.l.b16 %v2036_v49  ;;  %v2043_v2 = vrot.slane %v2041_v42, 5  ;;  %v4927_v35 = vld [vmem:[%s5287_s4 + $0x84] sm:$0xff] }
 0x10f   : > { %v1333_v3 = vpop.f32.mrf.mxu2  ;;  %4428 = vmatmul.msk.bf16.gmra.mxu1 %vm691_vm4, %v4926_v29  ;;  %v5768_v9 = vadd.f32 %v2272_v46, %v1695_v1  ;;  %v1186_v43 = vrot.slane %v5105_v23, 5  ;;  %v2053_v57 = vrot.slane %v2051_v56, 4 }
 0x110   : > { %v1409_v33 = vadd.f32 %v1333_v3, %v981_v30  ;;  %v2049_v3 = vrot.slane %v2047_v41, 5  ;;  %v2201_v55 = vpack.c.b16 %v2180_v10, %v2179_v22  ;;  %v2044_v20 = vor.u32 %v2043_v2, %v2040_v0  ;;  %v4615_v22 = vld [vmem:[%s5287_s4 + $0xa0] sm:$0xf]  ;;  %v5106_v10 = vld [vmem:[%s5287_s4 + $0x94] sm:$0xf] }
 0x111   : > { %v1190_v0 = vrot.slane %v5106_v10, 5 }
 0x112   : > { %v2054_v25 = vor.u32 %v2053_v57, %v2049_v3 }
 0x113   : > { %v2274_v28 = vpop.f32.mrf.mxu0 }
 0x114   : > { %v1620_v30 = vpop.f32.mrf.mxu3  ;;  %4460 = vmatmul.msk.bf16.gmra.mxu2 %vm691_vm4, %v1260_v15  ;;  %v985_v46 = vpop.f32.mrf.mxu1  ;;  %v4613_v15 = vld [vmem:[%s5287_s4 + $0x98] sm:$0x1] }
 0x115   : > { %v1696_v29 = vadd.f32 %v1620_v30, %v1409_v33  ;;  %v986_v21 = vadd.f32 %v985_v46, %v5682_v59  ;;  %v1184_v33 = vsel %vm5471_vm7, %v4445_v38, %v1183_v19  ;;  %v1187_v59 = vsel %vm5471_vm7, %v1185_v58, %v1186_v43 }
 0x116   : > { %v2057_v49 = vshll.u32 %v4613_v15, 16  ;;  %v1241_v41 = vunpack.c.l.b16 %v1187_v59  ;;  %v2045_v43 = vrot.slane %v2044_v20, 4  ;;  %v2055_v30 = vrot.slane %v2054_v25, 4  ;;  %v4943_v25 = vld [vmem:[%s5287_s4 + $0x90] sm:$0xff] }
 0x117   : > { %v1336_v1 = vpop.f32.mrf.mxu2  ;;  %v5781_v7 = vadd.f32 %v2274_v28, %v1696_v29  ;;  %v4614_v29 = vld [vmem:[%s5287_s4 + $0x9c] sm:$0xf]  ;;  %v2075_v59 = vshrl.u32 %v4615_v22, 16 }
 0x118   : > { %v1410_v8 = vadd.f32 %v1336_v1, %v984_v44  ;;  %v1240_v44 = vunpack.c.l.b16 %v1184_v33  ;;  %v2059_v46 = vrot.slane %v2057_v49, 5  ;;  %v1065_v1 = vld [vmem:[%s5287_s4 + $0x90] sm:$0xe]  ;;  %v2065_v2 = vshll.u32 %v4614_v29, 16 }
 0x119   : > { %4572 = vmatmul.msk.bf16.gmra.mxu3 %vm691_vm4, %v4942_v54  ;;  %v2071_v33 = vshll.u32 %v4615_v22, 16 }
 0x11a   : > { %v1261_v58 = vpack.c.b16 %v1241_v41, %v1240_v44  ;;  %v2060_v15 = vsel %vm5300_vm3, %v2055_v30, %v2059_v46  ;;  %v2077_v30 = vrot.slane %v2075_v59, 4 }
 0x11b   : > { %v2277_v53 = vpop.f32.mrf.mxu0 }
 0x11c   : > { %v1623_v42 = vpop.f32.mrf.mxu3  ;;  %v988_v28 = vpop.f32.mrf.mxu1 }
 0x11d   : > { %v1697_v56 = vadd.f32 %v1623_v42, %v1410_v8  ;;  %v989_v19 = vadd.f32 %v988_v28, %v5705_v48  ;;  %v2062_v48 = vshrl.u32 %v4614_v29, 16  ;;  %v2050_v8 = vsel %vm5300_vm3, %v2045_v43, %v2049_v3 }
 0x11e   : > { %4636 = vmatmul.msk.bf16.gmra.mxu0 %vm691_vm4, %v2201_v55  ;;  %v5107_v55 = vld [vmem:[%s5287_s4 + $0x98] sm:$0x1]  ;;  %v4446_v42 = vrot.slane %v1065_v1, 9  ;;  %v1192_v28 = vrot.slane %v1190_v0, 4  ;;  %v2181_v44 = vunpack.c.l.b16 %v2050_v8  ;;  %v2182_v3 = vunpack.c.l.b16 %v2060_v15 }
 0x11f   : > { %v1338_v23 = vpop.f32.mrf.mxu2  ;;  %4429 = vmatmul.msk.bf16.gmra.mxu1 %vm691_vm4, %v4927_v35  ;;  %v5794_v54 = vadd.f32 %v2277_v53, %v1697_v56  ;;  %v1193_v53 = vrot.slane %v5107_v55, 5  ;;  %v2064_v41 = vrot.slane %v2062_v48, 4  ;;  %v2067_v56 = vrot.slane %v2065_v2, 5  ;;  %v4928_v48 = vld [vmem:[%s5287_s4 + $0x90] sm:$0xff] }
 0x120   : > { %v1411_v38 = vadd.f32 %v1338_v23, %v986_v21  ;;  %v2073_v43 = vrot.slane %v2071_v33, 5  ;;  %v2202_v22 = vpack.c.b16 %v2182_v3, %v2181_v44  ;;  %v4618_v3 = vld [vmem:[%s5287_s4 + $0xac] sm:$0xf] }
 0x121   : > { %v2068_v10 = vor.u32 %v2067_v56, %v2064_v41  ;;  %v1066_v41 = vld [vmem:[%s5287_s4 + $0x9c] sm:$0xe] }
 0x122   : > { %v2078_v2 = vor.u32 %v2077_v30, %v2073_v43 }
 0x123   : > { %v2279_v57 = vpop.f32.mrf.mxu0 }
 0x124   : > { %v1625_v21 = vpop.f32.mrf.mxu3  ;;  %4461 = vmatmul.msk.bf16.gmra.mxu2 %vm691_vm4, %v1261_v58  ;;  %v990_v35 = vpop.f32.mrf.mxu1  ;;  %v4616_v58 = vld [vmem:[%s5287_s4 + $0xa4] sm:$0x1] }
 0x125   : > { %v1698_v20 = vadd.f32 %v1625_v21, %v1411_v38  ;;  %v991_v49 = vadd.f32 %v990_v35, %v5723_v16  ;;  %v1191_v38 = vsel %vm5471_vm7, %v4446_v42, %v1190_v0  ;;  %v1194_v16 = vsel %vm5471_vm7, %v1192_v28, %v1193_v53  ;;  %v4617_v35 = vld [vmem:[%s5287_s4 + $0xa8] sm:$0xf]  ;;  %v5108_v28 = vld [vmem:[%s5287_s4 + $0xa0] sm:$0xf] }
 0x126   : > { %v2081_v8 = vshll.u32 %v4616_v58, 16  ;;  %v1243_v33 = vunpack.c.l.b16 %v1194_v16  ;;  %v2069_v0 = vrot.slane %v2068_v10, 4  ;;  %v2079_v53 = vrot.slane %v2078_v2, 4 }
 0x127   : > { %v1341_v23 = vpop.f32.mrf.mxu2  ;;  %v5807_v46 = vadd.f32 %v2279_v57, %v1698_v20  ;;  %v1197_v44 = vrot.slane %v5108_v28, 5  ;;  %v2089_v30 = vshll.u32 %v4617_v35, 16  ;;  %v2099_v16 = vshrl.u32 %v4618_v3, 16 }
 0x128   : > { %v1412_v29 = vadd.f32 %v1341_v23, %v989_v19  ;;  %v1242_v19 = vunpack.c.l.b16 %v1191_v38  ;;  %v2083_v21 = vrot.slane %v2081_v8, 5  ;;  %v2074_v56 = vsel %vm5300_vm3, %v2069_v0, %v2073_v43 }
 0x129   : > { %4573 = vmatmul.msk.bf16.gmra.mxu3 %vm691_vm4, %v4943_v25  ;;  %v2086_v23 = vshrl.u32 %v4617_v35, 16  ;;  %v2095_v38 = vshll.u32 %v4618_v3, 16  ;;  %v1199_v2 = vrot.slane %v1197_v44, 4  ;;  %v2183_v43 = vunpack.c.l.b16 %v2074_v56  ;;  %v4619_v3 = vld [vmem:[%s5287_s4 + $0xb0] sm:$0x1]  ;;  %v4929_v56 = vld [vmem:[%s5287_s4 + $0x9c] sm:$0xff] }
 0x12a   : > { %v1262_v42 = vpack.c.b16 %v1243_v33, %v1242_v19  ;;  %v2084_v58 = vsel %vm5300_vm3, %v2079_v53, %v2083_v21  ;;  %v2091_v0 = vrot.slane %v2089_v30, 5  ;;  %v2101_v21 = vrot.slane %v2099_v16, 4 }
 0x12b   : > { %v2282_v1 = vpop.f32.mrf.mxu0  ;;  %v2184_v33 = vunpack.c.l.b16 %v2084_v58  ;;  %v2097_v53 = vrot.slane %v2095_v38, 5  ;;  %v2105_v58 = vshll.u32 %v4619_v3, 16 }
 0x12c   : > { %v1628_v57 = vpop.f32.mrf.mxu3  ;;  %v993_v15 = vpop.f32.mrf.mxu1 }
 0x12d   : > { %v1699_v59 = vadd.f32 %v1628_v57, %v1412_v29  ;;  %v4944_v57 = vld [vmem:[%s5287_s4 + $0x9c] sm:$0xff]  ;;  %v994_v19 = vadd.f32 %v993_v15, %v5558_v61  ;;  %v2203_v61 = vpack.c.b16 %v2184_v33, %v2183_v43  ;;  %v2107_v43 = vrot.slane %v2105_v58, 5 }
 0x12e   : > { %4637 = vmatmul.msk.bf16.gmra.mxu0 %vm691_vm4, %v2202_v22  ;;  %v5109_v22 = vld [vmem:[%s5287_s4 + $0xa4] sm:$0x1] }
 0x12f   : > { %v1343_v55 = vpop.f32.mrf.mxu2  ;;  %4430 = vmatmul.msk.bf16.gmra.mxu1 %vm691_vm4, %v4928_v48  ;;  %v5819_v20 = vadd.f32 %v2282_v1, %v1699_v59  ;;  %v1200_v10 = vrot.slane %v5109_v22, 5  ;;  %v4447_v48 = vrot.slane %v1066_v41, 9  ;;  %v2088_v59 = vrot.slane %v2086_v23, 4 }
 0x130   : > { %v1413_v25 = vadd.f32 %v1343_v55, %v991_v49 }
 0x131   : > { %v2092_v15 = vor.u32 %v2091_v0, %v2088_v59 }
 0x133   : > { %v2284_v29 = vpop.f32.mrf.mxu0 }
 0x134   : > { %v1630_v49 = vpop.f32.mrf.mxu3  ;;  %4462 = vmatmul.msk.bf16.gmra.mxu2 %vm691_vm4, %v1262_v42  ;;  %v995_v1 = vpop.f32.mrf.mxu1  ;;  %v1198_v42 = vsel %vm5471_vm7, %v4447_v48, %v1197_v44  ;;  %v4620_v44 = vld [vmem:[%s5287_s4 + $0xb4] sm:$0xf]  ;;  %v2093_v48 = vrot.slane %v2092_v15, 4 }
 0x135   : > { %v1700_v8 = vadd.f32 %v1630_v49, %v1413_v25  ;;  %v1201_v25 = vsel %vm5471_vm7, %v1199_v2, %v1200_v10  ;;  %v1244_v23 = vunpack.c.l.b16 %v1198_v42  ;;  %v4621_v49 = vld [vmem:[%s5287_s4 + $0xb8] sm:$0xf]  ;;  %v996_v10 = vadd.f32 %v995_v1, %v5574_v24 }
 0x136   : > { %v1245_v30 = vunpack.c.l.b16 %v1201_v25  ;;  %v2110_v59 = vshrl.u32 %v4620_v44, 16  ;;  %v2113_v0 = vshll.u32 %v4620_v44, 16  ;;  %v2123_v42 = vshrl.u32 %v4621_v49, 16  ;;  %v1067_v25 = vld [vmem:[%s5287_s4 + $0xa8] sm:$0xe] }
 0x137   : > { %v1346_v55 = vpop.f32.mrf.mxu2  ;;  %v5832_v35 = vadd.f32 %v2284_v29, %v1700_v8  ;;  %v2102_v29 = vor.u32 %v2101_v21, %v2097_v53  ;;  %v5110_v21 = vld [vmem:[%s5287_s4 + $0xac] sm:$0xf]  ;;  %v2098_v1 = vsel %vm5300_vm3, %v2093_v48, %v2097_v53 }
 0x138   : > { %v1414_v28 = vadd.f32 %v1346_v55, %v994_v19  ;;  %v1263_v8 = vpack.c.b16 %v1245_v30, %v1244_v23  ;;  %v2119_v55 = vshll.u32 %v4621_v49, 16  ;;  %v2112_v23 = vrot.slane %v2110_v59, 4 }
 0x139   : > { %4574 = vmatmul.msk.bf16.gmra.mxu3 %vm691_vm4, %v4944_v57  ;;  %v2103_v57 = vrot.slane %v2102_v29, 4  ;;  %v2115_v30 = vrot.slane %v2113_v0, 5  ;;  %v2125_v49 = vrot.slane %v2123_v42, 4  ;;  %v4930_v42 = vld [vmem:[%s5287_s4 + $0xa8] sm:$0xff] }
 0x13a   : > { %v2121_v29 = vrot.slane %v2119_v55, 5 }
 0x13b   : > { %v2287_v41 = vpop.f32.mrf.mxu0  ;;  %v2108_v3 = vsel %vm5300_vm3, %v2103_v57, %v2107_v43 }
 0x13c   : > { %v1633_v38 = vpop.f32.mrf.mxu3  ;;  %v998_v16 = vpop.f32.mrf.mxu1  ;;  %v2186_v48 = vunpack.c.l.b16 %v2108_v3  ;;  %v2126_v0 = vor.u32 %v2125_v49, %v2121_v29 }
 0x13d   : > { %v1701_v22 = vadd.f32 %v1633_v38, %v1414_v28  ;;  %v1204_v28 = vrot.slane %v5110_v21, 5  ;;  %v4945_v38 = vld [vmem:[%s5287_s4 + $0xa8] sm:$0xff]  ;;  %v999_v53 = vadd.f32 %v998_v16, %v5594_v62 }
 0x13e   : > { %4638 = vmatmul.msk.bf16.gmra.mxu0 %vm691_vm4, %v2203_v61  ;;  %v5111_v61 = vld [vmem:[%s5287_s4 + $0xb0] sm:$0x1] }
 0x13f   : > { %v1348_v2 = vpop.f32.mrf.mxu2  ;;  %4431 = vmatmul.msk.bf16.gmra.mxu1 %vm691_vm4, %v4929_v56  ;;  %v5846_v19 = vadd.f32 %v2287_v41, %v1701_v22  ;;  %v1207_v15 = vrot.slane %v5111_v61, 5  ;;  %v4448_v22 = vrot.slane %v1067_v25, 9  ;;  %v1206_v44 = vrot.slane %v1204_v28, 4 }
 0x140   : > { %v1415_v33 = vadd.f32 %v1348_v2, %v996_v10  ;;  %v2185_v10 = vunpack.c.l.b16 %v2098_v1  ;;  %v4622_v2 = vld [vmem:[%s5287_s4 + $0xbc] sm:$0x1] }
 0x141   : > { %v1208_v59 = vsel %vm5471_vm7, %v1206_v44, %v1207_v15  ;;  %v2129_v62 = vshll.u32 %v4622_v2, 16  ;;  %v4624_v44 = vld [vmem:[%s5287_s4 + $0xc4] sm:$0xf] }
 0x142   : > { %v2204_v16 = vpack.c.b16 %v2186_v48, %v2185_v10  ;;  %v1247_v3 = vunpack.c.l.b16 %v1208_v59  ;;  %v1068_v10 = vld [vmem:[%s5287_s4 + $0xb4] sm:$0xe]  ;;  %v5113_v48 = vld [vmem:[%s5287_s4 + $0xb8] sm:$0xf]  ;;  %v2147_v59 = vshrl.u32 %v4624_v44, 16 }
 0x143   : > { %v2289_v24 = vpop.f32.mrf.mxu0  ;;  %v1211_v2 = vrot.slane %v5113_v48, 5 }
 0x144   : > { %v1635_v41 = vpop.f32.mrf.mxu3  ;;  %4463 = vmatmul.msk.bf16.gmra.mxu2 %vm691_vm4, %v1263_v8  ;;  %v1000_v56 = vpop.f32.mrf.mxu1  ;;  %v2116_v8 = vor.u32 %v2115_v30, %v2112_v23  ;;  %v2131_v23 = vrot.slane %v2129_v62, 5  ;;  %v4623_v30 = vld [vmem:[%s5287_s4 + $0xc0] sm:$0xf]  ;;  %v5114_v62 = vld [vmem:[%s5287_s4 + $0x14] sm:$0x1] }
 0x145   : > { %v1702_v58 = vadd.f32 %v1635_v41, %v1415_v33  ;;  %v1205_v33 = vsel %vm5471_vm7, %v4448_v22, %v1204_v28  ;;  %v2127_v28 = vrot.slane %v2126_v0, 4  ;;  %v1001_v15 = vadd.f32 %v1000_v56, %v5611_v13 }
 0x146   : > { %v1246_v1 = vunpack.c.l.b16 %v1205_v33  ;;  %v2117_v41 = vrot.slane %v2116_v8, 4  ;;  %v2134_v56 = vshrl.u32 %v4623_v30, 16  ;;  %v2137_v8 = vshll.u32 %v4623_v30, 16  ;;  %v4946_v30 = vld [vmem:[%s5287_s4 + $0xb4] sm:$0xff] }
 0x147   : > { %v1351_v57 = vpop.f32.mrf.mxu2  ;;  %v5859_v43 = vadd.f32 %v2289_v24, %v1702_v58  ;;  %v5112_v58 = vld [vmem:[%s5287_s4 + $0x10] sm:$0xf]  ;;  %v2132_v13 = vsel %vm5300_vm3, %v2127_v28, %v2131_v23  ;;  %v2143_v33 = vshll.u32 %v4624_v44, 16  ;;  %v1213_v28 = vrot.slane %v1211_v2, 4  ;;  %v4642_v23 = vld [vmem:[%s5287_s4 + $0xc] sm:$0xe] }
 0x148   : > { %v1416_v21 = vadd.f32 %v1351_v57, %v999_v53  ;;  %v1264_v53 = vpack.c.b16 %v1247_v3, %v1246_v1  ;;  %v5115_v1 = vld [vmem:[%s5287_s4 + $0xbc] sm:$0x1]  ;;  %v4658_v44 = vrot.slane %v4642_v23, 9 }
 0x149   : > { %4575 = vmatmul.msk.bf16.gmra.mxu3 %vm691_vm4, %v4945_v38  ;;  %v2445_v38 = vrot.slane %v5112_v58, 5  ;;  %v2136_v58 = vrot.slane %v2134_v56, 4 }
 0x14b   : > { %v2292_v55 = vpop.f32.mrf.mxu0  ;;  %v2447_v0 = vrot.slane %v2445_v38, 4 }
 0x14c   : > { %v1638_v25 = vpop.f32.mrf.mxu3  ;;  %v1003_v24 = vpop.f32.mrf.mxu1 }
 0x14d   : > { %v1703_v61 = vadd.f32 %v1638_v25, %v1416_v21  ;;  %v2122_v21 = vsel %vm5300_vm3, %v2117_v41, %v2121_v29  ;;  %v4449_v25 = vrot.slane %v1068_v10, 9  ;;  %v1004_v48 = vadd.f32 %v1003_v24, %v5631_v45 }
 0x14e   : > { %4639 = vmatmul.msk.bf16.gmra.mxu0 %vm691_vm4, %v2204_v16  ;;  %v2448_v16 = vrot.slane %v5114_v62, 5  ;;  %v2187_v29 = vunpack.c.l.b16 %v2122_v21  ;;  %v2145_v10 = vrot.slane %v2143_v33, 5  ;;  %v2149_v62 = vrot.slane %v2147_v59, 4  ;;  %v4625_v21 = vld [vmem:[%s5287_s4 + $0xc8] sm:$0x1] }
 0x14f   : > { %v1353_v22 = vpop.f32.mrf.mxu2  ;;  %4432 = vmatmul.msk.bf16.gmra.mxu1 %vm691_vm4, %v4930_v42  ;;  %v5875_v57 = vadd.f32 %v2292_v55, %v1703_v61  ;;  %v1214_v55 = vrot.slane %v5115_v1, 5  ;;  %v2188_v61 = vunpack.c.l.b16 %v2132_v13  ;;  %v2446_v13 = vsel %vm5471_vm7, %v4658_v44, %v2445_v38  ;;  %v4802_v33 = vld [vmem:[%s5287_s4 + $0x18] sm:$0xf] }
 0x150   : > { %v1417_v49 = vadd.f32 %v1353_v22, %v1001_v15  ;;  %v2139_v22 = vrot.slane %v2137_v8, 5  ;;  %v2557_v45 = vunpack.c.l.b16 %v2446_v13  ;;  %v2153_v23 = vshll.u32 %v4625_v21, 16 }
 0x151   : > { %v1215_v8 = vsel %vm5471_vm7, %v1213_v28, %v1214_v55  ;;  %v2205_v59 = vpack.c.b16 %v2188_v61, %v2187_v29  ;;  %v3113_v55 = vshrl.u32 %v4802_v33, 16  ;;  %v3116_v28 = vshll.u32 %v4802_v33, 16 }
 0x153   : > { %v2294_v42 = vpop.f32.mrf.mxu0  ;;  %v3115_v21 = vrot.slane %v3113_v55, 4 }
 0x154   : > { %v1640_v3 = vpop.f32.mrf.mxu3  ;;  %4464 = vmatmul.msk.bf16.gmra.mxu2 %vm691_vm4, %v1264_v53  ;;  %v1005_v41 = vpop.f32.mrf.mxu1  ;;  %v1212_v53 = vsel %vm5471_vm7, %v4449_v25, %v1211_v2  ;;  %v5899_v2 = vld [vmem:[%s5287_s4 + $0x1c] sm:$0xf]  ;;  %v2150_v25 = vor.u32 %v2149_v62, %v2145_v10 }
 0x155   : > { %v1704_v15 = vadd.f32 %v1640_v3, %v1417_v49  ;;  %v2449_v49 = vsel %vm5471_vm7, %v2447_v0, %v2448_v16  ;;  %v2140_v3 = vor.u32 %v2139_v22, %v2136_v58  ;;  %v4931_v16 = vld [vmem:[%s5287_s4 + $0xb4] sm:$0xff]  ;;  %v3126_v29 = vshrl.u32 %v5899_v2, 16 }
 0x156   : > { %v2558_v24 = vunpack.c.l.b16 %v2449_v49  ;;  %v1006_v58 = vadd.f32 %v1005_v41, %v5651_v12 }
 0x157   : > { %v1356_v1 = vpop.f32.mrf.mxu2  ;;  %v5903_v44 = vadd.f32 %v2294_v42, %v1704_v15  ;;  %v2141_v42 = vrot.slane %v2140_v3, 4  ;;  %v2151_v15 = vrot.slane %v2150_v25, 4  ;;  %v3128_v33 = vrot.slane %v3126_v29, 4 }
 0x158   : > { %v1418_v56 = vadd.f32 %v1356_v1, %v1004_v48  ;;  %v5901_v38 = vpack.c.b16 %v2558_v24, %v2557_v45  ;;  %v1248_v48 = vunpack.c.l.b16 %v1212_v53  ;;  %v1249_v1 = vunpack.c.l.b16 %v1215_v8 }
 0x159   : > { %4576 = vmatmul.msk.bf16.gmra.mxu3 %vm691_vm4, %v4946_v30  ;;  %6648 = vst [vmem:[#allocation8_spill] sm:$0xff] %v5903_v44  ;;  %v3122_v30 = vshll.u32 %v5899_v2, 16  ;;  %v2155_v53 = vrot.slane %v2153_v23, 5  ;;  %v3118_v8 = vrot.slane %v3116_v28, 5  ;;  %v2146_v12 = vsel %vm5300_vm3, %v2141_v42, %v2145_v10  ;;  %v4866_v42 = vld [vmem:[%s5287_s4 + $0x18] sm:$0xe] }
 0x15a   : > { %v1265_v62 = vpack.c.b16 %v1249_v1, %v1248_v48  ;;  %v4947_v1 = vld [vmem:[%s5287_s4 + $0xc0] sm:$0xff]  ;;  %v2189_v10 = vunpack.c.l.b16 %v2146_v12 }
 0x15b   : > { %v2297_v0 = vpop.f32.mrf.mxu0  ;;  %v3124_v24 = vrot.slane %v3122_v30, 5  ;;  %v2156_v41 = vsel %vm5300_vm3, %v2151_v15, %v2155_v53  ;;  %v3119_v23 = vor.u32 %v3118_v8, %v3115_v21  ;;  %v4805_v15 = vld [vmem:[%s5287_s4 + $0x24] sm:$0xf]  ;;  %v5929_v53 = vld [vmem:[%s5287_s4 + $0x28] sm:$0xf] }
 0x15c   : > { %v1643_v13 = vpop.f32.mrf.mxu3  ;;  %v1008_v49 = vpop.f32.mrf.mxu1  ;;  %v2190_v28 = vunpack.c.l.b16 %v2156_v41 }
 0x15d   : > { %v1705_v61 = vadd.f32 %v1643_v13, %v1418_v56  ;;  %v5914_v56 = vld [vmem:[%s5287_s4 + $0x20] sm:$0x1]  ;;  %v1009_v55 = vadd.f32 %v1008_v49, %v5674_v47  ;;  %v3120_v29 = vrot.slane %v3119_v23, 4  ;;  %v5116_v49 = vld [vmem:[%s5287_s4 + $0x1c] sm:$0xf] }
 0x15e   : > { %4640 = vmatmul.msk.bf16.gmra.mxu0 %vm691_vm4, %v2205_v59  ;;  %v2452_v8 = vrot.slane %v5116_v49, 5  ;;  %v4643_v23 = vld [vmem:[%s5287_s4 + $0x18] sm:$0xe] }
 0x15f   : > { %v1358_v22 = vpop.f32.mrf.mxu2  ;;  %4433 = vmatmul.msk.bf16.gmra.mxu1 %vm691_vm4, %v4931_v16  ;;  %v5911_v44 = vadd.f32 %v2297_v0, %v1705_v61  ;;  %v3129_v16 = vor.u32 %v3128_v33, %v3124_v24  ;;  %v3132_v0 = vshll.u32 %v5914_v56, 16  ;;  %v3125_v12 = vsel %vm5300_vm3, %v3120_v29, %v3124_v24 }
 0x160   : > { %v1419_v45 = vadd.f32 %v1358_v22, %v1006_v58  ;;  %v2206_v22 = vpack.c.b16 %v2190_v28, %v2189_v10  ;;  %v3787_v24 = vrot.slane %v5914_v56, 5  ;;  %v5117_v10 = vld [vmem:[%s5287_s4 + $0x20] sm:$0x1]  ;;  %v4659_v29 = vrot.slane %v4643_v23, 9 }
 0x161   : > { %v3130_v61 = vrot.slane %v3129_v16, 4  ;;  %v3134_v58 = vrot.slane %v3132_v0, 5  ;;  %v3137_v16 = vshrl.u32 %v4805_v15, 16  ;;  %v3140_v0 = vshll.u32 %v4805_v15, 16 }
 0x162   : > { %v2455_v28 = vrot.slane %v5117_v10, 5  ;;  %v2453_v23 = vsel %vm5471_vm7, %v4659_v29, %v2452_v8  ;;  %v4808_v29 = vld [vmem:[%s5287_s4 + $0x30] sm:$0xf] }
 0x163   : > { %v2299_v59 = vpop.f32.mrf.mxu0  ;;  %v3135_v41 = vsel %vm5300_vm3, %v3130_v61, %v3134_v58  ;;  %v2454_v61 = vrot.slane %v2452_v8, 4  ;;  %v3142_v56 = vrot.slane %v3140_v0, 5 }
 0x164   : > { %v1645_v3 = vpop.f32.mrf.mxu3  ;;  %4465 = vmatmul.msk.bf16.gmra.mxu2 %vm691_vm4, %v1265_v62  ;;  %v1010_v25 = vpop.f32.mrf.mxu1  ;;  %v3784_v62 = vrot.slane %v5899_v2, 5  ;;  %v3499_v15 = vunpack.c.l.b16 %v3135_v41 }
 0x165   : > { %v1706_v48 = vadd.f32 %v1645_v3, %v1419_v45  ;;  %v4882_v3 = vrot.slane %v4866_v42, 9  ;;  %v4948_v42 = vld [vmem:[%s5287_s4 + $0x18] sm:$0xff]  ;;  %v2456_v41 = vsel %vm5471_vm7, %v2454_v61, %v2455_v28  ;;  %v5969_v61 = vld [vmem:[%s5287_s4 + $0x34] sm:$0xf] }
 0x167   : > { %v1361_v13 = vpop.f32.mrf.mxu2  ;;  %v5931_v21 = vadd.f32 %v2299_v59, %v1706_v48  ;;  %v3146_v59 = vshll.u32 %v5929_v53, 16  ;;  %v3150_v48 = vshrl.u32 %v5929_v53, 16 }
 0x168   : > { %v1420_v30 = vadd.f32 %v1361_v13, %v1009_v55  ;;  %v3786_v55 = vrot.slane %v3784_v62, 4 }
 0x169   : > { %4577 = vmatmul.msk.bf16.gmra.mxu3 %vm691_vm4, %v4947_v1  ;;  %v1011_v1 = vadd.f32 %v1010_v25, %v5694_v18  ;;  %v3139_v25 = vrot.slane %v3137_v16, 4  ;;  %v5952_v49 = vrot.slane %v3146_v59, 5 }
 0x16b   : > { %v2302_v47 = vpop.f32.mrf.mxu0  ;;  %v3143_v59 = vor.u32 %v3142_v56, %v3139_v25  ;;  %v4867_v25 = vld [vmem:[%s5287_s4 + $0x24] sm:$0xe] }
 0x16c   : > { %v1648_v45 = vpop.f32.mrf.mxu3  ;;  %v1013_v33 = vpop.f32.mrf.mxu1 }
 0x16d   : > { %v1707_v2 = vadd.f32 %v1648_v45, %v1420_v30  ;;  %v3498_v30 = vunpack.c.l.b16 %v3125_v12  ;;  %v3152_v45 = vrot.slane %v3150_v48, 4  ;;  %v1014_v8 = vadd.f32 %v1013_v33, %v5576_v31 }
 0x16e   : > { %4641 = vmatmul.msk.bf16.gmra.mxu0 %vm691_vm4, %v2206_v22  ;;  %v3785_v22 = vsel %vm5471_vm7, %v4882_v3, %v3784_v62  ;;  %v3791_v31 = vrot.slane %v5929_v53, 5 }
 0x16f   : > { %v1363_v13 = vpop.f32.mrf.mxu2  ;;  %4674 = vmatmul.msk.bf16.vlgmr.msra.gmra.mxu1 %vm691_vm4, %v5901_v38  ;;  %v5950_v18 = vadd.f32 %v2302_v47, %v1707_v2  ;;  %v3788_v38 = vsel %vm5471_vm7, %v3786_v55, %v3787_v24  ;;  %v3530_v47 = vpack.c.b16 %v3499_v15, %v3498_v30  ;;  %v3896_v3 = vunpack.c.l.b16 %v3785_v22 }
 0x170   : > { %v1421_v58 = vadd.f32 %v1363_v13, %v1011_v1  ;;  %v5961_v1 = vld [vmem:[%s5287_s4 + $0x2c] sm:$0x1]  ;;  %v3897_v0 = vunpack.c.l.b16 %v3788_v38  ;;  %v3153_v48 = vor.u32 %v3152_v45, %v5952_v49  ;;  %v2559_v55 = vunpack.c.l.b16 %v2453_v23 }
 0x171   : > { %v2560_v24 = vunpack.c.l.b16 %v2456_v41  ;;  %v3156_v10 = vshll.u32 %v5961_v1, 16  ;;  %v3161_v45 = vshrl.u32 %v4808_v29, 16  ;;  %v3164_v38 = vshll.u32 %v4808_v29, 16 }
 0x172   : > { %v3928_v30 = vpack.c.b16 %v3897_v0, %v3896_v3  ;;  %v3170_v23 = vshll.u32 %v5969_v61, 16  ;;  %v3174_v41 = vshrl.u32 %v5969_v61, 16  ;;  %v5118_v3 = vld [vmem:[%s5287_s4 + $0x28] sm:$0xf]  ;;  %v3794_v53 = vrot.slane %v5961_v1, 5 }
 0x173   : > { %v2304_v12 = vpop.f32.mrf.mxu0  ;;  %v2590_v15 = vpack.c.b16 %v2560_v24, %v2559_v55  ;;  %v3158_v22 = vrot.slane %v3156_v10, 5  ;;  %v2459_v0 = vrot.slane %v5118_v3, 5  ;;  %v4883_v55 = vrot.slane %v4867_v25, 9  ;;  %v4949_v3 = vld [vmem:[%s5287_s4 + $0x24] sm:$0xff] }
 0x174   : > { %v1650_v62 = vpop.f32.mrf.mxu3  ;;  %4786 = vmatmul.msk.bf16.vlgmr.msra.gmra.mxu2 %vm691_vm4, %v4948_v42  ;;  %v1015_v16 = vpop.f32.mrf.mxu1  ;;  %v3154_v42 = vrot.slane %v3153_v48, 4  ;;  %v3166_v25 = vrot.slane %v3164_v38, 5  ;;  %v5990_v1 = vrot.slane %v3170_v23, 5 }
 0x175   : > { %v1708_v2 = vadd.f32 %v1650_v62, %v1421_v58  ;;  %v3144_v58 = vrot.slane %v3143_v59, 4  ;;  %v5119_v59 = vld [vmem:[%s5287_s4 + $0x2c] sm:$0x1] }
 0x176   : > { %v2462_v48 = vrot.slane %v5119_v59, 5  ;;  %v3159_v10 = vsel %vm5300_vm3, %v3154_v42, %v3158_v22  ;;  %v3792_v22 = vsel %vm5471_vm7, %v4883_v55, %v3791_v31 }
 0x177   : > { %v1366_v28 = vpop.f32.mrf.mxu2  ;;  %v5974_v33 = vadd.f32 %v2304_v12, %v1708_v2  ;;  %v4644_v12 = vld [vmem:[%s5287_s4 + $0x24] sm:$0xe]  ;;  %v1016_v2 = vadd.f32 %v1015_v16, %v5597_v63  ;;  %v3149_v24 = vsel %vm5300_vm3, %v3144_v58, %v5952_v49  ;;  %v2461_v16 = vrot.slane %v2459_v0, 4 }
 0x178   : > { %v1422_v13 = vadd.f32 %v1366_v28, %v1014_v8  ;;  %v3793_v28 = vrot.slane %v3791_v31, 4  ;;  %v4660_v63 = vrot.slane %v4644_v12, 9  ;;  %v3500_v49 = vunpack.c.l.b16 %v3149_v24 }
 0x179   : > { %4850 = vmatmul.msk.bf16.vlgmr.msra.gmra.mxu3 %vm691_vm4, %v3530_v47  ;;  %6649 = vst [vmem:[#allocation9_spill] sm:$0xff] %v5974_v33  ;;  %v3501_v58 = vunpack.c.l.b16 %v3159_v10  ;;  %v5996_v33 = vld [vmem:[%s5287_s4 + $0x38] sm:$0x1] }
 0x17a   : > { %v3180_v31 = vshll.u32 %v5996_v33, 16 }
 0x17b   : > { %v2307_v56 = vpop.f32.mrf.mxu0  ;;  %v3531_v12 = vpack.c.b16 %v3501_v58, %v3500_v49  ;;  %v5120_v58 = vld [vmem:[%s5287_s4 + $0x34] sm:$0xf] }
 0x17c   : > { %v1653_v62 = vpop.f32.mrf.mxu3  ;;  %v1018_v47 = vpop.f32.mrf.mxu1 }
 0x17d   : > { %v1709_v8 = vadd.f32 %v1653_v62, %v1422_v13  ;;  %v3163_v13 = vrot.slane %v3161_v45, 4  ;;  %v3176_v62 = vrot.slane %v3174_v41, 4  ;;  %v2463_v41 = vsel %vm5471_vm7, %v2461_v16, %v2462_v48  ;;  %v6015_v16 = vld [vmem:[%s5287_s4 + $0x40] sm:$0xf] }
 0x17e   : > { %4898 = vmatmul.msk.bf16.vlgmr.msra.gmra.mxu0 %vm691_vm4, %v3928_v30 }
 0x17f   : > { %v1368_v29 = vpop.f32.mrf.mxu2  ;;  %4675 = vmatmul.msk.bf16.gmra.mxu1 %vm691_vm4, %v2590_v15  ;;  %v5993_v59 = vadd.f32 %v2307_v56, %v1709_v8  ;;  %v3795_v15 = vsel %vm5471_vm7, %v3793_v28, %v3794_v53  ;;  %v3167_v45 = vor.u32 %v3166_v25, %v3163_v13  ;;  %v2460_v56 = vsel %vm5471_vm7, %v4660_v63, %v2459_v0 }
 0x180   : > { %v1423_v30 = vadd.f32 %v1368_v29, %v1016_v2  ;;  %v3177_v8 = vor.u32 %v3176_v62, %v5990_v1  ;;  %v1019_v53 = vadd.f32 %v1018_v47, %v5614_v14  ;;  %v3898_v2 = vunpack.c.l.b16 %v3792_v22  ;;  %v4868_v62 = vld [vmem:[%s5287_s4 + $0x30] sm:$0xe] }
 0x181   : > { %v3899_v24 = vunpack.c.l.b16 %v3795_v15  ;;  %v2561_v28 = vunpack.c.l.b16 %v2460_v56  ;;  %v2562_v0 = vunpack.c.l.b16 %v2463_v41  ;;  %v3168_v13 = vrot.slane %v3167_v45, 4 }
 0x182   : > { %v3178_v48 = vrot.slane %v3177_v8, 4  ;;  %v3182_v25 = vrot.slane %v3180_v31, 5  ;;  %v3798_v63 = vrot.slane %v5969_v61, 5  ;;  %v2466_v22 = vrot.slane %v5120_v58, 5  ;;  %v4645_v61 = vld [vmem:[%s5287_s4 + $0x30] sm:$0xe] }
 0x183   : > { %v2309_v42 = vpop.f32.mrf.mxu0  ;;  %v2591_v49 = vpack.c.b16 %v2562_v0, %v2561_v28  ;;  %v4884_v41 = vrot.slane %v4868_v62, 9 }
 0x184   : > { %v1655_v38 = vpop.f32.mrf.mxu3  ;;  %4787 = vmatmul.msk.bf16.gmra.mxu2 %vm691_vm4, %v4949_v3  ;;  %v1020_v23 = vpop.f32.mrf.mxu1  ;;  %v4811_v3 = vld [vmem:[%s5287_s4 + $0x3c] sm:$0xf]  ;;  %v3183_v56 = vsel %vm5300_vm3, %v3178_v48, %v3182_v25  ;;  %v4950_v25 = vld [vmem:[%s5287_s4 + $0x30] sm:$0xff] }
 0x185   : > { %v1710_v55 = vadd.f32 %v1655_v38, %v1423_v30  ;;  %v3929_v30 = vpack.c.b16 %v3899_v24, %v3898_v2  ;;  %v3173_v38 = vsel %vm5300_vm3, %v3168_v13, %v5990_v1  ;;  %v3185_v8 = vshrl.u32 %v4811_v3, 16  ;;  %v5121_v24 = vld [vmem:[%s5287_s4 + $0x38] sm:$0x1] }
 0x186   : > { %v3800_v2 = vrot.slane %v3798_v63, 4  ;;  %v3801_v1 = vrot.slane %v5996_v33, 5  ;;  %v3502_v0 = vunpack.c.l.b16 %v3173_v38  ;;  %v2468_v13 = vrot.slane %v2466_v22, 4 }
 0x187   : > { %v1371_v10 = vpop.f32.mrf.mxu2  ;;  %v6017_v14 = vadd.f32 %v2309_v42, %v1710_v55  ;;  %v3188_v42 = vshll.u32 %v4811_v3, 16  ;;  %v3194_v55 = vshll.u32 %v6015_v16, 16  ;;  %v3503_v62 = vunpack.c.l.b16 %v3183_v56 }
 0x188   : > { %v1424_v29 = vadd.f32 %v1371_v10, %v1019_v53  ;;  %v1021_v53 = vadd.f32 %v1020_v23, %v5639_v50  ;;  %v2469_v10 = vrot.slane %v5121_v24, 5  ;;  %v3799_v3 = vsel %vm5471_vm7, %v4884_v41, %v3798_v63 }
 0x189   : > { %4851 = vmatmul.msk.bf16.gmra.mxu3 %vm691_vm4, %v3531_v12  ;;  %v3198_v12 = vshrl.u32 %v6015_v16, 16  ;;  %v3187_v50 = vrot.slane %v3185_v8, 4  ;;  %v3190_v23 = vrot.slane %v3188_v42, 5  ;;  %v6038_v33 = vrot.slane %v3194_v55, 5 }
 0x18a   : > { %v2470_v56 = vsel %vm5471_vm7, %v2468_v13, %v2469_v10  ;;  %v3900_v41 = vunpack.c.l.b16 %v3799_v3  ;;  %v4869_v3 = vld [vmem:[%s5287_s4 + $0x3c] sm:$0xe] }
 0x18b   : > { %v2312_v47 = vpop.f32.mrf.mxu0  ;;  %v3200_v58 = vrot.slane %v3198_v12, 4  ;;  %v3191_v55 = vor.u32 %v3190_v23, %v3187_v50 }
 0x18c   : > { %v1658_v15 = vpop.f32.mrf.mxu3  ;;  %v1023_v45 = vpop.f32.mrf.mxu1 }
 0x18d   : > { %v1711_v31 = vadd.f32 %v1658_v15, %v1424_v29  ;;  %v4661_v29 = vrot.slane %v4645_v61, 9  ;;  %v6047_v61 = vld [vmem:[%s5287_s4 + $0x44] sm:$0x1]  ;;  %v3201_v12 = vor.u32 %v3200_v58, %v6038_v33  ;;  %v3192_v13 = vrot.slane %v3191_v55, 4 }
 0x18e   : > { %4899 = vmatmul.msk.bf16.gmra.mxu0 %vm691_vm4, %v3929_v30 }
 0x18f   : > { %v1373_v28 = vpop.f32.mrf.mxu2  ;;  %4676 = vmatmul.msk.bf16.gmra.mxu1 %vm691_vm4, %v2591_v49  ;;  %v6036_v30 = vadd.f32 %v2312_v47, %v1711_v31  ;;  %v3802_v49 = vsel %vm5471_vm7, %v3800_v2, %v3801_v1  ;;  %v2467_v38 = vsel %vm5471_vm7, %v4661_v29, %v2466_v22  ;;  %v3532_v47 = vpack.c.b16 %v3503_v62, %v3502_v0  ;;  %v6055_v29 = vld [vmem:[%s5287_s4 + $0x4c] sm:$0xf] }
 0x190   : > { %v1425_v48 = vadd.f32 %v1373_v28, %v1021_v53  ;;  %v3901_v42 = vunpack.c.l.b16 %v3802_v49  ;;  %v1024_v22 = vadd.f32 %v1023_v45, %v5659_v17  ;;  %v2563_v53 = vunpack.c.l.b16 %v2467_v38  ;;  %v4814_v28 = vld [vmem:[%s5287_s4 + $0x48] sm:$0xf] }
 0x191   : > { %v2564_v2 = vunpack.c.l.b16 %v2470_v56  ;;  %v3204_v1 = vshll.u32 %v6047_v61, 16  ;;  %v3805_v17 = vrot.slane %v6015_v16, 5  ;;  %v3209_v23 = vshrl.u32 %v4814_v28, 16 }
 0x192   : > { %v3930_v0 = vpack.c.b16 %v3901_v42, %v3900_v41  ;;  %v3212_v58 = vshll.u32 %v4814_v28, 16  ;;  %v3218_v49 = vshll.u32 %v6055_v29, 16  ;;  %v3222_v38 = vshrl.u32 %v6055_v29, 16  ;;  %v5123_v42 = vld [vmem:[%s5287_s4 + $0x44] sm:$0x1] }
 0x193   : > { %v2314_v15 = vpop.f32.mrf.mxu0  ;;  %v3206_v62 = vrot.slane %v3204_v1, 5  ;;  %v2476_v55 = vrot.slane %v5123_v42, 5  ;;  %v3808_v16 = vrot.slane %v6047_v61, 5  ;;  %v3807_v1 = vrot.slane %v3805_v17, 4  ;;  %v6082_v42 = vld [vmem:[%s5287_s4 + $0x50] sm:$0x1] }
 0x194   : > { %v1660_v63 = vpop.f32.mrf.mxu3  ;;  %4788 = vmatmul.msk.bf16.gmra.mxu2 %vm691_vm4, %v4950_v25  ;;  %v1025_v8 = vpop.f32.mrf.mxu1  ;;  %v2592_v25 = vpack.c.b16 %v2564_v2, %v2563_v53  ;;  %v3197_v53 = vsel %vm5300_vm3, %v3192_v13, %v6038_v33  ;;  %v3214_v28 = vrot.slane %v3212_v58, 5  ;;  %v6076_v61 = vrot.slane %v3218_v49, 5 }
 0x195   : > { %v1712_v31 = vadd.f32 %v1660_v63, %v1425_v48  ;;  %v3202_v48 = vrot.slane %v3201_v12, 4  ;;  %v3504_v33 = vunpack.c.l.b16 %v3197_v53 }
 0x197   : > { %v1376_v24 = vpop.f32.mrf.mxu2  ;;  %v6060_v45 = vadd.f32 %v2314_v15, %v1712_v31  ;;  %v4646_v15 = vld [vmem:[%s5287_s4 + $0x3c] sm:$0xe]  ;;  %v1026_v31 = vadd.f32 %v1025_v8, %v5676_v51  ;;  %v3207_v2 = vsel %vm5300_vm3, %v3202_v48, %v3206_v62 }
 0x198   : > { %v1426_v10 = vadd.f32 %v1376_v24, %v1024_v22  ;;  %v4885_v22 = vrot.slane %v4869_v3, 9  ;;  %v3224_v3 = vrot.slane %v3222_v38, 4  ;;  %v4662_v51 = vrot.slane %v4646_v15, 9 }
 0x199   : > { %4852 = vmatmul.msk.bf16.gmra.mxu3 %vm691_vm4, %v3532_v47  ;;  %v5122_v47 = vld [vmem:[%s5287_s4 + $0x40] sm:$0xf]  ;;  %v3505_v13 = vunpack.c.l.b16 %v3207_v2 }
 0x19a   : > { %v2473_v41 = vrot.slane %v5122_v47, 5  ;;  %v3806_v62 = vsel %vm5471_vm7, %v4885_v22, %v3805_v17  ;;  %v3228_v17 = vshll.u32 %v6082_v42, 16 }
 0x19b   : > { %v2317_v50 = vpop.f32.mrf.mxu0  ;;  %v3533_v15 = vpack.c.b16 %v3505_v13, %v3504_v33  ;;  %v5124_v13 = vld [vmem:[%s5287_s4 + $0x4c] sm:$0xf] }
 0x19c   : > { %v1663_v56 = vpop.f32.mrf.mxu3  ;;  %v1028_v63 = vpop.f32.mrf.mxu1  ;;  %v2475_v8 = vrot.slane %v2473_v41, 4 }
 0x19d   : > { %v1713_v12 = vadd.f32 %v1663_v56, %v1426_v10  ;;  %v3211_v10 = vrot.slane %v3209_v23, 4  ;;  %v4951_v56 = vld [vmem:[%s5287_s4 + $0x3c] sm:$0xff] }
 0x19e   : > { %4900 = vmatmul.msk.bf16.gmra.mxu0 %vm691_vm4, %v3930_v0  ;;  %v2477_v38 = vsel %vm5471_vm7, %v2475_v8, %v2476_v55  ;;  %v6101_v8 = vld [vmem:[%s5287_s4 + $0x58] sm:$0xf] }
 0x19f   : > { %v1378_v24 = vpop.f32.mrf.mxu2  ;;  %4677 = vmatmul.msk.bf16.gmra.mxu1 %vm691_vm4, %v2592_v25  ;;  %v6079_v47 = vadd.f32 %v2317_v50, %v1713_v12  ;;  %v3809_v25 = vsel %vm5471_vm7, %v3807_v1, %v3808_v16  ;;  %v3215_v23 = vor.u32 %v3214_v28, %v3211_v10  ;;  %v2474_v50 = vsel %vm5471_vm7, %v4662_v51, %v2473_v41 }
 0x1a0   : > { %v1427_v0 = vadd.f32 %v1378_v24, %v1026_v31  ;;  %v3225_v12 = vor.u32 %v3224_v3, %v6076_v61  ;;  %v1029_v16 = vadd.f32 %v1028_v63, %v5697_v34  ;;  %v3902_v31 = vunpack.c.l.b16 %v3806_v62  ;;  %v4870_v3 = vld [vmem:[%s5287_s4 + $0x48] sm:$0xe] }
 0x1a1   : > { %v3903_v53 = vunpack.c.l.b16 %v3809_v25  ;;  %v2565_v1 = vunpack.c.l.b16 %v2474_v50  ;;  %v2566_v41 = vunpack.c.l.b16 %v2477_v38  ;;  %v3216_v10 = vrot.slane %v3215_v23, 4 }
 0x1a2   : > { %v3226_v55 = vrot.slane %v3225_v12, 4  ;;  %v3230_v28 = vrot.slane %v3228_v17, 5  ;;  %v3812_v51 = vrot.slane %v6055_v29, 5  ;;  %v2480_v62 = vrot.slane %v5124_v13, 5  ;;  %v4647_v29 = vld [vmem:[%s5287_s4 + $0x48] sm:$0xe] }
 0x1a3   : > { %v2319_v48 = vpop.f32.mrf.mxu0  ;;  %v2593_v33 = vpack.c.b16 %v2566_v41, %v2565_v1  ;;  %v4886_v38 = vrot.slane %v4870_v3, 9 }
 0x1a4   : > { %v1665_v58 = vpop.f32.mrf.mxu3  ;;  %4789 = vmatmul.msk.bf16.gmra.mxu2 %vm691_vm4, %v4951_v56  ;;  %v1030_v49 = vpop.f32.mrf.mxu1  ;;  %v4817_v56 = vld [vmem:[%s5287_s4 + $0x54] sm:$0xf]  ;;  %v3231_v50 = vsel %vm5300_vm3, %v3226_v55, %v3230_v28  ;;  %v4952_v28 = vld [vmem:[%s5287_s4 + $0x48] sm:$0xff] }
 0x1a5   : > { %v1714_v22 = vadd.f32 %v1665_v58, %v1427_v0  ;;  %v3931_v0 = vpack.c.b16 %v3903_v53, %v3902_v31  ;;  %v3221_v58 = vsel %vm5300_vm3, %v3216_v10, %v6076_v61  ;;  %v3233_v12 = vshrl.u32 %v4817_v56, 16  ;;  %v5125_v53 = vld [vmem:[%s5287_s4 + $0x50] sm:$0x1] }
 0x1a6   : > { %v3814_v31 = vrot.slane %v3812_v51, 4  ;;  %v3815_v61 = vrot.slane %v6082_v42, 5  ;;  %v3506_v41 = vunpack.c.l.b16 %v3221_v58  ;;  %v2482_v10 = vrot.slane %v2480_v62, 4 }
 0x1a7   : > { %v1381_v2 = vpop.f32.mrf.mxu2  ;;  %v6103_v34 = vadd.f32 %v2319_v48, %v1714_v22  ;;  %v3236_v48 = vshll.u32 %v4817_v56, 16  ;;  %v3242_v22 = vshll.u32 %v6101_v8, 16  ;;  %v3507_v3 = vunpack.c.l.b16 %v3231_v50 }
 0x1a8   : > { %v1428_v24 = vadd.f32 %v1381_v2, %v1029_v16  ;;  %v1031_v16 = vadd.f32 %v1030_v49, %v5712_v4  ;;  %v2483_v2 = vrot.slane %v5125_v53, 5  ;;  %v3813_v56 = vsel %vm5471_vm7, %v4886_v38, %v3812_v51 }
 0x1a9   : > { %4853 = vmatmul.msk.bf16.gmra.mxu3 %vm691_vm4, %v3533_v15  ;;  %v3246_v15 = vshrl.u32 %v6101_v8, 16  ;;  %v3235_v4 = vrot.slane %v3233_v12, 4  ;;  %v3238_v49 = vrot.slane %v3236_v48, 5  ;;  %v6124_v42 = vrot.slane %v3242_v22, 5 }
 0x1aa   : > { %v2484_v50 = vsel %vm5471_vm7, %v2482_v10, %v2483_v2  ;;  %v3904_v38 = vunpack.c.l.b16 %v3813_v56  ;;  %v4871_v56 = vld [vmem:[%s5287_s4 + $0x54] sm:$0xe] }
 0x1ab   : > { %v2322_v63 = vpop.f32.mrf.mxu0  ;;  %v3248_v13 = vrot.slane %v3246_v15, 4  ;;  %v3239_v22 = vor.u32 %v3238_v49, %v3235_v4 }
 0x1ac   : > { %v1668_v25 = vpop.f32.mrf.mxu3  ;;  %v1033_v23 = vpop.f32.mrf.mxu1 }
 0x1ad   : > { %v1715_v17 = vadd.f32 %v1668_v25, %v1428_v24  ;;  %v4663_v24 = vrot.slane %v4647_v29, 9  ;;  %v6133_v29 = vld [vmem:[%s5287_s4 + $0x5c] sm:$0x1]  ;;  %v3249_v15 = vor.u32 %v3248_v13, %v6124_v42  ;;  %v3240_v10 = vrot.slane %v3239_v22, 4 }
 0x1ae   : > { %4901 = vmatmul.msk.bf16.gmra.mxu0 %vm691_vm4, %v3931_v0 }
 0x1af   : > { %v1383_v1 = vpop.f32.mrf.mxu2  ;;  %4678 = vmatmul.msk.bf16.gmra.mxu1 %vm691_vm4, %v2593_v33  ;;  %v6122_v0 = vadd.f32 %v2322_v63, %v1715_v17  ;;  %v3816_v33 = vsel %vm5471_vm7, %v3814_v31, %v3815_v61  ;;  %v2481_v58 = vsel %vm5471_vm7, %v4663_v24, %v2480_v62  ;;  %v3534_v63 = vpack.c.b16 %v3507_v3, %v3506_v41  ;;  %v6141_v24 = vld [vmem:[%s5287_s4 + $0x64] sm:$0xf] }
 0x1b0   : > { %v1429_v55 = vadd.f32 %v1383_v1, %v1031_v16  ;;  %v3905_v48 = vunpack.c.l.b16 %v3816_v33  ;;  %v1034_v62 = vadd.f32 %v1033_v23, %v5588_v39  ;;  %v2567_v16 = vunpack.c.l.b16 %v2481_v58  ;;  %v4820_v1 = vld [vmem:[%s5287_s4 + $0x60] sm:$0xf] }
 0x1b1   : > { %v2568_v31 = vunpack.c.l.b16 %v2484_v50  ;;  %v3252_v61 = vshll.u32 %v6133_v29, 16  ;;  %v3819_v39 = vrot.slane %v6101_v8, 5  ;;  %v3257_v49 = vshrl.u32 %v4820_v1, 16 }
 0x1b2   : > { %v3932_v41 = vpack.c.b16 %v3905_v48, %v3904_v38  ;;  %v3260_v13 = vshll.u32 %v4820_v1, 16  ;;  %v3266_v33 = vshll.u32 %v6141_v24, 16  ;;  %v3270_v58 = vshrl.u32 %v6141_v24, 16  ;;  %v5127_v48 = vld [vmem:[%s5287_s4 + $0x5c] sm:$0x1] }
 0x1b3   : > { %v2324_v25 = vpop.f32.mrf.mxu0  ;;  %v3254_v3 = vrot.slane %v3252_v61, 5  ;;  %v2490_v22 = vrot.slane %v5127_v48, 5  ;;  %v3822_v8 = vrot.slane %v6133_v29, 5  ;;  %v3821_v61 = vrot.slane %v3819_v39, 4  ;;  %v6168_v48 = vld [vmem:[%s5287_s4 + $0x68] sm:$0x1] }
 0x1b4   : > { %v1670_v51 = vpop.f32.mrf.mxu3  ;;  %4790 = vmatmul.msk.bf16.gmra.mxu2 %vm691_vm4, %v4952_v28  ;;  %v1035_v12 = vpop.f32.mrf.mxu1  ;;  %v2594_v28 = vpack.c.b16 %v2568_v31, %v2567_v16  ;;  %v3245_v16 = vsel %vm5300_vm3, %v3240_v10, %v6124_v42  ;;  %v3262_v1 = vrot.slane %v3260_v13, 5  ;;  %v6162_v29 = vrot.slane %v3266_v33, 5 }
 0x1b5   : > { %v1716_v17 = vadd.f32 %v1670_v51, %v1429_v55  ;;  %v3250_v55 = vrot.slane %v3249_v15, 4  ;;  %v3508_v42 = vunpack.c.l.b16 %v3245_v16 }
 0x1b7   : > { %v1386_v53 = vpop.f32.mrf.mxu2  ;;  %v6146_v23 = vadd.f32 %v2324_v25, %v1716_v17  ;;  %v4648_v25 = vld [vmem:[%s5287_s4 + $0x54] sm:$0xe]  ;;  %v1036_v17 = vadd.f32 %v1035_v12, %v5607_v5  ;;  %v3255_v31 = vsel %vm5300_vm3, %v3250_v55, %v3254_v3 }
 0x1b8   : > { %v1430_v2 = vadd.f32 %v1386_v53, %v1034_v62  ;;  %v4887_v62 = vrot.slane %v4871_v56, 9  ;;  %v3272_v56 = vrot.slane %v3270_v58, 4  ;;  %v4664_v5 = vrot.slane %v4648_v25, 9 }
 0x1b9   : > { %4854 = vmatmul.msk.bf16.gmra.mxu3 %vm691_vm4, %v3534_v63  ;;  %v5126_v63 = vld [vmem:[%s5287_s4 + $0x58] sm:$0xf]  ;;  %v3509_v10 = vunpack.c.l.b16 %v3255_v31 }
 0x1ba   : > { %v2487_v38 = vrot.slane %v5126_v63, 5  ;;  %v3820_v3 = vsel %vm5471_vm7, %v4887_v62, %v3819_v39  ;;  %v3276_v39 = vshll.u32 %v6168_v48, 16 }
 0x1bb   : > { %v2327_v4 = vpop.f32.mrf.mxu0  ;;  %v3535_v25 = vpack.c.b16 %v3509_v10, %v3508_v42 }
 0x1bc   : > { %v1673_v50 = vpop.f32.mrf.mxu3  ;;  %v1038_v51 = vpop.f32.mrf.mxu1  ;;  %v2489_v12 = vrot.slane %v2487_v38, 4 }
 0x1bd   : > { %v1717_v15 = vadd.f32 %v1673_v50, %v1430_v2  ;;  %v3259_v2 = vrot.slane %v3257_v49, 4  ;;  %v4953_v50 = vld [vmem:[%s5287_s4 + $0x54] sm:$0xff] }
 0x1be   : > { %4902 = vmatmul.msk.bf16.gmra.mxu0 %vm691_vm4, %v3932_v41  ;;  %v2491_v58 = vsel %vm5471_vm7, %v2489_v12, %v2490_v22  ;;  %v3278_v22 = vrot.slane %v3276_v39, 5  ;;  %v6187_v12 = vld [vmem:[%s5287_s4 + $0x70] sm:$0xf]  ;;  %v4649_v39 = vld [vmem:[%s5287_s4 + $0x60] sm:$0xe] }
 0x1bf   : > { %v1388_v53 = vpop.f32.mrf.mxu2  ;;  %4679 = vmatmul.msk.bf16.gmra.mxu1 %vm691_vm4, %v2594_v28  ;;  %v6165_v63 = vadd.f32 %v2327_v4, %v1717_v15  ;;  %v3823_v28 = vsel %vm5471_vm7, %v3821_v61, %v3822_v8  ;;  %v3263_v49 = vor.u32 %v3262_v1, %v3259_v2  ;;  %v2488_v4 = vsel %vm5471_vm7, %v4664_v5, %v2487_v38 }
 0x1c0   : > { %v1431_v41 = vadd.f32 %v1388_v53, %v1036_v17  ;;  %v3273_v15 = vor.u32 %v3272_v56, %v6162_v29  ;;  %v1039_v8 = vadd.f32 %v1038_v51, %v5628_v32  ;;  %v3906_v17 = vunpack.c.l.b16 %v3820_v3  ;;  %v4823_v56 = vld [vmem:[%s5287_s4 + $0x6c] sm:$0xf] }
 0x1c1   : > { %v3907_v16 = vunpack.c.l.b16 %v3823_v28  ;;  %v2569_v61 = vunpack.c.l.b16 %v2488_v4  ;;  %v2570_v53 = vunpack.c.l.b16 %v2491_v58  ;;  %v3264_v2 = vrot.slane %v3263_v49, 4  ;;  %v5128_v4 = vld [vmem:[%s5287_s4 + $0x64] sm:$0xf] }
 0x1c2   : > { %v3274_v1 = vrot.slane %v3273_v15, 4  ;;  %v3826_v5 = vrot.slane %v6141_v24, 5  ;;  %v2494_v58 = vrot.slane %v5128_v4, 5  ;;  %v3281_v24 = vshrl.u32 %v4823_v56, 16 }
 0x1c3   : > { %v2329_v55 = vpop.f32.mrf.mxu0  ;;  %v2595_v42 = vpack.c.b16 %v2570_v53, %v2569_v61  ;;  %v3269_v49 = vsel %vm5300_vm3, %v3264_v2, %v6162_v29  ;;  %v3829_v29 = vrot.slane %v6168_v48, 5 }
 0x1c4   : > { %v1675_v13 = vpop.f32.mrf.mxu3  ;;  %4791 = vmatmul.msk.bf16.gmra.mxu2 %vm691_vm4, %v4953_v50  ;;  %v1040_v33 = vpop.f32.mrf.mxu1  ;;  %v4872_v50 = vld [vmem:[%s5287_s4 + $0x60] sm:$0xe]  ;;  %v3510_v53 = vunpack.c.l.b16 %v3269_v49  ;;  %v6215_v49 = vld [vmem:[%s5287_s4 + $0x74] sm:$0x1] }
 0x1c5   : > { %v1718_v62 = vadd.f32 %v1675_v13, %v1431_v41  ;;  %v3933_v41 = vpack.c.b16 %v3907_v16, %v3906_v17  ;;  %v4888_v10 = vrot.slane %v4872_v50, 9  ;;  %v3279_v13 = vsel %vm5300_vm3, %v3274_v1, %v3278_v22  ;;  %v5129_v16 = vld [vmem:[%s5287_s4 + $0x68] sm:$0x1]  ;;  %v4954_v22 = vld [vmem:[%s5287_s4 + $0x60] sm:$0xff] }
 0x1c6   : > { %v3828_v17 = vrot.slane %v3826_v5, 4  ;;  %v4665_v50 = vrot.slane %v4649_v39, 9 }
 0x1c7   : > { %v1391_v31 = vpop.f32.mrf.mxu2  ;;  %v6189_v32 = vadd.f32 %v2329_v55, %v1718_v62  ;;  %v3284_v55 = vshll.u32 %v4823_v56, 16  ;;  %v3290_v62 = vshll.u32 %v6187_v12, 16  ;;  %v3827_v2 = vsel %vm5471_vm7, %v4888_v10, %v3826_v5 }
 0x1c8   : > { %v1432_v38 = vadd.f32 %v1391_v31, %v1039_v8  ;;  %v1041_v8 = vadd.f32 %v1040_v33, %v5647_v60  ;;  %v2497_v31 = vrot.slane %v5129_v16, 5  ;;  %v2496_v56 = vrot.slane %v2494_v58, 4 }
 0x1c9   : > { %4855 = vmatmul.msk.bf16.gmra.mxu3 %vm691_vm4, %v3535_v25  ;;  %v3294_v25 = vshrl.u32 %v6187_v12, 16  ;;  %v3283_v60 = vrot.slane %v3281_v24, 4  ;;  %v3286_v33 = vrot.slane %v3284_v55, 5  ;;  %v6210_v48 = vrot.slane %v3290_v62, 5 }
 0x1ca   : > { %v3830_v4 = vsel %vm5471_vm7, %v3828_v17, %v3829_v29  ;;  %v3908_v10 = vunpack.c.l.b16 %v3827_v2  ;;  %v2495_v24 = vsel %vm5471_vm7, %v4665_v50, %v2494_v58  ;;  %v3300_v17 = vshll.u32 %v6215_v49, 16  ;;  %v6227_v2 = vld [vmem:[%s5287_s4 + $0x7c] sm:$0xf]  ;;  %v4873_v50 = vld [vmem:[%s5287_s4 + $0x6c] sm:$0xe] }
 0x1cb   : > { %v2332_v51 = vpop.f32.mrf.mxu0  ;;  %v3909_v55 = vunpack.c.l.b16 %v3830_v4  ;;  %v3287_v62 = vor.u32 %v3286_v33, %v3283_v60  ;;  %v2571_v16 = vunpack.c.l.b16 %v2495_v24  ;;  %v3314_v4 = vshll.u32 %v6227_v2, 16 }
 0x1cc   : > { %v1678_v3 = vpop.f32.mrf.mxu3  ;;  %v1043_v28 = vpop.f32.mrf.mxu1 }
 0x1cd   : > { %v1719_v15 = vadd.f32 %v1678_v3, %v1432_v38  ;;  %v3511_v38 = vunpack.c.l.b16 %v3279_v13  ;;  %v3296_v3 = vrot.slane %v3294_v25, 4  ;;  %v3934_v58 = vpack.c.b16 %v3909_v55, %v3908_v10  ;;  %v4650_v10 = vld [vmem:[%s5287_s4 + $0x6c] sm:$0xe] }
 0x1ce   : > { %4903 = vmatmul.msk.bf16.gmra.mxu0 %vm691_vm4, %v3933_v41 }
 0x1cf   : > { %v1393_v61 = vpop.f32.mrf.mxu2  ;;  %4680 = vmatmul.msk.bf16.gmra.mxu1 %vm691_vm4, %v2595_v42  ;;  %v6208_v41 = vadd.f32 %v2332_v51, %v1719_v15  ;;  %v3536_v5 = vpack.c.b16 %v3511_v38, %v3510_v53  ;;  %v2498_v15 = vsel %vm5471_vm7, %v2496_v56, %v2497_v31  ;;  %v3297_v25 = vor.u32 %v3296_v3, %v6210_v48  ;;  %v4826_v53 = vld [vmem:[%s5287_s4 + $0x78] sm:$0xf] }
 0x1d0   : > { %v1433_v1 = vadd.f32 %v1393_v61, %v1041_v8  ;;  %v1044_v8 = vadd.f32 %v1043_v28, %v5666_v36  ;;  %v2572_v61 = vunpack.c.l.b16 %v2498_v15  ;;  %v3288_v31 = vrot.slane %v3287_v62, 4  ;;  %v5130_v15 = vld [vmem:[%s5287_s4 + $0x70] sm:$0xf] }
 0x1d1   : > { %v3833_v36 = vrot.slane %v6187_v12, 5  ;;  %v3305_v28 = vshrl.u32 %v4826_v53, 16  ;;  %v3308_v3 = vshll.u32 %v4826_v53, 16  ;;  %v2501_v55 = vrot.slane %v5130_v15, 5 }
 0x1d2   : > { %v2596_v33 = vpack.c.b16 %v2572_v61, %v2571_v16  ;;  %v3293_v12 = vsel %vm5300_vm3, %v3288_v31, %v6210_v48  ;;  %v4666_v61 = vrot.slane %v4650_v10, 9  ;;  %v3316_v48 = vrot.slane %v3314_v4, 5 }
 0x1d3   : > { %v2334_v42 = vpop.f32.mrf.mxu0  ;;  %v3310_v53 = vrot.slane %v3308_v3, 5 }
 0x1d4   : > { %v1680_v13 = vpop.f32.mrf.mxu3  ;;  %4792 = vmatmul.msk.bf16.gmra.mxu2 %vm691_vm4, %v4954_v22  ;;  %v1045_v51 = vpop.f32.mrf.mxu1  ;;  %v3302_v22 = vrot.slane %v3300_v17, 5  ;;  %v3835_v17 = vrot.slane %v3833_v36, 4 }
 0x1d5   : > { %v1720_v39 = vadd.f32 %v1680_v13, %v1433_v1  ;;  %v3298_v1 = vrot.slane %v3297_v25, 4  ;;  %v3318_v13 = vshrl.u32 %v6227_v2, 16  ;;  %v1046_v25 = vadd.f32 %v1045_v51, %v5689_v6 }
 0x1d6   : > { %v3512_v6 = vunpack.c.l.b16 %v3293_v12 }
 0x1d7   : > { %v1396_v29 = vpop.f32.mrf.mxu2  ;;  %v6232_v56 = vadd.f32 %v2334_v42, %v1720_v39  ;;  %v4889_v42 = vrot.slane %v4873_v50, 9  ;;  %v3836_v39 = vrot.slane %v6215_v49, 5  ;;  %v4955_v50 = vld [vmem:[%s5287_s4 + $0x6c] sm:$0xff]  ;;  %v2503_v49 = vrot.slane %v2501_v55, 4 }
 0x1d8   : > { %v1434_v38 = vadd.f32 %v1396_v29, %v1044_v8  ;;  %v3303_v8 = vsel %vm5300_vm3, %v3298_v1, %v3302_v22  ;;  %v3307_v29 = vrot.slane %v3305_v28, 4  ;;  %v6252_v1 = vld [vmem:[%s5287_s4 + $0x80] sm:$0x1] }
 0x1d9   : > { %4856 = vmatmul.msk.bf16.gmra.mxu3 %vm691_vm4, %v3536_v5  ;;  %v3513_v51 = vunpack.c.l.b16 %v3303_v8  ;;  %v3834_v28 = vsel %vm5471_vm7, %v4889_v42, %v3833_v36  ;;  %v3324_v12 = vshll.u32 %v6252_v1, 16 }
 0x1da   : > { %v3311_v3 = vor.u32 %v3310_v53, %v3307_v29 }
 0x1db   : > { %v2337_v60 = vpop.f32.mrf.mxu0  ;;  %v3537_v42 = vpack.c.b16 %v3513_v51, %v3512_v6  ;;  %v3840_v6 = vrot.slane %v6227_v2, 5 }
 0x1dc   : > { %v1683_v5 = vpop.f32.mrf.mxu3  ;;  %v1048_v24 = vpop.f32.mrf.mxu1 }
 0x1dd   : > { %v1721_v62 = vadd.f32 %v1683_v5, %v1434_v38  ;;  %v3320_v38 = vrot.slane %v3318_v13, 4  ;;  %v5131_v5 = vld [vmem:[%s5287_s4 + $0x74] sm:$0x1] }
 0x1de   : > { %4904 = vmatmul.msk.bf16.gmra.mxu0 %vm691_vm4, %v3934_v58  ;;  %v2504_v58 = vrot.slane %v5131_v5, 5 }
 0x1df   : > { %v1398_v16 = vpop.f32.mrf.mxu2  ;;  %4681 = vmatmul.msk.bf16.gmra.mxu1 %vm691_vm4, %v2596_v33  ;;  %v6249_v15 = vadd.f32 %v2337_v60, %v1721_v62  ;;  %v3837_v33 = vsel %vm5471_vm7, %v3835_v17, %v3836_v39  ;;  %v2502_v60 = vsel %vm5471_vm7, %v4666_v61, %v2501_v55  ;;  %v3321_v62 = vor.u32 %v3320_v38, %v3316_v48  ;;  %v4829_v38 = vld [vmem:[%s5287_s4 + $0x84] sm:$0xf] }
 0x1e0   : > { %v1435_v31 = vadd.f32 %v1398_v16, %v1046_v25  ;;  %v2505_v10 = vsel %vm5471_vm7, %v2503_v49, %v2504_v58  ;;  %v1049_v39 = vadd.f32 %v1048_v24, %v5708_v52  ;;  %v3910_v25 = vunpack.c.l.b16 %v3834_v28  ;;  %v4874_v58 = vld [vmem:[%s5287_s4 + $0x78] sm:$0xe] }
 0x1e1   : > { %v3911_v8 = vunpack.c.l.b16 %v3837_v33  ;;  %v2573_v29 = vunpack.c.l.b16 %v2502_v60  ;;  %v2574_v16 = vunpack.c.l.b16 %v2505_v10  ;;  %v3312_v55 = vrot.slane %v3311_v3, 4  ;;  %v5132_v60 = vld [vmem:[%s5287_s4 + $0x7c] sm:$0xf] }
 0x1e2   : > { %v3322_v61 = vrot.slane %v3321_v62, 4  ;;  %v2508_v10 = vrot.slane %v5132_v60, 5  ;;  %v3329_v62 = vshrl.u32 %v4829_v38, 16 }
 0x1e3   : > { %v2339_v22 = vpop.f32.mrf.mxu0  ;;  %v3935_v49 = vpack.c.b16 %v3911_v8, %v3910_v25  ;;  %v2597_v24 = vpack.c.b16 %v2574_v16, %v2573_v29  ;;  %v3317_v33 = vsel %vm5300_vm3, %v3312_v55, %v3316_v48  ;;  %v4890_v48 = vrot.slane %v4874_v58, 9  ;;  %v4956_v55 = vld [vmem:[%s5287_s4 + $0x78] sm:$0xff] }
 0x1e4   : > { %v1685_v4 = vpop.f32.mrf.mxu3  ;;  %4793 = vmatmul.msk.bf16.gmra.mxu2 %vm691_vm4, %v4955_v50  ;;  %v1050_v13 = vpop.f32.mrf.mxu1  ;;  %v3326_v50 = vrot.slane %v3324_v12, 5  ;;  %v3332_v12 = vshll.u32 %v4829_v38, 16  ;;  %v3514_v8 = vunpack.c.l.b16 %v3317_v33  ;;  %v3842_v29 = vrot.slane %v3840_v6, 4 }
 0x1e5   : > { %v1722_v36 = vadd.f32 %v1685_v4, %v1435_v31  ;;  %v6268_v31 = vld [vmem:[%s5287_s4 + $0x88] sm:$0xf]  ;;  %v4651_v4 = vld [vmem:[%s5287_s4 + $0x78] sm:$0xe] }
 0x1e6   : > { %v3327_v3 = vsel %vm5300_vm3, %v3322_v61, %v3326_v50  ;;  %v3342_v2 = vshrl.u32 %v6268_v31, 16  ;;  %v4667_v16 = vrot.slane %v4651_v4, 9  ;;  %v2510_v61 = vrot.slane %v2508_v10, 4  ;;  %v5133_v50 = vld [vmem:[%s5287_s4 + $0x80] sm:$0x1] }
 0x1e7   : > { %v1401_v17 = vpop.f32.mrf.mxu2  ;;  %v6270_v5 = vadd.f32 %v2339_v22, %v1722_v36  ;;  %v3338_v36 = vshll.u32 %v6268_v31, 16  ;;  %v2511_v38 = vrot.slane %v5133_v50, 5  ;;  %v4832_v50 = vld [vmem:[%s5287_s4 + $0x90] sm:$0xf] }
 0x1e8   : > { %v1436_v53 = vadd.f32 %v1401_v17, %v1049_v39  ;;  %v3843_v39 = vrot.slane %v6252_v1, 5  ;;  %v3515_v17 = vunpack.c.l.b16 %v3327_v3  ;;  %v3344_v58 = vrot.slane %v3342_v2, 4  ;;  %v6291_v1 = vld [vmem:[%s5287_s4 + $0x8c] sm:$0x1] }
 0x1e9   : > { %4857 = vmatmul.msk.bf16.gmra.mxu3 %vm691_vm4, %v3537_v42  ;;  %v1051_v42 = vadd.f32 %v1050_v13, %v5725_v27  ;;  %v3334_v27 = vrot.slane %v3332_v12, 5  ;;  %v3340_v13 = vrot.slane %v3338_v36, 5 }
 0x1ea   : > { %v3844_v33 = vsel %vm5471_vm7, %v3842_v29, %v3843_v39  ;;  %v3538_v4 = vpack.c.b16 %v3515_v17, %v3514_v8 }
 0x1eb   : > { %v2342_v52 = vpop.f32.mrf.mxu0  ;;  %v3345_v36 = vor.u32 %v3344_v58, %v3340_v13 }
 0x1ec   : > { %v1688_v51 = vpop.f32.mrf.mxu3  ;;  %v2665_v28 = vpop.f32.mrf.mxu1 }
 0x1ed   : > { %v1723_v22 = vadd.f32 %v1688_v51, %v1436_v53  ;;  %v2745_v17 = vadd.f32 %v2665_v28, %v5742_v40  ;;  %v3346_v29 = vrot.slane %v3345_v36, 4  ;;  %v6312_v40 = vld [vmem:[%s5287_s4 + $0x94] sm:$0xf] }
 0x1ee   : > { %4905 = vmatmul.msk.bf16.gmra.mxu0 %vm691_vm4, %v3935_v49  ;;  %v3331_v49 = vrot.slane %v3329_v62, 4  ;;  %v2512_v62 = vsel %vm5471_vm7, %v2510_v61, %v2511_v38  ;;  %v3847_v61 = vrot.slane %v6268_v31, 5 }
 0x1ef   : > { %v1403_v25 = vpop.f32.mrf.mxu2  ;;  %4682 = vmatmul.msk.bf16.gmra.mxu1 %vm691_vm4, %v2597_v24  ;;  %v6288_v51 = vadd.f32 %v2342_v52, %v1723_v22  ;;  %v3841_v24 = vsel %vm5471_vm7, %v4890_v48, %v3840_v6  ;;  %v2509_v52 = vsel %vm5471_vm7, %v4667_v16, %v2508_v10  ;;  %v3348_v6 = vshll.u32 %v6291_v1, 16 }
 0x1f0   : > { %v1437_v53 = vadd.f32 %v1403_v25, %v1051_v42  ;;  %v3335_v12 = vor.u32 %v3334_v27, %v3331_v49  ;;  %v3912_v2 = vunpack.c.l.b16 %v3841_v24  ;;  %v3913_v48 = vunpack.c.l.b16 %v3844_v33  ;;  %v5134_v24 = vld [vmem:[%s5287_s4 + $0x88] sm:$0xf] }
 0x1f1   : > { %v2575_v25 = vunpack.c.l.b16 %v2509_v52  ;;  %v2576_v8 = vunpack.c.l.b16 %v2512_v62  ;;  %v3350_v16 = vrot.slane %v3348_v6, 5  ;;  %v2515_v33 = vrot.slane %v5134_v24, 5  ;;  %v4652_v62 = vld [vmem:[%s5287_s4 + $0x84] sm:$0xe] }
 0x1f2   : > { %v3336_v10 = vrot.slane %v3335_v12, 4  ;;  %v3850_v52 = vrot.slane %v6291_v1, 5  ;;  %v3356_v12 = vshll.u32 %v4832_v50, 16  ;;  %v3849_v6 = vrot.slane %v3847_v61, 4 }
 0x1f3   : > { %v2344_v60 = vpop.f32.mrf.mxu0  ;;  %v2598_v58 = vpack.c.b16 %v2576_v8, %v2575_v25  ;;  %v3362_v1 = vshll.u32 %v6312_v40, 16  ;;  %v2517_v25 = vrot.slane %v2515_v33, 4  ;;  %v5135_v8 = vld [vmem:[%s5287_s4 + $0x8c] sm:$0x1] }
 0x1f4   : > { %v1690_v3 = vpop.f32.mrf.mxu3  ;;  %4794 = vmatmul.msk.bf16.gmra.mxu2 %vm691_vm4, %v4956_v55  ;;  %v2667_v42 = vpop.f32.mrf.mxu1  ;;  %v3936_v55 = vpack.c.b16 %v3913_v48, %v3912_v2  ;;  %v3341_v31 = vsel %vm5300_vm3, %v3336_v10, %v3340_v13  ;;  %v3366_v2 = vshrl.u32 %v6312_v40, 16  ;;  %v4668_v13 = vrot.slane %v4652_v62, 9  ;;  %v4957_v10 = vld [vmem:[%s5287_s4 + $0x84] sm:$0xff] }
 0x1f5   : > { %v1724_v22 = vadd.f32 %v1690_v3, %v1437_v53  ;;  %v4875_v53 = vld [vmem:[%s5287_s4 + $0x84] sm:$0xe]  ;;  %v2746_v36 = vadd.f32 %v2667_v42, %v5755_v37 }
 0x1f7   : > { %v2952_v39 = vpop.f32.mrf.mxu2  ;;  %v6308_v38 = vadd.f32 %v2344_v60, %v1724_v22  ;;  %v3351_v60 = vsel %vm5300_vm3, %v3346_v29, %v3350_v16  ;;  %v3353_v22 = vshrl.u32 %v4832_v50, 16  ;;  %v3516_v29 = vunpack.c.l.b16 %v3341_v31  ;;  %v6347_v31 = vld [vmem:[%s5287_s4 + $0x98] sm:$0x1] }
 0x1f8   : > { %v3032_v27 = vadd.f32 %v2952_v39, %v2745_v17  ;;  %v2518_v17 = vrot.slane %v5135_v8, 5  ;;  %v3517_v16 = vunpack.c.l.b16 %v3351_v60  ;;  %v3851_v50 = vsel %vm5471_vm7, %v3849_v6, %v3850_v52 }
 0x1f9   : > { %4858 = vmatmul.msk.bf16.gmra.mxu3 %vm691_vm4, %v3538_v4  ;;  %v4891_v4 = vrot.slane %v4875_v53, 9  ;;  %v3355_v53 = vrot.slane %v3353_v22, 4 }
 0x1fa   : > { %v2519_v62 = vsel %vm5471_vm7, %v2517_v25, %v2518_v17 }
 0x1fb   : > { %v4004_v49 = vpop.f32.mrf.mxu0  ;;  %v3848_v37 = vsel %vm5471_vm7, %v4891_v4, %v3847_v61  ;;  %v2516_v4 = vsel %vm5471_vm7, %v4668_v13, %v2515_v33 }
 0x1fc   : > { %v3606_v28 = vpop.f32.mrf.mxu3  ;;  %v2670_v3 = vpop.f32.mrf.mxu1  ;;  %v3914_v22 = vunpack.c.l.b16 %v3848_v37  ;;  %v2577_v6 = vunpack.c.l.b16 %v2516_v4  ;;  %v4835_v37 = vld [vmem:[%s5287_s4 + $0x9c] sm:$0xf] }
 0x1fd   : > { %v3686_v48 = vadd.f32 %v3606_v28, %v3032_v27  ;;  %v6338_v27 = vrot.slane %v3362_v1, 5  ;;  %v6340_v28 = vld [vmem:[#allocation4] ss:$0 sm:$0xff]  ;;  %v2578_v1 = vunpack.c.l.b16 %v2519_v62  ;;  %v2747_v17 = vadd.f32 %v2670_v3, %v5768_v9 }
 0x1fe   : > { %4906 = vmatmul.msk.bf16.gmra.mxu0 %vm691_vm4, %v3936_v55  ;;  %v3358_v55 = vrot.slane %v3356_v12, 5  ;;  %v3539_v12 = vpack.c.b16 %v3517_v16, %v3516_v29 }
 0x1ff   : > { %v2954_v39 = vpop.f32.mrf.mxu2  ;;  %4683 = vmatmul.msk.bf16.gmra.mxu1 %vm691_vm4, %v2598_v58  ;;  %v3368_v58 = vrot.slane %v3366_v2, 4  ;;  %v4084_v24 = vadd.f32 %v4004_v49, %v3686_v48  ;;  %v3372_v48 = vshll.u32 %v6347_v31, 16  ;;  %v2599_v16 = vpack.c.b16 %v2578_v1, %v2577_v6 }
 0x200   : > { %v3033_v42 = vadd.f32 %v2954_v39, %v2746_v36  ;;  %v3915_v36 = vunpack.c.l.b16 %v3851_v50  ;;  %v3359_v33 = vor.u32 %v3358_v55, %v3355_v53  ;;  %v4876_v50 = vld [vmem:[%s5287_s4 + $0x90] sm:$0xe] }
 0x201   : > { %v3369_v2 = vor.u32 %v3368_v58, %v6338_v27  ;;  %v4120_v39 = vadd.f32 %v6340_v28, %v4084_v24  ;;  %v3374_v55 = vrot.slane %v3372_v48, 5  ;;  %v3854_v58 = vrot.slane %v6312_v40, 5 }
 0x202   : > { %v3360_v29 = vrot.slane %v3359_v33, 4  ;;  %v4892_v1 = vrot.slane %v4876_v50, 9  ;;  %v5137_v50 = vld [vmem:[%s5287_s4 + $0x98] sm:$0x1] }
 0x203   : > { %v4006_v61 = vpop.f32.mrf.mxu0  ;;  %v3370_v53 = vrot.slane %v3369_v2, 4  ;;  %v4152_v24 = vmax.f32 %v4120_v39, 0.0  ;;  %v3857_v2 = vrot.slane %v6347_v31, 5 }
 0x204   : > { %v3608_v60 = vpop.f32.mrf.mxu3  ;;  %4795 = vmatmul.msk.bf16.gmra.mxu2 %vm691_vm4, %v4957_v10  ;;  %v2672_v52 = vpop.f32.mrf.mxu1  ;;  %v3937_v10 = vpack.c.b16 %v3915_v36, %v3914_v22  ;;  %v3380_v36 = vshll.u32 %v4835_v37, 16  ;;  %v3365_v39 = vsel %vm5300_vm3, %v3360_v29, %v6338_v27 }
 0x205   : > { %v3687_v49 = vadd.f32 %v3608_v60, %v3033_v42  ;;  %v6365_v42 = vld [vmem:[%s5287_s4 + $0xa0] sm:$0xf]  ;;  %v5136_v60 = vld [vmem:[%s5287_s4 + $0x94] sm:$0xf]  ;;  %v2748_v48 = vadd.f32 %v2672_v52, %v5781_v7 }
 0x206   : > { %v2522_v9 = vrot.slane %v5136_v60, 5  ;;  %v3386_v33 = vshll.u32 %v6365_v42, 16  ;;  %v3390_v40 = vshrl.u32 %v6365_v42, 16  ;;  %v3382_v52 = vrot.slane %v3380_v36, 5 }
 0x207   : > { %v4085_v13 = vadd.f32 %v4006_v61, %v3687_v49  ;;  %v2957_v25 = vpop.f32.mrf.mxu2  ;;  %v4653_v49 = vld [vmem:[%s5287_s4 + $0x90] sm:$0xe]  ;;  %v3518_v60 = vunpack.c.l.b16 %v3365_v39 }
 0x208   : > { %v3034_v62 = vadd.f32 %v2957_v25, %v2747_v17  ;;  %v3856_v25 = vrot.slane %v3854_v58, 4  ;;  %v2524_v31 = vrot.slane %v2522_v9, 4  ;;  %v3392_v27 = vrot.slane %v3390_v40, 4 }
 0x209   : > { %v4121_v8 = vadd.f32 %v6340_v28, %v4085_v13  ;;  %4859 = vmatmul.msk.bf16.gmra.mxu3 %vm691_vm4, %v3539_v12  ;;  %v3377_v12 = vshrl.u32 %v4835_v37, 16  ;;  %v3375_v13 = vsel %vm5300_vm3, %v3370_v53, %v3374_v55  ;;  %v4669_v37 = vrot.slane %v4653_v49, 9 }
 0x20a   : > { %v3519_v53 = vunpack.c.l.b16 %v3375_v13  ;;  %v3855_v55 = vsel %vm5471_vm7, %v4892_v1, %v3854_v58  ;;  %v3858_v49 = vsel %vm5471_vm7, %v3856_v25, %v3857_v2 }
 0x20b   : > { %v4153_v61 = vmax.f32 %v4121_v8, 0.0  ;;  %v4009_v4 = vpop.f32.mrf.mxu0  ;;  %v3379_v7 = vrot.slane %v3377_v12, 4  ;;  %v2523_v12 = vsel %vm5471_vm7, %v4669_v37, %v2522_v9  ;;  %v3916_v2 = vunpack.c.l.b16 %v3855_v55  ;;  %v4838_v37 = vld [vmem:[%s5287_s4 + $0xa8] sm:$0xf] }
 0x20c   : > { %v3611_v3 = vpop.f32.mrf.mxu3  ;;  %v2675_v22 = vpop.f32.mrf.mxu1  ;;  %v3917_v39 = vunpack.c.l.b16 %v3858_v49  ;;  %v2579_v9 = vunpack.c.l.b16 %v2523_v12  ;;  %v3401_v55 = vshrl.u32 %v4838_v37, 16 }
 0x20d   : > { %v4967_v6 = vpack.c.bf16 %v4153_v61, %v4152_v24  ;;  %v3688_v8 = vadd.f32 %v3611_v3, %v3034_v62  ;;  %v4958_v24 = vld [vmem:[%s5287_s4 + $0x90] sm:$0xff]  ;;  %v6390_v61 = vrot.slane %v3386_v33, 5  ;;  %v6395_v62 = vld [vmem:[%s5287_s4 + $0xa4] sm:$0x1] }
 0x20e   : > { %4907 = vmatmul.msk.bf16.gmra.mxu0 %vm691_vm4, %v3937_v10  ;;  %v2525_v10 = vrot.slane %v5137_v50, 5 }
 0x20f   : > { %4968 = vst [vmem:[%s6373_s10] sm:$0xff] %v4967_v6   ;;  %v2959_v17 = vpop.f32.mrf.mxu2  ;;  %4684 = vmatmul.msk.bf16.gmra.mxu1 %vm691_vm4, %v2599_v16  ;;  %v4086_v3 = vadd.f32 %v4009_v4, %v3688_v8  ;;  %v3383_v6 = vor.u32 %v3382_v52, %v3379_v7  ;;  %v3393_v58 = vor.u32 %v3392_v27, %v6390_v61  ;;  %v4877_v52 = vld [vmem:[%s5287_s4 + $0x9c] sm:$0xe]  ;;  %v3861_v27 = vrot.slane %v6365_v42, 5 }
 0x210   : > { %v3035_v29 = vadd.f32 %v2959_v17, %v2748_v48  ;;  %v2526_v36 = vsel %vm5471_vm7, %v2524_v31, %v2525_v10  ;;  %v3540_v4 = vpack.c.b16 %v3519_v53, %v3518_v60  ;;  %v3396_v48 = vshll.u32 %v6395_v62, 16 }
 0x211   : > { %v2580_v13 = vunpack.c.l.b16 %v2526_v36  ;;  %v4122_v25 = vadd.f32 %v6340_v28, %v4086_v3  ;;  %v3384_v31 = vrot.slane %v3383_v6, 4  ;;  %v3394_v50 = vrot.slane %v3393_v58, 4 }
 0x212   : > { %v3398_v7 = vrot.slane %v3396_v48, 5  ;;  %v3938_v60 = vpack.c.b16 %v3917_v39, %v3916_v2  ;;  %v3404_v3 = vshll.u32 %v4838_v37, 16  ;;  %v4893_v58 = vrot.slane %v4877_v52, 9 }
 0x213   : > { %v4011_v16 = vpop.f32.mrf.mxu0  ;;  %v2600_v53 = vpack.c.b16 %v2580_v13, %v2579_v9  ;;  %v3389_v2 = vsel %vm5300_vm3, %v3384_v31, %v6390_v61  ;;  %v3863_v9 = vrot.slane %v3861_v27, 4 }
 0x214   : > { %v3613_v33 = vpop.f32.mrf.mxu3  ;;  %4796 = vmatmul.msk.bf16.gmra.mxu2 %vm691_vm4, %v4958_v24  ;;  %v2677_v40 = vpop.f32.mrf.mxu1  ;;  %v2749_v24 = vadd.f32 %v2675_v22, %v5794_v54  ;;  %v3399_v39 = vsel %vm5300_vm3, %v3394_v50, %v3398_v7  ;;  %v4959_v50 = vld [vmem:[%s5287_s4 + $0x9c] sm:$0xff] }
 0x215   : > { %v3689_v1 = vadd.f32 %v3613_v33, %v3035_v29  ;;  %v6414_v29 = vld [vmem:[%s5287_s4 + $0xac] sm:$0xf]  ;;  %v5138_v33 = vld [vmem:[%s5287_s4 + $0xa0] sm:$0xf]  ;;  %v2750_v13 = vadd.f32 %v2677_v40, %v5807_v46  ;;  %v3521_v46 = vunpack.c.l.b16 %v3399_v39  ;;  %v6433_v40 = vld [vmem:[%s5287_s4 + $0xb0] sm:$0x1] }
 0x216   : > { %v2529_v6 = vrot.slane %v5138_v33, 5  ;;  %v3414_v42 = vshrl.u32 %v6414_v29, 16 }
 0x217   : > { %v4087_v8 = vadd.f32 %v4011_v16, %v3689_v1  ;;  %v2962_v17 = vpop.f32.mrf.mxu2  ;;  %v4154_v16 = vmax.f32 %v4122_v25, 0.0  ;;  %v4654_v1 = vld [vmem:[%s5287_s4 + $0x9c] sm:$0xe]  ;;  %v3864_v25 = vrot.slane %v6395_v62, 5  ;;  %v3862_v62 = vsel %vm5471_vm7, %v4893_v58, %v3861_v27 }
 0x218   : > { %v3036_v36 = vadd.f32 %v2962_v17, %v2749_v24  ;;  %v3406_v17 = vrot.slane %v3404_v3, 5  ;;  %v4670_v61 = vrot.slane %v4654_v1, 9  ;;  %v2531_v31 = vrot.slane %v2529_v6, 4  ;;  %v5139_v24 = vld [vmem:[%s5287_s4 + $0xa4] sm:$0x1] }
 0x219   : > { %v4123_v10 = vadd.f32 %v6340_v28, %v4087_v8  ;;  %4860 = vmatmul.msk.bf16.gmra.mxu3 %vm691_vm4, %v3540_v4  ;;  %v3410_v4 = vshll.u32 %v6414_v29, 16  ;;  %v3403_v8 = vrot.slane %v3401_v55, 4  ;;  %v2532_v52 = vrot.slane %v5139_v24, 5 }
 0x21a   : > { %v2530_v33 = vsel %vm5471_vm7, %v4670_v61, %v2529_v6  ;;  %v3420_v27 = vshll.u32 %v6433_v40, 16  ;;  %v3868_v61 = vrot.slane %v6414_v29, 5 }
 0x21b   : > { %v4155_v49 = vmax.f32 %v4123_v10, 0.0  ;;  %v4014_v12 = vpop.f32.mrf.mxu0  ;;  %v3412_v7 = vrot.slane %v3410_v4, 5  ;;  %v3407_v55 = vor.u32 %v3406_v17, %v3403_v8  ;;  %v2581_v39 = vunpack.c.l.b16 %v2530_v33  ;;  %v4878_v17 = vld [vmem:[%s5287_s4 + $0xa8] sm:$0xe] }
 0x21c   : > { %v3616_v54 = vpop.f32.mrf.mxu3  ;;  %v2680_v22 = vpop.f32.mrf.mxu1 }
 0x21d   : > { %v4972_v48 = vpack.c.bf16 %v4155_v49, %v4154_v16  ;;  %v3690_v37 = vadd.f32 %v3616_v54, %v3036_v36  ;;  %v3416_v16 = vrot.slane %v3414_v42, 4  ;;  %v3520_v49 = vunpack.c.l.b16 %v3389_v2 }
 0x21e   : > { %4908 = vmatmul.msk.bf16.gmra.mxu0 %vm691_vm4, %v3938_v60  ;;  %v2533_v54 = vsel %vm5471_vm7, %v2531_v31, %v2532_v52  ;;  %v2751_v24 = vadd.f32 %v2680_v22, %v5819_v20  ;;  %v4841_v52 = vld [vmem:[%s5287_s4 + $0xb4] sm:$0xf] }
 0x21f   : > { %5044 = vst [vmem:[%s6373_s10 + $0x8] sm:$0xff] %v4972_v48   ;;  %v2964_v10 = vpop.f32.mrf.mxu2  ;;  %4685 = vmatmul.msk.bf16.gmra.mxu1 %vm691_vm4, %v2600_v53  ;;  %v4088_v3 = vadd.f32 %v4014_v12, %v3690_v37  ;;  %v3865_v53 = vsel %vm5471_vm7, %v3863_v9, %v3864_v25  ;;  %v3417_v42 = vor.u32 %v3416_v16, %v3412_v7  ;;  %v3918_v48 = vunpack.c.l.b16 %v3862_v62 }
 0x220   : > { %v3037_v60 = vadd.f32 %v2964_v10, %v2750_v13  ;;  %v3541_v12 = vpack.c.b16 %v3521_v46, %v3520_v49  ;;  %v3919_v2 = vunpack.c.l.b16 %v3865_v53  ;;  %v2582_v9 = vunpack.c.l.b16 %v2533_v54  ;;  %v6455_v46 = vld [vmem:[%s5287_s4 + $0xb8] sm:$0xf] }
 0x221   : > { %v3408_v13 = vrot.slane %v3407_v55, 4  ;;  %v4124_v6 = vadd.f32 %v6340_v28, %v4088_v3  ;;  %v3418_v37 = vrot.slane %v3417_v42, 4  ;;  %v3422_v10 = vrot.slane %v3420_v27, 5 }
 0x222   : > { %v2601_v16 = vpack.c.b16 %v2582_v9, %v2581_v39  ;;  %v4894_v49 = vrot.slane %v4878_v17, 9  ;;  %v3870_v54 = vrot.slane %v3868_v61, 4  ;;  %v3425_v42 = vshrl.u32 %v4841_v52, 16 }
 0x223   : > { %v4016_v36 = vpop.f32.mrf.mxu0  ;;  %v4156_v62 = vmax.f32 %v4124_v6, 0.0  ;;  %v3423_v33 = vsel %vm5300_vm3, %v3418_v37, %v3422_v10 }
 0x224   : > { %v3618_v1 = vpop.f32.mrf.mxu3  ;;  %4797 = vmatmul.msk.bf16.gmra.mxu2 %vm691_vm4, %v4959_v50  ;;  %v2682_v4 = vpop.f32.mrf.mxu1  ;;  %v3939_v50 = vpack.c.b16 %v3919_v2, %v3918_v48  ;;  %v3438_v48 = vshrl.u32 %v6455_v46, 16  ;;  %v3523_v37 = vunpack.c.l.b16 %v3423_v33  ;;  %v3869_v10 = vsel %vm5471_vm7, %v4894_v49, %v3868_v61 }
 0x225   : > { %v3691_v58 = vadd.f32 %v3618_v1, %v3037_v60  ;;  %v3413_v60 = vsel %vm5300_vm3, %v3408_v13, %v3412_v7  ;;  %v4655_v1 = vld [vmem:[%s5287_s4 + $0xa8] sm:$0xe]  ;;  %v3428_v7 = vshll.u32 %v4841_v52, 16  ;;  %v2752_v2 = vadd.f32 %v2682_v4, %v5832_v35 }
 0x226   : > { %v3522_v39 = vunpack.c.l.b16 %v3413_v60  ;;  %v4671_v6 = vrot.slane %v4655_v1, 9  ;;  %v6477_v60 = vld [vmem:[%s5287_s4 + $0xbc] sm:$0x1]  ;;  %v3920_v49 = vunpack.c.l.b16 %v3869_v10 }
 0x227   : > { %v4089_v25 = vadd.f32 %v4016_v36, %v3691_v58  ;;  %v2967_v8 = vpop.f32.mrf.mxu2  ;;  %v5140_v36 = vld [vmem:[%s5287_s4 + $0xac] sm:$0xf]  ;;  %v3871_v58 = vrot.slane %v6433_v40, 5 }
 0x228   : > { %v3038_v29 = vadd.f32 %v2967_v8, %v2751_v24  ;;  %v2536_v53 = vrot.slane %v5140_v36, 5  ;;  %v5141_v8 = vld [vmem:[%s5287_s4 + $0xb0] sm:$0x1]  ;;  %v4960_v40 = vld [vmem:[%s5287_s4 + $0xa8] sm:$0xff]  ;;  %v3430_v24 = vrot.slane %v3428_v7, 5  ;;  %v3542_v1 = vpack.c.b16 %v3523_v37, %v3522_v39 }
 0x229   : > { %v4125_v31 = vadd.f32 %v6340_v28, %v4089_v25  ;;  %4861 = vmatmul.msk.bf16.gmra.mxu3 %vm691_vm4, %v3541_v12  ;;  %v3434_v12 = vshll.u32 %v6455_v46, 16  ;;  %v2539_v17 = vrot.slane %v5141_v8, 5  ;;  %v3872_v35 = vsel %vm5471_vm7, %v3870_v54, %v3871_v58 }
 0x22a   : > { %v2538_v25 = vrot.slane %v2536_v53, 4  ;;  %v3921_v36 = vunpack.c.l.b16 %v3872_v35  ;;  %v3875_v37 = vrot.slane %v6455_v46, 5 }
 0x22b   : > { %v4157_v55 = vmax.f32 %v4125_v31, 0.0  ;;  %v4019_v3 = vpop.f32.mrf.mxu0  ;;  %v3427_v31 = vrot.slane %v3425_v42, 4  ;;  %v6474_v4 = vrot.slane %v3434_v12, 5  ;;  %v3444_v42 = vshll.u32 %v6477_v60, 16 }
 0x22c   : > { %v3621_v20 = vpop.f32.mrf.mxu3  ;;  %v2685_v22 = vpop.f32.mrf.mxu1 }
 0x22d   : > { %v4977_v27 = vpack.c.bf16 %v4157_v55, %v4156_v62  ;;  %v3692_v9 = vadd.f32 %v3621_v20, %v3038_v29  ;;  %v2537_v55 = vsel %vm5471_vm7, %v4671_v6, %v2536_v53  ;;  %v2540_v29 = vsel %vm5471_vm7, %v2538_v25, %v2539_v17 }
 0x22e   : > { %4909 = vmatmul.msk.bf16.gmra.mxu0 %vm691_vm4, %v3939_v50  ;;  %v3440_v50 = vrot.slane %v3438_v48, 4  ;;  %v3431_v33 = vor.u32 %v3430_v24, %v3427_v31  ;;  %v2583_v53 = vunpack.c.l.b16 %v2537_v55  ;;  %v2584_v7 = vunpack.c.l.b16 %v2540_v29  ;;  %v4844_v48 = vld [vmem:[%s5287_s4 + $0xc0] sm:$0xf] }
 0x22f   : > { %5045 = vst [vmem:[%s6373_s10 + $0x10] sm:$0xff] %v4977_v27   ;;  %v2969_v13 = vpop.f32.mrf.mxu2  ;;  %4686 = vmatmul.msk.bf16.gmra.mxu1 %vm691_vm4, %v2601_v16  ;;  %v4090_v16 = vadd.f32 %v4019_v3, %v3692_v9  ;;  %v2753_v39 = vadd.f32 %v2685_v22, %v5846_v19  ;;  %v3446_v8 = vrot.slane %v3444_v42, 5  ;;  %v3449_v10 = vshrl.u32 %v4844_v48, 16 }
 0x230   : > { %v3039_v52 = vadd.f32 %v2969_v13, %v2752_v2  ;;  %v3441_v3 = vor.u32 %v3440_v50, %v6474_v4  ;;  %v3940_v2 = vpack.c.b16 %v3921_v36, %v3920_v49  ;;  %v3432_v9 = vrot.slane %v3431_v33, 4  ;;  %v6489_v13 = vld [vmem:[%s5287_s4 + $0xc4] sm:$0xf]  ;;  %v4656_v36 = vld [vmem:[%s5287_s4 + $0xb4] sm:$0xe] }
 0x231   : > { %v4126_v27 = vadd.f32 %v6340_v28, %v4090_v16  ;;  %v2602_v17 = vpack.c.b16 %v2584_v7, %v2583_v53  ;;  %v3452_v31 = vshll.u32 %v4844_v48, 16  ;;  %v3458_v16 = vshll.u32 %v6489_v13, 16 }
 0x232   : > { %v3442_v25 = vrot.slane %v3441_v3, 4  ;;  %v3462_v29 = vshrl.u32 %v6489_v13, 16  ;;  %v3437_v46 = vsel %vm5300_vm3, %v3432_v9, %v6474_v4  ;;  %v3451_v3 = vrot.slane %v3449_v10, 4 }
 0x233   : > { %v4021_v62 = vpop.f32.mrf.mxu0  ;;  %v4158_v24 = vmax.f32 %v4126_v27, 0.0  ;;  %v3454_v4 = vrot.slane %v3452_v31, 5  ;;  %v6510_v27 = vrot.slane %v3458_v16, 5 }
 0x234   : > { %v3623_v61 = vpop.f32.mrf.mxu3  ;;  %4798 = vmatmul.msk.bf16.gmra.mxu2 %vm691_vm4, %v4960_v40  ;;  %v2687_v20 = vpop.f32.mrf.mxu1  ;;  %v4879_v40 = vld [vmem:[%s5287_s4 + $0xb4] sm:$0xe]  ;;  %v3447_v33 = vsel %vm5300_vm3, %v3442_v25, %v3446_v8  ;;  %v6515_v8 = vld [vmem:[%s5287_s4 + $0xc8] sm:$0x1] }
 0x235   : > { %v3693_v54 = vadd.f32 %v3623_v61, %v3039_v52  ;;  %v4895_v49 = vrot.slane %v4879_v40, 9  ;;  %v2754_v53 = vadd.f32 %v2687_v20, %v5859_v43  ;;  %v3525_v25 = vunpack.c.l.b16 %v3447_v33 }
 0x237   : > { %v4091_v58 = vadd.f32 %v4021_v62, %v3693_v54  ;;  %v2972_v12 = vpop.f32.mrf.mxu2  ;;  %v5142_v62 = vld [vmem:[%s5287_s4 + $0xb8] sm:$0xf]  ;;  %v3877_v54 = vrot.slane %v3875_v37, 4  ;;  %v3876_v43 = vsel %vm5471_vm7, %v4895_v49, %v3875_v37  ;;  %v3468_v37 = vshll.u32 %v6515_v8, 16 }
 0x238   : > { %v3040_v50 = vadd.f32 %v2972_v12, %v2753_v39  ;;  %v2543_v55 = vrot.slane %v5142_v62, 5  ;;  %v4672_v12 = vrot.slane %v4656_v36, 9  ;;  %v3922_v62 = vunpack.c.l.b16 %v3876_v43 }
 0x239   : > { %v4127_v6 = vadd.f32 %v6340_v28, %v4091_v58  ;;  %4862 = vmatmul.msk.bf16.gmra.mxu3 %vm691_vm4, %v3542_v1  ;;  %v3878_v1 = vrot.slane %v6477_v60, 5  ;;  %v4961_v58 = vld [vmem:[%s5287_s4 + $0xb4] sm:$0xff]  ;;  %v3524_v60 = vunpack.c.l.b16 %v3437_v46 }
 0x23a   : > { %v2545_v48 = vrot.slane %v2543_v55, 4 }
 0x23b   : > { %v4159_v52 = vmax.f32 %v4127_v6, 0.0  ;;  %v4024_v35 = vpop.f32.mrf.mxu0  ;;  %v3464_v6 = vrot.slane %v3462_v29, 4  ;;  %v3879_v20 = vsel %vm5471_vm7, %v3877_v54, %v3878_v1 }
 0x23c   : > { %v3626_v19 = vpop.f32.mrf.mxu3  ;;  %v2690_v22 = vpop.f32.mrf.mxu1  ;;  %v3923_v29 = vunpack.c.l.b16 %v3879_v20 }
 0x23d   : > { %v4982_v61 = vpack.c.bf16 %v4159_v52, %v4158_v24  ;;  %v3694_v42 = vadd.f32 %v3626_v19, %v3040_v50  ;;  %v2544_v24 = vsel %vm5471_vm7, %v4672_v12, %v2543_v55  ;;  %v3455_v50 = vor.u32 %v3454_v4, %v3451_v3 }
 0x23e   : > { %4910 = vmatmul.msk.bf16.gmra.mxu0 %vm691_vm4, %v3940_v2  ;;  %v5143_v2 = vld [vmem:[%s5287_s4 + $0xbc] sm:$0x1]  ;;  %v3543_v19 = vpack.c.b16 %v3525_v25, %v3524_v60  ;;  %v2585_v36 = vunpack.c.l.b16 %v2544_v24  ;;  %v2755_v3 = vadd.f32 %v2690_v22, %v5875_v57  ;;  %v3941_v4 = vpack.c.b16 %v3923_v29, %v3922_v62  ;;  %v4657_v24 = vld [vmem:[%s5287_s4 + $0xc0] sm:$0xe] }
 0x23f   : > { %5046 = vst [vmem:[%s6373_s10 + $0x18] sm:$0xff] %v4982_v61   ;;  %v2974_v7 = vpop.f32.mrf.mxu2  ;;  %4687 = vmatmul.msk.bf16.gmra.mxu1 %vm691_vm4, %v2602_v17  ;;  %v2546_v9 = vrot.slane %v5143_v2, 5  ;;  %v4092_v40 = vadd.f32 %v4024_v35, %v3694_v42  ;;  %v3465_v35 = vor.u32 %v3464_v6, %v6510_v27  ;;  %v3456_v33 = vrot.slane %v3455_v50, 4  ;;  %v4847_v6 = vld [vmem:[%s5287_s4 + $0xcc] sm:$0xf]  ;;  %v4962_v29 = vld [vmem:[%s5287_s4 + $0xc0] sm:$0xff] }
 0x240   : > { %v3041_v39 = vadd.f32 %v2974_v7, %v2754_v53  ;;  %v3470_v42 = vrot.slane %v3468_v37, 5  ;;  %v4880_v53 = vld [vmem:[%s5287_s4 + $0xc0] sm:$0xe]  ;;  %v3882_v7 = vrot.slane %v6489_v13, 5  ;;  %v3476_v50 = vshll.u32 %v4847_v6, 16 }
 0x241   : > { %v2547_v52 = vsel %vm5471_vm7, %v2545_v48, %v2546_v9  ;;  %v4128_v61 = vadd.f32 %v6340_v28, %v4092_v40  ;;  %v3466_v54 = vrot.slane %v3465_v35, 4  ;;  %v3461_v22 = vsel %vm5300_vm3, %v3456_v33, %v6510_v27  ;;  %v5144_v40 = vld [vmem:[%s5287_s4 + $0xc4] sm:$0xf] }
 0x242   : > { %v2586_v55 = vunpack.c.l.b16 %v2547_v52  ;;  %v4896_v25 = vrot.slane %v4880_v53, 9  ;;  %v2550_v13 = vrot.slane %v5144_v40, 5  ;;  %v3884_v20 = vrot.slane %v3882_v7, 4 }
 0x243   : > { %v4026_v10 = vpop.f32.mrf.mxu0  ;;  %v3471_v43 = vsel %vm5300_vm3, %v3466_v54, %v3470_v42  ;;  %v3473_v52 = vshrl.u32 %v4847_v6, 16 }
 0x244   : > { %v3628_v17 = vpop.f32.mrf.mxu3  ;;  %4799 = vmatmul.msk.bf16.gmra.mxu2 %vm691_vm4, %v4961_v58  ;;  %v2692_v31 = vpop.f32.mrf.mxu1  ;;  %v4160_v58 = vmax.f32 %v4128_v61, 0.0  ;;  %v2603_v9 = vpack.c.b16 %v2586_v55, %v2585_v36  ;;  %v4673_v61 = vrot.slane %v4657_v24, 9  ;;  %v3527_v33 = vunpack.c.l.b16 %v3471_v43 }
 0x245   : > { %v3695_v16 = vadd.f32 %v3628_v17, %v3041_v39  ;;  %v6536_v39 = vld [vmem:[%s5287_s4 + $0xd0] sm:$0xf]  ;;  %v3885_v17 = vrot.slane %v6515_v8, 5  ;;  %v3526_v8 = vunpack.c.l.b16 %v3461_v22  ;;  %v3883_v54 = vsel %vm5471_vm7, %v4896_v25, %v3882_v7 }
 0x246   : > { %v3482_v35 = vshll.u32 %v6536_v39, 16  ;;  %v3486_v27 = vshrl.u32 %v6536_v39, 16  ;;  %v2551_v6 = vsel %vm5471_vm7, %v4673_v61, %v2550_v13  ;;  %v3924_v25 = vunpack.c.l.b16 %v3883_v54 }
 0x247   : > { %v4093_v46 = vadd.f32 %v4026_v10, %v3695_v16  ;;  %v2977_v49 = vpop.f32.mrf.mxu2  ;;  %v3544_v22 = vpack.c.b16 %v3527_v33, %v3526_v8 }
 0x248   : > { %v3042_v2 = vadd.f32 %v2977_v49, %v2755_v3  ;;  %v5145_v49 = vld [vmem:[%s5287_s4 + $0xc8] sm:$0x1]  ;;  %v3475_v3 = vrot.slane %v3473_v52, 4  ;;  %v3484_v42 = vrot.slane %v3482_v35, 5  ;;  %v3488_v53 = vrot.slane %v3486_v27, 4 }
 0x249   : > { %v4129_v1 = vadd.f32 %v6340_v28, %v4093_v46  ;;  %4863 = vmatmul.msk.bf16.gmra.mxu3 %vm691_vm4, %v3543_v19  ;;  %v6651_v19 = vld [vmem:[#allocation8_spill] sm:$0xff]  ;;  %v2552_v46 = vrot.slane %v2550_v13, 4  ;;  %v2553_v36 = vrot.slane %v5145_v49, 5  ;;  %v2587_v52 = vunpack.c.l.b16 %v2551_v6 }
 0x24a   : > { %v2756_v37 = vadd.f32 %v2692_v31, %v6651_v19  ;;  %v3478_v31 = vrot.slane %v3476_v50, 5  ;;  %v3489_v43 = vor.u32 %v3488_v53, %v3484_v42 }
 0x24b   : > { %v4161_v12 = vmax.f32 %v4129_v1, 0.0  ;;  %v4029_v48 = vpop.f32.mrf.mxu0  ;;  %v3886_v1 = vsel %vm5471_vm7, %v3884_v20, %v3885_v17  ;;  %v2554_v7 = vsel %vm5471_vm7, %v2552_v46, %v2553_v36  ;;  %v4881_v36 = vld [vmem:[%s5287_s4 + $0xcc] sm:$0xe] }
 0x24c   : > { %v3631_v60 = vpop.f32.mrf.mxu3  ;;  %v2695_v57 = vpop.f32.mrf.mxu1  ;;  %v3925_v40 = vunpack.c.l.b16 %v3886_v1  ;;  %v2588_v50 = vunpack.c.l.b16 %v2554_v7  ;;  %v3490_v19 = vrot.slane %v3489_v43, 4  ;;  %v4897_v1 = vrot.slane %v4881_v36, 9 }
 0x24d   : > { %v4987_v10 = vpack.c.bf16 %v4161_v12, %v4160_v58  ;;  %v3696_v16 = vadd.f32 %v3631_v60, %v3042_v2  ;;  %v4849_v12 = vld [vmem:[%s5287_s4 + $0xd4] sm:$0x1]  ;;  %v2757_v13 = vadd.f32 %v2695_v57, %v5911_v44 }
 0x24e   : > { %4911 = vmatmul.msk.bf16.gmra.mxu0 %vm691_vm4, %v3941_v4  ;;  %v3492_v20 = vshll.u32 %v4849_v12, 16  ;;  %v3942_v27 = vpack.c.b16 %v3925_v40, %v3924_v25  ;;  %v2604_v49 = vpack.c.b16 %v2588_v50, %v2587_v52 }
 0x24f   : > { %5047 = vst [vmem:[%s6373_s10 + $0x20] sm:$0xff] %v4987_v10   ;;  %v2979_v62 = vpop.f32.mrf.mxu2  ;;  %4688 = vmatmul.msk.bf16.gmra.mxu1 %vm691_vm4, %v2603_v9  ;;  %v4094_v4 = vadd.f32 %v4029_v48, %v3696_v16  ;;  %v3479_v10 = vor.u32 %v3478_v31, %v3475_v3 }
 0x250   : > { %v3043_v55 = vadd.f32 %v2979_v62, %v2756_v37  ;;  %v3494_v37 = vrot.slane %v3492_v20, 5  ;;  %v3889_v62 = vrot.slane %v6536_v39, 5 }
 0x251   : > { %v4130_v48 = vadd.f32 %v6340_v28, %v4094_v4  ;;  %v3480_v16 = vrot.slane %v3479_v10, 4  ;;  %v3892_v4 = vrot.slane %v4849_v12, 5 }
 0x252   : > { %v3495_v57 = vsel %vm5300_vm3, %v3490_v19, %v3494_v37  ;;  %v3891_v53 = vrot.slane %v3889_v62, 4  ;;  %v3890_v26 = vsel %vm5471_vm7, %v4897_v1, %v3889_v62  ;;  %v6652_v62 = vld [vmem:[#allocation9_spill] sm:$0xff] }
 0x253   : > { %v4031_v58 = vpop.f32.mrf.mxu0  ;;  %v3485_v44 = vsel %vm5300_vm3, %v3480_v16, %v3484_v42  ;;  %v3529_v7 = vunpack.c.l.b16 %v3495_v57  ;;  %v3926_v10 = vunpack.c.l.b16 %v3890_v26 }
 0x254   : > { %v3633_v2 = vpop.f32.mrf.mxu3  ;;  %4800 = vmatmul.msk.bf16.gmra.mxu2 %vm691_vm4, %v4962_v29  ;;  %v2697_v9 = vpop.f32.mrf.mxu1  ;;  %v4162_v29 = vmax.f32 %v4130_v48, 0.0  ;;  %v3528_v6 = vunpack.c.l.b16 %v3485_v44  ;;  %v3893_v42 = vsel %vm5471_vm7, %v3891_v53, %v3892_v4 }
 0x255   : > { %v3697_v60 = vadd.f32 %v3633_v2, %v3043_v55  ;;  %v2758_v3 = vadd.f32 %v2697_v9, %v5931_v21  ;;  %v3927_v12 = vunpack.c.l.b16 %v3893_v42 }
 0x256   : > { %v3545_v40 = vpack.c.b16 %v3529_v7, %v3528_v6 }
 0x257   : > { %v4095_v17 = vadd.f32 %v4031_v58, %v3697_v60  ;;  %v2982_v24 = vpop.f32.mrf.mxu2  ;;  %v4963_v58 = vld [vmem:[%s5287_s4 + $0xcc] sm:$0xff]  ;;  %v3943_v11 = vpack.c.b16 %v3927_v12, %v3926_v10 }
 0x258   : > { %v3044_v46 = vadd.f32 %v2982_v24, %v2757_v13 }
 0x259   : > { %v4131_v35 = vadd.f32 %v6340_v28, %v4095_v17  ;;  %4864 = vmatmul.msk.bf16.gmra.mxu3 %vm691_vm4, %v3544_v22 }
 0x25b   : > { %v4163_v8 = vmax.f32 %v4131_v35, 0.0  ;;  %v4034_v61 = vpop.f32.mrf.mxu0 }
 0x25c   : > { %v3636_v55 = vpop.f32.mrf.mxu3  ;;  %v2700_v33 = vpop.f32.mrf.mxu1 }
 0x25d   : > { %v4992_v54 = vpack.c.bf16 %v4163_v8, %v4162_v29  ;;  %v3698_v39 = vadd.f32 %v3636_v55, %v3044_v46  ;;  %v2759_v24 = vadd.f32 %v2700_v33, %v5950_v18 }
 0x25e   : > { %4912 = vmatmul.msk.bf16.gmra.mxu0 %vm691_vm4, %v3942_v27 }
 0x25f   : > { %5048 = vst [vmem:[%s6373_s10 + $0x28] sm:$0xff] %v4992_v54   ;;  %v2984_v31 = vpop.f32.mrf.mxu2  ;;  %4689 = vmatmul.msk.bf16.gmra.mxu1 %vm691_vm4, %v2604_v49  ;;  %v4096_v60 = vadd.f32 %v4034_v61, %v3698_v39 }
 0x260   : > { %v3045_v2 = vadd.f32 %v2984_v31, %v2758_v3 }
 0x261   : > { %v4132_v43 = vadd.f32 %v6340_v28, %v4096_v60 }
 0x263   : > { %v4036_v22 = vpop.f32.mrf.mxu0  ;;  %v4164_v52 = vmax.f32 %v4132_v43, 0.0 }
 0x264   : > { %v3638_v25 = vpop.f32.mrf.mxu3  ;;  %4801 = vmatmul.msk.bf16.gmra.mxu2 %vm691_vm4, %v4963_v58  ;;  %v2702_v21 = vpop.f32.mrf.mxu1 }
 0x265   : > { %v3699_v9 = vadd.f32 %v3638_v25, %v3045_v2  ;;  %v2760_v29 = vadd.f32 %v2702_v21, %v6652_v62 }
 0x267   : > { %v4097_v20 = vadd.f32 %v4036_v22, %v3699_v9  ;;  %v2987_v48 = vpop.f32.mrf.mxu2 }
 0x268   : > { %v3046_v13 = vadd.f32 %v2987_v48, %v2759_v24 }
 0x269   : > { %v4133_v17 = vadd.f32 %v6340_v28, %v4097_v20  ;;  %4865 = vmatmul.msk.bf16.gmra.mxu3 %vm691_vm4, %v3545_v40 }
 0x26b   : > { %v4165_v50 = vmax.f32 %v4133_v17, 0.0  ;;  %v4039_v35 = vpop.f32.mrf.mxu0 }
 0x26c   : > { %v3641_v27 = vpop.f32.mrf.mxu3  ;;  %v2705_v16 = vpop.f32.mrf.mxu1 }
 0x26d   : > { %v4997_v19 = vpack.c.bf16 %v4165_v50, %v4164_v52  ;;  %v3700_v37 = vadd.f32 %v3641_v27, %v3046_v13  ;;  %v2761_v1 = vadd.f32 %v2705_v16, %v5993_v59 }
 0x26e   : > { %4913 = vmatmul.msk.bf16.gmra.mxu0 %vm691_vm4, %v3943_v11 }
 0x26f   : > { %5049 = vst [vmem:[%s6373_s10 + $0x30] sm:$0xff] %v4997_v19   ;;  %v2989_v8 = vpop.f32.mrf.mxu2  ;;  %v4098_v46 = vadd.f32 %v4039_v35, %v3700_v37 }
 0x270   : > { %v3047_v61 = vadd.f32 %v2989_v8, %v2760_v29 }
 0x271   : > { %v4134_v33 = vadd.f32 %v6340_v28, %v4098_v46 }
 0x273   : > { %v4041_v18 = vpop.f32.mrf.mxu0  ;;  %v4166_v39 = vmax.f32 %v4134_v33, 0.0 }
 0x274   : > { %v3643_v49 = vpop.f32.mrf.mxu3  ;;  %v2707_v36 = vpop.f32.mrf.mxu1 }
 0x275   : > { %v3701_v55 = vadd.f32 %v3643_v49, %v3047_v61  ;;  %v2762_v7 = vadd.f32 %v2707_v36, %v6017_v14 }
 0x277   : > { %v4099_v54 = vadd.f32 %v4041_v18, %v3701_v55  ;;  %v2992_v44 = vpop.f32.mrf.mxu2 }
 0x278   : > { %v3048_v53 = vadd.f32 %v2992_v44, %v2761_v1 }
 0x279   : > { %v4135_v57 = vadd.f32 %v6340_v28, %v4099_v54 }
 0x27b   : > { %v4167_v3 = vmax.f32 %v4135_v57, 0.0  ;;  %v4044_v31 = vpop.f32.mrf.mxu0 }
 0x27c   : > { %v3646_v4 = vpop.f32.mrf.mxu3  ;;  %v2710_v58 = vpop.f32.mrf.mxu1 }
 0x27d   : > { %v5002_v2 = vpack.c.bf16 %v4167_v3, %v4166_v39  ;;  %v3702_v6 = vadd.f32 %v3646_v4, %v3048_v53  ;;  %v2763_v43 = vadd.f32 %v2710_v58, %v6036_v30 }
 0x27f   : > { %5050 = vst [vmem:[%s6373_s10 + $0x38] sm:$0xff] %v5002_v2   ;;  %v2994_v60 = vpop.f32.mrf.mxu2  ;;  %v4100_v26 = vadd.f32 %v4044_v31, %v3702_v6 }
 0x280   : > { %v3049_v22 = vadd.f32 %v2994_v60, %v2762_v7 }
 0x281   : > { %v4136_v59 = vadd.f32 %v6340_v28, %v4100_v26 }
 0x283   : > { %v4046_v42 = vpop.f32.mrf.mxu0  ;;  %v4168_v20 = vmax.f32 %v4136_v59, 0.0 }
 0x284   : > { %v3648_v25 = vpop.f32.mrf.mxu3  ;;  %v2712_v21 = vpop.f32.mrf.mxu1 }
 0x285   : > { %v3703_v9 = vadd.f32 %v3648_v25, %v3049_v22  ;;  %v2764_v35 = vadd.f32 %v2712_v21, %v6060_v45 }
 0x287   : > { %v4101_v40 = vadd.f32 %v4046_v42, %v3703_v9  ;;  %v2997_v10 = vpop.f32.mrf.mxu2 }
 0x288   : > { %v3050_v14 = vadd.f32 %v2997_v10, %v2763_v43 }
 0x289   : > { %v4137_v12 = vadd.f32 %v6340_v28, %v4101_v40 }
 0x28b   : > { %v4169_v48 = vmax.f32 %v4137_v12, 0.0  ;;  %v4049_v17 = vpop.f32.mrf.mxu0 }
 0x28c   : > { %v3651_v24 = vpop.f32.mrf.mxu3  ;;  %v2715_v11 = vpop.f32.mrf.mxu1 }
 0x28d   : > { %v5007_v52 = vpack.c.bf16 %v4169_v48, %v4168_v20  ;;  %v3704_v50 = vadd.f32 %v3651_v24, %v3050_v14  ;;  %v2765_v18 = vadd.f32 %v2715_v11, %v6079_v47 }
 0x28f   : > { %5051 = vst [vmem:[%s6373_s10 + $0x40] sm:$0xff] %v5007_v52   ;;  %v2999_v13 = vpop.f32.mrf.mxu2  ;;  %v4102_v16 = vadd.f32 %v4049_v17, %v3704_v50 }
 0x290   : > { %v3051_v27 = vadd.f32 %v2999_v13, %v2764_v35 }
 0x291   : > { %v4138_v30 = vadd.f32 %v6340_v28, %v4102_v16 }
 0x293   : > { %v4051_v19 = vpop.f32.mrf.mxu0  ;;  %v4170_v49 = vmax.f32 %v4138_v30, 0.0 }
 0x294   : > { %v3653_v37 = vpop.f32.mrf.mxu3  ;;  %v2717_v62 = vpop.f32.mrf.mxu1 }
 0x295   : > { %v3705_v29 = vadd.f32 %v3653_v37, %v3051_v27  ;;  %v2766_v1 = vadd.f32 %v2717_v62, %v6103_v34 }
 0x297   : > { %v4103_v8 = vadd.f32 %v4051_v19, %v3705_v29  ;;  %v3002_v61 = vpop.f32.mrf.mxu2 }
 0x298   : > { %v3052_v45 = vadd.f32 %v3002_v61, %v2765_v18 }
 0x299   : > { %v4139_v46 = vadd.f32 %v6340_v28, %v4103_v8 }
 0x29b   : > { %v4171_v36 = vmax.f32 %v4139_v46, 0.0  ;;  %v4054_v55 = vpop.f32.mrf.mxu0 }
 0x29c   : > { %v3656_v33 = vpop.f32.mrf.mxu3  ;;  %v2720_v54 = vpop.f32.mrf.mxu1 }
 0x29d   : > { %v5012_v44 = vpack.c.bf16 %v4171_v36, %v4170_v49  ;;  %v3706_v57 = vadd.f32 %v3656_v33, %v3052_v45  ;;  %v2767_v22 = vadd.f32 %v2720_v54, %v6122_v0  ;;  %v6611_v0 = vld [vmem:[#allocation4] ss:$0 sm:$0xff] }
 0x29f   : > { %5052 = vst [vmem:[%s6373_s10 + $0x48] sm:$0xff] %v5012_v44   ;;  %v3004_v39 = vpop.f32.mrf.mxu2  ;;  %v4104_v31 = vadd.f32 %v4054_v55, %v3706_v57 }
 0x2a0   : > { %v3053_v3 = vadd.f32 %v3004_v39, %v2766_v1 }
 0x2a1   : > { %v4140_v47 = vadd.f32 %v6340_v28, %v4104_v31 }
 0x2a3   : > { %v4056_v53 = vpop.f32.mrf.mxu0  ;;  %v4172_v26 = vmax.f32 %v4140_v47, 0.0 }
 0x2a4   : > { %v3658_v4 = vpop.f32.mrf.mxu3  ;;  %v2722_v58 = vpop.f32.mrf.mxu1 }
 0x2a5   : > { %v3707_v2 = vadd.f32 %v3658_v4, %v3053_v3  ;;  %v2768_v10 = vadd.f32 %v2722_v58, %v6146_v23 }
 0x2a7   : > { %v4105_v6 = vadd.f32 %v4056_v53, %v3707_v2  ;;  %v3007_v7 = vpop.f32.mrf.mxu2 }
 0x2a8   : > { %v3054_v34 = vadd.f32 %v3007_v7, %v2767_v22 }
 0x2a9   : > { %v4141_v60 = vadd.f32 %v6340_v28, %v4105_v6 }
 0x2ab   : > { %v4173_v42 = vmax.f32 %v4141_v60, 0.0  ;;  %v4059_v25 = vpop.f32.mrf.mxu0 }
 0x2ac   : > { %v3661_v21 = vpop.f32.mrf.mxu3  ;;  %v2725_v9 = vpop.f32.mrf.mxu1 }
 0x2ad   : > { %v5017_v59 = vpack.c.bf16 %v4173_v42, %v4172_v26  ;;  %v3708_v40 = vadd.f32 %v3661_v21, %v3054_v34  ;;  %v2769_v35 = vadd.f32 %v2725_v9, %v6165_v63 }
 0x2af   : > { %5053 = vst [vmem:[%s6373_s10 + $0x50] sm:$0xff] %v5017_v59   ;;  %v3009_v12 = vpop.f32.mrf.mxu2  ;;  %v4106_v20 = vadd.f32 %v4059_v25, %v3708_v40 }
 0x2b0   : > { %v3055_v43 = vadd.f32 %v3009_v12, %v2768_v10 }
 0x2b1   : > { %v4142_v24 = vadd.f32 %v6611_v0, %v4106_v20 }
 0x2b3   : > { %v4061_v48 = vpop.f32.mrf.mxu0  ;;  %v4174_v13 = vmax.f32 %v4142_v24, 0.0 }
 0x2b4   : > { %v3663_v17 = vpop.f32.mrf.mxu3  ;;  %v2727_v28 = vpop.f32.mrf.mxu1 }
 0x2b5   : > { %v3709_v14 = vadd.f32 %v3663_v17, %v3055_v43  ;;  %v2770_v30 = vadd.f32 %v2727_v28, %v6189_v32 }
 0x2b7   : > { %v4107_v11 = vadd.f32 %v4061_v48, %v3709_v14  ;;  %v3012_v52 = vpop.f32.mrf.mxu2 }
 0x2b8   : > { %v3056_v16 = vadd.f32 %v3012_v52, %v2769_v35 }
 0x2b9   : > { %v4143_v50 = vadd.f32 %v6611_v0, %v4107_v11 }
 0x2bb   : > { %v4175_v23 = vmax.f32 %v4143_v50, 0.0  ;;  %v4064_v27 = vpop.f32.mrf.mxu0 }
 0x2bc   : > { %v3666_v19 = vpop.f32.mrf.mxu3  ;;  %v2730_v37 = vpop.f32.mrf.mxu1 }
 0x2bd   : > { %v5022_v62 = vpack.c.bf16 %v4175_v23, %v4174_v13  ;;  %v3710_v29 = vadd.f32 %v3666_v19, %v3056_v16  ;;  %v2771_v44 = vadd.f32 %v2730_v37, %v6208_v41 }
 0x2bf   : > { %5054 = vst [vmem:[%s6373_s10 + $0x58] sm:$0xff] %v5022_v62   ;;  %v3014_v8 = vpop.f32.mrf.mxu2  ;;  %v4108_v46 = vadd.f32 %v4064_v27, %v3710_v29 }
 0x2c0   : > { %v3057_v61 = vadd.f32 %v3014_v8, %v2770_v30 }
 0x2c1   : > { %v4144_v63 = vadd.f32 %v6611_v0, %v4108_v46 }
 0x2c3   : > { %v4066_v18 = vpop.f32.mrf.mxu0  ;;  %v4176_v57 = vmax.f32 %v4144_v63, 0.0 }
 0x2c4   : > { %v3668_v49 = vpop.f32.mrf.mxu3  ;;  %v2732_v36 = vpop.f32.mrf.mxu1 }
 0x2c5   : > { %v3711_v55 = vadd.f32 %v3668_v49, %v3057_v61  ;;  %v2772_v58 = vadd.f32 %v2732_v36, %v6232_v56 }
 0x2c7   : > { %v4109_v45 = vadd.f32 %v4066_v18, %v3711_v55  ;;  %v3017_v33 = vpop.f32.mrf.mxu2 }
 0x2c8   : > { %v3058_v32 = vadd.f32 %v3017_v33, %v2771_v44 }
 0x2c9   : > { %v4145_v54 = vadd.f32 %v6611_v0, %v4109_v45 }
 0x2cb   : > { %v4177_v1 = vmax.f32 %v4145_v54, 0.0  ;;  %v4069_v39 = vpop.f32.mrf.mxu0 }
 0x2cc   : > { %v3671_v3 = vpop.f32.mrf.mxu3  ;;  %v2735_v53 = vpop.f32.mrf.mxu1 }
 0x2cd   : > { %v5027_v31 = vpack.c.bf16 %v4177_v1, %v4176_v57  ;;  %v3712_v4 = vadd.f32 %v3671_v3, %v3058_v32  ;;  %v2773_v21 = vadd.f32 %v2735_v53, %v6249_v15 }
 0x2cf   : > { %5055 = vst [vmem:[%s6373_s10 + $0x60] sm:$0xff] %v5027_v31   ;;  %v3019_v2 = vpop.f32.mrf.mxu2  ;;  %v4110_v6 = vadd.f32 %v4069_v39, %v3712_v4 }
 0x2d0   : > { %v3059_v47 = vadd.f32 %v3019_v2, %v2772_v58 }
 0x2d1   : > { %v4146_v41 = vadd.f32 %v6611_v0, %v4110_v6 }
 0x2d3   : > { %v4071_v7 = vpop.f32.mrf.mxu0  ;;  %v4178_v9 = vmax.f32 %v4146_v41, 0.0 }
 0x2d4   : > { %v3673_v60 = vpop.f32.mrf.mxu3  ;;  %v2737_v25 = vpop.f32.mrf.mxu1 }
 0x2d5   : > { %v3713_v22 = vadd.f32 %v3673_v60, %v3059_v47  ;;  %v2774_v20 = vadd.f32 %v2737_v25, %v6270_v5 }
 0x2d7   : > { %v4111_v26 = vadd.f32 %v4071_v7, %v3713_v22  ;;  %v3022_v42 = vpop.f32.mrf.mxu2 }
 0x2d8   : > { %v3060_v56 = vadd.f32 %v3022_v42, %v2773_v21 }
 0x2d9   : > { %v4147_v34 = vadd.f32 %v6611_v0, %v4111_v26 }
 0x2db   : > { %v4179_v59 = vmax.f32 %v4147_v34, 0.0  ;;  %v4074_v40 = vpop.f32.mrf.mxu0 }
 0x2dc   : > { %v3676_v10 = vpop.f32.mrf.mxu3  ;;  %v2740_v28 = vpop.f32.mrf.mxu1 }
 0x2dd   : > { %v5032_v12 = vpack.c.bf16 %v4179_v59, %v4178_v9  ;;  %v3714_v43 = vadd.f32 %v3676_v10, %v3060_v56  ;;  %v2775_v23 = vadd.f32 %v2740_v28, %v6288_v51 }
 0x2df   : > { %5056 = vst [vmem:[%s6373_s10 + $0x68] sm:$0xff] %v5032_v12   ;;  %v3024_v48 = vpop.f32.mrf.mxu2  ;;  %v4112_v14 = vadd.f32 %v4074_v40, %v3714_v43 }
 0x2e0   : > { %v3061_v17 = vadd.f32 %v3024_v48, %v2774_v20 }
 0x2e1   : > { %v4148_v15 = vadd.f32 %v6611_v0, %v4112_v14 }
 0x2e3   : > { %v4076_v24 = vpop.f32.mrf.mxu0  ;;  %v4180_v27 = vmax.f32 %v4148_v15, 0.0 }
 0x2e4   : > { %v3678_v11 = vpop.f32.mrf.mxu3  ;;  %v2742_v5 = vpop.f32.mrf.mxu1 }
 0x2e5   : > { %v3715_v52 = vadd.f32 %v3678_v11, %v3061_v17  ;;  %v2776_v8 = vadd.f32 %v2742_v5, %v6308_v38 }
 0x2e7   : > { %v4113_v50 = vadd.f32 %v4076_v24, %v3715_v52  ;;  %v3027_v35 = vpop.f32.mrf.mxu2 }
 0x2e8   : > { %v3062_v19 = vadd.f32 %v3027_v35, %v2775_v23 }
 0x2e9   : > { %v4149_v13 = vadd.f32 %v6611_v0, %v4113_v50 }
 0x2eb   : > { %v4181_v16 = vmax.f32 %v4149_v13, 0.0  ;;  %v4079_v37 = vpop.f32.mrf.mxu0 }
 0x2ec   : > { %v3681_v62 = vpop.f32.mrf.mxu3 }
 0x2ed   : > { %v5037_v29 = vpack.c.bf16 %v4181_v16, %v4180_v27  ;;  %v3716_v30 = vadd.f32 %v3681_v62, %v3062_v19 }
 0x2ef   : > { %5057 = vst [vmem:[%s6373_s10 + $0x70] sm:$0xff] %v5037_v29   ;;  %v3029_v61 = vpop.f32.mrf.mxu2  ;;  %v4114_v18 = vadd.f32 %v4079_v37, %v3716_v30 }
 0x2f0   : > { %v3063_v46 = vadd.f32 %v3029_v61, %v2776_v8 }
 0x2f1   : > { %v4150_v51 = vadd.f32 %v6611_v0, %v4114_v18 }
 0x2f3   : > { %v4081_v55 = vpop.f32.mrf.mxu0  ;;  %v4182_v33 = vmax.f32 %v4150_v51, 0.0 }
 0x2f4   : > { %v3683_v49 = vpop.f32.mrf.mxu3 }
 0x2f5   : > { %v3717_v36 = vadd.f32 %v3683_v49, %v3063_v46 }
 0x2f7   : > { %v4115_v63 = vadd.f32 %v4081_v55, %v3717_v36 }
 0x2f9   : > { %v4151_v45 = vadd.f32 %v6611_v0, %v4115_v63 }
 0x2fb   : > { %v4183_v54 = vmax.f32 %v4151_v45, 0.0 }
 0x2fd   : > { %v5042_v44 = vpack.c.bf16 %v4183_v54, %v4182_v33 }
 0x2ff   : > { %5058 = vst [vmem:[%s6373_s10 + $0x78] sm:$0xff] %v5042_v44  }
 0x300 PF: > { %s15_s12 = sadd.s32 1, %s5221_s12  }
 0x301   : > { %p12_p8 = scmp.ge.s32.totalorder %s15_s12, 4  }
 0x303   :  { %14 = sbr.rel (!%p12_p8) target bundleno = 2 (0x2), region = 81 }
 0x308   :  { %4270 = vsyncpa [#allocation3], 1 }
 0x309   :  { %4272 = vsyncpa [#allocation3 + $0x1], 1 }
 0x30a   :  { %4273 = vsyncpa [#allocation5], 1 }

// kernel: a_call__.4
= control target key start
LH: loop header
LB: loop body
LE: loop exit
PB: predicated region body
PF: predicated region fallthrough
CT: control target
= control target key end

     0   :  { %10 = vsyncpa [#allocation3], 0  ;;  %s7271_s0 = inlined_call_operand.vmem [shape: bf16[2,18,18,128], index: 0, kind: input, shape index: {}]   ;;  %s7272_s1 = inlined_call_operand.hbm [shape: bf16[9,128,128], index: 1, kind: input, shape index: {}]   ;;  %s7273_s2 = inlined_call_operand.hbm [shape: f32[1,128], index: 2, kind: input, shape index: {}]   ;;  %s7274_s3 = inlined_call_operand.hbm [shape: bf16[128,128], index: 3, kind: input, shape index: {}]   ;;  %s7275_s4 = inlined_call_operand.hbm [shape: f32[1,128], index: 4, kind: input, shape index: {}]   ;;  %s7276_s5 = inlined_call_operand.vmem [shape: f32[512,128], index: 5, kind: output, shape index: {}]  }
   0x1   :  { %11 = vsyncpa [#allocation5], 0 }
   0x2   :  { %12 = vsyncpa [#allocation8], 0  ;;  %s5982_s18 = smov 0  }
   0x3 LB: > { %s185_s21 = sshll.u32 %s7273_s2, 4  ;;  %s5991_s22 = sadd.s32 4294967295, %s5944_s18   ;;  %s5944_s18 = sphi %s5982_s18, %s18_s18   ;;  %s186_s21 = int_to_ptr.hbm [resolvable:$true] %s185_s21 }
   0x4   : > { %p4822_p0 = scmp.ge.s32.totalorder %s5944_s18, 1  ;;  %p159_p1 = scmp.lt.s32.totalorder %s5944_s18, 3 }
   0x5   : > { %p5764_p2 = scmp.eq.s32.totalorder %s5991_s22, 0  ;;  %s5946_s24 = smov [#allocation4]  }
   0x6   : > { %p5996_p3 = pnand %p4822_p0, %p159_p1  ;;  %s187_s25 = sshll.u32 %s5946_s24, 4  ;;  %s188_s25 = int_to_ptr.vmem [resolvable:$true] %s187_s25 }
   0x7   : > { %s170_s28 = sshll.u32 %s7272_s1, 4  ;;  %s5947_s30 = smov [#allocation2]   ;;  %s171_s28 = int_to_ptr.hbm [resolvable:$true] %s170_s28 }
   0x8   : > { %p5751_p4 = pneg %p5996_p3  ;;  %s172_s6 = sshll.u32 %s5947_s30, 4  ;;  %s173_s6 = int_to_ptr.vmem [resolvable:$true] %s172_s6 }
   0x9   : > { %s196_s9 = sshll.u32 %s7274_s3, 4  ;;  %s5948_s10 = smov 64   ;;  %s197_s9 = int_to_ptr.hbm [resolvable:$true] %s196_s9 }
   0xa   : > { %p6007_p5 = pnand %p5764_p2, %p5751_p4  ;;  %s5949_s11 = smov 4  }
   0xb   : > { %s5950_s12 = smov [#allocation6]   ;;  %s211_s16 = sshll.u32 %s7275_s4, 4  ;;  %s212_s16 = int_to_ptr.hbm [resolvable:$true] %s211_s16 }
   0xc   : > { %5757 = dma.hbm_to_vmem [thread:$0]  (!%p6007_p5), %s186_s21, 16, %s188_s25, [#allocation5]  }
   0xd   : > { %5754 = dma.hbm_to_vmem [thread:$0]  (!%p6007_p5), %s171_s28, 9216, %s173_s6, [#allocation3], %s5948_s10, %s5948_s10, %s5949_s11  }
   0xe   : > { %s198_s13 = sshll.u32 %s5950_s12, 4  ;;  %s5951_s17 = smov [#allocation7]   ;;  %s199_s13 = int_to_ptr.vmem [resolvable:$true] %s198_s13 }
   0xf   : > { %5760 = dma.hbm_to_vmem [thread:$0]  (!%p6007_p5), %s197_s9, 1024, %s199_s13, [#allocation5], %s5948_s10, %s5948_s10, %s5949_s11  }
  0x10   : > { %s213_s19 = sshll.u32 %s5951_s17, 4  ;;  %234 = sbr.rel (%p5996_p3) target bundleno = 971 (0x3cb), region = 40  ;;  %s214_s19 = int_to_ptr.vmem [resolvable:$true] %s213_s19 }
  0x11   : > { %5763 = dma.hbm_to_vmem [thread:$0]  (!%p6007_p5), %s212_s16, 16, %s214_s19, [#allocation8]  }
  0x15   : > { %5931 = dma.done.wait (%p5764_p2), [#allocation3], 9216  }
  0x16   : > { %5933 = vsyncadd (%p5764_p2), [#allocation3], 4294958080 }
  0x17   : > { %5935 = dma.done.wait (%p5764_p2), [#allocation5], 1040  }
  0x18   : > { %5937 = vsyncadd (%p5764_p2), [#allocation5], 4294966256 }
  0x19   : > { %5939 = dma.done.wait (%p5764_p2), [#allocation8], 16  }
  0x1a   : > { %5941 = vsyncadd (%p5764_p2), [#allocation8], 4294967280  ;;  %p278_p6 = scmp.lt.s32.totalorder %s5991_s22, 1  ;;  %v5621_v0 = vld [vmem:[#allocation2 + $0x78] sm:$0xff]  ;;  %v5620_v2 = vld [vmem:[#allocation2 + $0x70] sm:$0xff]  ;;  %vm1239_vm3 = vcmask 1042432  }
  0x1b   : > { %v5613_v1 = vld [vmem:[#allocation2 + $0x38] sm:$0xff]  ;;  %5718 = vmatpush.bf16.msra.mxu2 %v5621_v0  ;;  %v5612_v3 = vld [vmem:[#allocation2 + $0x30] sm:$0xff]  ;;  %869 = vmatpush.bf16.msra.mxu0 %v5621_v0  ;;  %v5619_v6 = vld [vmem:[#allocation2 + $0x68] sm:$0xff]  ;;  %vm353_vm0 = vsmask.f32 3328  ;;  %vm1240_vm4 = vcmask 1046532  }
  0x1c   : > { %s279_s20 = scalar_select %p278_p6, %s5991_s22, 1  ;;  %5726 = vmatpush.bf16.msra.mxu3 %v5613_v1  ;;  %1102 = vmatpush.bf16.msra.mxu1 %v5613_v1  ;;  %v5611_v7 = vld [vmem:[#allocation2 + $0x28] sm:$0xff]  ;;  %v5618_v22 = vld [vmem:[#allocation2 + $0x60] sm:$0xff]  ;;  %v5617_v33 = vld [vmem:[#allocation2 + $0x58] sm:$0xff]  ;;  %vm354_vm1 = vsmask.f32 7440 }
  0x1d   : > { %v5610_v23 = vld [vmem:[#allocation2 + $0x20] sm:$0xff]  ;;  %v5609_v34 = vld [vmem:[#allocation2 + $0x18] sm:$0xff]  ;;  %vm6065_vm2 = vmor %vm353_vm0, %vm354_vm1  ;;  %s4834_s26 = sshll.u32 %s5991_s22, 5 }
  0x1e   : > { %s5734_s21 = smul.u32 216, %s279_s20  ;;  %v5616_v43 = vld [vmem:[#allocation2 + $0x50] sm:$0xff]  ;;  %v5615_v57 = vld [vmem:[#allocation2 + $0x48] sm:$0xff]  ;;  %vm6258_vm5 = vmor %vm1239_vm3, %vm1240_vm4  ;;  %p284_p7 = scmp.lt.s32.totalorder %s4834_s26, 63 }
  0x1f   : > { %5719 = vmatpush.bf16.msra.mxu2 %v5620_v2  ;;  %870 = vmatpush.bf16.msra.mxu0 %v5620_v2  ;;  %v5608_v44 = vld [vmem:[#allocation2 + $0x10] sm:$0xff]  ;;  %v5607_v58 = vld [vmem:[#allocation2 + $0x8] sm:$0xff] }
  0x20   : > { %s6044_s25 = scalar_lea.vmem %s7271_s0, %s5734_s21  ;;  %5727 = vmatpush.bf16.msra.mxu3 %v5612_v3  ;;  %1103 = vmatpush.bf16.msra.mxu1 %v5612_v3  ;;  %s7314_s26 = smov (!%p284_p7, %s4834_s26), 63 }
  0x21   : > { %v305_v4 = vld [vmem:[%s6044_s25 + $0x60] sm:$0xf]  ;;  %v306_v5 = vld [vmem:[%s6044_s25 + $0x64] sm:$0xf]  ;;  %v345_v17 = vld [vmem:[%s6044_s25 + $0x68] sm:$0x1] }
  0x22   : > { %v549_v8 = vshrl.u32 %v305_v4, 16  ;;  %v552_v9 = vshll.u32 %v305_v4, 16  ;;  %v558_v10 = vshll.u32 %v306_v5, 16  ;;  %v562_v11 = vshrl.u32 %v306_v5, 16  ;;  %v289_v12 = vld [vmem:[%s6044_s25] sm:$0xf] }
  0x23   : > { %v6052_v16 = vld [vmem:[%s6044_s25 + $0x4] sm:$0xf]  ;;  %v357_v19 = vshrl.u32 %v289_v12, 16  ;;  %v360_v20 = vshll.u32 %v289_v12, 16  ;;  %5720 = vmatpush.bf16.msra.mxu2 %v5619_v6  ;;  %871 = vmatpush.bf16.msra.mxu0 %v5619_v6  ;;  %v568_v28 = vshll.u32 %v345_v17, 16  ;;  %v5629_v17 = vld [vmem:[#allocation2 + $0xb8] sm:$0xff] }
  0x24   : > { %v551_v13 = vrot.slane %v549_v8, 4  ;;  %v554_v14 = vrot.slane %v552_v9, 5  ;;  %v6049_v15 = vrot.slane %v558_v10, 5  ;;  %v564_v18 = vrot.slane %v562_v11, 4  ;;  %5728 = vmatpush.bf16.msra.mxu3 %v5611_v7  ;;  %1104 = vmatpush.bf16.msra.mxu1 %v5611_v7  ;;  %v6060_v29 = vld [vmem:[%s6044_s25 + $0x8] sm:$0x1] }
  0x25   : > { %v366_v21 = vshll.u32 %v6052_v16, 16  ;;  %v370_v24 = vshrl.u32 %v6052_v16, 16  ;;  %v359_v25 = vrot.slane %v357_v19, 4  ;;  %v362_v26 = vrot.slane %v360_v20, 5  ;;  %v307_v42 = vld [vmem:[%s6044_s25 + $0x6c] sm:$0xf] }
  0x26   : > { %v555_v31 = vor.u32 %v554_v14, %v551_v13  ;;  %v565_v32 = vor.u32 %v564_v18, %v6049_v15  ;;  %v376_v37 = vshll.u32 %v6060_v29, 16  ;;  %v570_v38 = vrot.slane %v568_v28, 5  ;;  %v308_v45 = vld [vmem:[%s6044_s25 + $0x70] sm:$0xf]  ;;  %v291_v49 = vld [vmem:[%s6044_s25 + $0xc] sm:$0xf] }
  0x27   : > { %v6057_v27 = vrot.slane %v366_v21, 5  ;;  %v372_v30 = vrot.slane %v370_v24, 4  ;;  %5721 = vmatpush.bf16.msra.mxu2 %v5618_v22  ;;  %872 = vmatpush.bf16.msra.mxu0 %v5618_v22  ;;  %v363_v35 = vor.u32 %v362_v26, %v359_v25  ;;  %v573_v50 = vshrl.u32 %v307_v42, 16  ;;  %v6073_v52 = vld [vmem:[%s6044_s25 + $0x10] sm:$0xf]  ;;  %v5614_v8 = vld [vmem:[#allocation2 + $0x40] sm:$0xff] }
  0x28   : > { %5729 = vmatpush.bf16.msra.mxu3 %v5610_v23  ;;  %1105 = vmatpush.bf16.msra.mxu1 %v5610_v23  ;;  %v556_v40 = vrot.slane %v555_v31, 4  ;;  %v566_v41 = vrot.slane %v565_v32, 4  ;;  %v378_v48 = vrot.slane %v376_v37, 5  ;;  %v576_v51 = vshll.u32 %v307_v42, 16  ;;  %v346_v3 = vld [vmem:[%s6044_s25 + $0x74] sm:$0x1] }
  0x29   : > { %v373_v36 = vor.u32 %v372_v30, %v6057_v27  ;;  %v364_v46 = vrot.slane %v363_v35, 4  ;;  %v582_v55 = vshll.u32 %v308_v45, 16  ;;  %v586_v56 = vshrl.u32 %v308_v45, 16  ;;  %v5606_v9 = vld [vmem:[#allocation2] sm:$0xff]  ;;  %v5653_v18 = vld [vmem:[#allocation2 + $0xf8] sm:$0xff]  ;;  %v5628_v35 = vld [vmem:[#allocation2 + $0xb0] sm:$0xff] }
  0x2a   : > { %v561_v53 = vsel %vm6065_vm2, %v556_v40, %v6049_v15  ;;  %v571_v54 = vsel %vm6065_vm2, %v566_v41, %v570_v38  ;;  %v381_v59 = vshrl.u32 %v291_v49, 16  ;;  %v384_v60 = vshll.u32 %v291_v49, 16  ;;  %v6093_v20 = vld [vmem:[%s6044_s25 + $0x14] sm:$0x1]  ;;  %v5598_v22 = vld [vmem:[%s6044_s25 + $0x60] sm:$0xff]  ;;  %v5661_v30 = vld [vmem:[#allocation2 + $0x138] sm:$0xff] }
  0x2b   : > { %5722 = vmatpush.bf16.msra.mxu2 %v5617_v33  ;;  %873 = vmatpush.bf16.msra.mxu0 %v5617_v33  ;;  %v374_v47 = vrot.slane %v373_v36, 4  ;;  %v369_v61 = vsel %vm6065_vm2, %v364_v46, %v6057_v27  ;;  %v390_v63 = vshll.u32 %v6073_v52, 16  ;;  %v394_v0 = vshrl.u32 %v6073_v52, 16  ;;  %v5590_v26 = vld [vmem:[%s6044_s25] sm:$0xff]  ;;  %v309_v28 = vld [vmem:[%s6044_s25 + $0x78] sm:$0xf] }
  0x2c   : > { %5730 = vmatpush.bf16.msra.mxu3 %v5609_v34  ;;  %1106 = vmatpush.bf16.msra.mxu1 %v5609_v34  ;;  %v773_v1 = vunpack.c.l.b16 %v561_v53  ;;  %v774_v2 = vunpack.c.l.b16 %v571_v54  ;;  %v575_v4 = vrot.slane %v573_v50, 4  ;;  %v578_v5 = vrot.slane %v576_v51, 5  ;;  %v310_v33 = vld [vmem:[%s6044_s25 + $0x7c] sm:$0xf]  ;;  %v5652_v36 = vld [vmem:[#allocation2 + $0xf0] sm:$0xff]  ;;  %v5627_v49 = vld [vmem:[#allocation2 + $0xa8] sm:$0xff] }
  0x2d   : > { %v379_v62 = vsel %vm6065_vm2, %v374_v47, %v378_v48  ;;  %v6088_v6 = vrot.slane %v582_v55, 5  ;;  %v588_v7 = vrot.slane %v586_v56, 4  ;;  %v757_v10 = vunpack.c.l.b16 %v369_v61  ;;  %v5660_v47 = vld [vmem:[#allocation2 + $0x130] sm:$0xff]  ;;  %v293_v48 = vld [vmem:[%s6044_s25 + $0x18] sm:$0xf]  ;;  %v5651_v51 = vld [vmem:[#allocation2 + $0xe8] sm:$0xff] }
  0x2e   : > { %v758_v11 = vunpack.c.l.b16 %v379_v62  ;;  %v383_v12 = vrot.slane %v381_v59, 4  ;;  %v386_v13 = vrot.slane %v384_v60, 5  ;;  %v6090_v14 = vrot.slane %v390_v63, 5  ;;  %v6104_v50 = vld [vmem:[%s6044_s25 + $0x1c] sm:$0xf]  ;;  %s4835_s22 = sshll.u32 %s7314_s26, 3 }
  0x2f   : > { %5723 = vmatpush.bf16.msra.mxu2 %v5616_v43  ;;  %874 = vmatpush.bf16.msra.mxu0 %v5616_v43  ;;  %v396_v15 = vrot.slane %v394_v0, 4  ;;  %v592_v19 = vshll.u32 %v346_v3, 16  ;;  %v797_v21 = vpack.c.b16 %v774_v2, %v773_v1  ;;  %v579_v23 = vor.u32 %v578_v5, %v575_v4  ;;  %v5659_v2 = vld [vmem:[#allocation2 + $0x128] sm:$0xff]  ;;  %s7172_s29 = scalar_lea.vmem %s7276_s5, %s4835_s22 }
  0x30   : > { %5731 = vmatpush.bf16.msra.mxu3 %v5608_v44  ;;  %1107 = vmatpush.bf16.msra.mxu1 %v5608_v44  ;;  %v589_v24 = vor.u32 %v588_v7, %v6088_v6  ;;  %v789_v25 = vpack.c.b16 %v758_v11, %v757_v10  ;;  %v387_v27 = vor.u32 %v386_v13, %v383_v12  ;;  %v400_v32 = vshll.u32 %v6093_v20, 16 }
  0x31   : > { %v397_v31 = vor.u32 %v396_v15, %v6090_v14  ;;  %v594_v34 = vrot.slane %v592_v19, 5  ;;  %v580_v37 = vrot.slane %v579_v23, 4  ;;  %v597_v40 = vshrl.u32 %v309_v28, 16  ;;  %v5591_v19 = vld [vmem:[%s6044_s25 + $0xc] sm:$0xff] }
  0x32   : > { %v590_v38 = vrot.slane %v589_v24, 4  ;;  %v600_v41 = vshll.u32 %v309_v28, 16  ;;  %v388_v42 = vrot.slane %v387_v27, 4  ;;  %v606_v43 = vshll.u32 %v310_v33, 16  ;;  %v311_v27 = vld [vmem:[%s6044_s25 + $0x84] sm:$0xf] }
  0x33   : > { %5724 = vmatpush.bf16.msra.mxu2 %v5615_v57  ;;  %875 = vmatpush.bf16.msra.mxu0 %v5615_v57  ;;  %v610_v44 = vshrl.u32 %v310_v33, 16  ;;  %v398_v45 = vrot.slane %v397_v31, 4  ;;  %v402_v46 = vrot.slane %v400_v32, 5  ;;  %v585_v53 = vsel %vm6065_vm2, %v580_v37, %v6088_v6  ;;  %v312_v28 = vld [vmem:[%s6044_s25 + $0x88] sm:$0xf] }
  0x34   : > { %5732 = vmatpush.bf16.msra.mxu3 %v5607_v58  ;;  %1108 = vmatpush.bf16.msra.mxu1 %v5607_v58  ;;  %v595_v54 = vsel %vm6065_vm2, %v590_v38, %v594_v34  ;;  %v599_v55 = vrot.slane %v597_v40, 4  ;;  %v602_v56 = vrot.slane %v600_v41, 5  ;;  %v393_v57 = vsel %vm6065_vm2, %v388_v42, %v6090_v14  ;;  %v347_v58 = vld [vmem:[%s6044_s25 + $0x80] sm:$0x1]  ;;  %v295_v31 = vld [vmem:[%s6044_s25 + $0x24] sm:$0xf] }
  0x35   : > { %v608_v59 = vrot.slane %v606_v43, 5  ;;  %v612_v60 = vrot.slane %v610_v44, 4  ;;  %v405_v61 = vshrl.u32 %v293_v48, 16  ;;  %v403_v62 = vsel %vm6065_vm2, %v398_v45, %v402_v46  ;;  %v6120_v14 = vld [vmem:[%s6044_s25 + $0x20] sm:$0x1] }
  0x36   : > { %v408_v63 = vshll.u32 %v293_v48, 16  ;;  %v414_v0 = vshll.u32 %v6104_v50, 16  ;;  %v418_v1 = vshrl.u32 %v6104_v50, 16  ;;  %v775_v3 = vunpack.c.l.b16 %v585_v53  ;;  %v6131_v33 = vld [vmem:[%s6044_s25 + $0x28] sm:$0xf]  ;;  %v5650_v34 = vld [vmem:[#allocation2 + $0xe0] sm:$0xff] }
  0x37   : > { %5725 = vmatpush.bf16.msra.mxu2 %v5614_v8  ;;  %876 = vmatpush.bf16.msra.mxu0 %v5614_v8  ;;  %v776_v4 = vunpack.c.l.b16 %v595_v54  ;;  %v616_v5 = vshll.u32 %v347_v58, 16  ;;  %v759_v6 = vunpack.c.l.b16 %v393_v57  ;;  %v760_v7 = vunpack.c.l.b16 %v403_v62 }
  0x38   : > { %5733 = vmatpush.bf16.msra.mxu3 %v5606_v9  ;;  %1109 = vmatpush.bf16.msra.mxu1 %v5606_v9  ;;  %v603_v8 = vor.u32 %v602_v56, %v599_v55  ;;  %v407_v9 = vrot.slane %v405_v61, 4  ;;  %v613_v10 = vor.u32 %v612_v60, %v608_v59  ;;  %v410_v11 = vrot.slane %v408_v63, 5 }
  0x39   : > { %v416_v12 = vrot.slane %v414_v0, 5  ;;  %v420_v13 = vrot.slane %v418_v1, 4  ;;  %v798_v15 = vpack.c.b16 %v776_v4, %v775_v3  ;;  %v621_v41 = vshrl.u32 %v311_v27, 16 }
  0x3a   : > { %917 = vmatmul.bf16.vlgmr.msra.gmra.mxu2 %v797_v21  ;;  %877 = vmatmul.bf16.vlgmr.msra.gmra.mxu0 %v789_v25  ;;  %v604_v21 = vrot.slane %v603_v8, 4  ;;  %v614_v23 = vrot.slane %v613_v10, 4  ;;  %v411_v24 = vor.u32 %v410_v11, %v407_v9  ;;  %v624_v42 = vshll.u32 %v311_v27, 16 }
  0x3b   : > { %1483 = vmatpush.bf16.msrb.mxu2 %v5629_v17  ;;  %1150 = vmatmul.bf16.vlgmr.msra.gmra.mxu3 %v5598_v22  ;;  %v5599_v17 = vld [vmem:[%s6044_s25 + $0x6c] sm:$0xff]  ;;  %v618_v22 = vrot.slane %v616_v5, 5  ;;  %v421_v25 = vor.u32 %v420_v13, %v416_v12  ;;  %v630_v43 = vshll.u32 %v312_v28, 16  ;;  %v634_v44 = vshrl.u32 %v312_v28, 16 }
  0x3c   : > { %1798 = vmatpush.bf16.msrb.mxu3 %v5653_v18  ;;  %1110 = vmatmul.bf16.vlgmr.msra.gmra.mxu1 %v5590_v26  ;;  %v790_v18 = vpack.c.b16 %v760_v7, %v759_v6  ;;  %v424_v26 = vshll.u32 %v6120_v14, 16  ;;  %v609_v32 = vsel %vm6065_vm2, %v604_v21, %v608_v59  ;;  %v412_v37 = vrot.slane %v411_v24, 4  ;;  %v348_v59 = vld [vmem:[%s6044_s25 + $0x8c] sm:$0x1]  ;;  %v5600_v6 = vld [vmem:[%s6044_s25 + $0x78] sm:$0xff] }
  0x3d   : > { %2480 = vmatpush.bf16.msrb.mxu0 %v5661_v30  ;;  %v5626_v30 = vld [vmem:[#allocation2 + $0xa0] sm:$0xff]  ;;  %v422_v38 = vrot.slane %v421_v25, 4  ;;  %v429_v45 = vshrl.u32 %v295_v31, 16  ;;  %v432_v46 = vshll.u32 %v295_v31, 16  ;;  %v442_v48 = vshrl.u32 %v6131_v33, 16  ;;  %v5625_v24 = vld [vmem:[#allocation2 + $0x98] sm:$0xff] }
  0x3e   : > { %v426_v40 = vrot.slane %v424_v26, 5  ;;  %v417_v53 = vsel %vm6065_vm2, %v412_v37, %v416_v12  ;;  %v623_v55 = vrot.slane %v621_v41, 4  ;;  %v626_v56 = vrot.slane %v624_v42, 5  ;;  %v5592_v12 = vld [vmem:[%s6044_s25 + $0x18] sm:$0xff]  ;;  %v313_v13 = vld [vmem:[%s6044_s25 + $0x90] sm:$0xf] }
  0x3f   : > { %1484 = vmatpush.bf16.msrb.mxu2 %v5628_v35  ;;  %v5658_v35 = vld [vmem:[#allocation2 + $0x120] sm:$0xff]  ;;  %v632_v57 = vrot.slane %v630_v43, 5  ;;  %v636_v58 = vrot.slane %v634_v44, 4  ;;  %v431_v60 = vrot.slane %v429_v45, 4  ;;  %v434_v61 = vrot.slane %v432_v46, 5  ;;  %v5657_v31 = vld [vmem:[#allocation2 + $0x118] sm:$0xff] }
  0x40   : > { %1799 = vmatpush.bf16.msrb.mxu3 %v5652_v36  ;;  %v619_v36 = vsel %vm6065_vm2, %v614_v23, %v618_v22  ;;  %v427_v54 = vsel %vm6065_vm2, %v422_v38, %v426_v40  ;;  %v444_v63 = vrot.slane %v442_v48, 4  ;;  %v761_v0 = vunpack.c.l.b16 %v417_v53  ;;  %v349_v44 = vld [vmem:[%s6044_s25 + $0x98] sm:$0x1] }
  0x41   : > { %2481 = vmatpush.bf16.msrb.mxu0 %v5660_v47  ;;  %v438_v47 = vshll.u32 %v6131_v33, 16  ;;  %v762_v1 = vunpack.c.l.b16 %v427_v54  ;;  %v627_v4 = vor.u32 %v626_v56, %v623_v55  ;;  %v640_v5 = vshll.u32 %v348_v59, 16 }
  0x42   : > { %v637_v7 = vor.u32 %v636_v58, %v632_v57  ;;  %v435_v8 = vor.u32 %v434_v61, %v431_v60  ;;  %v645_v25 = vshrl.u32 %v313_v13, 16  ;;  %v648_v26 = vshll.u32 %v313_v13, 16  ;;  %v299_v13 = vld [vmem:[%s6044_s25 + $0x3c] sm:$0xf] }
  0x43   : > { %1485 = vmatpush.bf16.msrb.mxu2 %v5627_v49  ;;  %v777_v49 = vunpack.c.l.b16 %v609_v32  ;;  %v440_v62 = vrot.slane %v438_v47, 5  ;;  %v791_v11 = vpack.c.b16 %v762_v1, %v761_v0  ;;  %v297_v32 = vld [vmem:[%s6044_s25 + $0x30] sm:$0xf]  ;;  %v5601_v0 = vld [vmem:[%s6044_s25 + $0x84] sm:$0xff] }
  0x44   : > { %1800 = vmatpush.bf16.msrb.mxu3 %v5651_v51  ;;  %v778_v51 = vunpack.c.l.b16 %v619_v36  ;;  %v436_v21 = vrot.slane %v435_v8, 4  ;;  %v647_v40 = vrot.slane %v645_v25, 4  ;;  %v650_v41 = vrot.slane %v648_v26, 5 }
  0x45   : > { %2482 = vmatpush.bf16.msrb.mxu0 %v5659_v2  ;;  %v6143_v2 = vld [vmem:[%s6044_s25 + $0x2c] sm:$0x1]  ;;  %v445_v9 = vor.u32 %v444_v63, %v440_v62  ;;  %v453_v45 = vshrl.u32 %v297_v32, 16  ;;  %v456_v46 = vshll.u32 %v297_v32, 16 }
  0x46   : > { %v799_v3 = vpack.c.b16 %v778_v51, %v777_v49  ;;  %v448_v10 = vshll.u32 %v6143_v2, 16  ;;  %v441_v37 = vsel %vm6065_vm2, %v436_v21, %v440_v62  ;;  %v651_v55 = vor.u32 %v650_v41, %v647_v40  ;;  %v6166_v62 = vld [vmem:[%s6044_s25 + $0x38] sm:$0x1] }
  0x47   : > { %1486 = vmatpush.bf16.msrb.mxu2 %v5626_v30  ;;  %v446_v22 = vrot.slane %v445_v9, 4  ;;  %v5649_v30 = vld [vmem:[#allocation2 + $0xd8] sm:$0xff]  ;;  %v763_v53 = vunpack.c.l.b16 %v441_v37  ;;  %v455_v58 = vrot.slane %v453_v45, 4  ;;  %v458_v59 = vrot.slane %v456_v46, 5  ;;  %v350_v45 = vld [vmem:[%s6044_s25 + $0xa4] sm:$0x1] }
  0x48   : > { %1801 = vmatpush.bf16.msrb.mxu3 %v5650_v34  ;;  %v450_v23 = vrot.slane %v448_v10, 5  ;;  %v6152_v34 = vld [vmem:[%s6044_s25 + $0x34] sm:$0xf]  ;;  %v472_v9 = vshll.u32 %v6166_v62, 16  ;;  %v315_v10 = vld [vmem:[%s6044_s25 + $0x9c] sm:$0xf] }
  0x49   : > { %2483 = vmatpush.bf16.msrb.mxu0 %v5658_v35  ;;  %v462_v47 = vshll.u32 %v6152_v34, 16  ;;  %v466_v48 = vshrl.u32 %v6152_v34, 16  ;;  %v669_v25 = vshrl.u32 %v315_v10, 16  ;;  %v672_v26 = vshll.u32 %v315_v10, 16 }
  0x4a   : > { %922 = vmatmul.bf16.gmra.mxu2 %v798_v15  ;;  %882 = vmatmul.bf16.gmra.mxu0 %v790_v18  ;;  %v314_v15 = vld [vmem:[%s6044_s25 + $0x94] sm:$0xf]  ;;  %v642_v18 = vrot.slane %v640_v5, 5  ;;  %v451_v38 = vsel %vm6065_vm2, %v446_v22, %v450_v23 }
  0x4b   : > { %1155 = vmatmul.bf16.gmra.mxu3 %v5599_v17  ;;  %v628_v17 = vrot.slane %v627_v4, 4  ;;  %v654_v27 = vshll.u32 %v314_v15, 16  ;;  %v658_v28 = vshrl.u32 %v314_v15, 16  ;;  %1487 = vmatpush.bf16.msrb.mxu2 %v5625_v24  ;;  %v764_v54 = vunpack.c.l.b16 %v451_v38 }
  0x4c   : > { %1115 = vmatmul.bf16.gmra.mxu1 %v5591_v19  ;;  %v638_v19 = vrot.slane %v637_v7, 4  ;;  %1802 = vmatpush.bf16.msrb.mxu3 %v5649_v30  ;;  %v464_v60 = vrot.slane %v462_v47, 5  ;;  %v468_v61 = vrot.slane %v466_v48, 4  ;;  %v652_v4 = vrot.slane %v651_v55, 4 }
  0x4d   : > { %2484 = vmatpush.bf16.msrb.mxu0 %v5657_v31  ;;  %v633_v35 = vsel %vm6065_vm2, %v628_v17, %v632_v57  ;;  %v656_v42 = vrot.slane %v654_v27, 5  ;;  %v660_v43 = vrot.slane %v658_v28, 4  ;;  %v664_v57 = vshll.u32 %v349_v44, 16  ;;  %v6177_v17 = vld [vmem:[%s6044_s25 + $0x40] sm:$0xf] }
  0x4e   : > { %v643_v36 = vsel %vm6065_vm2, %v638_v19, %v642_v18  ;;  %v779_v49 = vunpack.c.l.b16 %v633_v35  ;;  %v792_v1 = vpack.c.b16 %v764_v54, %v763_v53  ;;  %v459_v7 = vor.u32 %v458_v59, %v455_v58  ;;  %v5648_v18 = vld [vmem:[#allocation2 + $0xd0] sm:$0xff]  ;;  %v6189_v54 = vld [vmem:[%s6044_s25 + $0x44] sm:$0x1] }
  0x4f   : > { %v780_v51 = vunpack.c.l.b16 %v643_v36  ;;  %v661_v56 = vor.u32 %v660_v43, %v656_v42  ;;  %v666_v5 = vrot.slane %v664_v57, 5  ;;  %v469_v8 = vor.u32 %v468_v61, %v464_v60  ;;  %v5656_v19 = vld [vmem:[#allocation2 + $0x110] sm:$0xff] }
  0x50   : > { %v657_v15 = vsel %vm6065_vm2, %v652_v4, %v656_v42  ;;  %v460_v22 = vrot.slane %v459_v7, 4  ;;  %v474_v24 = vrot.slane %v472_v9, 5  ;;  %1803 = vmatpush.bf16.msrb.mxu3 %v5648_v18  ;;  %v477_v30 = vshrl.u32 %v299_v13, 16  ;;  %v5602_v59 = vld [vmem:[%s6044_s25 + $0x90] sm:$0xff]  ;;  %v318_v4 = vld [vmem:[%s6044_s25 + $0xac] sm:$0xf] }
  0x51   : > { %v800_v63 = vpack.c.b16 %v780_v51, %v779_v49  ;;  %v470_v23 = vrot.slane %v469_v8, 4  ;;  %2485 = vmatpush.bf16.msrb.mxu0 %v5656_v19  ;;  %v480_v31 = vshll.u32 %v299_v13, 16  ;;  %v486_v32 = vshll.u32 %v6177_v17, 16  ;;  %v5647_v19 = vld [vmem:[#allocation2 + $0xc8] sm:$0xff] }
  0x52   : > { %v490_v35 = vshrl.u32 %v6177_v17, 16  ;;  %v781_v36 = vunpack.c.l.b16 %v657_v15  ;;  %v465_v38 = vsel %vm6065_vm2, %v460_v22, %v464_v60  ;;  %v671_v41 = vrot.slane %v669_v25, 4  ;;  %v5669_v22 = vld [vmem:[#allocation2 + $0x178] sm:$0xff] }
  0x53   : > { %v475_v40 = vsel %vm6065_vm2, %v470_v23, %v474_v24  ;;  %v674_v42 = vrot.slane %v672_v26, 5  ;;  %v479_v46 = vrot.slane %v477_v30, 4  ;;  %v482_v47 = vrot.slane %v480_v31, 5  ;;  %v301_v23 = vld [vmem:[%s6044_s25 + $0x48] sm:$0xf]  ;;  %2906 = vmatpush.bf16.msrb.mxu1 %v5669_v22  ;;  %v5654_v22 = vld [vmem:[#allocation2 + $0x100] sm:$0xff] }
  0x54   : > { %v488_v48 = vrot.slane %v486_v32, 5  ;;  %v492_v49 = vrot.slane %v490_v35, 4  ;;  %v765_v51 = vunpack.c.l.b16 %v465_v38  ;;  %v766_v53 = vunpack.c.l.b16 %v475_v40  ;;  %v6198_v24 = vld [vmem:[%s6044_s25 + $0x4c] sm:$0xf]  ;;  %1804 = vmatpush.bf16.msrb.mxu3 %v5647_v19 }
  0x55   : > { %v675_v55 = vor.u32 %v674_v42, %v671_v41  ;;  %v688_v57 = vshll.u32 %v350_v45, 16  ;;  %v483_v60 = vor.u32 %v482_v47, %v479_v46  ;;  %v702_v15 = vshll.u32 %v318_v4, 16 }
  0x56   : > { %v493_v61 = vor.u32 %v492_v49, %v488_v48  ;;  %v706_v18 = vshrl.u32 %v318_v4, 16  ;;  %v504_v38 = vshll.u32 %v301_v23, 16  ;;  %v510_v40 = vshll.u32 %v6198_v24, 16 }
  0x57   : > { %v690_v7 = vrot.slane %v688_v57, 5  ;;  %v484_v8 = vrot.slane %v483_v60, 4  ;;  %v704_v32 = vrot.slane %v702_v15, 5  ;;  %v514_v41 = vshrl.u32 %v6198_v24, 16  ;;  %v5595_v60 = vld [vmem:[%s6044_s25 + $0x3c] sm:$0xff] }
  0x58   : > { %v494_v9 = vrot.slane %v493_v61, 4  ;;  %v708_v35 = vrot.slane %v706_v18, 4 }
  0x5a   : > { %927 = vmatmul.bf16.gmra.mxu2 %v799_v3  ;;  %887 = vmatmul.bf16.gmra.mxu0 %v791_v11  ;;  %v5593_v3 = vld [vmem:[%s6044_s25 + $0x24] sm:$0xff]  ;;  %v316_v11 = vld [vmem:[%s6044_s25 + $0xa0] sm:$0xf]  ;;  %v709_v47 = vor.u32 %v708_v35, %v704_v32 }
  0x5b   : > { %1160 = vmatmul.bf16.gmra.mxu3 %v5600_v6  ;;  %v662_v6 = vrot.slane %v661_v56, 4  ;;  %v678_v27 = vshll.u32 %v316_v11, 16  ;;  %v682_v28 = vshrl.u32 %v316_v11, 16 }
  0x5c   : > { %1120 = vmatmul.bf16.gmra.mxu1 %v5592_v12  ;;  %v5624_v12 = vld [vmem:[#allocation2 + $0x90] sm:$0xff] }
  0x5d   : > { %v667_v21 = vsel %vm6065_vm2, %v662_v6, %v666_v5  ;;  %1488 = vmatpush.bf16.msrb.mxu2 %v5624_v12  ;;  %v680_v43 = vrot.slane %v678_v27, 5  ;;  %v684_v44 = vrot.slane %v682_v28, 4  ;;  %v676_v5 = vrot.slane %v675_v55, 4  ;;  %v5623_v12 = vld [vmem:[#allocation2 + $0x88] sm:$0xff] }
  0x5e   : > { %v782_v37 = vunpack.c.l.b16 %v667_v21  ;;  %v5655_v21 = vld [vmem:[#allocation2 + $0x108] sm:$0xff]  ;;  %v489_v27 = vsel %vm6065_vm2, %v484_v8, %v488_v48  ;;  %v516_v55 = vrot.slane %v514_v41, 4  ;;  %v5622_v8 = vld [vmem:[#allocation2 + $0x80] sm:$0xff] }
  0x5f   : > { %v685_v56 = vor.u32 %v684_v44, %v680_v43  ;;  %2486 = vmatpush.bf16.msrb.mxu0 %v5655_v21  ;;  %v681_v25 = vsel %vm6065_vm2, %v676_v5, %v680_v43  ;;  %v767_v44 = vunpack.c.l.b16 %v489_v27  ;;  %v5668_v5 = vld [vmem:[#allocation2 + $0x170] sm:$0xff]  ;;  %v5667_v21 = vld [vmem:[#allocation2 + $0x168] sm:$0xff] }
  0x60   : > { %v801_v58 = vpack.c.b16 %v782_v37, %v781_v36  ;;  %v351_v36 = vld [vmem:[%s6044_s25 + $0xb0] sm:$0x1]  ;;  %v501_v37 = vshrl.u32 %v301_v23, 16  ;;  %v783_v42 = vunpack.c.l.b16 %v681_v25  ;;  %2907 = vmatpush.bf16.msrb.mxu1 %v5668_v5  ;;  %v5596_v5 = vld [vmem:[%s6044_s25 + $0x48] sm:$0xff] }
  0x61   : > { %v686_v6 = vrot.slane %v685_v56, 4  ;;  %1489 = vmatpush.bf16.msrb.mxu2 %v5623_v12  ;;  %v712_v48 = vshll.u32 %v351_v36, 16  ;;  %v6212_v56 = vld [vmem:[%s6044_s25 + $0x50] sm:$0x1]  ;;  %v5646_v12 = vld [vmem:[#allocation2 + $0xc0] sm:$0xff] }
  0x62   : > { %v503_v49 = vrot.slane %v501_v37, 4  ;;  %v520_v4 = vshll.u32 %v6212_v56, 16  ;;  %1805 = vmatpush.bf16.msrb.mxu3 %v5646_v12 }
  0x63   : > { %v691_v26 = vsel %vm6065_vm2, %v686_v6, %v690_v7  ;;  %v319_v6 = vld [vmem:[%s6044_s25 + $0xb4] sm:$0xf]  ;;  %v320_v7 = vld [vmem:[%s6044_s25 + $0xb8] sm:$0xf]  ;;  %2487 = vmatpush.bf16.msrb.mxu0 %v5654_v22 }
  0x64   : > { %v784_v43 = vunpack.c.l.b16 %v691_v26  ;;  %v522_v19 = vrot.slane %v520_v4, 5  ;;  %v717_v23 = vshrl.u32 %v319_v6, 16  ;;  %v720_v25 = vshll.u32 %v319_v6, 16  ;;  %2908 = vmatpush.bf16.msrb.mxu1 %v5667_v21  ;;  %v5663_v21 = vld [vmem:[#allocation2 + $0x148] sm:$0xff] }
  0x65   : > { %1490 = vmatpush.bf16.msrb.mxu2 %v5622_v8  ;;  %v726_v26 = vshll.u32 %v320_v7, 16  ;;  %v730_v27 = vshrl.u32 %v320_v7, 16  ;;  %v5664_v8 = vld [vmem:[#allocation2 + $0x150] sm:$0xff] }
  0x66   : > { %v802_v57 = vpack.c.b16 %v784_v43, %v783_v42  ;;  %v719_v41 = vrot.slane %v717_v23, 4  ;;  %v722_v42 = vrot.slane %v720_v25, 5 }
  0x67   : > { %v728_v43 = vrot.slane %v726_v26, 5 }
  0x6a   : > { %932 = vmatmul.bf16.gmra.mxu2 %v800_v63  ;;  %892 = vmatmul.bf16.gmra.mxu0 %v792_v1  ;;  %v496_v63 = vshll.u32 %v6189_v54, 16  ;;  %v5594_v1 = vld [vmem:[%s6044_s25 + $0x30] sm:$0xff] }
  0x6b   : > { %1165 = vmatmul.bf16.gmra.mxu3 %v5601_v0  ;;  %v793_v0 = vpack.c.b16 %v766_v53, %v765_v51  ;;  %v506_v51 = vrot.slane %v504_v38, 5  ;;  %v512_v53 = vrot.slane %v510_v40, 5  ;;  %v5666_v40 = vld [vmem:[#allocation2 + $0x160] sm:$0xff] }
  0x6c   : > { %1125 = vmatmul.bf16.gmra.mxu1 %v5593_v3  ;;  %v317_v3 = vld [vmem:[%s6044_s25 + $0xa8] sm:$0xf]  ;;  %v498_v10 = vrot.slane %v496_v63, 5  ;;  %v714_v63 = vrot.slane %v712_v48, 5 }
  0x6d   : > { %v693_v11 = vshrl.u32 %v317_v3, 16  ;;  %v696_v13 = vshll.u32 %v317_v3, 16  ;;  %v517_v3 = vor.u32 %v516_v55, %v512_v53  ;;  %2909 = vmatpush.bf16.msrb.mxu1 %v5666_v40 }
  0x6e   : > { %v499_v28 = vsel %vm6065_vm2, %v494_v9, %v498_v10  ;;  %v303_v10 = vld [vmem:[%s6044_s25 + $0x54] sm:$0xf] }
  0x6f   : > { %v695_v30 = vrot.slane %v693_v11, 4  ;;  %v698_v31 = vrot.slane %v696_v13, 5  ;;  %v768_v45 = vunpack.c.l.b16 %v499_v28  ;;  %v304_v11 = vld [vmem:[%s6044_s25 + $0x58] sm:$0xf]  ;;  %v518_v18 = vrot.slane %v517_v3, 4 }
  0x70   : > { %v525_v28 = vshrl.u32 %v303_v10, 16 }
  0x71   : > { %v699_v46 = vor.u32 %v698_v31, %v695_v30  ;;  %v528_v30 = vshll.u32 %v303_v10, 16  ;;  %v534_v31 = vshll.u32 %v304_v11, 16  ;;  %v523_v38 = vsel %vm6065_vm2, %v518_v18, %v522_v19  ;;  %v5140_v18 = vld [vmem:[%s6044_s25 + $0xc] sm:$0xf]  ;;  %v6238_v19 = vld [vmem:[%s6044_s25 + $0x10] sm:$0xf] }
  0x72   : > { %v770_v55 = vunpack.c.l.b16 %v523_v38 }
  0x73   : > { %v700_v61 = vrot.slane %v699_v46, 4  ;;  %v527_v46 = vrot.slane %v525_v28, 4  ;;  %v536_v48 = vrot.slane %v534_v31, 5  ;;  %v1971_v28 = vshll.u32 %v5140_v18, 16 }
  0x74   : > { %v1981_v31 = vshrl.u32 %v6238_v19, 16 }
  0x75   : > { %v705_v9 = vsel %vm6065_vm2, %v700_v61, %v704_v32  ;;  %v538_v32 = vshrl.u32 %v304_v11, 16  ;;  %v5604_v61 = vld [vmem:[%s6044_s25 + $0xa8] sm:$0xff] }
  0x76   : > { %v785_v35 = vunpack.c.l.b16 %v705_v9 }
  0x7a   : > { %937 = vmatmul.bf16.gmra.mxu2 %v801_v58  ;;  %897 = vmatmul.bf16.gmra.mxu0 %v793_v0  ;;  %v5603_v58 = vld [vmem:[%s6044_s25 + $0x9c] sm:$0xff]  ;;  %v710_v0 = vrot.slane %v709_v47, 4  ;;  %v530_v47 = vrot.slane %v528_v30, 5  ;;  %v1977_v30 = vshll.u32 %v6238_v19, 16 }
  0x7b   : > { %1170 = vmatmul.bf16.gmra.mxu3 %v5602_v59  ;;  %v794_v59 = vpack.c.b16 %v768_v45, %v767_v44  ;;  %v732_v44 = vrot.slane %v730_v27, 4  ;;  %v352_v45 = vld [vmem:[%s6044_s25 + $0xbc] sm:$0x1]  ;;  %v1968_v27 = vshrl.u32 %v5140_v18, 16 }
  0x7c   : > { %1130 = vmatmul.bf16.gmra.mxu1 %v5594_v1  ;;  %v507_v1 = vor.u32 %v506_v51, %v503_v49  ;;  %v715_v13 = vsel %vm6065_vm2, %v710_v0, %v714_v63  ;;  %v540_v49 = vrot.slane %v538_v32, 4  ;;  %v531_v0 = vor.u32 %v530_v47, %v527_v46  ;;  %v5662_v32 = vld [vmem:[#allocation2 + $0x140] sm:$0xff]  ;;  %v5142_v46 = vld [vmem:[%s6044_s25 + $0x14] sm:$0x1] }
  0x7d   : > { %v786_v36 = vunpack.c.l.b16 %v715_v13  ;;  %v733_v63 = vor.u32 %v732_v44, %v728_v43  ;;  %v5693_v13 = vld [vmem:[#allocation2 + $0x1b8] sm:$0xff]  ;;  %v1983_v44 = vrot.slane %v1981_v31, 4 }
  0x7e   : > { %v508_v15 = vrot.slane %v507_v1, 4  ;;  %v541_v1 = vor.u32 %v540_v49, %v536_v48  ;;  %v532_v10 = vrot.slane %v531_v0, 4  ;;  %3221 = vmatpush.bf16.msra.mxu2 %v5693_v13  ;;  %v5220_v0 = vld [vmem:[%s6044_s25 + $0xc] sm:$0xe] }
  0x7f   : > { %v734_v9 = vrot.slane %v733_v63, 4 }
  0x80   : > { %v513_v37 = vsel %vm6065_vm2, %v508_v15, %v512_v53  ;;  %v5665_v53 = vld [vmem:[#allocation2 + $0x158] sm:$0xff]  ;;  %v542_v11 = vrot.slane %v541_v1, 4  ;;  %v537_v25 = vsel %vm6065_vm2, %v532_v10, %v536_v48  ;;  %v2670_v10 = vrot.slane %v5142_v46, 5 }
  0x81   : > { %v769_v51 = vunpack.c.l.b16 %v513_v37  ;;  %2910 = vmatpush.bf16.msrb.mxu1 %v5665_v53  ;;  %v5701_v15 = vld [vmem:[#allocation2 + $0x1f8] sm:$0xff]  ;;  %v771_v38 = vunpack.c.l.b16 %v537_v25 }
  0x82   : > { %3903 = vmatpush.bf16.msra.mxu3 %v5701_v15  ;;  %v5605_v48 = vld [vmem:[%s6044_s25 + $0xb4] sm:$0xff] }
  0x83   : > { %v795_v4 = vpack.c.b16 %v770_v55, %v769_v51  ;;  %v1191_v51 = vld [vmem:[%s6044_s25] sm:$0xe]  ;;  %v5597_v55 = vld [vmem:[%s6044_s25 + $0x54] sm:$0xff] }
  0x85   : > { %2911 = vmatpush.bf16.msrb.mxu1 %v5664_v8  ;;  %v5236_v8 = vrot.slane %v5220_v0, 9  ;;  %v5692_v0 = vld [vmem:[#allocation2 + $0x1b0] sm:$0xff] }
  0x86   : > { %3222 = vmatpush.bf16.msra.mxu2 %v5692_v0 }
  0x89   : > { %2912 = vmatpush.bf16.msrb.mxu1 %v5663_v21 }
  0x8a   : > { %942 = vmatmul.bf16.gmra.mxu2 %v802_v57  ;;  %902 = vmatmul.bf16.gmra.mxu0 %v794_v59  ;;  %v6231_v57 = vld [vmem:[%s6044_s25 + $0x5c] sm:$0x1]  ;;  %v723_v59 = vor.u32 %v722_v42, %v719_v41  ;;  %v1970_v41 = vrot.slane %v1968_v27, 4  ;;  %v1973_v42 = vrot.slane %v1971_v28, 5 }
  0x8b   : > { %1175 = vmatmul.bf16.gmra.mxu3 %v5603_v58  ;;  %v803_v58 = vpack.c.b16 %v786_v36, %v785_v35  ;;  %v544_v3 = vshll.u32 %v6231_v57, 16  ;;  %v5709_v35 = vld [vmem:[#allocation2 + $0x238] sm:$0xff] }
  0x8c   : > { %1135 = vmatmul.bf16.gmra.mxu1 %v5595_v60  ;;  %v736_v60 = vshll.u32 %v352_v45, 16  ;;  %v724_v6 = vrot.slane %v723_v59, 4  ;;  %4329 = vmatpush.bf16.msra.mxu0 %v5709_v35  ;;  %v1244_v45 = vrot.slane %v6052_v16, 5  ;;  %v1974_v53 = vor.u32 %v1973_v42, %v1970_v41  ;;  %v5630_v42 = vld [vmem:[%s6044_s25 + $0xc] sm:$0xff] }
  0x8d   : > { %v546_v12 = vrot.slane %v544_v3, 5  ;;  %2913 = vmatpush.bf16.msrb.mxu1 %v5662_v32  ;;  %v1987_v59 = vshll.u32 %v5142_v46, 16  ;;  %v1247_v16 = vrot.slane %v6060_v29, 5 }
  0x8e   : > { %v738_v7 = vrot.slane %v736_v60, 5  ;;  %v729_v22 = vsel %vm6065_vm2, %v724_v6, %v728_v43  ;;  %v1979_v43 = vrot.slane %v1977_v30, 5  ;;  %v2667_v60 = vrot.slane %v6238_v19, 5  ;;  %v6264_v6 = vld [vmem:[%s6044_s25 + $0x1c] sm:$0xf] }
  0x8f   : > { %v547_v26 = vsel %vm6065_vm2, %v542_v11, %v546_v12  ;;  %v787_v36 = vunpack.c.l.b16 %v729_v22  ;;  %v1246_v63 = vrot.slane %v1244_v45, 4  ;;  %v1975_v3 = vrot.slane %v1974_v53, 4 }
  0x90   : > { %v739_v23 = vsel %vm6065_vm2, %v734_v9, %v738_v7  ;;  %v772_v40 = vunpack.c.l.b16 %v547_v26  ;;  %v1989_v7 = vrot.slane %v1987_v59, 5  ;;  %v2669_v9 = vrot.slane %v2667_v60, 4 }
  0x91   : > { %v788_v37 = vunpack.c.l.b16 %v739_v23  ;;  %v1248_v11 = vsel %vm6258_vm5, %v1246_v63, %v1247_v16  ;;  %v2001_v15 = vshll.u32 %v6264_v6, 16  ;;  %v2005_v18 = vshrl.u32 %v6264_v6, 16 }
  0x92   : > { %v796_v49 = vpack.c.b16 %v772_v40, %v771_v38  ;;  %v1980_v19 = vsel %vm6065_vm2, %v1975_v3, %v1979_v43  ;;  %v2668_v22 = vsel %vm6258_vm5, %v5236_v8, %v2667_v60  ;;  %v2671_v23 = vsel %vm6258_vm5, %v2669_v9, %v2670_v10  ;;  %v5145_v38 = vld [vmem:[%s6044_s25 + $0x20] sm:$0x1]  ;;  %v6291_v8 = vld [vmem:[%s6044_s25 + $0x28] sm:$0xf] }
  0x93   : > { %v804_v47 = vpack.c.b16 %v788_v37, %v787_v36  ;;  %v1372_v26 = vunpack.c.l.b16 %v1248_v11  ;;  %v2003_v30 = vrot.slane %v2001_v15, 5  ;;  %v2007_v31 = vrot.slane %v2005_v18, 4 }
  0x94   : > { %v2368_v32 = vunpack.c.l.b16 %v1980_v19  ;;  %v2794_v36 = vunpack.c.l.b16 %v2668_v22  ;;  %v2795_v37 = vunpack.c.l.b16 %v2671_v23  ;;  %v1251_v40 = vrot.slane %v6073_v52, 5 }
  0x95   : > { %v2011_v46 = vshll.u32 %v5145_v38, 16  ;;  %v2674_v53 = vrot.slane %v6264_v6, 5  ;;  %v1254_v52 = vrot.slane %v6093_v20, 5  ;;  %v2677_v6 = vrot.slane %v5145_v38, 5 }
  0x96   : > { %v1253_v60 = vrot.slane %v1251_v40, 4  ;;  %v2029_v22 = vshrl.u32 %v6291_v8, 16 }
  0x97   : > { %v2013_v16 = vrot.slane %v2011_v46, 5 }
  0x9a   : > { %947 = vmatmul.bf16.gmra.mxu2 %v803_v58  ;;  %907 = vmatmul.bf16.gmra.mxu0 %v795_v4  ;;  %v1984_v58 = vor.u32 %v1983_v44, %v1979_v43  ;;  %v1192_v43 = vld [vmem:[%s6044_s25 + $0xc] sm:$0xe] }
  0x9b   : > { %1180 = vmatmul.bf16.gmra.mxu3 %v5604_v61  ;;  %v4964_v61 = vrot.slane %v1191_v51, 9  ;;  %v4965_v59 = vrot.slane %v1192_v43, 9  ;;  %v5148_v43 = vld [vmem:[%s6044_s25 + $0x2c] sm:$0x1] }
  0x9c   : > { %1140 = vmatmul.bf16.gmra.mxu1 %v5596_v5  ;;  %v1985_v4 = vrot.slane %v1984_v58, 4  ;;  %v5143_v5 = vld [vmem:[%s6044_s25 + $0x18] sm:$0xf] }
  0x9d   : > { %v1245_v29 = vsel %vm6258_vm5, %v4964_v61, %v1244_v45  ;;  %v1992_v12 = vshrl.u32 %v5143_v5, 16  ;;  %v1995_v13 = vshll.u32 %v5143_v5, 16  ;;  %v2008_v45 = vor.u32 %v2007_v31, %v2003_v30  ;;  %v5700_v5 = vld [vmem:[#allocation2 + $0x1f0] sm:$0xff] }
  0x9e   : > { %v1990_v21 = vsel %vm6065_vm2, %v1985_v4, %v1989_v7  ;;  %v1371_v25 = vunpack.c.l.b16 %v1245_v29  ;;  %v5146_v4 = vld [vmem:[%s6044_s25 + $0x24] sm:$0xf]  ;;  %v2676_v7 = vrot.slane %v2674_v53, 4  ;;  %v1252_v20 = vsel %vm6258_vm5, %v4965_v59, %v1251_v40  ;;  %3904 = vmatpush.bf16.msra.mxu3 %v5700_v5  ;;  %v5708_v31 = vld [vmem:[#allocation2 + $0x230] sm:$0xff] }
  0x9f   : > { %v1994_v27 = vrot.slane %v1992_v12, 4  ;;  %v1997_v28 = vrot.slane %v1995_v13, 5  ;;  %v2369_v35 = vunpack.c.l.b16 %v1990_v21  ;;  %v2009_v63 = vrot.slane %v2008_v45, 4  ;;  %4330 = vmatpush.bf16.msra.mxu0 %v5708_v31 }
  0xa0   : > { %v1403_v41 = vpack.c.b16 %v1372_v26, %v1371_v25  ;;  %v1255_v29 = vsel %vm6258_vm5, %v1253_v60, %v1254_v52  ;;  %v2016_v15 = vshrl.u32 %v5146_v4, 16  ;;  %v2019_v19 = vshll.u32 %v5146_v4, 16 }
  0xa1   : > { %v1998_v44 = vor.u32 %v1997_v28, %v1994_v27  ;;  %v2014_v13 = vsel %vm6065_vm2, %v2009_v63, %v2013_v16  ;;  %v2025_v21 = vshll.u32 %v6291_v8, 16  ;;  %v2678_v26 = vsel %vm6258_vm5, %v2676_v7, %v2677_v6 }
  0xa2   : > { %v1373_v28 = vunpack.c.l.b16 %v1252_v20  ;;  %v2797_v38 = vunpack.c.l.b16 %v2678_v26  ;;  %v2021_v40 = vrot.slane %v2019_v19, 5  ;;  %v2035_v52 = vshll.u32 %v5148_v43, 16 }
  0xa3   : > { %v1999_v61 = vrot.slane %v1998_v44, 4  ;;  %v2681_v16 = vrot.slane %v6291_v8, 5  ;;  %v5149_v8 = vld [vmem:[%s6044_s25 + $0x30] sm:$0xf] }
  0xa5   : > { %v2004_v12 = vsel %vm6065_vm2, %v1999_v61, %v2003_v30  ;;  %v1374_v30 = vunpack.c.l.b16 %v1255_v29  ;;  %v2683_v20 = vrot.slane %v2681_v16, 4  ;;  %v2684_v29 = vrot.slane %v5148_v43, 5 }
  0xa7   : > { %v2685_v31 = vsel %vm6258_vm5, %v2683_v20, %v2684_v29 }
  0xa8   : > { %v2799_v43 = vunpack.c.l.b16 %v2685_v31 }
  0xaa   : > { %952 = vmatmul.bf16.gmra.mxu2 %v804_v47  ;;  %912 = vmatmul.bf16.gmra.mxu0 %v796_v49  ;;  %v2400_v47 = vpack.c.b16 %v2369_v35, %v2368_v32  ;;  %v2370_v32 = vunpack.c.l.b16 %v2004_v12  ;;  %v2371_v35 = vunpack.c.l.b16 %v2014_v13 }
  0xab   : > { %1185 = vmatmul.bf16.gmra.mxu3 %v5605_v48  ;;  %v2826_v48 = vpack.c.b16 %v2795_v37, %v2794_v36  ;;  %v2018_v37 = vrot.slane %v2016_v15, 4  ;;  %v6324_v15 = vld [vmem:[%s6044_s25 + $0x34] sm:$0xf] }
  0xac   : > { %1145 = vmatmul.bf16.gmra.mxu1 %v5597_v55  ;;  %v5221_v55 = vld [vmem:[%s6044_s25 + $0x18] sm:$0xe] }
  0xad   : > { %v5237_v3 = vrot.slane %v5221_v55, 9  ;;  %v2022_v59 = vor.u32 %v2021_v40, %v2018_v37 }
  0xaf   : > { %v2675_v18 = vsel %vm6258_vm5, %v5237_v3, %v2674_v53  ;;  %v1193_v53 = vld [vmem:[%s6044_s25 + $0x18] sm:$0xe]  ;;  %v5222_v3 = vld [vmem:[%s6044_s25 + $0x24] sm:$0xe]  ;;  %v2023_v7 = vrot.slane %v2022_v59, 4 }
  0xb0   : > { %v2796_v36 = vunpack.c.l.b16 %v2675_v18  ;;  %v4966_v4 = vrot.slane %v1193_v53, 9 }
  0xb2   : > { %v2827_v55 = vpack.c.b16 %v2797_v38, %v2796_v36 }
  0xb7   : > { %v878_v49 = vpop.f32.mrf.mxu0 }
  0xb9   : > { %v1111_v51 = vpop.f32.mrf.mxu1 }
  0xba   : > { %v6286_v58 = vadd.f32 %v1111_v51, %v878_v49  ;;  %1491 = vmatmul.bf16.vlgmr.msrb.gmra.mxu2 %v1403_v41  ;;  %2488 = vmatmul.bf16.vlgmr.msrb.gmra.mxu0 %v2400_v47  ;;  %v2027_v41 = vrot.slane %v2025_v21, 5  ;;  %v1404_v47 = vpack.c.b16 %v1374_v30, %v1373_v28  ;;  %v2401_v49 = vpack.c.b16 %v2371_v35, %v2370_v32 }
  0xbb   : > { %1806 = vmatmul.bf16.vlgmr.msrb.gmra.mxu3 %v5630_v42  ;;  %v2031_v42 = vrot.slane %v2029_v22, 4  ;;  %v1258_v51 = vrot.slane %v6104_v50, 5  ;;  %v1261_v50 = vrot.slane %v6120_v14, 5  ;;  %v2049_v32 = vshll.u32 %v6324_v15, 16 }
  0xbc   : > { %2914 = vmatmul.bf16.vlgmr.msrb.gmra.mxu1 %v2826_v48  ;;  %v5631_v48 = vld [vmem:[%s6044_s25 + $0x18] sm:$0xff]  ;;  %v2028_v21 = vsel %vm6065_vm2, %v2023_v7, %v2027_v41  ;;  %v2053_v35 = vshrl.u32 %v6324_v15, 16 }
  0xbd   : > { %v918_v9 = vpop.f32.mrf.mxu2  ;;  %v2032_v60 = vor.u32 %v2031_v42, %v2027_v41  ;;  %v1260_v5 = vrot.slane %v1258_v51, 4  ;;  %v1259_v19 = vsel %vm6258_vm5, %v4966_v4, %v1258_v51  ;;  %v2372_v40 = vunpack.c.l.b16 %v2028_v21  ;;  %v5699_v21 = vld [vmem:[#allocation2 + $0x1e8] sm:$0xff] }
  0xbe   : > { %v1151_v10 = vpop.f32.mrf.mxu3  ;;  %v1375_v37 = vunpack.c.l.b16 %v1259_v19  ;;  %3905 = vmatpush.bf16.msra.mxu3 %v5699_v21 }
  0xbf   : > { %v6297_v11 = vadd.f32 %v1151_v10, %v918_v9  ;;  %v880_v23 = vpop.f32.mrf.mxu0  ;;  %v2033_v6 = vrot.slane %v2032_v60, 4  ;;  %v2037_v9 = vrot.slane %v2035_v52, 5  ;;  %v5238_v10 = vrot.slane %v5222_v3, 9  ;;  %v5632_v60 = vld [vmem:[%s6044_s25 + $0x24] sm:$0xff] }
  0xc0   : > { %v1262_v14 = vsel %vm6258_vm5, %v1260_v5, %v1261_v50  ;;  %v1265_v52 = vrot.slane %v6131_v33, 5  ;;  %v5691_v33 = vld [vmem:[#allocation2 + $0x1a8] sm:$0xff] }
  0xc1   : > { %v1113_v25 = vpop.f32.mrf.mxu1  ;;  %v2038_v22 = vsel %vm6065_vm2, %v2033_v6, %v2037_v9  ;;  %v2682_v30 = vsel %vm6258_vm5, %v5238_v10, %v2681_v16  ;;  %v1376_v38 = vunpack.c.l.b16 %v1262_v14  ;;  %v1194_v16 = vld [vmem:[%s6044_s25 + $0x24] sm:$0xe]  ;;  %v2688_v6 = vrot.slane %v6324_v15, 5  ;;  %v5223_v10 = vld [vmem:[%s6044_s25 + $0x30] sm:$0xe]  ;;  %3223 = vmatpush.bf16.msra.mxu2 %v5691_v33 }
  0xc2   : > { %v6309_v27 = vadd.f32 %v1113_v25, %v880_v23  ;;  %v2040_v23 = vshrl.u32 %v5149_v8, 16  ;;  %v2043_v25 = vshll.u32 %v5149_v8, 16  ;;  %v2373_v41 = vunpack.c.l.b16 %v2038_v22  ;;  %v5152_v8 = vld [vmem:[%s6044_s25 + $0x3c] sm:$0xf]  ;;  %v6357_v14 = vld [vmem:[%s6044_s25 + $0x40] sm:$0xf] }
  0xc3   : > { %v2798_v42 = vunpack.c.l.b16 %v2682_v30  ;;  %v1405_v59 = vpack.c.b16 %v1376_v38, %v1375_v37  ;;  %v4967_v20 = vrot.slane %v1194_v16, 9  ;;  %v1267_v29 = vrot.slane %v1265_v52, 4  ;;  %v5633_v33 = vld [vmem:[%s6044_s25 + $0x30] sm:$0xff] }
  0xc4   : > { %v5239_v15 = vrot.slane %v5223_v10, 9  ;;  %v2064_v30 = vshrl.u32 %v5152_v8, 16  ;;  %v2067_v31 = vshll.u32 %v5152_v8, 16  ;;  %v2695_v21 = vrot.slane %v6357_v14, 5 }
  0xc5   : > { %v920_v44 = vpop.f32.mrf.mxu2  ;;  %v1266_v37 = vsel %vm6258_vm5, %v4967_v20, %v1265_v52 }
  0xc6   : > { %v1153_v45 = vpop.f32.mrf.mxu3 }
  0xc7   : > { %v6312_v46 = vadd.f32 %v1153_v45, %v920_v44  ;;  %v883_v61 = vpop.f32.mrf.mxu0  ;;  %v2042_v44 = vrot.slane %v2040_v23, 4  ;;  %v2045_v45 = vrot.slane %v2043_v25, 5  ;;  %v2690_v23 = vrot.slane %v2688_v6, 4 }
  0xc9   : > { %v1116_v63 = vpop.f32.mrf.mxu1  ;;  %v2046_v3 = vor.u32 %v2045_v45, %v2042_v44  ;;  %v2689_v44 = vsel %vm6258_vm5, %v5239_v15, %v2688_v6  ;;  %v1272_v6 = vrot.slane %v6152_v34, 5 }
  0xca   : > { %v6318_v0 = vadd.f32 %v1116_v63, %v883_v61  ;;  %1496 = vmatmul.bf16.gmra.mxu2 %v1404_v47  ;;  %2493 = vmatmul.bf16.gmra.mxu0 %v2401_v49  ;;  %v5151_v47 = vld [vmem:[%s6044_s25 + $0x38] sm:$0x1]  ;;  %v2055_v49 = vrot.slane %v2053_v35, 4  ;;  %v2402_v61 = vpack.c.b16 %v2373_v41, %v2372_v40  ;;  %v2828_v63 = vpack.c.b16 %v2799_v43, %v2798_v42 }
  0xcb   : > { %1811 = vmatmul.bf16.gmra.mxu3 %v5631_v48  ;;  %v2051_v48 = vrot.slane %v2049_v32, 5  ;;  %v2059_v4 = vshll.u32 %v5151_v47, 16  ;;  %v2691_v25 = vrot.slane %v5151_v47, 5  ;;  %v2073_v35 = vshll.u32 %v6357_v14, 16 }
  0xcc   : > { %2919 = vmatmul.bf16.gmra.mxu1 %v2827_v55  ;;  %v2800_v16 = vunpack.c.l.b16 %v2689_v44  ;;  %v1274_v34 = vrot.slane %v1272_v6, 4 }
  0xcd   : > { %v923_v12 = vpop.f32.mrf.mxu2  ;;  %v2056_v7 = vor.u32 %v2055_v49, %v2051_v48  ;;  %v2061_v19 = vrot.slane %v2059_v4, 5  ;;  %v2692_v45 = vsel %vm6258_vm5, %v2690_v23, %v2691_v25  ;;  %v2066_v49 = vrot.slane %v2064_v30, 4  ;;  %v5154_v4 = vld [vmem:[%s6044_s25 + $0x44] sm:$0x1]  ;;  %v5224_v25 = vld [vmem:[%s6044_s25 + $0x3c] sm:$0xe] }
  0xce   : > { %v1156_v13 = vpop.f32.mrf.mxu3 }
  0xcf   : > { %v6326_v18 = vadd.f32 %v1156_v13, %v923_v12  ;;  %v885_v26 = vpop.f32.mrf.mxu0  ;;  %v1268_v12 = vrot.slane %v6143_v2, 5  ;;  %v2047_v13 = vrot.slane %v2046_v3, 4  ;;  %v2057_v22 = vrot.slane %v2056_v7, 4  ;;  %v1195_v7 = vld [vmem:[%s6044_s25 + $0x30] sm:$0xe] }
  0xd0   : > { %v2077_v2 = vshrl.u32 %v6357_v14, 16  ;;  %v2801_v3 = vunpack.c.l.b16 %v2692_v45  ;;  %v4968_v23 = vrot.slane %v1195_v7, 9  ;;  %v2697_v14 = vrot.slane %v2695_v21, 4 }
  0xd1   : > { %v1118_v28 = vpop.f32.mrf.mxu1  ;;  %v1269_v38 = vsel %vm6258_vm5, %v1267_v29, %v1268_v12  ;;  %v2052_v42 = vsel %vm6065_vm2, %v2047_v13, %v2051_v48  ;;  %v2062_v43 = vsel %vm6065_vm2, %v2057_v22, %v2061_v19  ;;  %v2075_v48 = vrot.slane %v2073_v35, 5 }
  0xd2   : > { %v6342_v36 = vadd.f32 %v1118_v28, %v885_v26  ;;  %v2079_v52 = vrot.slane %v2077_v2, 4  ;;  %v2083_v12 = vshll.u32 %v5154_v4, 16  ;;  %v2829_v19 = vpack.c.b16 %v2801_v3, %v2800_v16 }
  0xd3   : > { %v5240_v2 = vrot.slane %v5224_v25, 9  ;;  %v1279_v25 = vrot.slane %v6177_v17, 5  ;;  %v1282_v17 = vrot.slane %v6189_v54, 5 }
  0xd4   : > { %v2080_v8 = vor.u32 %v2079_v52, %v2075_v48  ;;  %v2085_v35 = vrot.slane %v2083_v12, 5  ;;  %v5157_v12 = vld [vmem:[%s6044_s25 + $0x50] sm:$0x1] }
  0xd5   : > { %v925_v51 = vpop.f32.mrf.mxu2 }
  0xd6   : > { %v1158_v55 = vpop.f32.mrf.mxu3 }
  0xd7   : > { %v6345_v53 = vadd.f32 %v1158_v55, %v925_v51  ;;  %v888_v5 = vpop.f32.mrf.mxu0  ;;  %v2069_v51 = vrot.slane %v2067_v31, 5  ;;  %v5707_v55 = vld [vmem:[#allocation2 + $0x228] sm:$0xff]  ;;  %v2081_v31 = vrot.slane %v2080_v8, 4 }
  0xd8   : > { %4331 = vmatpush.bf16.msra.mxu0 %v5707_v55 }
  0xd9   : > { %v1121_v50 = vpop.f32.mrf.mxu1  ;;  %v2070_v10 = vor.u32 %v2069_v51, %v2066_v49  ;;  %v2086_v49 = vsel %vm6065_vm2, %v2081_v31, %v2085_v35  ;;  %v2107_v35 = vshll.u32 %v5157_v12, 16 }
  0xda   : > { %v6351_v9 = vadd.f32 %v1121_v50, %v888_v5  ;;  %1501 = vmatmul.bf16.gmra.mxu2 %v1405_v59  ;;  %2498 = vmatmul.bf16.gmra.mxu0 %v2402_v61  ;;  %v1377_v59 = vunpack.c.l.b16 %v1266_v37  ;;  %v2374_v61 = vunpack.c.l.b16 %v2052_v42  ;;  %v2698_v37 = vrot.slane %v5154_v4, 5 }
  0xdb   : > { %1816 = vmatmul.bf16.gmra.mxu3 %v5632_v60  ;;  %v1378_v60 = vunpack.c.l.b16 %v1269_v38  ;;  %v2071_v30 = vrot.slane %v2070_v10, 4  ;;  %v5155_v38 = vld [vmem:[%s6044_s25 + $0x48] sm:$0xf] }
  0xdc   : > { %2924 = vmatmul.bf16.gmra.mxu1 %v2828_v63  ;;  %v2375_v63 = vunpack.c.l.b16 %v2062_v43  ;;  %v1273_v43 = vsel %vm6258_vm5, %v4968_v23, %v1272_v6  ;;  %v2088_v51 = vshrl.u32 %v5155_v38, 16  ;;  %v2091_v55 = vshll.u32 %v5155_v38, 16 }
  0xdd   : > { %v928_v26 = vpop.f32.mrf.mxu2  ;;  %v1406_v29 = vpack.c.b16 %v1378_v60, %v1377_v59  ;;  %v2076_v44 = vsel %vm6065_vm2, %v2071_v30, %v2075_v48  ;;  %v2696_v59 = vsel %vm6258_vm5, %v5240_v2, %v2695_v21  ;;  %v2699_v60 = vsel %vm6258_vm5, %v2697_v14, %v2698_v37 }
  0xde   : > { %v1161_v28 = vpop.f32.mrf.mxu3  ;;  %v2403_v13 = vpack.c.b16 %v2375_v63, %v2374_v61  ;;  %v1379_v3 = vunpack.c.l.b16 %v1273_v43  ;;  %v2802_v7 = vunpack.c.l.b16 %v2696_v59  ;;  %v2803_v6 = vunpack.c.l.b16 %v2699_v60 }
  0xdf   : > { %v6359_v32 = vadd.f32 %v1161_v28, %v928_v26  ;;  %v890_v40 = vpop.f32.mrf.mxu0  ;;  %v1275_v28 = vrot.slane %v6166_v62, 5  ;;  %v2090_v10 = vrot.slane %v2088_v51, 4  ;;  %v1281_v43 = vrot.slane %v1279_v25, 4 }
  0xe0   : > { %v2109_v51 = vrot.slane %v2107_v35, 5  ;;  %v2705_v60 = vrot.slane %v5157_v12, 5 }
  0xe1   : > { %v1123_v41 = vpop.f32.mrf.mxu1  ;;  %v1276_v62 = vsel %vm6258_vm5, %v1274_v34, %v1275_v28  ;;  %v2830_v34 = vpack.c.b16 %v2803_v6, %v2802_v7  ;;  %v1196_v28 = vld [vmem:[%s6044_s25 + $0x3c] sm:$0xe] }
  0xe2   : > { %v6375_v47 = vadd.f32 %v1123_v41, %v890_v40  ;;  %v6390_v40 = vld [vmem:[%s6044_s25 + $0x4c] sm:$0xf]  ;;  %v1380_v4 = vunpack.c.l.b16 %v1276_v62  ;;  %v5690_v62 = vld [vmem:[#allocation2 + $0x1a0] sm:$0xff] }
  0xe3   : > { %v2097_v52 = vshll.u32 %v6390_v40, 16  ;;  %v2101_v61 = vshrl.u32 %v6390_v40, 16  ;;  %v2702_v37 = vrot.slane %v6390_v40, 5  ;;  %3224 = vmatpush.bf16.msra.mxu2 %v5690_v62  ;;  %v5635_v62 = vld [vmem:[%s6044_s25 + $0x48] sm:$0xff] }
  0xe5   : > { %v930_v5 = vpop.f32.mrf.mxu2  ;;  %v2103_v8 = vrot.slane %v2101_v61, 4  ;;  %v2704_v40 = vrot.slane %v2702_v37, 4 }
  0xe6   : > { %v1163_v50 = vpop.f32.mrf.mxu3 }
  0xe7   : > { %v6380_v20 = vadd.f32 %v1163_v50, %v930_v5  ;;  %v893_v22 = vpop.f32.mrf.mxu0  ;;  %v2376_v5 = vunpack.c.l.b16 %v2076_v44  ;;  %v2377_v50 = vunpack.c.l.b16 %v2086_v49  ;;  %v2706_v12 = vsel %vm6258_vm5, %v2704_v40, %v2705_v60 }
  0xe9   : > { %v1126_v15 = vpop.f32.mrf.mxu1  ;;  %v2404_v23 = vpack.c.b16 %v2377_v50, %v2376_v5 }
  0xea   : > { %v6385_v26 = vadd.f32 %v1126_v15, %v893_v22  ;;  %1506 = vmatmul.bf16.gmra.mxu2 %v1406_v29  ;;  %2503 = vmatmul.bf16.gmra.mxu0 %v2403_v13  ;;  %v2093_v29 = vrot.slane %v2091_v55, 5  ;;  %v1407_v22 = vpack.c.b16 %v1380_v4, %v1379_v3  ;;  %v5634_v15 = vld [vmem:[%s6044_s25 + $0x3c] sm:$0xff]  ;;  %v1283_v4 = vsel %vm6258_vm5, %v1281_v43, %v1282_v17 }
  0xeb   : > { %1821 = vmatmul.bf16.gmra.mxu3 %v5633_v33  ;;  %v2099_v33 = vrot.slane %v2097_v52, 5  ;;  %v5698_v55 = vld [vmem:[#allocation2 + $0x1e0] sm:$0xff]  ;;  %v5158_v52 = vld [vmem:[%s6044_s25 + $0x54] sm:$0xf] }
  0xec   : > { %2929 = vmatmul.bf16.gmra.mxu1 %v2829_v19  ;;  %v2094_v30 = vor.u32 %v2093_v29, %v2090_v10  ;;  %3906 = vmatpush.bf16.msra.mxu3 %v5698_v55  ;;  %v2112_v7 = vshrl.u32 %v5158_v52, 16  ;;  %v2115_v6 = vshll.u32 %v5158_v52, 16  ;;  %v1286_v55 = vrot.slane %v6198_v24, 5 }
  0xed   : > { %v933_v41 = vpop.f32.mrf.mxu2  ;;  %v2104_v31 = vor.u32 %v2103_v8, %v2099_v33  ;;  %v1289_v24 = vrot.slane %v6212_v56, 5 }
  0xee   : > { %v1166_v42 = vpop.f32.mrf.mxu3  ;;  %v2095_v44 = vrot.slane %v2094_v30, 4  ;;  %v2805_v30 = vunpack.c.l.b16 %v2706_v12  ;;  %v2117_v35 = vrot.slane %v2115_v6, 5 }
  0xef   : > { %v6398_v45 = vadd.f32 %v1166_v42, %v933_v41  ;;  %v895_v63 = vpop.f32.mrf.mxu0  ;;  %v5225_v41 = vld [vmem:[%s6044_s25 + $0x48] sm:$0xe]  ;;  %v4969_v42 = vrot.slane %v1196_v28, 9  ;;  %v2105_v49 = vrot.slane %v2104_v31, 4  ;;  %v2114_v31 = vrot.slane %v2112_v7, 4 }
  0xf0   : > { %v5241_v59 = vrot.slane %v5225_v41, 9  ;;  %v2100_v5 = vsel %vm6065_vm2, %v2095_v44, %v2099_v33  ;;  %v5706_v33 = vld [vmem:[#allocation2 + $0x220] sm:$0xff]  ;;  %v1288_v7 = vrot.slane %v1286_v55, 4 }
  0xf1   : > { %v1128_v48 = vpop.f32.mrf.mxu1  ;;  %v1280_v54 = vsel %vm6258_vm5, %v4969_v42, %v1279_v25  ;;  %v2110_v50 = vsel %vm6065_vm2, %v2105_v49, %v2109_v51  ;;  %v2378_v25 = vunpack.c.l.b16 %v2100_v5  ;;  %4332 = vmatpush.bf16.msra.mxu0 %v5706_v33  ;;  %v1197_v51 = vld [vmem:[%s6044_s25 + $0x48] sm:$0xe] }
  0xf2   : > { %v6408_v16 = vadd.f32 %v1128_v48, %v895_v63  ;;  %v6423_v48 = vld [vmem:[%s6044_s25 + $0x58] sm:$0xf]  ;;  %v2703_v8 = vsel %vm6258_vm5, %v5241_v59, %v2702_v37  ;;  %v2118_v59 = vor.u32 %v2117_v35, %v2114_v31  ;;  %v4970_v5 = vrot.slane %v1197_v51, 9 }
  0xf3   : > { %v2804_v28 = vunpack.c.l.b16 %v2703_v8 }
  0xf4   : > { %v2119_v6 = vrot.slane %v2118_v59, 4  ;;  %v1287_v56 = vsel %vm6258_vm5, %v4970_v5, %v1286_v55  ;;  %v1198_v5 = vld [vmem:[%s6044_s25 + $0x54] sm:$0xe] }
  0xf5   : > { %v935_v13 = vpop.f32.mrf.mxu2  ;;  %v2831_v49 = vpack.c.b16 %v2805_v30, %v2804_v28  ;;  %v1290_v30 = vsel %vm6258_vm5, %v1288_v7, %v1289_v24 }
  0xf6   : > { %v1168_v19 = vpop.f32.mrf.mxu3  ;;  %v1384_v51 = vunpack.c.l.b16 %v1290_v30 }
  0xf7   : > { %v6411_v21 = vadd.f32 %v1168_v19, %v935_v13  ;;  %v898_v2 = vpop.f32.mrf.mxu0  ;;  %v2121_v13 = vshll.u32 %v6423_v48, 16  ;;  %v2125_v19 = vshrl.u32 %v6423_v48, 16 }
  0xf9   : > { %v1131_v14 = vpop.f32.mrf.mxu1  ;;  %v2127_v37 = vrot.slane %v2125_v19, 4 }
  0xfa   : > { %v6417_v38 = vadd.f32 %v1131_v14, %v898_v2  ;;  %1511 = vmatmul.bf16.gmra.mxu2 %v1407_v22  ;;  %2508 = vmatmul.bf16.gmra.mxu0 %v2404_v23  ;;  %v1382_v23 = vunpack.c.l.b16 %v1283_v4  ;;  %v5160_v2 = vld [vmem:[%s6044_s25 + $0x5c] sm:$0x1]  ;;  %v2123_v14 = vrot.slane %v2121_v13, 5  ;;  %v5226_v4 = vld [vmem:[%s6044_s25 + $0x54] sm:$0xe] }
  0xfb   : > { %1826 = vmatmul.bf16.gmra.mxu3 %v5634_v15  ;;  %v1381_v15 = vunpack.c.l.b16 %v1280_v54  ;;  %v2131_v40 = vshll.u32 %v5160_v2, 16  ;;  %v5242_v12 = vrot.slane %v5226_v4, 9 }
  0xfc   : > { %2934 = vmatmul.bf16.gmra.mxu1 %v2830_v34  ;;  %v2379_v34 = vunpack.c.l.b16 %v2110_v50  ;;  %v5161_v50 = vld [vmem:[%s6044_s25 + $0x60] sm:$0xf] }
  0xfd   : > { %v938_v61 = vpop.f32.mrf.mxu2  ;;  %v1408_v17 = vpack.c.b16 %v1382_v23, %v1381_v15  ;;  %v2136_v15 = vshrl.u32 %v5161_v50, 16  ;;  %v2139_v23 = vshll.u32 %v5161_v50, 16  ;;  %v5788_v50 = vld [vmem:[%s6044_s25 + $0x58] sm:$0xf] }
  0xfe   : > { %v1171_v63 = vpop.f32.mrf.mxu3  ;;  %v2405_v44 = vpack.c.b16 %v2379_v34, %v2378_v25  ;;  %v1293_v7 = vrot.slane %v5788_v50, 5 }
  0xff   : > { %v6425_v3 = vadd.f32 %v1171_v63, %v938_v61  ;;  %v900_v10 = vpop.f32.mrf.mxu0  ;;  %v2128_v61 = vor.u32 %v2127_v37, %v2123_v14  ;;  %v2709_v63 = vrot.slane %v6423_v48, 5  ;;  %v2712_v48 = vrot.slane %v5160_v2, 5 }
 0x100   : > { %v2124_v2 = vsel %vm6065_vm2, %v2119_v6, %v2123_v14  ;;  %v1295_v30 = vrot.slane %v1293_v7, 4 }
 0x101   : > { %v1133_v29 = vpop.f32.mrf.mxu1  ;;  %v2129_v8 = vrot.slane %v2128_v61, 4  ;;  %v2711_v13 = vrot.slane %v2709_v63, 4  ;;  %v2380_v59 = vunpack.c.l.b16 %v2124_v2  ;;  %v5163_v61 = vld [vmem:[%s6044_s25 + $0x68] sm:$0x1] }
 0x102   : > { %v6441_v22 = vadd.f32 %v1133_v29, %v900_v10  ;;  %v2133_v10 = vrot.slane %v2131_v40, 5  ;;  %v6456_v29 = vld [vmem:[%s6044_s25 + $0x64] sm:$0xf] }
 0x103   : > { %v2145_v34 = vshll.u32 %v6456_v29, 16  ;;  %v2149_v28 = vshrl.u32 %v6456_v29, 16 }
 0x104   : > { %v2134_v37 = vsel %vm6065_vm2, %v2129_v8, %v2133_v10  ;;  %v5636_v8 = vld [vmem:[%s6044_s25 + $0x54] sm:$0xff] }
 0x105   : > { %v940_v41 = vpop.f32.mrf.mxu2  ;;  %v2147_v55 = vrot.slane %v2145_v34, 5  ;;  %v2151_v14 = vrot.slane %v2149_v28, 4  ;;  %v2381_v40 = vunpack.c.l.b16 %v2134_v37  ;;  %v4971_v34 = vrot.slane %v1198_v5, 9  ;;  %v5227_v28 = vld [vmem:[%s6044_s25 + $0x60] sm:$0xe] }
 0x106   : > { %v1173_v42 = vpop.f32.mrf.mxu3 }
 0x107   : > { %v6444_v43 = vadd.f32 %v1173_v42, %v940_v41  ;;  %v903_v60 = vpop.f32.mrf.mxu0  ;;  %v2710_v41 = vsel %vm6258_vm5, %v5242_v12, %v2709_v63  ;;  %v2713_v42 = vsel %vm6258_vm5, %v2711_v13, %v2712_v48  ;;  %v2152_v12 = vor.u32 %v2151_v14, %v2147_v55 }
 0x108   : > { %v2155_v13 = vshll.u32 %v5163_v61, 16  ;;  %v2406_v48 = vpack.c.b16 %v2381_v40, %v2380_v59 }
 0x109   : > { %v1136_v52 = vpop.f32.mrf.mxu1  ;;  %v2153_v2 = vrot.slane %v2152_v12, 4 }
 0x10a   : > { %v6450_v54 = vadd.f32 %v1136_v52, %v903_v60  ;;  %1516 = vmatmul.bf16.gmra.mxu2 %v1408_v17  ;;  %2513 = vmatmul.bf16.gmra.mxu0 %v2405_v44  ;;  %v2141_v44 = vrot.slane %v2139_v23, 5  ;;  %v2806_v60 = vunpack.c.l.b16 %v2710_v41  ;;  %v2807_v52 = vunpack.c.l.b16 %v2713_v42  ;;  %v5689_v41 = vld [vmem:[#allocation2 + $0x198] sm:$0xff] }
 0x10b   : > { %1831 = vmatmul.bf16.gmra.mxu3 %v5635_v62  ;;  %v2138_v62 = vrot.slane %v2136_v15, 4  ;;  %v2157_v37 = vrot.slane %v2155_v13, 5  ;;  %3225 = vmatpush.bf16.msra.mxu2 %v5689_v41 }
 0x10c   : > { %2939 = vmatmul.bf16.gmra.mxu1 %v2831_v49  ;;  %v1383_v49 = vunpack.c.l.b16 %v1287_v56 }
 0x10d   : > { %v943_v19 = vpop.f32.mrf.mxu2  ;;  %v2142_v24 = vor.u32 %v2141_v44, %v2138_v62  ;;  %v2719_v62 = vrot.slane %v5163_v61, 5  ;;  %v5164_v44 = vld [vmem:[%s6044_s25 + $0x6c] sm:$0xf]  ;;  %v2158_v61 = vsel %vm6065_vm2, %v2153_v2, %v2157_v37 }
 0x10e   : > { %v1176_v33 = vpop.f32.mrf.mxu3  ;;  %v1409_v10 = vpack.c.b16 %v1384_v51, %v1383_v49  ;;  %v5697_v49 = vld [vmem:[#allocation2 + $0x1d8] sm:$0xff]  ;;  %v6489_v51 = vld [vmem:[%s6044_s25 + $0x70] sm:$0xf] }
 0x10f   : > { %v6458_v25 = vadd.f32 %v1176_v33, %v943_v19  ;;  %v905_v31 = vpop.f32.mrf.mxu0  ;;  %v2832_v19 = vpack.c.b16 %v2807_v52, %v2806_v60  ;;  %v2716_v33 = vrot.slane %v6456_v29, 5  ;;  %v5243_v29 = vrot.slane %v5227_v28, 9  ;;  %3907 = vmatpush.bf16.msra.mxu3 %v5697_v49  ;;  %v5789_v49 = vld [vmem:[%s6044_s25 + $0x64] sm:$0xf] }
 0x111   : > { %v1138_v35 = vpop.f32.mrf.mxu1  ;;  %v2718_v42 = vrot.slane %v2716_v33, 4  ;;  %v2717_v5 = vsel %vm6258_vm5, %v5243_v29, %v2716_v33 }
 0x112   : > { %v6474_v17 = vadd.f32 %v1138_v35, %v905_v31  ;;  %v1296_v31 = vrot.slane %v6231_v57, 5  ;;  %v2143_v35 = vrot.slane %v2142_v24, 4  ;;  %v1294_v57 = vsel %vm6258_vm5, %v4971_v34, %v1293_v7 }
 0x113   : > { %v2720_v50 = vsel %vm6258_vm5, %v2718_v42, %v2719_v62  ;;  %v2169_v7 = vshll.u32 %v6489_v51, 16  ;;  %v2173_v24 = vshrl.u32 %v6489_v51, 16  ;;  %v1385_v12 = vunpack.c.l.b16 %v1294_v57  ;;  %v5637_v42 = vld [vmem:[%s6044_s25 + $0x60] sm:$0xff] }
 0x114   : > { %v1297_v40 = vsel %vm6258_vm5, %v1295_v30, %v1296_v31  ;;  %v2148_v60 = vsel %vm6065_vm2, %v2143_v35, %v2147_v55  ;;  %v2808_v33 = vunpack.c.l.b16 %v2717_v5  ;;  %v5166_v31 = vld [vmem:[%s6044_s25 + $0x74] sm:$0x1]  ;;  %v5705_v35 = vld [vmem:[#allocation2 + $0x218] sm:$0xff] }
 0x115   : > { %v945_v63 = vpop.f32.mrf.mxu2  ;;  %v1386_v13 = vunpack.c.l.b16 %v1297_v40  ;;  %v2171_v28 = vrot.slane %v2169_v7, 5  ;;  %v2175_v30 = vrot.slane %v2173_v24, 4  ;;  %4333 = vmatpush.bf16.msra.mxu0 %v5705_v35  ;;  %v5228_v7 = vld [vmem:[%s6044_s25 + $0x6c] sm:$0xe] }
 0x116   : > { %v1178_v4 = vpop.f32.mrf.mxu3 }
 0x117   : > { %v6479_v6 = vadd.f32 %v1178_v4, %v945_v63  ;;  %v908_v15 = vpop.f32.mrf.mxu0  ;;  %v2160_v63 = vshrl.u32 %v5164_v44, 16  ;;  %v2163_v4 = vshll.u32 %v5164_v44, 16  ;;  %v1410_v29 = vpack.c.b16 %v1386_v13, %v1385_v12  ;;  %v1199_v44 = vld [vmem:[%s6044_s25 + $0x60] sm:$0xe] }
 0x118   : > { %v2176_v40 = vor.u32 %v2175_v30, %v2171_v28 }
 0x119   : > { %v1141_v23 = vpop.f32.mrf.mxu1  ;;  %v2165_v34 = vrot.slane %v2163_v4, 5  ;;  %v2723_v4 = vrot.slane %v6489_v51, 5  ;;  %v6522_v51 = vld [vmem:[%s6044_s25 + $0x7c] sm:$0xf] }
 0x11a   : > { %v6484_v56 = vadd.f32 %v1141_v23, %v908_v15  ;;  %1521 = vmatmul.bf16.gmra.mxu2 %v1409_v10  ;;  %2518 = vmatmul.bf16.gmra.mxu0 %v2406_v48  ;;  %v2382_v48 = vunpack.c.l.b16 %v2148_v60  ;;  %v2809_v15 = vunpack.c.l.b16 %v2720_v50  ;;  %v2162_v23 = vrot.slane %v2160_v63, 4 }
 0x11b   : > { %1836 = vmatmul.bf16.gmra.mxu3 %v5636_v8  ;;  %v2179_v60 = vshll.u32 %v5166_v31, 16  ;;  %v4972_v50 = vrot.slane %v1199_v44, 9  ;;  %v2177_v13 = vrot.slane %v2176_v40, 4  ;;  %v2193_v44 = vshll.u32 %v6522_v51, 16 }
 0x11c   : > { %2944 = vmatmul.bf16.gmra.mxu1 %v2832_v19  ;;  %v2383_v19 = vunpack.c.l.b16 %v2158_v61  ;;  %v2166_v57 = vor.u32 %v2165_v34, %v2162_v23  ;;  %v2726_v23 = vrot.slane %v5166_v31, 5 }
 0x11d   : > { %v948_v14 = vpop.f32.mrf.mxu2 }
 0x11e   : > { %v1181_v59 = vpop.f32.mrf.mxu3  ;;  %v2407_v62 = vpack.c.b16 %v2383_v19, %v2382_v48  ;;  %v2167_v12 = vrot.slane %v2166_v57, 4  ;;  %v2181_v48 = vrot.slane %v2179_v60, 5  ;;  %v5167_v19 = vld [vmem:[%s6044_s25 + $0x78] sm:$0xf] }
 0x11f   : > { %v6497_v52 = vadd.f32 %v1181_v59, %v948_v14  ;;  %v910_v55 = vpop.f32.mrf.mxu0  ;;  %v1300_v14 = vrot.slane %v5789_v49, 5  ;;  %v2833_v59 = vpack.c.b16 %v2809_v15, %v2808_v33  ;;  %v5244_v33 = vrot.slane %v5228_v7, 9  ;;  %v5717_v60 = vld [vmem:[#allocation6 + $0x38] sm:$0xff] }
 0x120   : > { %v2725_v15 = vrot.slane %v2723_v4, 4  ;;  %v2182_v31 = vsel %vm6065_vm2, %v2177_v13, %v2181_v48  ;;  %v2197_v49 = vshrl.u32 %v6522_v51, 16  ;;  %4602 = vmatpush.bf16.msra.mxu1 %v5717_v60  ;;  %v2195_v13 = vrot.slane %v2193_v44, 5  ;;  %v5169_v48 = vld [vmem:[%s6044_s25 + $0x80] sm:$0x1] }
 0x121   : > { %v1143_v10 = vpop.f32.mrf.mxu1  ;;  %v1302_v24 = vrot.slane %v1300_v14, 4  ;;  %v1301_v35 = vsel %vm6258_vm5, %v4972_v50, %v1300_v14  ;;  %v2724_v14 = vsel %vm6258_vm5, %v5244_v33, %v2723_v4  ;;  %v2385_v7 = vunpack.c.l.b16 %v2182_v31  ;;  %v5792_v60 = vld [vmem:[%s6044_s25 + $0x74] sm:$0x1] }
 0x122   : > { %v6507_v8 = vadd.f32 %v1143_v10, %v910_v55  ;;  %v5790_v55 = vld [vmem:[%s6044_s25 + $0x68] sm:$0x1]  ;;  %v2727_v40 = vsel %vm6258_vm5, %v2725_v15, %v2726_v23  ;;  %v2199_v4 = vrot.slane %v2197_v49, 4  ;;  %v5791_v15 = vld [vmem:[%s6044_s25 + $0x70] sm:$0xf]  ;;  %v2730_v49 = vrot.slane %v6522_v51, 5 }
 0x123   : > { %v1303_v10 = vrot.slane %v5790_v55, 5  ;;  %v1307_v23 = vrot.slane %v5791_v15, 5  ;;  %v6553_v51 = vld [vmem:[%s6044_s25 + $0x88] sm:$0xf] }
 0x124   : > { %v2200_v31 = vor.u32 %v2199_v4, %v2195_v13  ;;  %v5696_v4 = vld [vmem:[#allocation2 + $0x1d0] sm:$0xff] }
 0x125   : > { %v950_v2 = vpop.f32.mrf.mxu2  ;;  %3908 = vmatpush.bf16.msra.mxu3 %v5696_v4 }
 0x126   : > { %v1183_v37 = vpop.f32.mrf.mxu3 }
 0x127   : > { %v6510_v41 = vadd.f32 %v1183_v37, %v950_v2  ;;  %v913_v61 = vpop.f32.mrf.mxu0  ;;  %v1304_v37 = vsel %vm6258_vm5, %v1302_v24, %v1303_v10  ;;  %v2810_v10 = vunpack.c.l.b16 %v2724_v14 }
 0x129   : > { %v1146_v63 = vpop.f32.mrf.mxu1 }
 0x12a   : > { %v6516_v5 = vadd.f32 %v1146_v63, %v913_v61  ;;  %1526 = vmatmul.bf16.gmra.mxu2 %v1410_v29  ;;  %2523 = vmatmul.bf16.gmra.mxu0 %v2407_v62  ;;  %v2184_v29 = vshrl.u32 %v5167_v19, 16  ;;  %v2172_v62 = vsel %vm6065_vm2, %v2167_v12, %v2171_v28  ;;  %v1387_v28 = vunpack.c.l.b16 %v1301_v35  ;;  %v5638_v35 = vld [vmem:[%s6044_s25 + $0x6c] sm:$0xff] }
 0x12b   : > { %1841 = vmatmul.bf16.gmra.mxu3 %v5637_v42  ;;  %v2187_v42 = vshll.u32 %v5167_v19, 16  ;;  %v1388_v63 = vunpack.c.l.b16 %v1304_v37  ;;  %v2384_v50 = vunpack.c.l.b16 %v2172_v62  ;;  %v2811_v12 = vunpack.c.l.b16 %v2727_v40  ;;  %v1200_v37 = vld [vmem:[%s6044_s25 + $0x6c] sm:$0xe] }
 0x12c   : > { %2949 = vmatmul.bf16.gmra.mxu1 %v2833_v59  ;;  %v2186_v24 = vrot.slane %v2184_v29, 4  ;;  %v4973_v14 = vrot.slane %v1200_v37, 9  ;;  %v1309_v40 = vrot.slane %v1307_v23, 4 }
 0x12d   : > { %v953_v34 = vpop.f32.mrf.mxu2  ;;  %v2189_v55 = vrot.slane %v2187_v42, 5  ;;  %v2408_v29 = vpack.c.b16 %v2385_v7, %v2384_v50  ;;  %v2834_v42 = vpack.c.b16 %v2811_v12, %v2810_v10  ;;  %v2201_v50 = vrot.slane %v2200_v31, 4 }
 0x12e   : > { %v1186_v30 = vpop.f32.mrf.mxu3  ;;  %v2732_v10 = vrot.slane %v2730_v49, 4  ;;  %v2733_v12 = vrot.slane %v5169_v48, 5 }
 0x12f   : > { %v6526_v2 = vadd.f32 %v1186_v30, %v953_v34  ;;  %v915_v59 = vpop.f32.mrf.mxu0  ;;  %v1411_v30 = vpack.c.b16 %v1388_v63, %v1387_v28  ;;  %v2190_v62 = vor.u32 %v2189_v55, %v2186_v24  ;;  %v5688_v63 = vld [vmem:[#allocation2 + $0x190] sm:$0xff]  ;;  %v5170_v24 = vld [vmem:[%s6044_s25 + $0x84] sm:$0xf] }
 0x130   : > { %3226 = vmatpush.bf16.msra.mxu2 %v5688_v63  ;;  %v2211_v31 = vshll.u32 %v5170_v24, 16 }
 0x131   : > { %7283 = vst [vmem:[#allocation12_spill] sm:$0xff] %v6526_v2  ;;  %v1148_v57 = vpop.f32.mrf.mxu1  ;;  %v2191_v28 = vrot.slane %v2190_v62, 4 }
 0x132   : > { %v6540_v61 = vadd.f32 %v1148_v57, %v915_v59  ;;  %v2203_v59 = vshll.u32 %v5169_v48, 16 }
 0x134   : > { %v2205_v7 = vrot.slane %v2203_v59, 5  ;;  %v2217_v59 = vshll.u32 %v6553_v51, 16 }
 0x135   : > { %v955_v19 = vpop.f32.mrf.mxu2 }
 0x136   : > { %v1188_v33 = vpop.f32.mrf.mxu3  ;;  %v2206_v48 = vsel %vm6065_vm2, %v2201_v50, %v2205_v7 }
 0x137   : > { %v6544_v34 = vadd.f32 %v1188_v33, %v955_v19  ;;  %v2489_v57 = vpop.f32.mrf.mxu0  ;;  %v1310_v19 = vrot.slane %v5792_v60, 5  ;;  %v5229_v33 = vld [vmem:[%s6044_s25 + $0x78] sm:$0xe]  ;;  %v2221_v60 = vshrl.u32 %v6553_v51, 16  ;;  %v2387_v50 = vunpack.c.l.b16 %v2206_v48 }
 0x138   : > { %v5245_v55 = vrot.slane %v5229_v33, 9 }
 0x139   : > { %7284 = vst [vmem:[#allocation13_spill] sm:$0xff] %v6544_v34  ;;  %v2915_v44 = vpop.f32.mrf.mxu1 }
 0x13a   : > { %1531 = vmatmul.bf16.gmra.mxu2 %v1411_v30  ;;  %2528 = vmatmul.bf16.gmra.mxu0 %v2408_v29  ;;  %v1308_v30 = vsel %vm6258_vm5, %v4973_v14, %v1307_v23  ;;  %v2196_v29 = vsel %vm6065_vm2, %v2191_v28, %v2195_v13  ;;  %v2734_v13 = vsel %vm6258_vm5, %v2732_v10, %v2733_v12  ;;  %v5793_v12 = vld [vmem:[%s6044_s25 + $0x7c] sm:$0xf] }
 0x13b   : > { %1846 = vmatmul.bf16.gmra.mxu3 %v5638_v35  ;;  %v1311_v35 = vsel %vm6258_vm5, %v1309_v40, %v1310_v19  ;;  %v1389_v40 = vunpack.c.l.b16 %v1308_v30  ;;  %v2386_v28 = vunpack.c.l.b16 %v2196_v29  ;;  %v1314_v30 = vrot.slane %v5793_v12, 5  ;;  %v5639_v29 = vld [vmem:[%s6044_s25 + $0x78] sm:$0xff] }
 0x13c   : > { %2954 = vmatmul.bf16.gmra.mxu1 %v2834_v42  ;;  %v2208_v42 = vshrl.u32 %v5170_v24, 16  ;;  %v1390_v19 = vunpack.c.l.b16 %v1311_v35  ;;  %v2213_v24 = vrot.slane %v2211_v31, 5 }
 0x13d   : > { %v1492_v15 = vpop.f32.mrf.mxu2  ;;  %v2409_v48 = vpack.c.b16 %v2387_v50, %v2386_v28 }
 0x13e   : > { %v1807_v37 = vpop.f32.mrf.mxu3  ;;  %v1572_v62 = vadd.f32 %v1492_v15, %v6286_v58  ;;  %v2731_v58 = vsel %vm6258_vm5, %v5245_v55, %v2730_v49  ;;  %v2210_v7 = vrot.slane %v2208_v42, 4  ;;  %v2813_v15 = vunpack.c.l.b16 %v2734_v13  ;;  %v5172_v49 = vld [vmem:[%s6044_s25 + $0x8c] sm:$0x1]  ;;  %v5704_v55 = vld [vmem:[#allocation2 + $0x210] sm:$0xff]  ;;  %v1201_v42 = vld [vmem:[%s6044_s25 + $0x78] sm:$0xe] }
 0x13f   : > { %v2491_v23 = vpop.f32.mrf.mxu0  ;;  %v2812_v4 = vunpack.c.l.b16 %v2731_v58  ;;  %4334 = vmatpush.bf16.msra.mxu0 %v5704_v55  ;;  %v4974_v12 = vrot.slane %v1201_v42, 9  ;;  %v6584_v55 = vld [vmem:[%s6044_s25 + $0x94] sm:$0xf] }
 0x140   : > { %v1887_v33 = vadd.f32 %v1807_v37, %v1572_v62  ;;  %v2219_v37 = vrot.slane %v2217_v59, 5  ;;  %v2223_v62 = vrot.slane %v2221_v60, 4  ;;  %v2214_v31 = vor.u32 %v2213_v24, %v2210_v7  ;;  %v5173_v24 = vld [vmem:[%s6044_s25 + $0x90] sm:$0xf] }
 0x141   : > { %v2917_v14 = vpop.f32.mrf.mxu1  ;;  %v2835_v59 = vpack.c.b16 %v2813_v15, %v2812_v4 }
 0x142   : > { %v2569_v63 = vadd.f32 %v2489_v57, %v1887_v33  ;;  %v1412_v57 = vpack.c.b16 %v1390_v19, %v1389_v40  ;;  %v2224_v60 = vor.u32 %v2223_v62, %v2219_v37  ;;  %v5230_v40 = vld [vmem:[%s6044_s25 + $0x84] sm:$0xe]  ;;  %v2215_v7 = vrot.slane %v2214_v31, 4 }
 0x143   : > { %v5246_v15 = vrot.slane %v5230_v40, 9  ;;  %v2235_v31 = vshll.u32 %v5173_v24, 16 }
 0x144   : > { %v6570_v34 = vadd.f32 %v2915_v44, %v2569_v63  ;;  %v2227_v44 = vshll.u32 %v5172_v49, 16  ;;  %v2737_v63 = vrot.slane %v6553_v51, 5  ;;  %v2225_v28 = vrot.slane %v2224_v60, 4 }
 0x145   : > { %v1494_v2 = vpop.f32.mrf.mxu2  ;;  %v2740_v51 = vrot.slane %v5172_v49, 5  ;;  %v2220_v42 = vsel %vm6065_vm2, %v2215_v7, %v2219_v37  ;;  %v5716_v37 = vld [vmem:[#allocation6 + $0x30] sm:$0xff]  ;;  %v2237_v7 = vrot.slane %v2235_v31, 5 }
 0x146   : > { %7285 = vst [vmem:[#allocation14_spill] sm:$0xff] %v6570_v34  ;;  %v1809_v10 = vpop.f32.mrf.mxu3  ;;  %v1573_v35 = vadd.f32 %v1494_v2, %v6309_v27  ;;  %v1316_v34 = vrot.slane %v1314_v30, 4  ;;  %v5794_v27 = vld [vmem:[%s6044_s25 + $0x80] sm:$0x1]  ;;  %v2229_v50 = vrot.slane %v2227_v44, 5  ;;  %v2739_v62 = vrot.slane %v2737_v63, 4  ;;  %4603 = vmatpush.bf16.msra.mxu1 %v5716_v37 }
 0x147   : > { %v2494_v58 = vpop.f32.mrf.mxu0  ;;  %v1317_v2 = vrot.slane %v5794_v27, 5  ;;  %v2388_v27 = vunpack.c.l.b16 %v2220_v42  ;;  %v1202_v42 = vld [vmem:[%s6044_s25 + $0x84] sm:$0xe] }
 0x148   : > { %v1888_v33 = vadd.f32 %v1809_v10, %v1573_v35  ;;  %v2230_v49 = vsel %vm6065_vm2, %v2225_v28, %v2229_v50  ;;  %v4975_v37 = vrot.slane %v1202_v42, 9 }
 0x149   : > { %v2920_v13 = vpop.f32.mrf.mxu1  ;;  %v2389_v40 = vunpack.c.l.b16 %v2230_v49 }
 0x14a   : > { %1536 = vmatmul.bf16.gmra.mxu2 %v1412_v57  ;;  %v2570_v19 = vadd.f32 %v2491_v23, %v1888_v33  ;;  %2533 = vmatmul.bf16.gmra.mxu0 %v2409_v48  ;;  %v1315_v57 = vsel %vm6258_vm5, %v4974_v12, %v1314_v30  ;;  %v1318_v23 = vsel %vm6258_vm5, %v1316_v34, %v1317_v2  ;;  %v2241_v48 = vshll.u32 %v6584_v55, 16 }
 0x14b   : > { %1851 = vmatmul.bf16.gmra.mxu3 %v5639_v29  ;;  %v2738_v34 = vsel %vm6258_vm5, %v5246_v15, %v2737_v63  ;;  %v1391_v33 = vunpack.c.l.b16 %v1315_v57  ;;  %v1392_v12 = vunpack.c.l.b16 %v1318_v23  ;;  %v2410_v31 = vpack.c.b16 %v2389_v40, %v2388_v27  ;;  %v5687_v27 = vld [vmem:[#allocation2 + $0x188] sm:$0xff] }
 0x14c   : > { %2959 = vmatmul.bf16.gmra.mxu1 %v2835_v59  ;;  %v6581_v4 = vadd.f32 %v2917_v14, %v2570_v19  ;;  %v2232_v14 = vshrl.u32 %v5173_v24, 16  ;;  %v2245_v59 = vshrl.u32 %v6584_v55, 16  ;;  %v2814_v28 = vunpack.c.l.b16 %v2738_v34  ;;  %3227 = vmatpush.bf16.msra.mxu2 %v5687_v27 }
 0x14d   : > { %v1497_v10 = vpop.f32.mrf.mxu2  ;;  %v2243_v24 = vrot.slane %v2241_v48, 5  ;;  %v1413_v23 = vpack.c.b16 %v1392_v12, %v1391_v33 }
 0x14e   : > { %v1812_v35 = vpop.f32.mrf.mxu3  ;;  %v1574_v29 = vadd.f32 %v1497_v10, %v6318_v0  ;;  %v2741_v0 = vsel %vm6258_vm5, %v2739_v62, %v2740_v51  ;;  %v2234_v19 = vrot.slane %v2232_v14, 4  ;;  %v2247_v63 = vrot.slane %v2245_v59, 4  ;;  %v5175_v10 = vld [vmem:[%s6044_s25 + $0x98] sm:$0x1] }
 0x14f   : > { %v2496_v44 = vpop.f32.mrf.mxu0  ;;  %v2815_v50 = vunpack.c.l.b16 %v2741_v0  ;;  %v2251_v48 = vshll.u32 %v5175_v10, 16  ;;  %v2744_v0 = vrot.slane %v6584_v55, 5 }
 0x150   : > { %v1889_v60 = vadd.f32 %v1812_v35, %v1574_v29  ;;  %v5795_v35 = vld [vmem:[%s6044_s25 + $0x88] sm:$0xf]  ;;  %v2238_v14 = vor.u32 %v2237_v7, %v2234_v19  ;;  %v5176_v7 = vld [vmem:[%s6044_s25 + $0x9c] sm:$0xf] }
 0x151   : > { %v2922_v30 = vpop.f32.mrf.mxu1  ;;  %v1321_v57 = vrot.slane %v5795_v35, 5  ;;  %v5640_v29 = vld [vmem:[%s6044_s25 + $0x84] sm:$0xff]  ;;  %v2836_v49 = vpack.c.b16 %v2815_v50, %v2814_v28  ;;  %v5796_v35 = vld [vmem:[%s6044_s25 + $0x8c] sm:$0x1]  ;;  %v2253_v19 = vrot.slane %v2251_v48, 5  ;;  %v2746_v55 = vrot.slane %v2744_v0, 4 }
 0x152   : > { %v2571_v2 = vadd.f32 %v2494_v58, %v1889_v60  ;;  %v2248_v60 = vor.u32 %v2247_v63, %v2243_v24  ;;  %v2239_v12 = vrot.slane %v2238_v14, 4  ;;  %v2747_v63 = vrot.slane %v5175_v10, 5 }
 0x153   : > { %v2256_v14 = vshrl.u32 %v5176_v7, 16 }
 0x154   : > { %v6601_v15 = vadd.f32 %v2920_v13, %v2571_v2  ;;  %v1323_v2 = vrot.slane %v1321_v57, 4  ;;  %v2249_v40 = vrot.slane %v2248_v60, 4 }
 0x155   : > { %v1499_v62 = vpop.f32.mrf.mxu2 }
 0x156   : > { %7286 = vst [vmem:[#allocation15_spill] sm:$0xff] %v6601_v15  ;;  %v1814_v51 = vpop.f32.mrf.mxu3  ;;  %v1575_v58 = vadd.f32 %v1499_v62, %v6342_v36  ;;  %v1324_v15 = vrot.slane %v5796_v35, 5  ;;  %v5231_v36 = vld [vmem:[%s6044_s25 + $0x90] sm:$0xe]  ;;  %v6615_v62 = vld [vmem:[%s6044_s25 + $0xa0] sm:$0xf]  ;;  %v2254_v10 = vsel %vm6065_vm2, %v2249_v40, %v2253_v19 }
 0x157   : > { %v2499_v13 = vpop.f32.mrf.mxu0  ;;  %v5247_v50 = vrot.slane %v5231_v36, 9  ;;  %v2269_v60 = vshrl.u32 %v6615_v62, 16  ;;  %v2391_v36 = vunpack.c.l.b16 %v2254_v10 }
 0x158   : > { %v1890_v59 = vadd.f32 %v1814_v51, %v1575_v58  ;;  %v5695_v51 = vld [vmem:[#allocation2 + $0x1c8] sm:$0xff] }
 0x159   : > { %v2925_v34 = vpop.f32.mrf.mxu1  ;;  %3909 = vmatpush.bf16.msra.mxu3 %v5695_v51 }
 0x15a   : > { %1541 = vmatmul.bf16.gmra.mxu2 %v1413_v23  ;;  %v2572_v33 = vadd.f32 %v2496_v44, %v1890_v59  ;;  %2538 = vmatmul.bf16.gmra.mxu0 %v2410_v31  ;;  %v1322_v44 = vsel %vm6258_vm5, %v4975_v37, %v1321_v57  ;;  %v2259_v31 = vshll.u32 %v5176_v7, 16  ;;  %v2271_v7 = vrot.slane %v2269_v60, 4 }
 0x15b   : > { %1856 = vmatmul.bf16.gmra.mxu3 %v5640_v29  ;;  %v1325_v29 = vsel %vm6258_vm5, %v1323_v2, %v1324_v15  ;;  %v1393_v15 = vunpack.c.l.b16 %v1322_v44 }
 0x15c   : > { %2964 = vmatmul.bf16.gmra.mxu1 %v2836_v49  ;;  %v6612_v28 = vadd.f32 %v2922_v30, %v2572_v33  ;;  %v2244_v30 = vsel %vm6065_vm2, %v2239_v12, %v2243_v24  ;;  %v2265_v49 = vshll.u32 %v6615_v62, 16  ;;  %v2748_v24 = vsel %vm6258_vm5, %v2746_v55, %v2747_v63  ;;  %v5797_v63 = vld [vmem:[%s6044_s25 + $0x94] sm:$0xf] }
 0x15d   : > { %v1502_v58 = vpop.f32.mrf.mxu2  ;;  %v1394_v37 = vunpack.c.l.b16 %v1325_v29  ;;  %v2390_v2 = vunpack.c.l.b16 %v2244_v30  ;;  %v2258_v33 = vrot.slane %v2256_v14, 4  ;;  %v2261_v12 = vrot.slane %v2259_v31, 5  ;;  %v5641_v29 = vld [vmem:[%s6044_s25 + $0x90] sm:$0xff] }
 0x15e   : > { %v1817_v23 = vpop.f32.mrf.mxu3  ;;  %v1576_v42 = vadd.f32 %v1502_v58, %v6351_v9  ;;  %v2745_v9 = vsel %vm6258_vm5, %v5247_v50, %v2744_v0  ;;  %v2817_v40 = vunpack.c.l.b16 %v2748_v24  ;;  %v2267_v19 = vrot.slane %v2265_v49, 5  ;;  %v5178_v0 = vld [vmem:[%s6044_s25 + $0xa4] sm:$0x1]  ;;  %v5703_v50 = vld [vmem:[#allocation2 + $0x208] sm:$0xff] }
 0x15f   : > { %v2501_v57 = vpop.f32.mrf.mxu0  ;;  %v2816_v27 = vunpack.c.l.b16 %v2745_v9  ;;  %v2262_v30 = vor.u32 %v2261_v12, %v2258_v33  ;;  %4335 = vmatpush.bf16.msra.mxu0 %v5703_v50  ;;  %v2411_v14 = vpack.c.b16 %v2391_v36, %v2390_v2  ;;  %v2751_v9 = vrot.slane %v6615_v62, 5 }
 0x160   : > { %v1891_v48 = vadd.f32 %v1817_v23, %v1576_v42  ;;  %v1328_v23 = vrot.slane %v5797_v63, 5  ;;  %v1203_v42 = vld [vmem:[%s6044_s25 + $0x90] sm:$0xe]  ;;  %v2272_v10 = vor.u32 %v2271_v7, %v2267_v19  ;;  %v2754_v62 = vrot.slane %v5178_v0, 5 }
 0x161   : > { %v2927_v59 = vpop.f32.mrf.mxu1  ;;  %v2837_v31 = vpack.c.b16 %v2817_v40, %v2816_v27  ;;  %v4976_v24 = vrot.slane %v1203_v42, 9  ;;  %v2263_v12 = vrot.slane %v2262_v30, 4  ;;  %v5179_v27 = vld [vmem:[%s6044_s25 + $0xa8] sm:$0xf]  ;;  %v2753_v50 = vrot.slane %v2751_v9, 4 }
 0x162   : > { %v2573_v35 = vadd.f32 %v2499_v13, %v1891_v48  ;;  %v1414_v13 = vpack.c.b16 %v1394_v37, %v1393_v15  ;;  %v5232_v37 = vld [vmem:[%s6044_s25 + $0x9c] sm:$0xe]  ;;  %v2273_v2 = vrot.slane %v2272_v10, 4  ;;  %v2283_v42 = vshll.u32 %v5179_v27, 16 }
 0x163   : > { %v5248_v7 = vrot.slane %v5232_v37, 9 }
 0x164   : > { %v6632_v51 = vadd.f32 %v2925_v34, %v2573_v35  ;;  %v2275_v34 = vshll.u32 %v5178_v0, 16  ;;  %v1330_v35 = vrot.slane %v1328_v23, 4 }
 0x165   : > { %v1504_v58 = vpop.f32.mrf.mxu2 }
 0x166   : > { %v1819_v55 = vpop.f32.mrf.mxu3  ;;  %v1577_v44 = vadd.f32 %v1504_v58, %v6375_v47  ;;  %v5798_v47 = vld [vmem:[%s6044_s25 + $0x98] sm:$0x1]  ;;  %v2277_v36 = vrot.slane %v2275_v34, 5  ;;  %v6646_v58 = vld [vmem:[%s6044_s25 + $0xac] sm:$0xf]  ;;  %v2752_v34 = vsel %vm6258_vm5, %v5248_v7, %v2751_v9 }
 0x167   : > { %v2504_v60 = vpop.f32.mrf.mxu0  ;;  %v1331_v15 = vrot.slane %v5798_v47, 5  ;;  %v2289_v30 = vshll.u32 %v6646_v58, 16  ;;  %v5181_v7 = vld [vmem:[%s6044_s25 + $0xb0] sm:$0x1] }
 0x168   : > { %v1892_v49 = vadd.f32 %v1819_v55, %v1577_v44  ;;  %v1329_v44 = vsel %vm6258_vm5, %v4976_v24, %v1328_v23  ;;  %v2278_v0 = vsel %vm6065_vm2, %v2273_v2, %v2277_v36 }
 0x169   : > { %v2930_v48 = vpop.f32.mrf.mxu1  ;;  %v2291_v36 = vrot.slane %v2289_v30, 5  ;;  %v2299_v30 = vshll.u32 %v5181_v7, 16 }
 0x16a   : > { %1546 = vmatmul.bf16.gmra.mxu2 %v1414_v13  ;;  %v2574_v33 = vadd.f32 %v2501_v57, %v1892_v49  ;;  %2543 = vmatmul.bf16.gmra.mxu0 %v2411_v14  ;;  %v1332_v57 = vsel %vm6258_vm5, %v1330_v35, %v1331_v15  ;;  %v2293_v14 = vshrl.u32 %v6646_v58, 16  ;;  %v1395_v49 = vunpack.c.l.b16 %v1329_v44 }
 0x16b   : > { %1861 = vmatmul.bf16.gmra.mxu3 %v5641_v29  ;;  %v2268_v29 = vsel %vm6065_vm2, %v2263_v12, %v2267_v19  ;;  %v5715_v19 = vld [vmem:[#allocation6 + $0x28] sm:$0xff]  ;;  %v1396_v24 = vunpack.c.l.b16 %v1332_v57  ;;  %v2393_v15 = vunpack.c.l.b16 %v2278_v0  ;;  %v2818_v12 = vunpack.c.l.b16 %v2752_v34  ;;  %v5642_v57 = vld [vmem:[%s6044_s25 + $0x9c] sm:$0xff] }
 0x16c   : > { %2969 = vmatmul.bf16.gmra.mxu1 %v2837_v31  ;;  %v6643_v40 = vadd.f32 %v2927_v59, %v2574_v33  ;;  %v2280_v59 = vshrl.u32 %v5179_v27, 16  ;;  %v2392_v35 = vunpack.c.l.b16 %v2268_v29  ;;  %v2285_v33 = vrot.slane %v2283_v42, 5 }
 0x16d   : > { %v1507_v55 = vpop.f32.mrf.mxu2  ;;  %4604 = vmatpush.bf16.msra.mxu1 %v5715_v19  ;;  %v2295_v9 = vrot.slane %v2293_v14, 4  ;;  %v1415_v44 = vpack.c.b16 %v1396_v24, %v1395_v49  ;;  %v2758_v34 = vrot.slane %v6646_v58, 5 }
 0x16e   : > { %v1822_v63 = vpop.f32.mrf.mxu3  ;;  %v1578_v13 = vadd.f32 %v1507_v55, %v6385_v26  ;;  %v2755_v26 = vsel %vm6258_vm5, %v2753_v50, %v2754_v62  ;;  %v2282_v37 = vrot.slane %v2280_v59, 4  ;;  %v5799_v55 = vld [vmem:[%s6044_s25 + $0xa0] sm:$0xf]  ;;  %v2412_v59 = vpack.c.b16 %v2393_v15, %v2392_v35 }
 0x16f   : > { %v2506_v10 = vpop.f32.mrf.mxu0  ;;  %v2819_v2 = vunpack.c.l.b16 %v2755_v26  ;;  %v2296_v0 = vor.u32 %v2295_v9, %v2291_v36  ;;  %v5686_v35 = vld [vmem:[#allocation2 + $0x180] sm:$0xff]  ;;  %v2760_v58 = vrot.slane %v2758_v34, 4  ;;  %v2761_v9 = vrot.slane %v5181_v7, 5 }
 0x170   : > { %v1893_v31 = vadd.f32 %v1822_v63, %v1578_v13  ;;  %v1335_v63 = vrot.slane %v5799_v55, 5  ;;  %v1204_v13 = vld [vmem:[%s6044_s25 + $0x9c] sm:$0xe]  ;;  %v2286_v29 = vor.u32 %v2285_v33, %v2282_v37  ;;  %v2301_v37 = vrot.slane %v2299_v30, 5  ;;  %v5182_v33 = vld [vmem:[%s6044_s25 + $0xb4] sm:$0xf]  ;;  %3228 = vmatpush.bf16.msra.mxu2 %v5686_v35 }
 0x171   : > { %v2932_v23 = vpop.f32.mrf.mxu1  ;;  %v2838_v42 = vpack.c.b16 %v2819_v2, %v2818_v12  ;;  %v4977_v26 = vrot.slane %v1204_v13, 9  ;;  %v2297_v15 = vrot.slane %v2296_v0, 4 }
 0x172   : > { %v2575_v47 = vadd.f32 %v2504_v60, %v1893_v31  ;;  %v1337_v19 = vrot.slane %v1335_v63, 4  ;;  %v2287_v24 = vrot.slane %v2286_v29, 4  ;;  %v2304_v29 = vshrl.u32 %v5182_v33, 16 }
 0x173   : > { %v2302_v7 = vsel %vm6065_vm2, %v2297_v15, %v2301_v37 }
 0x174   : > { %v6663_v27 = vadd.f32 %v2930_v48, %v2575_v47  ;;  %v5800_v47 = vld [vmem:[%s6044_s25 + $0xa4] sm:$0x1] }
 0x175   : > { %v1509_v50 = vpop.f32.mrf.mxu2  ;;  %v1338_v55 = vrot.slane %v5800_v47, 5 }
 0x176   : > { %v1824_v62 = vpop.f32.mrf.mxu3  ;;  %v1579_v60 = vadd.f32 %v1509_v50, %v6408_v16  ;;  %v5233_v16 = vld [vmem:[%s6044_s25 + $0xa8] sm:$0xe]  ;;  %v6677_v50 = vld [vmem:[%s6044_s25 + $0xb8] sm:$0xf] }
 0x177   : > { %v2509_v48 = vpop.f32.mrf.mxu0  ;;  %v5249_v2 = vrot.slane %v5233_v16, 9  ;;  %v2317_v0 = vshrl.u32 %v6677_v50, 16  ;;  %v2395_v16 = vunpack.c.l.b16 %v2302_v7 }
 0x178   : > { %v1894_v14 = vadd.f32 %v1824_v62, %v1579_v60  ;;  %v5694_v62 = vld [vmem:[#allocation2 + $0x1c0] sm:$0xff] }
 0x179   : > { %v2935_v31 = vpop.f32.mrf.mxu1  ;;  %3910 = vmatpush.bf16.msra.mxu3 %v5694_v62 }
 0x17a   : > { %1551 = vmatmul.bf16.gmra.mxu2 %v1415_v44  ;;  %v2576_v49 = vadd.f32 %v2506_v10, %v1894_v14  ;;  %2548 = vmatmul.bf16.gmra.mxu0 %v2412_v59  ;;  %v1336_v10 = vsel %vm6258_vm5, %v4977_v26, %v1335_v63  ;;  %v2307_v59 = vshll.u32 %v5182_v33, 16  ;;  %v2319_v33 = vrot.slane %v2317_v0, 4 }
 0x17b   : > { %1866 = vmatmul.bf16.gmra.mxu3 %v5642_v57  ;;  %v1339_v57 = vsel %vm6258_vm5, %v1337_v19, %v1338_v55  ;;  %v1397_v26 = vunpack.c.l.b16 %v1336_v10  ;;  %v1205_v10 = vld [vmem:[%s6044_s25 + $0xa8] sm:$0xe] }
 0x17c   : > { %2974 = vmatmul.bf16.gmra.mxu1 %v2838_v42  ;;  %v6674_v12 = vadd.f32 %v2932_v23, %v2576_v49  ;;  %v2292_v23 = vsel %vm6065_vm2, %v2287_v24, %v2291_v36  ;;  %v2313_v42 = vshll.u32 %v6677_v50, 16  ;;  %v2762_v36 = vsel %vm6258_vm5, %v2760_v58, %v2761_v9 }
 0x17d   : > { %v1512_v60 = vpop.f32.mrf.mxu2  ;;  %v1398_v19 = vunpack.c.l.b16 %v1339_v57  ;;  %v2394_v47 = vunpack.c.l.b16 %v2292_v23  ;;  %v2306_v49 = vrot.slane %v2304_v29, 4  ;;  %v2309_v24 = vrot.slane %v2307_v59, 5  ;;  %v5801_v57 = vld [vmem:[%s6044_s25 + $0xac] sm:$0xf] }
 0x17e   : > { %v1827_v44 = vpop.f32.mrf.mxu3  ;;  %v1580_v13 = vadd.f32 %v1512_v60, %v6417_v38  ;;  %v2759_v38 = vsel %vm6258_vm5, %v5249_v2, %v2758_v34  ;;  %v2821_v15 = vunpack.c.l.b16 %v2762_v36  ;;  %v2315_v37 = vrot.slane %v2313_v42, 5  ;;  %v5184_v34 = vld [vmem:[%s6044_s25 + $0xbc] sm:$0x1]  ;;  %v5702_v2 = vld [vmem:[#allocation2 + $0x200] sm:$0xff]  ;;  %v5234_v36 = vld [vmem:[%s6044_s25 + $0xb4] sm:$0xe] }
 0x17f   : > { %v2511_v63 = vpop.f32.mrf.mxu0  ;;  %v2820_v35 = vunpack.c.l.b16 %v2759_v38  ;;  %v2310_v23 = vor.u32 %v2309_v24, %v2306_v49  ;;  %4336 = vmatpush.bf16.msra.mxu0 %v5702_v2  ;;  %v2413_v29 = vpack.c.b16 %v2395_v16, %v2394_v47  ;;  %v2765_v38 = vrot.slane %v6677_v50, 5  ;;  %v6710_v50 = vld [vmem:[%s6044_s25 + $0xc4] sm:$0xf] }
 0x180   : > { %v1895_v30 = vadd.f32 %v1827_v44, %v1580_v13  ;;  %v1416_v44 = vpack.c.b16 %v1398_v19, %v1397_v26  ;;  %v1342_v13 = vrot.slane %v5801_v57, 5  ;;  %v2320_v7 = vor.u32 %v2319_v33, %v2315_v37 }
 0x181   : > { %v6690_v14 = vpop.f32.mrf.mxu1  ;;  %v2839_v59 = vpack.c.b16 %v2821_v15, %v2820_v35  ;;  %v2311_v47 = vrot.slane %v2310_v23, 4  ;;  %v5185_v35 = vld [vmem:[%s6044_s25 + $0xc0] sm:$0xf]  ;;  %v5250_v15 = vrot.slane %v5234_v36, 9  ;;  %v2767_v33 = vrot.slane %v2765_v38, 4 }
 0x182   : > { %v2577_v55 = vadd.f32 %v2509_v48, %v1895_v30  ;;  %v5643_v48 = vld [vmem:[%s6044_s25 + $0xa8] sm:$0xff]  ;;  %v1344_v19 = vrot.slane %v1342_v13, 4  ;;  %v2321_v16 = vrot.slane %v2320_v7, 4  ;;  %v2768_v2 = vrot.slane %v5184_v34, 5 }
 0x183   : > { %v2328_v57 = vshrl.u32 %v5185_v35, 16  ;;  %v2337_v23 = vshll.u32 %v6710_v50, 16 }
 0x184   : > { %v6696_v62 = vadd.f32 %v2935_v31, %v2577_v55  ;;  %v2323_v31 = vshll.u32 %v5184_v34, 16  ;;  %v5802_v55 = vld [vmem:[%s6044_s25 + $0xb0] sm:$0x1]  ;;  %v2331_v34 = vshll.u32 %v5185_v35, 16  ;;  %v5187_v35 = vld [vmem:[%s6044_s25 + $0xc8] sm:$0x1] }
 0x185   : > { %v1514_v60 = vpop.f32.mrf.mxu2  ;;  %v1345_v49 = vrot.slane %v5802_v55, 5 }
 0x186   : > { %v1829_v58 = vpop.f32.mrf.mxu3  ;;  %v1581_v9 = vadd.f32 %v1514_v60, %v6441_v22  ;;  %v4978_v22 = vrot.slane %v1205_v10, 9  ;;  %v2325_v24 = vrot.slane %v2323_v31, 5  ;;  %v5714_v31 = vld [vmem:[#allocation6 + $0x20] sm:$0xff] }
 0x187   : > { %v2514_v0 = vpop.f32.mrf.mxu0  ;;  %4605 = vmatpush.bf16.msra.mxu1 %v5714_v31  ;;  %v5235_v31 = vld [vmem:[%s6044_s25 + $0xc0] sm:$0xe] }
 0x188   : > { %v1896_v42 = vadd.f32 %v1829_v58, %v1581_v9  ;;  %v2326_v10 = vsel %vm6065_vm2, %v2321_v16, %v2325_v24  ;;  %v2330_v16 = vrot.slane %v2328_v57, 4  ;;  %v2333_v24 = vrot.slane %v2331_v34, 5 }
 0x189   : > { %v2940_v30 = vpop.f32.mrf.mxu1  ;;  %v2397_v55 = vunpack.c.l.b16 %v2326_v10  ;;  %v5803_v10 = vld [vmem:[%s6044_s25 + $0xb8] sm:$0xf] }
 0x18a   : > { %1556 = vmatmul.bf16.gmra.mxu2 %v1416_v44  ;;  %v6705_v26 = vadd.f32 %v2511_v63, %v1896_v42  ;;  %2553 = vmatmul.bf16.gmra.mxu0 %v2413_v29  ;;  %v1343_v63 = vsel %vm6258_vm5, %v4978_v22, %v1342_v13  ;;  %v1346_v44 = vsel %vm6258_vm5, %v1344_v19, %v1345_v49  ;;  %v1349_v57 = vrot.slane %v5803_v10, 5 }
 0x18b   : > { %1871 = vmatmul.bf16.gmra.mxu3 %v5643_v48  ;;  %v2316_v48 = vsel %vm6065_vm2, %v2311_v47, %v2315_v37  ;;  %v2769_v13 = vsel %vm6258_vm5, %v2767_v33, %v2768_v2  ;;  %v2341_v37 = vshrl.u32 %v6710_v50, 16  ;;  %v1399_v42 = vunpack.c.l.b16 %v1343_v63 }
 0x18c   : > { %2979 = vmatmul.bf16.gmra.mxu1 %v2839_v59  ;;  %v1400_v36 = vunpack.c.l.b16 %v1346_v44  ;;  %v2396_v19 = vunpack.c.l.b16 %v2316_v48  ;;  %v2823_v47 = vunpack.c.l.b16 %v2769_v13  ;;  %v1206_v48 = vld [vmem:[%s6044_s25 + $0xb4] sm:$0xe]  ;;  %v2334_v34 = vor.u32 %v2333_v24, %v2330_v16 }
 0x18d   : > { %v1517_v60 = vpop.f32.mrf.mxu2  ;;  %v2343_v33 = vrot.slane %v2341_v37, 4  ;;  %v2772_v37 = vrot.slane %v6710_v50, 5  ;;  %v2775_v50 = vrot.slane %v5187_v35, 5 }
 0x18e   : > { %v1832_v58 = vpop.f32.mrf.mxu3  ;;  %v1582_v9 = vadd.f32 %v1517_v60, %v6450_v54  ;;  %v2766_v54 = vsel %vm6258_vm5, %v5250_v15, %v2765_v38  ;;  %v2339_v15 = vrot.slane %v2337_v23, 5  ;;  %v2414_v63 = vpack.c.b16 %v2397_v55, %v2396_v19  ;;  %v5804_v55 = vld [vmem:[%s6044_s25 + $0xbc] sm:$0x1] }
 0x18f   : > { %v2516_v59 = vpop.f32.mrf.mxu0  ;;  %v2822_v49 = vunpack.c.l.b16 %v2766_v54  ;;  %v1351_v19 = vrot.slane %v1349_v57, 4 }
 0x190   : > { %v1897_v29 = vadd.f32 %v1832_v58, %v1582_v9  ;;  %v1417_v58 = vpack.c.b16 %v1400_v36, %v1399_v42  ;;  %v5644_v9 = vld [vmem:[%s6044_s25 + $0xb4] sm:$0xff]  ;;  %v2344_v13 = vor.u32 %v2343_v33, %v2339_v15  ;;  %v4979_v42 = vrot.slane %v1206_v48, 9  ;;  %v6742_v36 = vld [vmem:[%s6044_s25 + $0x1c] sm:$0xf] }
 0x191   : > { %v6722_v7 = vpop.f32.mrf.mxu1  ;;  %v2840_v44 = vpack.c.b16 %v2823_v47, %v2822_v49  ;;  %v1352_v49 = vrot.slane %v5804_v55, 5  ;;  %v2335_v47 = vrot.slane %v2334_v34, 4  ;;  %v5251_v33 = vrot.slane %v5235_v31, 9 }
 0x192   : > { %v2579_v22 = vadd.f32 %v2514_v0, %v1897_v29  ;;  %v2345_v24 = vrot.slane %v2344_v13, 4  ;;  %v3404_v48 = vshrl.u32 %v6742_v36, 16 }
 0x193   : > { %v1353_v10 = vsel %vm6258_vm5, %v1351_v19, %v1352_v49 }
 0x194   : > { %v6729_v38 = vadd.f32 %v2940_v30, %v2579_v22  ;;  %v2347_v30 = vshll.u32 %v5187_v35, 16  ;;  %v5412_v22 = vld [vmem:[%s6044_s25 + $0x18] sm:$0xf]  ;;  %v2340_v35 = vsel %vm6065_vm2, %v2335_v47, %v2339_v15  ;;  %v3406_v19 = vrot.slane %v3404_v48, 4  ;;  %v5414_v47 = vld [vmem:[%s6044_s25 + $0x20] sm:$0x1] }
 0x195   : > { %v1519_v2 = vpop.f32.mrf.mxu2  ;;  %v1402_v49 = vunpack.c.l.b16 %v1353_v10  ;;  %v5492_v10 = vld [vmem:[%s6044_s25 + $0x18] sm:$0xe] }
 0x196   : > { %v1834_v60 = vpop.f32.mrf.mxu3  ;;  %v1583_v0 = vadd.f32 %v1519_v2, %v6474_v17  ;;  %v2349_v16 = vrot.slane %v2347_v30, 5  ;;  %v2774_v2 = vrot.slane %v2772_v37, 4 }
 0x197   : > { %v2519_v23 = vpop.f32.mrf.mxu0 }
 0x198   : > { %v1898_v29 = vadd.f32 %v1834_v60, %v1583_v0  ;;  %v2350_v13 = vsel %vm6065_vm2, %v2345_v24, %v2349_v16 }
 0x199   : > { %v2945_v54 = vpop.f32.mrf.mxu1 }
 0x19a   : > { %1561 = vmatmul.bf16.gmra.mxu2 %v1417_v58  ;;  %v6738_v17 = vadd.f32 %v2516_v59, %v1898_v29  ;;  %2558 = vmatmul.bf16.gmra.mxu0 %v2414_v63  ;;  %v3391_v58 = vshrl.u32 %v5412_v22, 16  ;;  %v3394_v59 = vshll.u32 %v5412_v22, 16 }
 0x19b   : > { %1876 = vmatmul.bf16.gmra.mxu3 %v5644_v9  ;;  %v3400_v9 = vshll.u32 %v6742_v36, 16 }
 0x19c   : > { %2984 = vmatmul.bf16.gmra.mxu1 %v2840_v44  ;;  %v1350_v44 = vsel %vm6258_vm5, %v4979_v42, %v1349_v57  ;;  %v2776_v57 = vsel %vm6258_vm5, %v2774_v2, %v2775_v50  ;;  %v3393_v31 = vrot.slane %v3391_v58, 4  ;;  %v3396_v42 = vrot.slane %v3394_v59, 5 }
 0x19d   : > { %v1522_v60 = vpop.f32.mrf.mxu2  ;;  %v3402_v22 = vrot.slane %v3400_v9, 5  ;;  %v1401_v15 = vunpack.c.l.b16 %v1350_v44  ;;  %v2825_v16 = vunpack.c.l.b16 %v2776_v57  ;;  %v3410_v50 = vshll.u32 %v5414_v47, 16 }
 0x19e   : > { %v1837_v0 = vpop.f32.mrf.mxu3  ;;  %v1584_v63 = vadd.f32 %v1522_v60, %v6484_v56  ;;  %v2773_v56 = vsel %vm6258_vm5, %v5251_v33, %v2772_v37  ;;  %v2398_v60 = vunpack.c.l.b16 %v2340_v35  ;;  %v4090_v9 = vrot.slane %v6742_v36, 5  ;;  %v5415_v36 = vld [vmem:[%s6044_s25 + $0x24] sm:$0xf] }
 0x19f   : > { %v2521_v30 = vpop.f32.mrf.mxu0  ;;  %v3407_v2 = vor.u32 %v3406_v19, %v3402_v22  ;;  %v1418_v59 = vpack.c.b16 %v1402_v49, %v1401_v15  ;;  %v3412_v57 = vrot.slane %v3410_v50, 5  ;;  %v4093_v19 = vrot.slane %v5414_v47, 5 }
 0x1a0   : > { %v1899_v34 = vadd.f32 %v1837_v0, %v1584_v63  ;;  %v2399_v0 = vunpack.c.l.b16 %v2350_v13  ;;  %v2824_v63 = vunpack.c.l.b16 %v2773_v56 }
 0x1a1   : > { %v6754_v29 = vpop.f32.mrf.mxu1  ;;  %v3408_v56 = vrot.slane %v3407_v2, 4 }
 0x1a2   : > { %7287 = vst [vmem:[#allocation16_spill] sm:$0xff] %v6754_v29  ;;  %v2581_v55 = vadd.f32 %v2519_v23, %v1899_v34  ;;  %v3397_v29 = vor.u32 %v3396_v42, %v3393_v31  ;;  %v5645_v23 = vld [vmem:[%s6044_s25 + $0xc0] sm:$0xff]  ;;  %v2415_v48 = vpack.c.b16 %v2399_v0, %v2398_v60  ;;  %v2841_v44 = vpack.c.b16 %v2825_v16, %v2824_v63 }
 0x1a3   : > { %v4092_v42 = vrot.slane %v4090_v9, 4  ;;  %v3413_v0 = vsel %vm6065_vm2, %v3408_v56, %v3412_v57  ;;  %v3415_v63 = vshrl.u32 %v5415_v36, 16  ;;  %v3418_v16 = vshll.u32 %v5415_v36, 16  ;;  %v5417_v57 = vld [vmem:[%s6044_s25 + $0x2c] sm:$0x1]  ;;  %v5670_v36 = vld [vmem:[%s6044_s25 + $0x18] sm:$0xff] }
 0x1a4   : > { %v6763_v24 = vadd.f32 %v2945_v54, %v2581_v55  ;;  %v3398_v13 = vrot.slane %v3397_v29, 4  ;;  %v6773_v55 = vld [vmem:[%s6044_s25 + $0x28] sm:$0xf] }
 0x1a5   : > { %v1524_v37 = vpop.f32.mrf.mxu2  ;;  %v4094_v47 = vsel %vm6258_vm5, %v4092_v42, %v4093_v19 }
 0x1a6   : > { %v1839_v33 = vpop.f32.mrf.mxu3  ;;  %v1585_v58 = vadd.f32 %v1524_v37, %v6507_v8  ;;  %v5508_v8 = vrot.slane %v5492_v10, 9  ;;  %v3403_v60 = vsel %vm6065_vm2, %v3398_v13, %v3402_v22  ;;  %v3424_v37 = vshll.u32 %v6773_v55, 16 }
 0x1a7   : > { %v2524_v34 = vpop.f32.mrf.mxu0  ;;  %v3420_v10 = vrot.slane %v3418_v16, 5 }
 0x1a8   : > { %v1900_v35 = vadd.f32 %v1839_v33, %v1585_v58  ;;  %v3428_v33 = vshrl.u32 %v6773_v55, 16  ;;  %v3791_v58 = vunpack.c.l.b16 %v3403_v60 }
 0x1a9   : > { %v2950_v54 = vpop.f32.mrf.mxu1 }
 0x1aa   : > { %1566 = vmatmul.bf16.gmra.mxu2 %v1418_v59  ;;  %v6769_v31 = vadd.f32 %v2521_v30, %v1900_v35  ;;  %2563 = vmatmul.bf16.gmra.mxu0 %v2415_v48  ;;  %v4091_v30 = vsel %vm6258_vm5, %v5508_v8, %v4090_v9  ;;  %v4218_v48 = vunpack.c.l.b16 %v4094_v47  ;;  %v3426_v35 = vrot.slane %v3424_v37, 5  ;;  %v5418_v37 = vld [vmem:[%s6044_s25 + $0x30] sm:$0xf] }
 0x1ab   : > { %1881 = vmatmul.bf16.gmra.mxu3 %v5645_v23  ;;  %v3792_v23 = vunpack.c.l.b16 %v3413_v0  ;;  %v4217_v9 = vunpack.c.l.b16 %v4091_v30  ;;  %v3430_v13 = vrot.slane %v3428_v33, 4  ;;  %v6799_v33 = vld [vmem:[%s6044_s25 + $0x34] sm:$0xf] }
 0x1ac   : > { %2989 = vmatmul.bf16.gmra.mxu1 %v2841_v44  ;;  %v3417_v44 = vrot.slane %v3415_v63, 4  ;;  %v4097_v63 = vrot.slane %v6773_v55, 5  ;;  %v3448_v55 = vshll.u32 %v6799_v33, 16 }
 0x1ad   : > { %v1527_v15 = vpop.f32.mrf.mxu2  ;;  %v3431_v60 = vor.u32 %v3430_v13, %v3426_v35  ;;  %v3452_v13 = vshrl.u32 %v6799_v33, 16 }
 0x1ae   : > { %v1842_v49 = vpop.f32.mrf.mxu3  ;;  %v1586_v29 = vadd.f32 %v1527_v15, %v6516_v5  ;;  %v5713_v5 = vld [vmem:[#allocation6 + $0x18] sm:$0xff]  ;;  %v4249_v15 = vpack.c.b16 %v4218_v48, %v4217_v9 }
 0x1af   : > { %v2526_v22 = vpop.f32.mrf.mxu0  ;;  %4606 = vmatpush.bf16.msra.mxu1 %v5713_v5 }
 0x1b0   : > { %v1901_v2 = vadd.f32 %v1842_v49, %v1586_v29  ;;  %v3421_v49 = vor.u32 %v3420_v10, %v3417_v44  ;;  %v3434_v29 = vshll.u32 %v5417_v57, 16  ;;  %v3439_v44 = vshrl.u32 %v5418_v37, 16 }
 0x1b1   : > { %v6786_v50 = vpop.f32.mrf.mxu1  ;;  %v3442_v10 = vshll.u32 %v5418_v37, 16  ;;  %v5420_v37 = vld [vmem:[%s6044_s25 + $0x38] sm:$0x1] }
 0x1b2   : > { %v2583_v59 = vadd.f32 %v2524_v34, %v1901_v2  ;;  %v3823_v34 = vpack.c.b16 %v3792_v23, %v3791_v58  ;;  %v3432_v2 = vrot.slane %v3431_v60, 4  ;;  %v3436_v5 = vrot.slane %v3434_v29, 5 }
 0x1b3   : > { %v4100_v23 = vrot.slane %v5417_v57, 5  ;;  %v3444_v60 = vrot.slane %v3442_v10, 5  ;;  %v3454_v29 = vrot.slane %v3452_v13, 4  ;;  %v4104_v10 = vrot.slane %v6799_v33, 5  ;;  %v6825_v33 = vld [vmem:[%s6044_s25 + $0x40] sm:$0xf] }
 0x1b4   : > { %v6788_v56 = vadd.f32 %v2950_v54, %v2583_v59  ;;  %v5493_v54 = vld [vmem:[%s6044_s25 + $0x24] sm:$0xe]  ;;  %v4099_v59 = vrot.slane %v4097_v63, 4 }
 0x1b5   : > { %v1529_v8 = vpop.f32.mrf.mxu2  ;;  %v5509_v58 = vrot.slane %v5493_v54, 9 }
 0x1b6   : > { %v1844_v42 = vpop.f32.mrf.mxu3  ;;  %v1587_v19 = vadd.f32 %v1529_v8, %v6540_v61  ;;  %v3422_v61 = vrot.slane %v3421_v49, 4  ;;  %v3441_v49 = vrot.slane %v3439_v44, 4 }
 0x1b7   : > { %v2529_v30 = vpop.f32.mrf.mxu0 }
 0x1b8   : > { %v1902_v0 = vadd.f32 %v1844_v42, %v1587_v19  ;;  %v3427_v8 = vsel %vm6065_vm2, %v3422_v61, %v3426_v35  ;;  %v3437_v42 = vsel %vm6065_vm2, %v3432_v2, %v3436_v5 }
 0x1b9   : > { %v2955_v47 = vpop.f32.mrf.mxu1  ;;  %v3793_v35 = vunpack.c.l.b16 %v3427_v8  ;;  %v3794_v54 = vunpack.c.l.b16 %v3437_v42 }
 0x1ba   : > { %3229 = vmatmul.bf16.vlgmr.msra.gmra.mxu2 %v5670_v36  ;;  %v6795_v16 = vadd.f32 %v2526_v22, %v1902_v0  ;;  %4337 = vmatmul.bf16.vlgmr.msra.gmra.mxu0 %v4249_v15  ;;  %v4101_v15 = vsel %vm6258_vm5, %v4099_v59, %v4100_v23  ;;  %v5671_v23 = vld [vmem:[%s6044_s25 + $0x24] sm:$0xff] }
 0x1bb   : > { %3911 = vmatmul.bf16.vlgmr.msra.gmra.mxu3 %v3823_v34  ;;  %v4098_v34 = vsel %vm6258_vm5, %v5509_v58, %v4097_v63  ;;  %v4220_v2 = vunpack.c.l.b16 %v4101_v15  ;;  %v3445_v63 = vor.u32 %v3444_v60, %v3441_v49  ;;  %v3824_v44 = vpack.c.b16 %v3794_v54, %v3793_v35 }
 0x1bc   : > { %v4219_v61 = vunpack.c.l.b16 %v4098_v34  ;;  %v4107_v60 = vrot.slane %v5420_v37, 5 }
 0x1bd   : > { %v1532_v9 = vpop.f32.mrf.mxu2 }
 0x1be   : > { %v1847_v48 = vpop.f32.mrf.mxu3  ;;  %v1588_v22 = vadd.f32 %v1532_v9, %v6297_v11  ;;  %v3450_v11 = vrot.slane %v3448_v55, 5  ;;  %v5494_v55 = vld [vmem:[%s6044_s25 + $0x30] sm:$0xe] }
 0x1bf   : > { %v2531_v36 = vpop.f32.mrf.mxu0  ;;  %v5510_v49 = vrot.slane %v5494_v55, 9 }
 0x1c0   : > { %v1903_v19 = vadd.f32 %v1847_v48, %v1588_v22  ;;  %v3455_v58 = vor.u32 %v3454_v29, %v3450_v11  ;;  %v3458_v22 = vshll.u32 %v5420_v37, 16  ;;  %v5421_v29 = vld [vmem:[%s6044_s25 + $0x3c] sm:$0xf] }
 0x1c1   : > { %v6808_v57 = vpop.f32.mrf.mxu1 }
 0x1c2   : > { %v2585_v0 = vadd.f32 %v2529_v30, %v1903_v19  ;;  %v4250_v30 = vpack.c.b16 %v4220_v2, %v4219_v61  ;;  %v3456_v19 = vrot.slane %v3455_v58, 4  ;;  %v3460_v34 = vrot.slane %v3458_v22, 5 }
 0x1c3   : > { %v3476_v58 = vshrl.u32 %v6825_v33, 16 }
 0x1c4   : > { %v6815_v5 = vadd.f32 %v2955_v47, %v2585_v0  ;;  %v3446_v47 = vrot.slane %v3445_v63, 4  ;;  %v3461_v2 = vsel %vm6065_vm2, %v3456_v19, %v3460_v34  ;;  %v3472_v63 = vshll.u32 %v6825_v33, 16 }
 0x1c5   : > { %v1534_v9 = vpop.f32.mrf.mxu2  ;;  %v3478_v34 = vrot.slane %v3476_v58, 4 }
 0x1c6   : > { %v1849_v48 = vpop.f32.mrf.mxu3  ;;  %v1589_v59 = vadd.f32 %v1534_v9, %v6312_v46  ;;  %v4106_v46 = vrot.slane %v4104_v10, 4  ;;  %v3451_v54 = vsel %vm6065_vm2, %v3446_v47, %v3450_v11  ;;  %v3463_v9 = vshrl.u32 %v5421_v29, 16 }
 0x1c7   : > { %v2534_v8 = vpop.f32.mrf.mxu0  ;;  %v3474_v19 = vrot.slane %v3472_v63, 5  ;;  %v4111_v63 = vrot.slane %v6825_v33, 5 }
 0x1c8   : > { %v1904_v13 = vadd.f32 %v1849_v48, %v1589_v59  ;;  %v4108_v37 = vsel %vm6258_vm5, %v4106_v46, %v4107_v60  ;;  %v3466_v48 = vshll.u32 %v5421_v29, 16  ;;  %v5423_v46 = vld [vmem:[%s6044_s25 + $0x44] sm:$0x1] }
 0x1c9   : > { %v2960_v42 = vpop.f32.mrf.mxu1  ;;  %v4222_v55 = vunpack.c.l.b16 %v4108_v37 }
 0x1ca   : > { %3234 = vmatmul.bf16.gmra.mxu2 %v5671_v23  ;;  %v6821_v15 = vadd.f32 %v2531_v36, %v1904_v13  ;;  %4342 = vmatmul.bf16.gmra.mxu0 %v4250_v30  ;;  %v4105_v36 = vsel %vm6258_vm5, %v5510_v49, %v4104_v10  ;;  %v3795_v23 = vunpack.c.l.b16 %v3451_v54  ;;  %v3796_v30 = vunpack.c.l.b16 %v3461_v2 }
 0x1cb   : > { %3916 = vmatmul.bf16.gmra.mxu3 %v3824_v44  ;;  %v4221_v10 = vunpack.c.l.b16 %v4105_v36  ;;  %v3465_v13 = vrot.slane %v3463_v9, 4  ;;  %v3468_v47 = vrot.slane %v3466_v48, 5  ;;  %v3479_v2 = vor.u32 %v3478_v34, %v3474_v19 }
 0x1cc   : > { %v3482_v36 = vshll.u32 %v5423_v46, 16 }
 0x1cd   : > { %v1537_v0 = vpop.f32.mrf.mxu2  ;;  %v4251_v54 = vpack.c.b16 %v4222_v55, %v4221_v10  ;;  %v4113_v10 = vrot.slane %v4111_v63, 4  ;;  %v4114_v55 = vrot.slane %v5423_v46, 5 }
 0x1ce   : > { %v1852_v35 = vpop.f32.mrf.mxu3  ;;  %v1590_v61 = vadd.f32 %v1537_v0, %v6326_v18  ;;  %v5712_v18 = vld [vmem:[#allocation6 + $0x10] sm:$0xff] }
 0x1cf   : > { %v2536_v11 = vpop.f32.mrf.mxu0  ;;  %4607 = vmatpush.bf16.msra.mxu1 %v5712_v18  ;;  %v6851_v18 = vld [vmem:[%s6044_s25 + $0x4c] sm:$0xf] }
 0x1d0   : > { %v1905_v22 = vadd.f32 %v1852_v35, %v1590_v61  ;;  %v5672_v35 = vld [vmem:[%s6044_s25 + $0x30] sm:$0xff]  ;;  %v3469_v61 = vor.u32 %v3468_v47, %v3465_v13  ;;  %v3496_v33 = vshll.u32 %v6851_v18, 16 }
 0x1d1   : > { %v6838_v59 = vpop.f32.mrf.mxu1 }
 0x1d2   : > { %7288 = vst [vmem:[#allocation17_spill] sm:$0xff] %v6838_v59  ;;  %v2587_v44 = vadd.f32 %v2534_v8, %v1905_v22  ;;  %v3825_v8 = vpack.c.b16 %v3796_v30, %v3795_v23  ;;  %v5424_v22 = vld [vmem:[%s6044_s25 + $0x48] sm:$0xf]  ;;  %v3480_v23 = vrot.slane %v3479_v2, 4  ;;  %v4115_v2 = vsel %vm6258_vm5, %v4113_v10, %v4114_v55  ;;  %v5673_v55 = vld [vmem:[%s6044_s25 + $0x3c] sm:$0xff] }
 0x1d3   : > { %v3487_v34 = vshrl.u32 %v5424_v22, 16 }
 0x1d4   : > { %v6840_v49 = vadd.f32 %v2960_v42, %v2587_v44  ;;  %v5495_v42 = vld [vmem:[%s6044_s25 + $0x3c] sm:$0xe]  ;;  %v3484_v44 = vrot.slane %v3482_v36, 5 }
 0x1d5   : > { %v1539_v60 = vpop.f32.mrf.mxu2  ;;  %v5511_v30 = vrot.slane %v5495_v42, 9  ;;  %v3489_v36 = vrot.slane %v3487_v34, 4 }
 0x1d6   : > { %v1854_v29 = vpop.f32.mrf.mxu3  ;;  %v1591_v0 = vadd.f32 %v1539_v60, %v6345_v53  ;;  %v3470_v53 = vrot.slane %v3469_v61, 4  ;;  %v3490_v60 = vshll.u32 %v5424_v22, 16 }
 0x1d7   : > { %v2539_v9 = vpop.f32.mrf.mxu0  ;;  %v4112_v61 = vsel %vm6258_vm5, %v5511_v30, %v4111_v63 }
 0x1d8   : > { %v1906_v37 = vadd.f32 %v1854_v29, %v1591_v0  ;;  %v3500_v29 = vshrl.u32 %v6851_v18, 16  ;;  %v3475_v0 = vsel %vm6065_vm2, %v3470_v53, %v3474_v19 }
 0x1d9   : > { %v2965_v48 = vpop.f32.mrf.mxu1  ;;  %v3797_v19 = vunpack.c.l.b16 %v3475_v0 }
 0x1da   : > { %3239 = vmatmul.bf16.gmra.mxu2 %v5672_v35  ;;  %v6847_v58 = vadd.f32 %v2536_v11, %v1906_v37  ;;  %4347 = vmatmul.bf16.gmra.mxu0 %v4251_v54  ;;  %v3485_v35 = vsel %vm6065_vm2, %v3480_v23, %v3484_v44  ;;  %v3492_v37 = vrot.slane %v3490_v60, 5  ;;  %v3502_v42 = vrot.slane %v3500_v29, 4  ;;  %v5426_v23 = vld [vmem:[%s6044_s25 + $0x50] sm:$0x1] }
 0x1db   : > { %3921 = vmatmul.bf16.gmra.mxu3 %v3825_v8  ;;  %v3798_v53 = vunpack.c.l.b16 %v3485_v35  ;;  %v4223_v44 = vunpack.c.l.b16 %v4112_v61  ;;  %v3506_v59 = vshll.u32 %v5426_v23, 16  ;;  %v4118_v60 = vrot.slane %v6851_v18, 5  ;;  %v6877_v18 = vld [vmem:[%s6044_s25 + $0x58] sm:$0xf] }
 0x1dc   : > { %v3493_v63 = vor.u32 %v3492_v37, %v3489_v36  ;;  %v4121_v37 = vrot.slane %v5426_v23, 5 }
 0x1dd   : > { %v1542_v13 = vpop.f32.mrf.mxu2  ;;  %v3826_v34 = vpack.c.b16 %v3798_v53, %v3797_v19  ;;  %v3508_v61 = vrot.slane %v3506_v59, 5 }
 0x1de   : > { %v1857_v47 = vpop.f32.mrf.mxu3  ;;  %v1592_v11 = vadd.f32 %v1542_v13, %v6359_v32  ;;  %v3498_v32 = vrot.slane %v3496_v33, 5  ;;  %v4224_v13 = vunpack.c.l.b16 %v4115_v2  ;;  %v5496_v33 = vld [vmem:[%s6044_s25 + $0x48] sm:$0xe] }
 0x1df   : > { %v2541_v54 = vpop.f32.mrf.mxu0  ;;  %v5512_v36 = vrot.slane %v5496_v33, 9 }
 0x1e0   : > { %v1907_v8 = vadd.f32 %v1857_v47, %v1592_v11  ;;  %v3503_v30 = vor.u32 %v3502_v42, %v3498_v32  ;;  %v5427_v42 = vld [vmem:[%s6044_s25 + $0x54] sm:$0xf] }
 0x1e1   : > { %v6860_v46 = vpop.f32.mrf.mxu1 }
 0x1e2   : > { %7289 = vst [vmem:[#allocation18_spill] sm:$0xff] %v6860_v46  ;;  %v2589_v22 = vadd.f32 %v2539_v9, %v1907_v8  ;;  %v4252_v9 = vpack.c.b16 %v4224_v13, %v4223_v44  ;;  %v3504_v8 = vrot.slane %v3503_v30, 4  ;;  %v3511_v44 = vshrl.u32 %v5427_v42, 16 }
 0x1e3   : > { %v3514_v13 = vshll.u32 %v5427_v42, 16 }
 0x1e4   : > { %v6867_v47 = vadd.f32 %v2965_v48, %v2589_v22  ;;  %v3494_v48 = vrot.slane %v3493_v63, 4  ;;  %v3509_v59 = vsel %vm6065_vm2, %v3504_v8, %v3508_v61  ;;  %v3524_v63 = vshrl.u32 %v6877_v18, 16 }
 0x1e5   : > { %v1544_v11 = vpop.f32.mrf.mxu2 }
 0x1e6   : > { %v1859_v46 = vpop.f32.mrf.mxu3  ;;  %v1593_v10 = vadd.f32 %v1544_v11, %v6380_v20  ;;  %v4120_v20 = vrot.slane %v4118_v60, 4  ;;  %v3520_v11 = vshll.u32 %v6877_v18, 16  ;;  %v3526_v61 = vrot.slane %v3524_v63, 4 }
 0x1e7   : > { %v2544_v0 = vpop.f32.mrf.mxu0 }
 0x1e8   : > { %v1908_v29 = vadd.f32 %v1859_v46, %v1593_v10  ;;  %v3499_v46 = vsel %vm6065_vm2, %v3494_v48, %v3498_v32  ;;  %v4122_v23 = vsel %vm6258_vm5, %v4120_v20, %v4121_v37  ;;  %v3516_v48 = vrot.slane %v3514_v13, 5  ;;  %v5429_v20 = vld [vmem:[%s6044_s25 + $0x5c] sm:$0x1] }
 0x1e9   : > { %v2970_v35 = vpop.f32.mrf.mxu1  ;;  %v4226_v33 = vunpack.c.l.b16 %v4122_v23  ;;  %v3522_v8 = vrot.slane %v3520_v11, 5  ;;  %v4125_v11 = vrot.slane %v6877_v18, 5 }
 0x1ea   : > { %3244 = vmatmul.bf16.gmra.mxu2 %v5673_v55  ;;  %v6873_v2 = vadd.f32 %v2541_v54, %v1908_v29  ;;  %4352 = vmatmul.bf16.gmra.mxu0 %v4252_v9  ;;  %v4119_v54 = vsel %vm6258_vm5, %v5512_v36, %v4118_v60  ;;  %v3799_v55 = vunpack.c.l.b16 %v3499_v46  ;;  %v3800_v9 = vunpack.c.l.b16 %v3509_v59 }
 0x1eb   : > { %3926 = vmatmul.bf16.gmra.mxu3 %v3826_v34  ;;  %v4225_v60 = vunpack.c.l.b16 %v4119_v54  ;;  %v3513_v29 = vrot.slane %v3511_v44, 4  ;;  %v3527_v59 = vor.u32 %v3526_v61, %v3522_v8  ;;  %v3530_v54 = vshll.u32 %v5429_v20, 16 }
 0x1ed   : > { %v1547_v22 = vpop.f32.mrf.mxu2  ;;  %v4253_v46 = vpack.c.b16 %v4226_v33, %v4225_v60  ;;  %v4127_v60 = vrot.slane %v4125_v11, 4  ;;  %v4128_v33 = vrot.slane %v5429_v20, 5 }
 0x1ee   : > { %v1862_v19 = vpop.f32.mrf.mxu3  ;;  %v1594_v53 = vadd.f32 %v1547_v22, %v6398_v45  ;;  %v5711_v45 = vld [vmem:[#allocation6 + $0x8] sm:$0xff] }
 0x1ef   : > { %v2546_v32 = vpop.f32.mrf.mxu0  ;;  %4608 = vmatpush.bf16.msra.mxu1 %v5711_v45  ;;  %v6903_v45 = vld [vmem:[%s6044_s25 + $0x64] sm:$0xf] }
 0x1f0   : > { %v1909_v30 = vadd.f32 %v1862_v19, %v1594_v53  ;;  %v5674_v19 = vld [vmem:[%s6044_s25 + $0x48] sm:$0xff]  ;;  %v3517_v53 = vor.u32 %v3516_v48, %v3513_v29  ;;  %v3544_v18 = vshll.u32 %v6903_v45, 16 }
 0x1f1   : > { %v6890_v10 = vpop.f32.mrf.mxu1 }
 0x1f2   : > { %7290 = vst [vmem:[#allocation19_spill] sm:$0xff] %v6890_v10  ;;  %v2591_v34 = vadd.f32 %v2544_v0, %v1909_v30  ;;  %v3827_v0 = vpack.c.b16 %v3800_v9, %v3799_v55  ;;  %v5430_v30 = vld [vmem:[%s6044_s25 + $0x60] sm:$0xf]  ;;  %v3528_v55 = vrot.slane %v3527_v59, 4  ;;  %v4129_v59 = vsel %vm6258_vm5, %v4127_v60, %v4128_v33  ;;  %v5675_v33 = vld [vmem:[%s6044_s25 + $0x54] sm:$0xff] }
 0x1f3   : > { %v3535_v61 = vshrl.u32 %v5430_v30, 16 }
 0x1f4   : > { %v6892_v36 = vadd.f32 %v2970_v35, %v2591_v34  ;;  %v5497_v35 = vld [vmem:[%s6044_s25 + $0x54] sm:$0xe]  ;;  %v3532_v34 = vrot.slane %v3530_v54, 5 }
 0x1f5   : > { %v1549_v37 = vpop.f32.mrf.mxu2  ;;  %v5513_v9 = vrot.slane %v5497_v35, 9  ;;  %v3537_v54 = vrot.slane %v3535_v61, 4 }
 0x1f6   : > { %v1864_v42 = vpop.f32.mrf.mxu3  ;;  %v1595_v22 = vadd.f32 %v1549_v37, %v6411_v21  ;;  %v3518_v21 = vrot.slane %v3517_v53, 4  ;;  %v3538_v37 = vshll.u32 %v5430_v30, 16 }
 0x1f7   : > { %v2549_v44 = vpop.f32.mrf.mxu0  ;;  %v4126_v53 = vsel %vm6258_vm5, %v5513_v9, %v4125_v11 }
 0x1f8   : > { %v1910_v23 = vadd.f32 %v1864_v42, %v1595_v22  ;;  %v3548_v42 = vshrl.u32 %v6903_v45, 16  ;;  %v3523_v22 = vsel %vm6065_vm2, %v3518_v21, %v3522_v8 }
 0x1f9   : > { %v2975_v13 = vpop.f32.mrf.mxu1  ;;  %v3801_v8 = vunpack.c.l.b16 %v3523_v22 }
 0x1fa   : > { %3249 = vmatmul.bf16.gmra.mxu2 %v5674_v19  ;;  %v6899_v63 = vadd.f32 %v2546_v32, %v1910_v23  ;;  %4357 = vmatmul.bf16.gmra.mxu0 %v4253_v46  ;;  %v3533_v19 = vsel %vm6065_vm2, %v3528_v55, %v3532_v34  ;;  %v3540_v23 = vrot.slane %v3538_v37, 5  ;;  %v3550_v35 = vrot.slane %v3548_v42, 4  ;;  %v5432_v55 = vld [vmem:[%s6044_s25 + $0x68] sm:$0x1] }
 0x1fb   : > { %3931 = vmatmul.bf16.gmra.mxu3 %v3827_v0  ;;  %v3802_v21 = vunpack.c.l.b16 %v3533_v19  ;;  %v4227_v34 = vunpack.c.l.b16 %v4126_v53  ;;  %v3554_v10 = vshll.u32 %v5432_v55, 16  ;;  %v4132_v37 = vrot.slane %v6903_v45, 5  ;;  %v6929_v45 = vld [vmem:[%s6044_s25 + $0x70] sm:$0xf] }
 0x1fc   : > { %v3541_v11 = vor.u32 %v3540_v23, %v3537_v54  ;;  %v4135_v23 = vrot.slane %v5432_v55, 5 }
 0x1fd   : > { %v1552_v29 = vpop.f32.mrf.mxu2  ;;  %v3828_v61 = vpack.c.b16 %v3802_v21, %v3801_v8  ;;  %v3556_v53 = vrot.slane %v3554_v10, 5 }
 0x1fe   : > { %v1867_v48 = vpop.f32.mrf.mxu3  ;;  %v1596_v32 = vadd.f32 %v1552_v29, %v6425_v3  ;;  %v3546_v3 = vrot.slane %v3544_v18, 5  ;;  %v4228_v29 = vunpack.c.l.b16 %v4129_v59  ;;  %v5498_v18 = vld [vmem:[%s6044_s25 + $0x60] sm:$0xe] }
 0x1ff   : > { %v2551_v46 = vpop.f32.mrf.mxu0  ;;  %v5514_v54 = vrot.slane %v5498_v18, 9 }
 0x200   : > { %v1911_v0 = vadd.f32 %v1867_v48, %v1596_v32  ;;  %v3551_v9 = vor.u32 %v3550_v35, %v3546_v3  ;;  %v5433_v35 = vld [vmem:[%s6044_s25 + $0x6c] sm:$0xf] }
 0x201   : > { %v6912_v20 = vpop.f32.mrf.mxu1 }
 0x202   : > { %7291 = vst [vmem:[#allocation20_spill] sm:$0xff] %v6912_v20  ;;  %v2593_v30 = vadd.f32 %v2549_v44, %v1911_v0  ;;  %v4254_v44 = vpack.c.b16 %v4228_v29, %v4227_v34  ;;  %v3552_v0 = vrot.slane %v3551_v9, 4  ;;  %v3559_v34 = vshrl.u32 %v5433_v35, 16 }
 0x203   : > { %v3562_v29 = vshll.u32 %v5433_v35, 16 }
 0x204   : > { %v6919_v48 = vadd.f32 %v2975_v13, %v2593_v30  ;;  %v3542_v13 = vrot.slane %v3541_v11, 4  ;;  %v3557_v10 = vsel %vm6065_vm2, %v3552_v0, %v3556_v53  ;;  %v3572_v11 = vshrl.u32 %v6929_v45, 16 }
 0x205   : > { %v1554_v32 = vpop.f32.mrf.mxu2 }
 0x206   : > { %v1869_v20 = vpop.f32.mrf.mxu3  ;;  %v1597_v60 = vadd.f32 %v1554_v32, %v6444_v43  ;;  %v4134_v43 = vrot.slane %v4132_v37, 4  ;;  %v3568_v32 = vshll.u32 %v6929_v45, 16  ;;  %v3574_v53 = vrot.slane %v3572_v11, 4  ;;  %v5436_v11 = vld [vmem:[%s6044_s25 + $0x78] sm:$0xf] }
 0x207   : > { %v2554_v22 = vpop.f32.mrf.mxu0 }
 0x208   : > { %v1912_v42 = vadd.f32 %v1869_v20, %v1597_v60  ;;  %v3547_v20 = vsel %vm6065_vm2, %v3542_v13, %v3546_v3  ;;  %v4136_v55 = vsel %vm6258_vm5, %v4134_v43, %v4135_v23  ;;  %v5710_v60 = vld [vmem:[#allocation6] sm:$0xff]  ;;  %v3564_v13 = vrot.slane %v3562_v29, 5  ;;  %v5435_v43 = vld [vmem:[%s6044_s25 + $0x74] sm:$0x1] }
 0x209   : > { %v2980_v19 = vpop.f32.mrf.mxu1  ;;  %v4230_v18 = vunpack.c.l.b16 %v4136_v55  ;;  %4609 = vmatpush.bf16.msra.mxu1 %v5710_v60  ;;  %v3570_v0 = vrot.slane %v3568_v32, 5  ;;  %v4139_v29 = vrot.slane %v6929_v45, 5  ;;  %v5499_v32 = vld [vmem:[%s6044_s25 + $0x6c] sm:$0xe]  ;;  %v3586_v45 = vshll.u32 %v5436_v11, 16 }
 0x20a   : > { %3254 = vmatmul.bf16.gmra.mxu2 %v5675_v33  ;;  %v6925_v59 = vadd.f32 %v2551_v46, %v1912_v42  ;;  %4362 = vmatmul.bf16.gmra.mxu0 %v4254_v44  ;;  %v4133_v46 = vsel %vm6258_vm5, %v5514_v54, %v4132_v37  ;;  %v3561_v42 = vrot.slane %v3559_v34, 4 }
 0x20b   : > { %3936 = vmatmul.bf16.gmra.mxu3 %v3828_v61  ;;  %v3804_v61 = vunpack.c.l.b16 %v3557_v10  ;;  %v4229_v37 = vunpack.c.l.b16 %v4133_v46  ;;  %v3575_v10 = vor.u32 %v3574_v53, %v3570_v0  ;;  %v3578_v46 = vshll.u32 %v5435_v43, 16 }
 0x20c   : > { %v3583_v53 = vshrl.u32 %v5436_v11, 16 }
 0x20d   : > { %v1557_v30 = vpop.f32.mrf.mxu2  ;;  %v3576_v60 = vrot.slane %v3575_v10, 4 }
 0x20e   : > { %v1872_v8 = vpop.f32.mrf.mxu3  ;;  %v1598_v21 = vadd.f32 %v1557_v30, %v6458_v25  ;;  %v3803_v25 = vunpack.c.l.b16 %v3547_v20  ;;  %v5676_v30 = vld [vmem:[%s6044_s25 + $0x60] sm:$0xff]  ;;  %v4255_v20 = vpack.c.b16 %v4230_v18, %v4229_v37  ;;  %v4141_v37 = vrot.slane %v4139_v29, 4 }
 0x20f   : > { %v2556_v3 = vpop.f32.mrf.mxu0  ;;  %v4142_v18 = vrot.slane %v5435_v43, 5  ;;  %v3585_v10 = vrot.slane %v3583_v53, 4 }
 0x210   : > { %v1913_v9 = vadd.f32 %v1872_v8, %v1598_v21  ;;  %v3829_v8 = vpack.c.b16 %v3804_v61, %v3803_v25  ;;  %v3565_v21 = vor.u32 %v3564_v13, %v3561_v42  ;;  %v3580_v25 = vrot.slane %v3578_v46, 5 }
 0x211   : > { %v6942_v44 = vpop.f32.mrf.mxu1  ;;  %v5515_v61 = vrot.slane %v5499_v32, 9  ;;  %v3588_v46 = vrot.slane %v3586_v45, 5 }
 0x212   : > { %v2595_v33 = vadd.f32 %v2554_v22, %v1913_v9  ;;  %7292 = vst [vmem:[#allocation21_spill] sm:$0xff] %v6942_v44  ;;  %v6955_v9 = vld [vmem:[%s6044_s25 + $0x7c] sm:$0xf] }
 0x213   : > { %v4140_v43 = vsel %vm6258_vm5, %v5515_v61, %v4139_v29  ;;  %v3589_v29 = vor.u32 %v3588_v46, %v3585_v10  ;;  %v4146_v45 = vrot.slane %v6955_v9, 5 }
 0x214   : > { %v6944_v54 = vadd.f32 %v2980_v19, %v2595_v33 }
 0x215   : > { %v1559_v23 = vpop.f32.mrf.mxu2  ;;  %v4148_v10 = vrot.slane %v4146_v45, 4 }
 0x216   : > { %v1874_v35 = vpop.f32.mrf.mxu3  ;;  %v1599_v22 = vadd.f32 %v1559_v23, %v6479_v6  ;;  %v3566_v6 = vrot.slane %v3565_v21, 4  ;;  %v3592_v23 = vshll.u32 %v6955_v9, 16  ;;  %v4143_v21 = vsel %vm6258_vm5, %v4141_v37, %v4142_v18  ;;  %v5677_v18 = vld [vmem:[%s6044_s25 + $0x6c] sm:$0xff] }
 0x217   : > { %v2559_v34 = vpop.f32.mrf.mxu0 }
 0x218   : > { %v1914_v55 = vadd.f32 %v1874_v35, %v1599_v22  ;;  %v3571_v22 = vsel %vm6065_vm2, %v3566_v6, %v3570_v0  ;;  %v5438_v0 = vld [vmem:[%s6044_s25 + $0x80] sm:$0x1]  ;;  %v4231_v6 = vunpack.c.l.b16 %v4140_v43 }
 0x219   : > { %v2985_v33 = vpop.f32.mrf.mxu1  ;;  %v3805_v11 = vunpack.c.l.b16 %v3571_v22  ;;  %v3602_v44 = vshll.u32 %v5438_v0, 16  ;;  %v4149_v46 = vrot.slane %v5438_v0, 5 }
 0x21a   : > { %3259 = vmatmul.bf16.gmra.mxu2 %v5676_v30  ;;  %v6951_v19 = vadd.f32 %v2556_v3, %v1914_v55  ;;  %4367 = vmatmul.bf16.gmra.mxu0 %v4255_v20  ;;  %v3596_v3 = vshrl.u32 %v6955_v9, 16  ;;  %v3581_v30 = vsel %vm6065_vm2, %v3576_v60, %v3580_v25  ;;  %v3594_v55 = vrot.slane %v3592_v23, 5  ;;  %v5439_v9 = vld [vmem:[%s6044_s25 + $0x84] sm:$0xf] }
 0x21b   : > { %3941 = vmatmul.bf16.gmra.mxu3 %v3829_v8  ;;  %v4232_v60 = vunpack.c.l.b16 %v4143_v21  ;;  %v3604_v43 = vrot.slane %v3602_v44, 5  ;;  %v4150_v0 = vsel %vm6258_vm5, %v4148_v10, %v4149_v46  ;;  %v5441_v46 = vld [vmem:[%s6044_s25 + $0x8c] sm:$0x1] }
 0x21c   : > { %v3598_v32 = vrot.slane %v3596_v3, 4  ;;  %v5500_v3 = vld [vmem:[%s6044_s25 + $0x78] sm:$0xe] }
 0x21d   : > { %v1562_v42 = vpop.f32.mrf.mxu2  ;;  %v4256_v23 = vpack.c.b16 %v4232_v60, %v4231_v6  ;;  %v7296_v6 = vld [vmem:[#allocation12_spill] sm:$0xff] }
 0x21e   : > { %v1877_v13 = vpop.f32.mrf.mxu3  ;;  %v1600_v35 = vadd.f32 %v1562_v42, %v6497_v52  ;;  %v3806_v42 = vunpack.c.l.b16 %v3581_v30  ;;  %v3599_v61 = vor.u32 %v3598_v32, %v3594_v55  ;;  %v3590_v30 = vrot.slane %v3589_v29, 4  ;;  %v6981_v32 = vld [vmem:[%s6044_s25 + $0x88] sm:$0xf] }
 0x21f   : > { %v2561_v20 = vpop.f32.mrf.mxu0  ;;  %v3616_v29 = vshll.u32 %v6981_v32, 16 }
 0x220   : > { %v1915_v8 = vadd.f32 %v1877_v13, %v1600_v35  ;;  %v3830_v53 = vpack.c.b16 %v3806_v42, %v3805_v11  ;;  %v3595_v42 = vsel %vm6065_vm2, %v3590_v30, %v3594_v55  ;;  %v4234_v30 = vunpack.c.l.b16 %v4150_v0 }
 0x221   : > { %v3626_v0 = vshll.u32 %v5441_v46, 16 }
 0x222   : > { %v2597_v52 = vadd.f32 %v2559_v34, %v1915_v8  ;;  %v6974_v34 = vpop.f32.mrf.mxu1  ;;  %v3600_v8 = vrot.slane %v3599_v61, 4  ;;  %v3620_v61 = vshrl.u32 %v6981_v32, 16 }
 0x223   : > { %7294 = vst [vmem:[#allocation23_spill] sm:$0xff] %v6974_v34 }
 0x224   : > { %v6969_v25 = vadd.f32 %v2985_v33, %v2597_v52  ;;  %v3605_v44 = vsel %vm6065_vm2, %v3600_v8, %v3604_v43  ;;  %v3618_v43 = vrot.slane %v3616_v29, 5  ;;  %v4153_v29 = vrot.slane %v6981_v32, 5 }
 0x225   : > { %v1564_v13 = vpop.f32.mrf.mxu2 }
 0x226   : > { %7293 = vst [vmem:[#allocation22_spill] sm:$0xff] %v6969_v25  ;;  %v1879_v35 = vpop.f32.mrf.mxu3  ;;  %v1601_v37 = vadd.f32 %v1564_v13, %v6510_v41  ;;  %v5516_v41 = vrot.slane %v5500_v3, 9  ;;  %v3607_v13 = vshrl.u32 %v5439_v9, 16  ;;  %v3808_v3 = vunpack.c.l.b16 %v3605_v44  ;;  %v7019_v25 = vld [vmem:[#allocation4] ss:$0 sm:$0xff] }
 0x227   : > { %v2564_v33 = vpop.f32.mrf.mxu0 }
 0x228   : > { %v1916_v22 = vadd.f32 %v1879_v35, %v1601_v37  ;;  %v3610_v35 = vshll.u32 %v5439_v9, 16 }
 0x22a   : > { %3264 = vmatmul.bf16.gmra.mxu2 %v5677_v18  ;;  %v6977_v21 = vadd.f32 %v2561_v20, %v1916_v22  ;;  %4372 = vmatmul.bf16.gmra.mxu0 %v4256_v23  ;;  %v4147_v20 = vsel %vm6258_vm5, %v5516_v41, %v4146_v45  ;;  %v2990_v18 = vpop.f32.mrf.mxu1  ;;  %v3609_v45 = vrot.slane %v3607_v13, 4  ;;  %v3612_v8 = vrot.slane %v3610_v35, 5 }
 0x22b   : > { %3946 = vmatmul.bf16.gmra.mxu3 %v3830_v53  ;;  %v3807_v53 = vunpack.c.l.b16 %v3595_v42  ;;  %v4233_v22 = vunpack.c.l.b16 %v4147_v20  ;;  %v3622_v41 = vrot.slane %v3620_v61, 4  ;;  %v5501_v61 = vld [vmem:[%s6044_s25 + $0x84] sm:$0xe] }
 0x22c   : > { %7295 = vst [vmem:[#allocation24_spill] sm:$0xff] %v6977_v21  ;;  %v3613_v44 = vor.u32 %v3612_v8, %v3609_v45 }
 0x22d   : > { %v1567_v52 = vpop.f32.mrf.mxu2  ;;  %v3831_v42 = vpack.c.b16 %v3808_v3, %v3807_v53  ;;  %v3623_v20 = vor.u32 %v3622_v41, %v3618_v43  ;;  %v3628_v53 = vrot.slane %v3626_v0, 5  ;;  %v5517_v3 = vrot.slane %v5501_v61, 9 }
 0x22e   : > { %v1882_v11 = vpop.f32.mrf.mxu3  ;;  %v1602_v60 = vadd.f32 %v1567_v52, %v7296_v6 }
 0x22f   : > { %v2566_v55 = vpop.f32.mrf.mxu0 }
 0x230   : > { %v1917_v37 = vadd.f32 %v1882_v11, %v1602_v60  ;;  %v7298_v11 = vld [vmem:[#allocation13_spill] sm:$0xff]  ;;  %v5678_v60 = vld [vmem:[%s6044_s25 + $0x78] sm:$0xff] }
 0x232   : > { %v2599_v23 = vadd.f32 %v2564_v33, %v1917_v37  ;;  %v4257_v33 = vpack.c.b16 %v4234_v30, %v4233_v22  ;;  %v4155_v22 = vrot.slane %v4153_v29, 4  ;;  %v4156_v30 = vrot.slane %v5441_v46, 5 }
 0x233   : > { %v4154_v46 = vsel %vm6258_vm5, %v5517_v3, %v4153_v29 }
 0x234   : > { %v6994_v10 = vadd.f32 %v2990_v18, %v2599_v23  ;;  %v5442_v18 = vld [vmem:[%s6044_s25 + $0x90] sm:$0xf]  ;;  %v7005_v23 = vld [vmem:[%s6044_s25 + $0x94] sm:$0xf] }
 0x235   : > { %v1569_v9 = vpop.f32.mrf.mxu2  ;;  %v3631_v41 = vshrl.u32 %v5442_v18, 16  ;;  %v3640_v32 = vshll.u32 %v7005_v23, 16 }
 0x236   : > { %7297 = vst [vmem:[#allocation12_spill] sm:$0xff] %v6994_v10  ;;  %v1884_v52 = vpop.f32.mrf.mxu3  ;;  %v1603_v6 = vadd.f32 %v1569_v9, %v7298_v11  ;;  %v3614_v9 = vrot.slane %v3613_v44, 4  ;;  %v3624_v11 = vrot.slane %v3623_v20, 4  ;;  %v4157_v20 = vsel %vm6258_vm5, %v4155_v22, %v4156_v30  ;;  %v5679_v30 = vld [vmem:[%s6044_s25 + $0x84] sm:$0xff] }
 0x237   : > { %v4338_v35 = vpop.f32.mrf.mxu0  ;;  %v3633_v0 = vrot.slane %v3631_v41, 4  ;;  %v3642_v61 = vrot.slane %v3640_v32, 5  ;;  %v4236_v10 = vunpack.c.l.b16 %v4157_v20 }
 0x238   : > { %v1918_v13 = vadd.f32 %v1884_v52, %v1603_v6  ;;  %v3634_v52 = vshll.u32 %v5442_v18, 16  ;;  %v7300_v6 = vld [vmem:[#allocation14_spill] sm:$0xff] }
 0x23a   : > { %3269 = vmatmul.bf16.gmra.mxu2 %v5678_v60  ;;  %v7001_v37 = vadd.f32 %v2566_v55, %v1918_v13  ;;  %4377 = vmatmul.bf16.gmra.mxu0 %v4257_v33  ;;  %v3644_v55 = vshrl.u32 %v7005_v23, 16  ;;  %v3629_v33 = vsel %vm6065_vm2, %v3624_v11, %v3628_v53  ;;  %v3636_v13 = vrot.slane %v3634_v52, 5  ;;  %v5502_v52 = vld [vmem:[%s6044_s25 + $0x90] sm:$0xe] }
 0x23b   : > { %3951 = vmatmul.bf16.gmra.mxu3 %v3831_v42  ;;  %v3619_v42 = vsel %vm6065_vm2, %v3614_v9, %v3618_v43  ;;  %v5444_v43 = vld [vmem:[%s6044_s25 + $0x98] sm:$0x1]  ;;  %v4235_v9 = vunpack.c.l.b16 %v4154_v46  ;;  %v5518_v20 = vrot.slane %v5502_v52, 9 }
 0x23c   : > { %7299 = vst [vmem:[#allocation13_spill] sm:$0xff] %v7001_v37  ;;  %v3646_v18 = vrot.slane %v3644_v55, 4  ;;  %v3637_v34 = vor.u32 %v3636_v13, %v3633_v0  ;;  %v3650_v29 = vshll.u32 %v5444_v43, 16  ;;  %v4163_v0 = vrot.slane %v5444_v43, 5  ;;  %v7301_v43 = vld [vmem:[#allocation15_spill] sm:$0xff] }
 0x23d   : > { %v3230_v45 = vpop.f32.mrf.mxu2  ;;  %v4258_v32 = vpack.c.b16 %v4236_v10, %v4235_v9 }
 0x23e   : > { %v3912_v8 = vpop.f32.mrf.mxu3  ;;  %v3310_v60 = vadd.f32 %v3230_v45, %v7300_v6  ;;  %v3809_v45 = vunpack.c.l.b16 %v3619_v42  ;;  %v3810_v6 = vunpack.c.l.b16 %v3629_v33  ;;  %v3647_v21 = vor.u32 %v3646_v18, %v3642_v61  ;;  %v7029_v18 = vld [vmem:[%s6044_s25 + $0xa0] sm:$0xf] }
 0x23f   : > { %v4340_v44 = vpop.f32.mrf.mxu0  ;;  %v3638_v42 = vrot.slane %v3637_v34, 4  ;;  %v3652_v46 = vrot.slane %v3650_v29, 5 }
 0x240   : > { %v3992_v37 = vadd.f32 %v3912_v8, %v3310_v60  ;;  %v3832_v41 = vpack.c.b16 %v3810_v6, %v3809_v45  ;;  %v4160_v8 = vrot.slane %v7005_v23, 5  ;;  %v3648_v33 = vrot.slane %v3647_v21, 4  ;;  %v5445_v23 = vld [vmem:[%s6044_s25 + $0x9c] sm:$0xf] }
 0x241   : > { %v3643_v34 = vsel %vm6065_vm2, %v3638_v42, %v3642_v61  ;;  %v3655_v29 = vshrl.u32 %v5445_v23, 16  ;;  %v3668_v61 = vshrl.u32 %v7029_v18, 16 }
 0x242   : > { %v4418_v3 = vadd.f32 %v4338_v35, %v3992_v37  ;;  %v3653_v21 = vsel %vm6065_vm2, %v3648_v33, %v3652_v46  ;;  %v3811_v52 = vunpack.c.l.b16 %v3643_v34 }
 0x243   : > { %v3657_v33 = vrot.slane %v3655_v29, 4 }
 0x244   : > { %v4454_v35 = vadd.f32 %v7019_v25, %v4418_v3  ;;  %v3658_v3 = vshll.u32 %v5445_v23, 16 }
 0x245   : > { %v3232_v11 = vpop.f32.mrf.mxu2 }
 0x246   : > { %v3914_v53 = vpop.f32.mrf.mxu3  ;;  %v3311_v22 = vadd.f32 %v3232_v11, %v6581_v4  ;;  %v4162_v4 = vrot.slane %v4160_v8, 4  ;;  %v4486_v6 = vmax.f32 %v4454_v35, 0.0  ;;  %v3660_v46 = vrot.slane %v3658_v3, 5 }
 0x247   : > { %v4343_v60 = vpop.f32.mrf.mxu0  ;;  %v3670_v35 = vrot.slane %v3668_v61, 4 }
 0x248   : > { %v3993_v55 = vadd.f32 %v3914_v53, %v3311_v22  ;;  %v4164_v53 = vsel %vm6258_vm5, %v4162_v4, %v4163_v0  ;;  %v3664_v22 = vshll.u32 %v7029_v18, 16 }
 0x249   : > { %v4238_v42 = vunpack.c.l.b16 %v4164_v53  ;;  %v5503_v53 = vld [vmem:[%s6044_s25 + $0x9c] sm:$0xe] }
 0x24a   : > { %v4419_v37 = vadd.f32 %v4340_v44, %v3993_v55  ;;  %3274 = vmatmul.bf16.gmra.mxu2 %v5679_v30  ;;  %4382 = vmatmul.bf16.gmra.mxu0 %v4258_v32  ;;  %v4161_v44 = vsel %vm6258_vm5, %v5518_v20, %v4160_v8  ;;  %v3812_v8 = vunpack.c.l.b16 %v3653_v21  ;;  %v3666_v20 = vrot.slane %v3664_v22, 5  ;;  %v7050_v22 = vld [vmem:[%s6044_s25 + $0xac] sm:$0xf] }
 0x24b   : > { %3956 = vmatmul.bf16.gmra.mxu3 %v3832_v41  ;;  %v4237_v55 = vunpack.c.l.b16 %v4161_v44 }
 0x24c   : > { %v4455_v13 = vadd.f32 %v7019_v25, %v4419_v37  ;;  %v5447_v37 = vld [vmem:[%s6044_s25 + $0xa4] sm:$0x1]  ;;  %v3833_v34 = vpack.c.b16 %v3812_v8, %v3811_v52  ;;  %v3671_v21 = vor.u32 %v3670_v35, %v3666_v20  ;;  %v3692_v35 = vshrl.u32 %v7050_v22, 16 }
 0x24d   : > { %v3235_v10 = vpop.f32.mrf.mxu2  ;;  %v3674_v44 = vshll.u32 %v5447_v37, 16 }
 0x24e   : > { %v3917_v45 = vpop.f32.mrf.mxu3  ;;  %v4487_v9 = vmax.f32 %v4455_v13, 0.0  ;;  %v3312_v11 = vadd.f32 %v3235_v10, %v7301_v43  ;;  %v5680_v10 = vld [vmem:[%s6044_s25 + $0x90] sm:$0xff]  ;;  %v3672_v61 = vrot.slane %v3671_v21, 4 }
 0x24f   : > { %v4345_v41 = vpop.f32.mrf.mxu0 }
 0x250   : > { %v4518_v30 = vpack.c.bf16 %v4487_v9, %v4486_v6  ;;  %v3994_v32 = vadd.f32 %v3917_v45, %v3312_v11  ;;  %v4259_v45 = vpack.c.b16 %v4238_v42, %v4237_v55  ;;  %v3661_v6 = vor.u32 %v3660_v46, %v3657_v33 }
 0x251   : > { %v4167_v11 = vrot.slane %v7029_v18, 5  ;;  %v4170_v55 = vrot.slane %v5447_v37, 5 }
 0x252   : > { %4610 = vmatmul.bf16.vlgmr.msra.gmra.mxu1 %v4518_v30  ;;  %v4420_v13 = vadd.f32 %v4343_v60, %v3994_v32  ;;  %v5448_v60 = vld [vmem:[%s6044_s25 + $0xa8] sm:$0xf]  ;;  %v3676_v30 = vrot.slane %v3674_v44, 5  ;;  %v5519_v32 = vrot.slane %v5503_v53, 9 }
 0x253   : > { %v4169_v8 = vrot.slane %v4167_v11, 4  ;;  %v3679_v33 = vshrl.u32 %v5448_v60, 16  ;;  %v3682_v46 = vshll.u32 %v5448_v60, 16 }
 0x254   : > { %v4456_v29 = vadd.f32 %v7019_v25, %v4420_v13 }
 0x255   : > { %v3237_v4 = vpop.f32.mrf.mxu2  ;;  %v3681_v21 = vrot.slane %v3679_v33, 4  ;;  %v3684_v44 = vrot.slane %v3682_v46, 5  ;;  %v5504_v46 = vld [vmem:[%s6044_s25 + $0xa8] sm:$0xe] }
 0x256   : > { %v3919_v0 = vpop.f32.mrf.mxu3  ;;  %v3313_v23 = vadd.f32 %v3237_v4, %v6612_v28  ;;  %v3662_v28 = vrot.slane %v3661_v6, 4  ;;  %v4488_v4 = vmax.f32 %v4456_v29, 0.0  ;;  %v4171_v6 = vsel %vm6258_vm5, %v4169_v8, %v4170_v55  ;;  %v5681_v55 = vld [vmem:[%s6044_s25 + $0x9c] sm:$0xff] }
 0x257   : > { %v4348_v43 = vpop.f32.mrf.mxu0 }
 0x258   : > { %v3995_v9 = vadd.f32 %v3919_v0, %v3313_v23  ;;  %v3667_v23 = vsel %vm6065_vm2, %v3662_v28, %v3666_v20  ;;  %v4240_v28 = vunpack.c.l.b16 %v4171_v6 }
 0x259   : > { %v3813_v20 = vunpack.c.l.b16 %v3667_v23 }
 0x25a   : > { %v4421_v3 = vadd.f32 %v4345_v41, %v3995_v9  ;;  %3279 = vmatmul.bf16.gmra.mxu2 %v5680_v10  ;;  %4387 = vmatmul.bf16.gmra.mxu0 %v4259_v45  ;;  %v3688_v41 = vshll.u32 %v7050_v22, 16  ;;  %v3677_v10 = vsel %vm6065_vm2, %v3672_v61, %v3676_v30  ;;  %v4168_v45 = vsel %vm6258_vm5, %v5519_v32, %v4167_v11 }
 0x25b   : > { %3961 = vmatmul.bf16.gmra.mxu3 %v3833_v34  ;;  %v3814_v29 = vunpack.c.l.b16 %v3677_v10  ;;  %v4239_v60 = vunpack.c.l.b16 %v4168_v45  ;;  %v5520_v10 = vrot.slane %v5504_v46, 9 }
 0x25c   : > { %v4457_v52 = vadd.f32 %v7019_v25, %v4421_v3  ;;  %v3690_v9 = vrot.slane %v3688_v41, 5  ;;  %v5450_v3 = vld [vmem:[%s6044_s25 + $0xb0] sm:$0x1] }
 0x25d   : > { %v3240_v42 = vpop.f32.mrf.mxu2  ;;  %v3698_v32 = vshll.u32 %v5450_v3, 16  ;;  %v3834_v33 = vpack.c.b16 %v3814_v29, %v3813_v20  ;;  %v4260_v41 = vpack.c.b16 %v4240_v28, %v4239_v60 }
 0x25e   : > { %v3922_v18 = vpop.f32.mrf.mxu3  ;;  %v3314_v0 = vadd.f32 %v3240_v42, %v6632_v51  ;;  %v4489_v13 = vmax.f32 %v4457_v52, 0.0  ;;  %v3694_v51 = vrot.slane %v3692_v35, 4  ;;  %v3685_v52 = vor.u32 %v3684_v44, %v3681_v21  ;;  %v7073_v21 = vld [vmem:[%s6044_s25 + $0xb8] sm:$0xf] }
 0x25f   : > { %v4350_v37 = vpop.f32.mrf.mxu0  ;;  %v3700_v23 = vrot.slane %v3698_v32, 5 }
 0x260   : > { %v4519_v34 = vpack.c.bf16 %v4489_v13, %v4488_v4  ;;  %v3996_v53 = vadd.f32 %v3922_v18, %v3314_v0  ;;  %v3695_v11 = vor.u32 %v3694_v51, %v3690_v9  ;;  %v4174_v18 = vrot.slane %v7050_v22, 5  ;;  %v5451_v22 = vld [vmem:[%s6044_s25 + $0xb4] sm:$0xf] }
 0x261   : > { %v3686_v0 = vrot.slane %v3685_v52, 4  ;;  %v3712_v52 = vshll.u32 %v7073_v21, 16 }
 0x262   : > { %4615 = vmatmul.bf16.gmra.mxu1 %v4519_v34  ;;  %v4422_v42 = vadd.f32 %v4348_v43, %v3996_v53  ;;  %v3696_v13 = vrot.slane %v3695_v11, 4  ;;  %v4177_v43 = vrot.slane %v5450_v3, 5 }
 0x263   : > { %v3691_v53 = vsel %vm6065_vm2, %v3686_v0, %v3690_v9  ;;  %v3716_v9 = vshrl.u32 %v7073_v21, 16  ;;  %v5453_v0 = vld [vmem:[%s6044_s25 + $0xbc] sm:$0x1] }
 0x264   : > { %v4458_v34 = vadd.f32 %v7019_v25, %v4422_v42  ;;  %v3701_v20 = vsel %vm6065_vm2, %v3696_v13, %v3700_v23  ;;  %v3815_v42 = vunpack.c.l.b16 %v3691_v53 }
 0x265   : > { %v3242_v61 = vpop.f32.mrf.mxu2 }
 0x266   : > { %v3924_v30 = vpop.f32.mrf.mxu3  ;;  %v3315_v8 = vadd.f32 %v3242_v61, %v6643_v40  ;;  %v4176_v40 = vrot.slane %v4174_v18, 4  ;;  %v4490_v29 = vmax.f32 %v4458_v34, 0.0  ;;  %v3703_v61 = vshrl.u32 %v5451_v22, 16 }
 0x267   : > { %v4353_v4 = vpop.f32.mrf.mxu0 }
 0x268   : > { %v3997_v35 = vadd.f32 %v3924_v30, %v3315_v8  ;;  %v4178_v28 = vsel %vm6258_vm5, %v4176_v40, %v4177_v43  ;;  %v3706_v30 = vshll.u32 %v5451_v22, 16  ;;  %v3705_v46 = vrot.slane %v3703_v61, 4 }
 0x26a   : > { %v4423_v45 = vadd.f32 %v4350_v37, %v3997_v35  ;;  %3284 = vmatmul.bf16.gmra.mxu2 %v5681_v55  ;;  %4392 = vmatmul.bf16.gmra.mxu0 %v4260_v41  ;;  %v4175_v37 = vsel %vm6258_vm5, %v5520_v10, %v4174_v18  ;;  %v3816_v55 = vunpack.c.l.b16 %v3701_v20  ;;  %v3708_v18 = vrot.slane %v3706_v30, 5 }
 0x26b   : > { %3966 = vmatmul.bf16.gmra.mxu3 %v3834_v33  ;;  %v4241_v33 = vunpack.c.l.b16 %v4175_v37  ;;  %v3714_v41 = vrot.slane %v3712_v52, 5  ;;  %v3718_v35 = vrot.slane %v3716_v9, 4  ;;  %v4181_v20 = vrot.slane %v7073_v21, 5  ;;  %v5505_v37 = vld [vmem:[%s6044_s25 + $0xb4] sm:$0xe] }
 0x26c   : > { %v4459_v6 = vadd.f32 %v7019_v25, %v4423_v45  ;;  %v5682_v45 = vld [vmem:[%s6044_s25 + $0xa8] sm:$0xff]  ;;  %v3835_v40 = vpack.c.b16 %v3816_v55, %v3815_v42  ;;  %v5521_v52 = vrot.slane %v5505_v37, 9 }
 0x26d   : > { %v3245_v44 = vpop.f32.mrf.mxu2  ;;  %v3719_v22 = vor.u32 %v3718_v35, %v3714_v41  ;;  %v4183_v9 = vrot.slane %v4181_v20, 4 }
 0x26e   : > { %v3927_v51 = vpop.f32.mrf.mxu3  ;;  %v3316_v3 = vadd.f32 %v3245_v44, %v6663_v27  ;;  %v4491_v60 = vmax.f32 %v4459_v6, 0.0  ;;  %v4242_v27 = vunpack.c.l.b16 %v4178_v28  ;;  %v3709_v6 = vor.u32 %v3708_v18, %v3705_v46 }
 0x26f   : > { %v4355_v11 = vpop.f32.mrf.mxu0  ;;  %v3722_v44 = vshll.u32 %v5453_v0, 16  ;;  %v3720_v28 = vrot.slane %v3719_v22, 4 }
 0x270   : > { %v4520_v32 = vpack.c.bf16 %v4491_v60, %v4490_v29  ;;  %v3998_v8 = vadd.f32 %v3927_v51, %v3316_v3  ;;  %v4261_v43 = vpack.c.b16 %v4242_v27, %v4241_v33  ;;  %v7094_v60 = vld [vmem:[%s6044_s25 + $0xc4] sm:$0xf] }
 0x271   : > { %v3724_v61 = vrot.slane %v3722_v44, 5  ;;  %v3740_v33 = vshrl.u32 %v7094_v60, 16  ;;  %v5456_v44 = vld [vmem:[%s6044_s25 + $0xc8] sm:$0x1] }
 0x272   : > { %4620 = vmatmul.bf16.gmra.mxu1 %v4520_v32  ;;  %v4424_v10 = vadd.f32 %v4353_v4, %v3998_v8  ;;  %v5454_v4 = vld [vmem:[%s6044_s25 + $0xc0] sm:$0xf]  ;;  %v4184_v32 = vrot.slane %v5453_v0, 5 }
 0x273   : > { %v3727_v8 = vshrl.u32 %v5454_v4, 16  ;;  %v3730_v55 = vshll.u32 %v5454_v4, 16 }
 0x274   : > { %v4460_v29 = vadd.f32 %v7019_v25, %v4424_v10  ;;  %v4182_v10 = vsel %vm6258_vm5, %v5521_v52, %v4181_v20  ;;  %v5683_v52 = vld [vmem:[%s6044_s25 + $0xb4] sm:$0xff] }
 0x275   : > { %v3247_v13 = vpop.f32.mrf.mxu2 }
 0x276   : > { %v3929_v23 = vpop.f32.mrf.mxu3  ;;  %v3317_v34 = vadd.f32 %v3247_v13, %v6674_v12  ;;  %v3710_v12 = vrot.slane %v3709_v6, 4  ;;  %v4492_v27 = vmax.f32 %v4460_v29, 0.0  ;;  %v3725_v13 = vsel %vm6065_vm2, %v3720_v28, %v3724_v61 }
 0x277   : > { %v4358_v53 = vpop.f32.mrf.mxu0  ;;  %v3818_v22 = vunpack.c.l.b16 %v3725_v13  ;;  %v3004_v29 = vadd.f32 %v6690_v14, %v6705_v26  ;;  %v3746_v28 = vshll.u32 %v5456_v44, 16  ;;  %v7118_v13 = vld [vmem:[%s6044_s25 + $0xd0] sm:$0xf] }
 0x278   : > { %v3999_v51 = vadd.f32 %v3929_v23, %v3317_v34  ;;  %v3715_v35 = vsel %vm6065_vm2, %v3710_v12, %v3714_v41  ;;  %v4185_v34 = vsel %vm6258_vm5, %v4183_v9, %v4184_v32  ;;  %v5506_v32 = vld [vmem:[%s6044_s25 + $0xc0] sm:$0xe] }
 0x279   : > { %v3817_v41 = vunpack.c.l.b16 %v3715_v35  ;;  %v4244_v37 = vunpack.c.l.b16 %v4185_v34  ;;  %v3748_v14 = vrot.slane %v3746_v28, 5  ;;  %v5522_v26 = vrot.slane %v5506_v32, 9  ;;  %v5459_v32 = vld [vmem:[%s6044_s25 + $0xd4] sm:$0x1] }
 0x27a   : > { %v4425_v3 = vadd.f32 %v4355_v11, %v3999_v51  ;;  %3289 = vmatmul.bf16.gmra.mxu2 %v5682_v45  ;;  %4397 = vmatmul.bf16.gmra.mxu0 %v4261_v43  ;;  %v3736_v11 = vshll.u32 %v7094_v60, 16  ;;  %v3729_v45 = vrot.slane %v3727_v8, 4  ;;  %v4243_v51 = vunpack.c.l.b16 %v4182_v10 }
 0x27b   : > { %3971 = vmatmul.bf16.gmra.mxu3 %v3835_v40  ;;  %v3732_v40 = vrot.slane %v3730_v55, 5  ;;  %v3836_v9 = vpack.c.b16 %v3818_v22, %v3817_v41 }
 0x27c   : > { %v4461_v30 = vadd.f32 %v7019_v25, %v4425_v3  ;;  %v3738_v43 = vrot.slane %v3736_v11, 5 }
 0x27d   : > { %v3250_v42 = vpop.f32.mrf.mxu2  ;;  %v3733_v4 = vor.u32 %v3732_v40, %v3729_v45 }
 0x27e   : > { %v3932_v21 = vpop.f32.mrf.mxu3  ;;  %v3318_v46 = vadd.f32 %v3250_v42, %v6696_v62  ;;  %v4493_v18 = vmax.f32 %v4461_v30, 0.0  ;;  %v3742_v62 = vrot.slane %v3740_v33, 4  ;;  %v4188_v42 = vrot.slane %v7094_v60, 5  ;;  %v5457_v60 = vld [vmem:[%s6044_s25 + $0xcc] sm:$0xf] }
 0x27f   : > { %v4360_v0 = vpop.f32.mrf.mxu0  ;;  %v3734_v11 = vrot.slane %v3733_v4, 4  ;;  %v3751_v22 = vshrl.u32 %v5457_v60, 16 }
 0x280   : > { %v4521_v23 = vpack.c.bf16 %v4493_v18, %v4492_v27  ;;  %v4000_v6 = vadd.f32 %v3932_v21, %v3318_v46  ;;  %v3743_v12 = vor.u32 %v3742_v62, %v3738_v43  ;;  %v4262_v21 = vpack.c.b16 %v4244_v37, %v4243_v51 }
 0x281   : > { %v4191_v18 = vrot.slane %v5456_v44, 5  ;;  %v3739_v34 = vsel %vm6065_vm2, %v3734_v11, %v3738_v43  ;;  %v3754_v44 = vshll.u32 %v5457_v60, 16  ;;  %v3760_v51 = vshll.u32 %v7118_v13, 16 }
 0x282   : > { %4625 = vmatmul.bf16.gmra.mxu1 %v4521_v23  ;;  %v4426_v61 = vadd.f32 %v4358_v53, %v4000_v6  ;;  %v3744_v33 = vrot.slane %v3743_v12, 4  ;;  %v4190_v53 = vrot.slane %v4188_v42, 4  ;;  %v3764_v43 = vshrl.u32 %v7118_v13, 16 }
 0x283   : > { %v4195_v60 = vrot.slane %v7118_v13, 5 }
 0x284   : > { %v4462_v27 = vadd.f32 %v7019_v25, %v4426_v61  ;;  %v3749_v45 = vsel %vm6065_vm2, %v3744_v33, %v3748_v14  ;;  %v4192_v41 = vsel %vm6258_vm5, %v4190_v53, %v4191_v18  ;;  %v3756_v61 = vrot.slane %v3754_v44, 5  ;;  %v5684_v33 = vld [vmem:[%s6044_s25 + $0xc0] sm:$0xff] }
 0x285   : > { %v3252_v20 = vpop.f32.mrf.mxu2  ;;  %v3820_v4 = vunpack.c.l.b16 %v3749_v45  ;;  %v4246_v28 = vunpack.c.l.b16 %v4192_v41  ;;  %v3770_v53 = vshll.u32 %v5459_v32, 16 }
 0x286   : > { %v3934_v3 = vpop.f32.mrf.mxu3  ;;  %v3319_v30 = vadd.f32 %v3252_v20, %v3004_v29  ;;  %v4494_v40 = vmax.f32 %v4462_v27, 0.0  ;;  %v3819_v20 = vunpack.c.l.b16 %v3739_v34 }
 0x287   : > { %v4363_v55 = vpop.f32.mrf.mxu0 }
 0x288   : > { %v4001_v8 = vadd.f32 %v3934_v3, %v3319_v30  ;;  %v3762_v30 = vrot.slane %v3760_v51, 5  ;;  %v3837_v14 = vpack.c.b16 %v3820_v4, %v3819_v20 }
 0x28a   : > { %v4427_v46 = vadd.f32 %v4360_v0, %v4001_v8  ;;  %3294 = vmatmul.bf16.gmra.mxu2 %v5683_v52  ;;  %4402 = vmatmul.bf16.gmra.mxu0 %v4262_v21  ;;  %v4189_v0 = vsel %vm6258_vm5, %v5522_v26, %v4188_v42  ;;  %v3766_v52 = vrot.slane %v3764_v43, 4 }
 0x28b   : > { %3976 = vmatmul.bf16.gmra.mxu3 %v3836_v9  ;;  %v4245_v12 = vunpack.c.l.b16 %v4189_v0  ;;  %v3006_v9 = vadd.f32 %v6722_v7, %v6738_v17 }
 0x28c   : > { %v4463_v35 = vadd.f32 %v7019_v25, %v4427_v46  ;;  %v3767_v46 = vor.u32 %v3766_v52, %v3762_v30 }
 0x28d   : > { %v3255_v23 = vpop.f32.mrf.mxu2  ;;  %v4263_v26 = vpack.c.b16 %v4246_v28, %v4245_v12 }
 0x28e   : > { %v3937_v10 = vpop.f32.mrf.mxu3  ;;  %v4495_v62 = vmax.f32 %v4463_v35, 0.0  ;;  %v3320_v6 = vadd.f32 %v3255_v23, %v6729_v38  ;;  %v3753_v38 = vrot.slane %v3751_v22, 4  ;;  %v5507_v23 = vld [vmem:[%s6044_s25 + $0xcc] sm:$0xe]  ;;  %v3768_v17 = vrot.slane %v3767_v46, 4 }
 0x28f   : > { %v4365_v37 = vpop.f32.mrf.mxu0  ;;  %v5523_v0 = vrot.slane %v5507_v23, 9 }
 0x290   : > { %v4522_v29 = vpack.c.bf16 %v4495_v62, %v4494_v40  ;;  %v4002_v3 = vadd.f32 %v3937_v10, %v3320_v6  ;;  %v3757_v27 = vor.u32 %v3756_v61, %v3753_v38  ;;  %v4197_v40 = vrot.slane %v4195_v60, 4  ;;  %v7302_v61 = vld [vmem:[#allocation16_spill] sm:$0xff] }
 0x291   : > { %v4198_v62 = vrot.slane %v5459_v32, 5  ;;  %v4196_v20 = vsel %vm6258_vm5, %v5523_v0, %v4195_v60 }
 0x292   : > { %4630 = vmatmul.bf16.gmra.mxu1 %v4522_v29  ;;  %v4428_v8 = vadd.f32 %v4363_v55, %v4002_v3  ;;  %v3758_v7 = vrot.slane %v3757_v27, 4  ;;  %v3772_v55 = vrot.slane %v3770_v53, 5 }
 0x293   : > { %v4199_v3 = vsel %vm6258_vm5, %v4197_v40, %v4198_v62 }
 0x294   : > { %v4464_v10 = vadd.f32 %v7019_v25, %v4428_v8  ;;  %v3763_v51 = vsel %vm6065_vm2, %v3758_v7, %v3762_v30  ;;  %v3773_v43 = vsel %vm6065_vm2, %v3768_v17, %v3772_v55  ;;  %v4248_v38 = vunpack.c.l.b16 %v4199_v3 }
 0x295   : > { %v3257_v42 = vpop.f32.mrf.mxu2  ;;  %v3821_v12 = vunpack.c.l.b16 %v3763_v51  ;;  %v3822_v28 = vunpack.c.l.b16 %v3773_v43  ;;  %v3008_v30 = vadd.f32 %v7302_v61, %v6769_v31  ;;  %v3012_v43 = vadd.f32 %v6808_v57, %v6821_v15  ;;  %v7166_v61 = vld [vmem:[#allocation7] ss:$0 sm:$0xff] }
 0x296   : > { %v3939_v21 = vpop.f32.mrf.mxu3  ;;  %v3321_v11 = vadd.f32 %v3257_v42, %v3006_v9  ;;  %v4496_v22 = vmax.f32 %v4464_v10, 0.0  ;;  %v5685_v42 = vld [vmem:[%s6044_s25 + $0xcc] sm:$0xff]  ;;  %v3010_v10 = vadd.f32 %v6786_v50, %v6795_v16 }
 0x297   : > { %v4368_v35 = vpop.f32.mrf.mxu0 }
 0x298   : > { %v4003_v18 = vadd.f32 %v3939_v21, %v3321_v11  ;;  %v3838_v21 = vpack.c.b16 %v3822_v28, %v3821_v12 }
 0x29a   : > { %v4429_v34 = vadd.f32 %v4365_v37, %v4003_v18  ;;  %3299 = vmatmul.bf16.gmra.mxu2 %v5684_v33  ;;  %4407 = vmatmul.bf16.gmra.mxu0 %v4263_v26 }
 0x29b   : > { %3981 = vmatmul.bf16.gmra.mxu3 %v3837_v14 }
 0x29c   : > { %v4465_v45 = vadd.f32 %v7019_v25, %v4429_v34 }
 0x29d   : > { %v3260_v6 = vpop.f32.mrf.mxu2 }
 0x29e   : > { %v3942_v41 = vpop.f32.mrf.mxu3  ;;  %v4497_v44 = vmax.f32 %v4465_v45, 0.0  ;;  %v3322_v13 = vadd.f32 %v3260_v6, %v6763_v24  ;;  %v4247_v24 = vunpack.c.l.b16 %v4196_v20 }
 0x29f   : > { %v4370_v37 = vpop.f32.mrf.mxu0 }
 0x2a0   : > { %v4523_v29 = vpack.c.bf16 %v4497_v44, %v4496_v22  ;;  %v4004_v4 = vadd.f32 %v3942_v41, %v3322_v13  ;;  %v4264_v8 = vpack.c.b16 %v4248_v38, %v4247_v24 }
 0x2a2   : > { %4635 = vmatmul.bf16.gmra.mxu1 %v4523_v29  ;;  %v4430_v9 = vadd.f32 %v4368_v35, %v4004_v4  ;;  %v7162_v4 = vpop.f32.mrf.mxu1 }
 0x2a4   : > { %v4466_v1 = vadd.f32 %v7019_v25, %v4430_v9 }
 0x2a5   : > { %v3262_v39 = vpop.f32.mrf.mxu2 }
 0x2a6   : > { %v3944_v52 = vpop.f32.mrf.mxu3  ;;  %v3323_v32 = vadd.f32 %v3262_v39, %v3008_v30  ;;  %v4498_v31 = vmax.f32 %v4466_v1, 0.0 }
 0x2a7   : > { %v4373_v33 = vpop.f32.mrf.mxu0 }
 0x2a8   : > { %v4005_v11 = vadd.f32 %v3944_v52, %v3323_v32 }
 0x2aa   : > { %v4431_v14 = vadd.f32 %v4370_v37, %v4005_v11  ;;  %3304 = vmatmul.bf16.gmra.mxu2 %v5685_v42  ;;  %4412 = vmatmul.bf16.gmra.mxu0 %v4264_v8  ;;  %v7303_v11 = vld [vmem:[#allocation17_spill] sm:$0xff] }
 0x2ab   : > { %3986 = vmatmul.bf16.gmra.mxu3 %v3838_v21 }
 0x2ac   : > { %v4467_v26 = vadd.f32 %v7019_v25, %v4431_v14 }
 0x2ad   : > { %v3265_v27 = vpop.f32.mrf.mxu2 }
 0x2ae   : > { %v3947_v46 = vpop.f32.mrf.mxu3  ;;  %v4499_v53 = vmax.f32 %v4467_v26, 0.0  ;;  %v3324_v18 = vadd.f32 %v3265_v27, %v6788_v56 }
 0x2af   : > { %v4375_v35 = vpop.f32.mrf.mxu0 }
 0x2b0   : > { %v4524_v60 = vpack.c.bf16 %v4499_v53, %v4498_v31  ;;  %v4006_v23 = vadd.f32 %v3947_v46, %v3324_v18 }
 0x2b2   : > { %4640 = vmatmul.bf16.gmra.mxu1 %v4524_v60  ;;  %v4432_v17 = vadd.f32 %v4373_v33, %v4006_v23  ;;  %v3014_v33 = vadd.f32 %v7303_v11, %v6847_v58 }
 0x2b4   : > { %v4468_v40 = vadd.f32 %v7019_v25, %v4432_v17 }
 0x2b5   : > { %v3267_v34 = vpop.f32.mrf.mxu2 }
 0x2b6   : > { %v3949_v7 = vpop.f32.mrf.mxu3  ;;  %v3325_v55 = vadd.f32 %v3267_v34, %v3010_v10  ;;  %v4500_v22 = vmax.f32 %v4468_v40, 0.0 }
 0x2b7   : > { %v4378_v0 = vpop.f32.mrf.mxu0 }
 0x2b8   : > { %v4007_v45 = vadd.f32 %v3949_v7, %v3325_v55 }
 0x2ba   : > { %v4433_v62 = vadd.f32 %v4375_v35, %v4007_v45 }
 0x2bc   : > { %v4469_v6 = vadd.f32 %v7019_v25, %v4433_v62  ;;  %v7304_v62 = vld [vmem:[#allocation18_spill] sm:$0xff] }
 0x2bd   : > { %v3270_v56 = vpop.f32.mrf.mxu2 }
 0x2be   : > { %v3952_v41 = vpop.f32.mrf.mxu3  ;;  %v4501_v44 = vmax.f32 %v4469_v6, 0.0  ;;  %v3326_v13 = vadd.f32 %v3270_v56, %v6815_v5  ;;  %v3016_v6 = vadd.f32 %v7304_v62, %v6873_v2 }
 0x2bf   : > { %v4380_v51 = vpop.f32.mrf.mxu0 }
 0x2c0   : > { %v4525_v50 = vpack.c.bf16 %v4501_v44, %v4500_v22  ;;  %v4008_v16 = vadd.f32 %v3952_v41, %v3326_v13 }
 0x2c2   : > { %4645 = vmatmul.bf16.gmra.mxu1 %v4525_v50  ;;  %v4434_v20 = vadd.f32 %v4378_v0, %v4008_v16 }
 0x2c4   : > { %v4470_v5 = vadd.f32 %v7019_v25, %v4434_v20 }
 0x2c5   : > { %v3272_v37 = vpop.f32.mrf.mxu2 }
 0x2c6   : > { %v3954_v29 = vpop.f32.mrf.mxu3  ;;  %v3327_v3 = vadd.f32 %v3272_v37, %v3012_v43  ;;  %v4502_v15 = vmax.f32 %v4470_v5, 0.0 }
 0x2c7   : > { %v4383_v28 = vpop.f32.mrf.mxu0 }
 0x2c8   : > { %v4009_v12 = vadd.f32 %v3954_v29, %v3327_v3 }
 0x2ca   : > { %v4435_v24 = vadd.f32 %v4380_v51, %v4009_v12 }
 0x2cc   : > { %v4471_v38 = vadd.f32 %v7019_v25, %v4435_v24 }
 0x2cd   : > { %v3275_v30 = vpop.f32.mrf.mxu2 }
 0x2ce   : > { %v3957_v57 = vpop.f32.mrf.mxu3  ;;  %v4503_v39 = vmax.f32 %v4471_v38, 0.0  ;;  %v3328_v52 = vadd.f32 %v3275_v30, %v6840_v49 }
 0x2cf   : > { %v4611_v9 = vpop.f32.mrf.mxu1  ;;  %v4385_v42 = vpop.f32.mrf.mxu0 }
 0x2d0   : > { %v4612_v32 = vadd.f32 %v7166_v61, %v4611_v9  ;;  %v4526_v21 = vpack.c.bf16 %v4503_v39, %v4502_v15  ;;  %v4010_v8 = vadd.f32 %v3957_v57, %v3328_v52  ;;  %v7305_v57 = vld [vmem:[#allocation19_spill] sm:$0xff] }
 0x2d1   : > { %v3018_v15 = vadd.f32 %v7305_v57, %v6899_v63 }
 0x2d2   : > { %4691 = vst [vmem:[%s7172_s29] sm:$0xff] %v4612_v32  ;;  %4650 = vmatmul.bf16.gmra.mxu1 %v4526_v21  ;;  %v4436_v14 = vadd.f32 %v4383_v28, %v4010_v8 }
 0x2d4   : > { %v4472_v18 = vadd.f32 %v7019_v25, %v4436_v14 }
 0x2d5   : > { %v3277_v1 = vpop.f32.mrf.mxu2 }
 0x2d6   : > { %v3959_v49 = vpop.f32.mrf.mxu3  ;;  %v3329_v26 = vadd.f32 %v3277_v1, %v3014_v33  ;;  %v4504_v34 = vmax.f32 %v4472_v18, 0.0 }
 0x2d7   : > { %v4613_v27 = vpop.f32.mrf.mxu1  ;;  %v4388_v53 = vpop.f32.mrf.mxu0 }
 0x2d8   : > { %v4011_v46 = vadd.f32 %v3959_v49, %v3329_v26  ;;  %v4614_v31 = vadd.f32 %v7166_v61, %v4613_v27 }
 0x2da   : > { %v4437_v35 = vadd.f32 %v4385_v42, %v4011_v46  ;;  %4692 = vst [vmem:[%s7172_s29 + $0x8] sm:$0xff] %v4614_v31 }
 0x2dc   : > { %v4473_v60 = vadd.f32 %v7019_v25, %v4437_v35 }
 0x2dd   : > { %v3280_v23 = vpop.f32.mrf.mxu2 }
 0x2de   : > { %v3962_v10 = vpop.f32.mrf.mxu3  ;;  %v4505_v58 = vmax.f32 %v4473_v60, 0.0  ;;  %v3330_v7 = vadd.f32 %v3280_v23, %v6867_v47  ;;  %v7306_v60 = vld [vmem:[#allocation20_spill] sm:$0xff] }
 0x2df   : > { %v4616_v17 = vpop.f32.mrf.mxu1  ;;  %v4390_v45 = vpop.f32.mrf.mxu0  ;;  %v3020_v23 = vadd.f32 %v7306_v60, %v6925_v59 }
 0x2e0   : > { %v4617_v55 = vadd.f32 %v7166_v61, %v4616_v17  ;;  %v4527_v0 = vpack.c.bf16 %v4505_v58, %v4504_v34  ;;  %v4012_v40 = vadd.f32 %v3962_v10, %v3330_v7 }
 0x2e2   : > { %4693 = vst [vmem:[%s7172_s29 + $0x10] sm:$0xff] %v4617_v55  ;;  %4655 = vmatmul.bf16.gmra.mxu1 %v4527_v0  ;;  %v4438_v22 = vadd.f32 %v4388_v53, %v4012_v40 }
 0x2e4   : > { %v4474_v16 = vadd.f32 %v7019_v25, %v4438_v22 }
 0x2e5   : > { %v3282_v56 = vpop.f32.mrf.mxu2 }
 0x2e6   : > { %v3964_v41 = vpop.f32.mrf.mxu3  ;;  %v3331_v44 = vadd.f32 %v3282_v56, %v3016_v6  ;;  %v4506_v3 = vmax.f32 %v4474_v16, 0.0  ;;  %v7307_v16 = vld [vmem:[#allocation21_spill] sm:$0xff] }
 0x2e7   : > { %v4618_v13 = vpop.f32.mrf.mxu1  ;;  %v4393_v50 = vpop.f32.mrf.mxu0 }
 0x2e8   : > { %v4013_v51 = vadd.f32 %v3964_v41, %v3331_v44  ;;  %v4619_v47 = vadd.f32 %v7166_v61, %v4618_v13 }
 0x2ea   : > { %v4439_v43 = vadd.f32 %v4390_v45, %v4013_v51  ;;  %4694 = vst [vmem:[%s7172_s29 + $0x18] sm:$0xff] %v4619_v47 }
 0x2ec   : > { %v4475_v37 = vadd.f32 %v7019_v25, %v4439_v43  ;;  %v3022_v43 = vadd.f32 %v7307_v16, %v6951_v19 }
 0x2ed   : > { %v3285_v29 = vpop.f32.mrf.mxu2 }
 0x2ee   : > { %v3967_v20 = vpop.f32.mrf.mxu3  ;;  %v4507_v2 = vmax.f32 %v4475_v37, 0.0  ;;  %v3332_v12 = vadd.f32 %v3285_v29, %v6892_v36 }
 0x2ef   : > { %v4621_v28 = vpop.f32.mrf.mxu1  ;;  %v4395_v24 = vpop.f32.mrf.mxu0 }
 0x2f0   : > { %v4622_v5 = vadd.f32 %v7166_v61, %v4621_v28  ;;  %v4528_v38 = vpack.c.bf16 %v4507_v2, %v4506_v3  ;;  %v4014_v30 = vadd.f32 %v3967_v20, %v3332_v12 }
 0x2f2   : > { %4695 = vst [vmem:[%s7172_s29 + $0x20] sm:$0xff] %v4622_v5  ;;  %4660 = vmatmul.bf16.gmra.mxu1 %v4528_v38  ;;  %v4440_v9 = vadd.f32 %v4393_v50, %v4014_v30 }
 0x2f4   : > { %v4476_v11 = vadd.f32 %v7019_v25, %v4440_v9 }
 0x2f5   : > { %v3287_v39 = vpop.f32.mrf.mxu2 }
 0x2f6   : > { %v3969_v52 = vpop.f32.mrf.mxu3  ;;  %v3333_v32 = vadd.f32 %v3287_v39, %v3018_v15  ;;  %v4508_v26 = vmax.f32 %v4476_v11, 0.0  ;;  %v7308_v39 = vld [vmem:[#allocation22_spill] sm:$0xff] }
 0x2f7   : > { %v4623_v42 = vpop.f32.mrf.mxu1  ;;  %v4398_v8 = vpop.f32.mrf.mxu0 }
 0x2f8   : > { %v4015_v21 = vadd.f32 %v3969_v52, %v3333_v32  ;;  %v4624_v36 = vadd.f32 %v7166_v61, %v4623_v42 }
 0x2fa   : > { %v4441_v33 = vadd.f32 %v4395_v24, %v4015_v21  ;;  %4696 = vst [vmem:[%s7172_s29 + $0x28] sm:$0xff] %v4624_v36  ;;  %v7309_v36 = vld [vmem:[#allocation24_spill] sm:$0xff] }
 0x2fc   : > { %v4477_v1 = vadd.f32 %v7019_v25, %v4441_v33 }
 0x2fd   : > { %v3290_v49 = vpop.f32.mrf.mxu2 }
 0x2fe   : > { %v3972_v14 = vpop.f32.mrf.mxu3  ;;  %v4509_v63 = vmax.f32 %v4477_v1, 0.0  ;;  %v3334_v27 = vadd.f32 %v3290_v49, %v6919_v48 }
 0x2ff   : > { %v4626_v46 = vpop.f32.mrf.mxu1  ;;  %v4400_v53 = vpop.f32.mrf.mxu0 }
 0x300   : > { %v4627_v31 = vadd.f32 %v7166_v61, %v4626_v46  ;;  %v4529_v18 = vpack.c.bf16 %v4509_v63, %v4508_v26  ;;  %v4016_v35 = vadd.f32 %v3972_v14, %v3334_v27  ;;  %v5805_v46 = vld [vmem:[#allocation4] ss:$0 sm:$0xff] }
 0x302   : > { %4697 = vst [vmem:[%s7172_s29 + $0x30] sm:$0xff] %v4627_v31  ;;  %4665 = vmatmul.bf16.gmra.mxu1 %v4529_v18  ;;  %v4442_v58 = vadd.f32 %v4398_v8, %v4016_v35  ;;  %v7310_v8 = vld [vmem:[#allocation23_spill] sm:$0xff] }
 0x303   : > { %v3024_v11 = vadd.f32 %v7310_v8, %v7309_v36 }
 0x304   : > { %v4478_v0 = vadd.f32 %v7019_v25, %v4442_v58 }
 0x305   : > { %v3292_v10 = vpop.f32.mrf.mxu2 }
 0x306   : > { %v3974_v34 = vpop.f32.mrf.mxu3  ;;  %v3335_v7 = vadd.f32 %v3292_v10, %v3020_v23  ;;  %v4510_v41 = vmax.f32 %v4478_v0, 0.0  ;;  %v7312_v0 = vld [vmem:[#allocation13_spill] sm:$0xff] }
 0x307   : > { %v4628_v17 = vpop.f32.mrf.mxu1  ;;  %v4403_v45 = vpop.f32.mrf.mxu0 }
 0x308   : > { %v4017_v55 = vadd.f32 %v3974_v34, %v3335_v7  ;;  %v4629_v48 = vadd.f32 %v7166_v61, %v4628_v17  ;;  %v7311_v34 = vld [vmem:[#allocation12_spill] sm:$0xff] }
 0x30a   : > { %v4443_v40 = vadd.f32 %v4400_v53, %v4017_v55  ;;  %4698 = vst [vmem:[%s7172_s29 + $0x38] sm:$0xff] %v4629_v48 }
 0x30c   : > { %v4479_v62 = vadd.f32 %v7019_v25, %v4443_v40  ;;  %v3026_v40 = vadd.f32 %v7162_v4, %v7312_v0 }
 0x30d   : > { %v3295_v6 = vpop.f32.mrf.mxu2 }
 0x30e   : > { %v3977_v56 = vpop.f32.mrf.mxu3  ;;  %v4511_v59 = vmax.f32 %v4479_v62, 0.0  ;;  %v3336_v22 = vadd.f32 %v3295_v6, %v6944_v54 }
 0x30f   : > { %v4631_v44 = vpop.f32.mrf.mxu1  ;;  %v4405_v51 = vpop.f32.mrf.mxu0 }
 0x310   : > { %v4632_v13 = vadd.f32 %v7166_v61, %v4631_v44  ;;  %v4530_v47 = vpack.c.bf16 %v4511_v59, %v4510_v41  ;;  %v4018_v50 = vadd.f32 %v3977_v56, %v3336_v22 }
 0x312   : > { %4699 = vst [vmem:[%s7172_s29 + $0x40] sm:$0xff] %v4632_v13  ;;  %4670 = vmatmul.bf16.gmra.mxu1 %v4530_v47  ;;  %v4444_v20 = vadd.f32 %v4403_v45, %v4018_v50 }
 0x314   : > { %v4480_v28 = vadd.f32 %v7019_v25, %v4444_v20 }
 0x315   : > { %v3297_v37 = vpop.f32.mrf.mxu2 }
 0x316   : > { %v3979_v29 = vpop.f32.mrf.mxu3  ;;  %v3337_v3 = vadd.f32 %v3297_v37, %v3022_v43  ;;  %v4512_v15 = vmax.f32 %v4480_v28, 0.0 }
 0x317   : > { %v4633_v2 = vpop.f32.mrf.mxu1  ;;  %v4408_v24 = vpop.f32.mrf.mxu0 }
 0x318   : > { %v4019_v12 = vadd.f32 %v3979_v29, %v3337_v3  ;;  %v4634_v54 = vadd.f32 %v7166_v61, %v4633_v2 }
 0x31a   : > { %v4445_v5 = vadd.f32 %v4405_v51, %v4019_v12  ;;  %4700 = vst [vmem:[%s7172_s29 + $0x48] sm:$0xff] %v4634_v54 }
 0x31c   : > { %v4481_v38 = vadd.f32 %v7019_v25, %v4445_v5 }
 0x31d   : > { %v3300_v30 = vpop.f32.mrf.mxu2 }
 0x31e   : > { %v3982_v57 = vpop.f32.mrf.mxu3  ;;  %v4513_v19 = vmax.f32 %v4481_v38, 0.0  ;;  %v3338_v52 = vadd.f32 %v3300_v30, %v7308_v39 }
 0x31f   : > { %v4636_v9 = vpop.f32.mrf.mxu1  ;;  %v4410_v33 = vpop.f32.mrf.mxu0 }
 0x320   : > { %v4637_v32 = vadd.f32 %v7166_v61, %v4636_v9  ;;  %v4531_v42 = vpack.c.bf16 %v4513_v19, %v4512_v15  ;;  %v4020_v21 = vadd.f32 %v3982_v57, %v3338_v52 }
 0x322   : > { %4701 = vst [vmem:[%s7172_s29 + $0x50] sm:$0xff] %v4637_v32  ;;  %4675 = vmatmul.bf16.gmra.mxu1 %v4531_v42  ;;  %v4446_v49 = vadd.f32 %v4408_v24, %v4020_v21 }
 0x324   : > { %v4482_v31 = vadd.f32 %v5805_v46, %v4446_v49 }
 0x325   : > { %v3302_v1 = vpop.f32.mrf.mxu2 }
 0x326   : > { %v3984_v25 = vpop.f32.mrf.mxu3  ;;  %v3339_v14 = vadd.f32 %v3302_v1, %v3024_v11  ;;  %v4514_v23 = vmax.f32 %v4482_v31, 0.0 }
 0x327   : > { %v4638_v26 = vpop.f32.mrf.mxu1  ;;  %v4413_v7 = vpop.f32.mrf.mxu0 }
 0x328   : > { %v4021_v63 = vadd.f32 %v3984_v25, %v3339_v14  ;;  %v4639_v27 = vadd.f32 %v7166_v61, %v4638_v26 }
 0x32a   : > { %v4447_v53 = vadd.f32 %v4410_v33, %v4021_v63  ;;  %4702 = vst [vmem:[%s7172_s29 + $0x58] sm:$0xff] %v4639_v27 }
 0x32c   : > { %v4483_v18 = vadd.f32 %v5805_v46, %v4447_v53 }
 0x32d   : > { %v3305_v35 = vpop.f32.mrf.mxu2 }
 0x32e   : > { %v3987_v60 = vpop.f32.mrf.mxu3  ;;  %v4515_v10 = vmax.f32 %v4483_v18, 0.0  ;;  %v3340_v58 = vadd.f32 %v3305_v35, %v7311_v34 }
 0x32f   : > { %v4641_v17 = vpop.f32.mrf.mxu1  ;;  %v4415_v13 = vpop.f32.mrf.mxu0 }
 0x330   : > { %v4642_v55 = vadd.f32 %v7166_v61, %v4641_v17  ;;  %v4532_v48 = vpack.c.bf16 %v4515_v10, %v4514_v23  ;;  %v4022_v45 = vadd.f32 %v3987_v60, %v3340_v58 }
 0x332   : > { %4703 = vst [vmem:[%s7172_s29 + $0x60] sm:$0xff] %v4642_v55  ;;  %4680 = vmatmul.bf16.gmra.mxu1 %v4532_v48  ;;  %v4448_v6 = vadd.f32 %v4413_v7, %v4022_v45 }
 0x334   : > { %v4484_v51 = vadd.f32 %v5805_v46, %v4448_v6 }
 0x335   : > { %v3307_v62 = vpop.f32.mrf.mxu2 }
 0x336   : > { %v3341_v56 = vadd.f32 %v3307_v62, %v3026_v40  ;;  %v3989_v41 = vpop.f32.mrf.mxu3  ;;  %v4516_v16 = vmax.f32 %v4484_v51, 0.0 }
 0x337   : > { %v4643_v59 = vpop.f32.mrf.mxu1 }
 0x338   : > { %v4023_v22 = vadd.f32 %v3989_v41, %v3341_v56  ;;  %v4644_v44 = vadd.f32 %v7166_v61, %v4643_v59 }
 0x33a   : > { %v4449_v47 = vadd.f32 %v4415_v13, %v4023_v22  ;;  %4704 = vst [vmem:[%s7172_s29 + $0x68] sm:$0xff] %v4644_v44 }
 0x33c   : > { %v4485_v50 = vadd.f32 %v5805_v46, %v4449_v47 }
 0x33e   : > { %v4517_v43 = vmax.f32 %v4485_v50, 0.0 }
 0x33f   : > { %v4646_v4 = vpop.f32.mrf.mxu1 }
 0x340   : > { %v4647_v37 = vadd.f32 %v7166_v61, %v4646_v4  ;;  %v4533_v29 = vpack.c.bf16 %v4517_v43, %v4516_v16 }
 0x342   : > { %4705 = vst [vmem:[%s7172_s29 + $0x70] sm:$0xff] %v4647_v37  ;;  %4685 = vmatmul.bf16.gmra.mxu1 %v4533_v29 }
 0x347   : > { %v4648_v20 = vpop.f32.mrf.mxu1 }
 0x348   : > { %v4649_v3 = vadd.f32 %v7166_v61, %v4648_v20 }
 0x34a   : > { %4706 = vst [vmem:[%s7172_s29 + $0x78] sm:$0xff] %v4649_v3 }
 0x34f   : > { %v4651_v2 = vpop.f32.mrf.mxu1 }
 0x350   : > { %v4652_v12 = vadd.f32 %v7166_v61, %v4651_v2 }
 0x352   : > { %4707 = vst [vmem:[%s7172_s29 + $0x80] sm:$0xff] %v4652_v12 }
 0x357   : > { %v4653_v54 = vpop.f32.mrf.mxu1 }
 0x358   : > { %v4654_v28 = vadd.f32 %v7166_v61, %v4653_v54 }
 0x35a   : > { %4708 = vst [vmem:[%s7172_s29 + $0x88] sm:$0xff] %v4654_v28 }
 0x35f   : > { %v4656_v5 = vpop.f32.mrf.mxu1 }
 0x360   : > { %v4657_v24 = vadd.f32 %v7166_v61, %v4656_v5 }
 0x362   : > { %4709 = vst [vmem:[%s7172_s29 + $0x90] sm:$0xff] %v4657_v24 }
 0x367   : > { %v4658_v38 = vpop.f32.mrf.mxu1 }
 0x368   : > { %v4659_v30 = vadd.f32 %v7166_v61, %v4658_v38 }
 0x36a   : > { %4710 = vst [vmem:[%s7172_s29 + $0x98] sm:$0xff] %v4659_v30 }
 0x36f   : > { %v4661_v57 = vpop.f32.mrf.mxu1 }
 0x370   : > { %v4662_v15 = vadd.f32 %v7166_v61, %v4661_v57 }
 0x372   : > { %4711 = vst [vmem:[%s7172_s29 + $0xa0] sm:$0xff] %v4662_v15 }
 0x377   : > { %v4663_v19 = vpop.f32.mrf.mxu1 }
 0x378   : > { %v4664_v39 = vadd.f32 %v7166_v61, %v4663_v19 }
 0x37a   : > { %4712 = vst [vmem:[%s7172_s29 + $0xa8] sm:$0xff] %v4664_v39 }
 0x37f   : > { %v4666_v52 = vpop.f32.mrf.mxu1 }
 0x380   : > { %v4667_v9 = vadd.f32 %v7166_v61, %v4666_v52 }
 0x382   : > { %4713 = vst [vmem:[%s7172_s29 + $0xb0] sm:$0xff] %v4667_v9 }
 0x387   : > { %v4668_v32 = vpop.f32.mrf.mxu1 }
 0x388   : > { %v4669_v42 = vadd.f32 %v7166_v61, %v4668_v32 }
 0x38a   : > { %4714 = vst [vmem:[%s7172_s29 + $0xb8] sm:$0xff] %v4669_v42 }
 0x38f   : > { %v4671_v21 = vpop.f32.mrf.mxu1 }
 0x390   : > { %v4672_v36 = vadd.f32 %v7166_v61, %v4671_v21 }
 0x392   : > { %4715 = vst [vmem:[%s7172_s29 + $0xc0] sm:$0xff] %v4672_v36 }
 0x397   : > { %v4673_v8 = vpop.f32.mrf.mxu1 }
 0x398   : > { %v4674_v11 = vadd.f32 %v7166_v61, %v4673_v8 }
 0x39a   : > { %4716 = vst [vmem:[%s7172_s29 + $0xc8] sm:$0xff] %v4674_v11 }
 0x39f   : > { %v4676_v33 = vpop.f32.mrf.mxu1 }
 0x3a0   : > { %v4677_v1 = vadd.f32 %v7166_v61, %v4676_v33 }
 0x3a2   : > { %4717 = vst [vmem:[%s7172_s29 + $0xd0] sm:$0xff] %v4677_v1 }
 0x3a7   : > { %v4678_v25 = vpop.f32.mrf.mxu1 }
 0x3a8   : > { %v4679_v49 = vadd.f32 %v7166_v61, %v4678_v25 }
 0x3aa   : > { %4718 = vst [vmem:[%s7172_s29 + $0xd8] sm:$0xff] %v4679_v49 }
 0x3af   : > { %v4681_v14 = vpop.f32.mrf.mxu1 }
 0x3b0   : > { %v4682_v26 = vadd.f32 %v7166_v61, %v4681_v14 }
 0x3b2   : > { %4719 = vst [vmem:[%s7172_s29 + $0xe0] sm:$0xff] %v4682_v26 }
 0x3b7   : > { %v4683_v63 = vpop.f32.mrf.mxu1 }
 0x3b8   : > { %v4684_v27 = vadd.f32 %v7166_v61, %v4683_v63 }
 0x3ba   : > { %4720 = vst [vmem:[%s7172_s29 + $0xe8] sm:$0xff] %v4684_v27 }
 0x3bf   : > { %v4686_v46 = vpop.f32.mrf.mxu1 }
 0x3c0   : > { %v4687_v31 = vadd.f32 %v7166_v61, %v4686_v46 }
 0x3c2   : > { %4721 = vst [vmem:[%s7172_s29 + $0xf0] sm:$0xff] %v4687_v31 }
 0x3c7   : > { %v4688_v53 = vpop.f32.mrf.mxu1 }
 0x3c8   : > { %v4689_v18 = vadd.f32 %v7166_v61, %v4688_v53 }
 0x3ca   : > { %4722 = vst [vmem:[%s7172_s29 + $0xf8] sm:$0xff] %v4689_v18 }
 0x3cb PF: > { %s18_s18 = sadd.s32 1, %s5944_s18  }
 0x3cc   : > { %p15_p8 = scmp.ge.s32.totalorder %s18_s18, 4  }
 0x3ce   :  { %17 = sbr.rel (!%p15_p8) target bundleno = 3 (0x3), region = 97 }
 0x3d3   :  { %4745 = vsyncpa [#allocation3], 1 }
 0x3d4   :  { %4747 = vsyncpa [#allocation3 + $0x1], 1 }
 0x3d5   :  { %4748 = vsyncpa [#allocation5], 1 }
 0x3d6   :  { %4749 = vsyncpa [#allocation8], 1 }

// kernel: a_call__.5
= control target key start
LH: loop header
LB: loop body
LE: loop exit
PB: predicated region body
PF: predicated region fallthrough
CT: control target
= control target key end

     0   :  { %s9387_s1 = inlined_call_operand.vmem [shape: bf16[6272,128], index: 1, kind: input, shape index: {}]   ;;  %s9388_s0 = inlined_call_operand.vmem [shape: bf16[32,6272], index: 0, kind: input, shape index: {}]   ;;  %s9389_s2 = inlined_call_operand.vmem [shape: f32[1,128], index: 2, kind: input, shape index: {}]   ;;  %s9390_s4 = inlined_call_operand.vmem [shape: f32[1,128], index: 4, kind: input, shape index: {}]   ;;  %s9391_s3 = inlined_call_operand.vmem [shape: bf16[128,128], index: 3, kind: input, shape index: {}]   ;;  %s9392_s5 = inlined_call_operand.vmem [shape: bf16[128,128], index: 5, kind: input, shape index: {}]   ;;  %s9393_s6 = inlined_call_operand.vmem [shape: f32[1,128], index: 6, kind: input, shape index: {}]   ;;  %s9394_s7 = inlined_call_operand.vmem [shape: f32[32,128], index: 7, kind: output, shape index: {}]  }
   0x1   :  { %v7012_v0 = vld [vmem:[%s9387_s1 + $0x38] sm:$0xff]  ;;  %v7011_v4 = vld [vmem:[%s9387_s1 + $0x30] sm:$0xff]  ;;  %v7010_v8 = vld [vmem:[%s9387_s1 + $0x28] sm:$0xff] }
   0x2   :  { %v7028_v1 = vld [vmem:[%s9387_s1 + $0xb8] sm:$0xff]  ;;  %3758 = vmatpush.bf16.msra.mxu0 %v7012_v0  ;;  %v7027_v5 = vld [vmem:[%s9387_s1 + $0xb0] sm:$0xff]  ;;  %v7026_v9 = vld [vmem:[%s9387_s1 + $0xa8] sm:$0xff] }
   0x3   :  { %v7036_v2 = vld [vmem:[%s9387_s1 + $0xf8] sm:$0xff]  ;;  %3796 = vmatpush.bf16.msra.mxu2 %v7028_v1  ;;  %v7035_v6 = vld [vmem:[%s9387_s1 + $0xf0] sm:$0xff]  ;;  %v7034_v10 = vld [vmem:[%s9387_s1 + $0xe8] sm:$0xff] }
   0x4   :  { %v7020_v3 = vld [vmem:[%s9387_s1 + $0x78] sm:$0xff]  ;;  %3815 = vmatpush.bf16.msra.mxu3 %v7036_v2  ;;  %v7019_v7 = vld [vmem:[%s9387_s1 + $0x70] sm:$0xff]  ;;  %v7018_v11 = vld [vmem:[%s9387_s1 + $0x68] sm:$0xff] }
   0x5   :  { %3777 = vmatpush.bf16.msra.mxu1 %v7020_v3  ;;  %v7009_v12 = vld [vmem:[%s9387_s1 + $0x20] sm:$0xff]  ;;  %v7008_v16 = vld [vmem:[%s9387_s1 + $0x18] sm:$0xff]  ;;  %v7007_v20 = vld [vmem:[%s9387_s1 + $0x10] sm:$0xff] }
   0x6   :  { %3759 = vmatpush.bf16.msra.mxu0 %v7011_v4  ;;  %v7025_v13 = vld [vmem:[%s9387_s1 + $0xa0] sm:$0xff]  ;;  %v7024_v17 = vld [vmem:[%s9387_s1 + $0x98] sm:$0xff]  ;;  %v7023_v21 = vld [vmem:[%s9387_s1 + $0x90] sm:$0xff] }
   0x7   :  { %3797 = vmatpush.bf16.msra.mxu2 %v7027_v5  ;;  %v7033_v14 = vld [vmem:[%s9387_s1 + $0xe0] sm:$0xff]  ;;  %v7032_v18 = vld [vmem:[%s9387_s1 + $0xd8] sm:$0xff]  ;;  %v7031_v22 = vld [vmem:[%s9387_s1 + $0xd0] sm:$0xff] }
   0x8   :  { %3816 = vmatpush.bf16.msra.mxu3 %v7035_v6  ;;  %v7017_v15 = vld [vmem:[%s9387_s1 + $0x60] sm:$0xff]  ;;  %v7016_v19 = vld [vmem:[%s9387_s1 + $0x58] sm:$0xff]  ;;  %v7015_v23 = vld [vmem:[%s9387_s1 + $0x50] sm:$0xff] }
   0x9   :  { %3778 = vmatpush.bf16.msra.mxu1 %v7019_v7  ;;  %v7006_v24 = vld [vmem:[%s9387_s1 + $0x8] sm:$0xff]  ;;  %v7005_v28 = vld [vmem:[%s9387_s1] sm:$0xff]  ;;  %v4895_v37 = vld [vmem:[%s9388_s0 + $0xcc] sm:$0xf0] }
   0xa   :  { %3760 = vmatpush.bf16.msra.mxu0 %v7010_v8  ;;  %v7022_v25 = vld [vmem:[%s9387_s1 + $0x88] sm:$0xff]  ;;  %v7021_v29 = vld [vmem:[%s9387_s1 + $0x80] sm:$0xff]  ;;  %v7044_v40 = vld [vmem:[%s9387_s1 + $0x138] sm:$0xff] }
   0xb   :  { %3798 = vmatpush.bf16.msra.mxu2 %v7026_v9  ;;  %v7030_v26 = vld [vmem:[%s9387_s1 + $0xc8] sm:$0xff]  ;;  %v7029_v30 = vld [vmem:[%s9387_s1 + $0xc0] sm:$0xff]  ;;  %v7060_v41 = vld [vmem:[%s9387_s1 + $0x1b8] sm:$0xff] }
   0xc   :  { %3817 = vmatpush.bf16.msra.mxu3 %v7034_v10  ;;  %v7014_v27 = vld [vmem:[%s9387_s1 + $0x48] sm:$0xff]  ;;  %v7013_v31 = vld [vmem:[%s9387_s1 + $0x40] sm:$0xff]  ;;  %v7068_v46 = vld [vmem:[%s9387_s1 + $0x1f8] sm:$0xff] }
   0xd   :  { %3779 = vmatpush.bf16.msra.mxu1 %v7018_v11  ;;  %v4885_v32 = vld [vmem:[%s9388_s0] sm:$0xf]  ;;  %v6931_v33 = vld [vmem:[%s9388_s0 + $0xc0] sm:$0xf0]  ;;  %v4893_v34 = vld [vmem:[%s9388_s0 + $0x8] sm:$0xf] }
   0xe   :  { %3761 = vmatpush.bf16.msra.mxu0 %v7009_v12  ;;  %v6932_v35 = vld [vmem:[%s9388_s0 + $0xc8] sm:$0xf0]  ;;  %v6907_v38 = vld [vmem:[%s9388_s0 + $0x4] sm:$0xf]  ;;  %v4887_v39 = vld [vmem:[%s9388_s0 + $0xc4] sm:$0xf0]  ;;  %v4886_v42 = vor.u32 %v6931_v33, %v4885_v32 }
   0xf   :  { %3799 = vmatpush.bf16.msra.mxu2 %v7025_v13  ;;  %v6908_v36 = vld [vmem:[%s9388_s0 + $0xc] sm:$0xf]  ;;  %v4894_v43 = vor.u32 %v6932_v35, %v4893_v34  ;;  %v4890_v45 = vor.u32 %v6907_v38, %v4887_v39  ;;  %v7052_v47 = vld [vmem:[%s9387_s1 + $0x178] sm:$0xff]  ;;  %v7043_v48 = vld [vmem:[%s9387_s1 + $0x130] sm:$0xff] }
  0x10   :  { %3818 = vmatpush.bf16.msra.mxu3 %v7033_v14  ;;  %v4898_v44 = vor.u32 %v6908_v36, %v4895_v37  ;;  %v7059_v49 = vld [vmem:[%s9387_s1 + $0x1b0] sm:$0xff]  ;;  %v7042_v52 = vld [vmem:[%s9387_s1 + $0x128] sm:$0xff]  ;;  %v7041_v56 = vld [vmem:[%s9387_s1 + $0x120] sm:$0xff] }
  0x11   :  { %3780 = vmatpush.bf16.msra.mxu1 %v7017_v15  ;;  %v7067_v50 = vld [vmem:[%s9387_s1 + $0x1f0] sm:$0xff]  ;;  %v7058_v53 = vld [vmem:[%s9387_s1 + $0x1a8] sm:$0xff]  ;;  %v7057_v57 = vld [vmem:[%s9387_s1 + $0x1a0] sm:$0xff] }
  0x12   :  { %3762 = vmatpush.bf16.msra.mxu0 %v7008_v16  ;;  %v7051_v51 = vld [vmem:[%s9387_s1 + $0x170] sm:$0xff]  ;;  %v7066_v54 = vld [vmem:[%s9387_s1 + $0x1e8] sm:$0xff]  ;;  %v7065_v58 = vld [vmem:[%s9387_s1 + $0x1e0] sm:$0xff] }
  0x13   :  { %3800 = vmatpush.bf16.msra.mxu2 %v7024_v17  ;;  %v7050_v55 = vld [vmem:[%s9387_s1 + $0x168] sm:$0xff]  ;;  %v7049_v59 = vld [vmem:[%s9387_s1 + $0x160] sm:$0xff]  ;;  %v5089_v62 = vld [vmem:[%s9388_s0 + $0x190] sm:$0xf] }
  0x14   :  { %3819 = vmatpush.bf16.msra.mxu3 %v7032_v18  ;;  %v5081_v60 = vld [vmem:[%s9388_s0 + $0x188] sm:$0xf]  ;;  %v6980_v61 = vld [vmem:[%s9388_s0 + $0x248] sm:$0xf0]  ;;  %v6981_v63 = vld [vmem:[%s9388_s0 + $0x250] sm:$0xf0] }
  0x15   :  { %3781 = vmatpush.bf16.msra.mxu1 %v7016_v19  ;;  %v6957_v0 = vld [vmem:[%s9388_s0 + $0x194] sm:$0xf]  ;;  %v5091_v1 = vld [vmem:[%s9388_s0 + $0x254] sm:$0xf0]  ;;  %v6956_v2 = vld [vmem:[%s9388_s0 + $0x18c] sm:$0xf]  ;;  %v5082_v6 = vor.u32 %v6980_v61, %v5081_v60  ;;  %v5090_v7 = vor.u32 %v6981_v63, %v5089_v62 }
  0x16   :  { %3763 = vmatpush.bf16.msra.mxu0 %v7007_v20  ;;  %v5083_v3 = vld [vmem:[%s9388_s0 + $0x24c] sm:$0xf0]  ;;  %v7040_v4 = vld [vmem:[%s9387_s1 + $0x118] sm:$0xff]  ;;  %v5094_v8 = vor.u32 %v6957_v0, %v5091_v1  ;;  %v7038_v16 = vld [vmem:[%s9387_s1 + $0x108] sm:$0xff] }
  0x17   :  { %3801 = vmatpush.bf16.msra.mxu2 %v7023_v21  ;;  %v7056_v5 = vld [vmem:[%s9387_s1 + $0x198] sm:$0xff]  ;;  %v5086_v9 = vor.u32 %v6956_v2, %v5083_v3  ;;  %v7039_v12 = vld [vmem:[%s9387_s1 + $0x110] sm:$0xff]  ;;  %v7054_v17 = vld [vmem:[%s9387_s1 + $0x188] sm:$0xff] }
  0x18   :  { %3820 = vmatpush.bf16.msra.mxu3 %v7031_v22  ;;  %v7064_v10 = vld [vmem:[%s9387_s1 + $0x1d8] sm:$0xff]  ;;  %v7055_v13 = vld [vmem:[%s9387_s1 + $0x190] sm:$0xff]  ;;  %v7062_v18 = vld [vmem:[%s9387_s1 + $0x1c8] sm:$0xff] }
  0x19   :  { %3782 = vmatpush.bf16.msra.mxu1 %v7015_v23  ;;  %v7048_v11 = vld [vmem:[%s9387_s1 + $0x158] sm:$0xff]  ;;  %v7063_v14 = vld [vmem:[%s9387_s1 + $0x1d0] sm:$0xff]  ;;  %v7046_v19 = vld [vmem:[%s9387_s1 + $0x148] sm:$0xff] }
  0x1a   :  { %3764 = vmatpush.bf16.msra.mxu0 %v7006_v24  ;;  %v7047_v15 = vld [vmem:[%s9387_s1 + $0x150] sm:$0xff]  ;;  %v7037_v20 = vld [vmem:[%s9387_s1 + $0x100] sm:$0xff]  ;;  %v4903_v33 = vld [vmem:[%s9388_s0 + $0xd4] sm:$0xf0] }
  0x1b   :  { %3802 = vmatpush.bf16.msra.mxu2 %v7022_v25  ;;  %v7053_v21 = vld [vmem:[%s9387_s1 + $0x180] sm:$0xff]  ;;  %v4901_v22 = vld [vmem:[%s9388_s0 + $0x10] sm:$0xf]  ;;  %v6933_v25 = vld [vmem:[%s9388_s0 + $0xd0] sm:$0xf0] }
  0x1c   :  { %3821 = vmatpush.bf16.msra.mxu3 %v7030_v26  ;;  %v7061_v23 = vld [vmem:[%s9387_s1 + $0x1c0] sm:$0xff]  ;;  %v7076_v26 = vld [vmem:[%s9387_s1 + $0x238] sm:$0xff]  ;;  %v6909_v32 = vld [vmem:[%s9388_s0 + $0x14] sm:$0xf]  ;;  %v4902_v36 = vor.u32 %v6933_v25, %v4901_v22 }
  0x1d   :  { %3783 = vmatpush.bf16.msra.mxu1 %v7014_v27  ;;  %v7045_v24 = vld [vmem:[%s9387_s1 + $0x140] sm:$0xff]  ;;  %v7092_v27 = vld [vmem:[%s9387_s1 + $0x2b8] sm:$0xff]  ;;  %v4906_v39 = vor.u32 %v6909_v32, %v4903_v33  ;;  %v6912_v22 = vld [vmem:[%s9388_s0 + $0x2c] sm:$0xf] }
  0x1e   :  { %3765 = vmatpush.bf16.msra.mxu0 %v7005_v28  ;;  %v4909_v28 = vld [vmem:[%s9388_s0 + $0x18] sm:$0xf]  ;;  %v6958_v60 = vld [vmem:[%s9388_s0 + $0x19c] sm:$0xf]  ;;  %v5099_v61 = vld [vmem:[%s9388_s0 + $0x25c] sm:$0xf0] }
  0x1f   :  { %3803 = vmatpush.bf16.msra.mxu2 %v7021_v29  ;;  %v6934_v29 = vld [vmem:[%s9388_s0 + $0xd8] sm:$0xf0]  ;;  %v5102_v3 = vor.u32 %v6958_v60, %v5099_v61  ;;  %v4927_v25 = vld [vmem:[%s9388_s0 + $0xec] sm:$0xf0] }
  0x20   :  { %3822 = vmatpush.bf16.msra.mxu3 %v7029_v30  ;;  %v6910_v30 = vld [vmem:[%s9388_s0 + $0x1c] sm:$0xf]  ;;  %v4910_v37 = vor.u32 %v6934_v29, %v4909_v28  ;;  %v7107_v32 = vld [vmem:[%s9387_s1 + $0x330] sm:$0xff] }
  0x21   :  { %3784 = vmatpush.bf16.msra.mxu1 %v7013_v31  ;;  %3766 = vmatmul.bf16.vlgmr.msra.gmra.mxu0 %v4886_v42  ;;  %v4911_v31 = vld [vmem:[%s9388_s0 + $0xdc] sm:$0xf0]  ;;  %v7100_v34 = vld [vmem:[%s9387_s1 + $0x2f8] sm:$0xff]  ;;  %v7099_v42 = vld [vmem:[%s9387_s1 + $0x2f0] sm:$0xff] }
  0x22   :  { %3834 = vmatpush.bf16.msrb.mxu0 %v7044_v40  ;;  %3804 = vmatmul.bf16.vlgmr.msra.gmra.mxu2 %v4894_v43  ;;  %v7084_v35 = vld [vmem:[%s9387_s1 + $0x278] sm:$0xff]  ;;  %v4914_v38 = vor.u32 %v6910_v30, %v4911_v31  ;;  %v7075_v40 = vld [vmem:[%s9387_s1 + $0x230] sm:$0xff]  ;;  %v4930_v30 = vor.u32 %v6912_v22, %v4927_v25 }
  0x23   :  { %3872 = vmatpush.bf16.msrb.mxu2 %v7060_v41  ;;  %3823 = vmatmul.bf16.vlgmr.msra.gmra.mxu3 %v4898_v44  ;;  %v7091_v41 = vld [vmem:[%s9387_s1 + $0x2b0] sm:$0xff]  ;;  %v7074_v44 = vld [vmem:[%s9387_s1 + $0x228] sm:$0xff]  ;;  %v7096_v62 = vld [vmem:[%s9387_s1 + $0x2d8] sm:$0xff] }
  0x24   :  { %3785 = vmatmul.bf16.vlgmr.msra.gmra.mxu1 %v4890_v45  ;;  %3891 = vmatpush.bf16.msrb.mxu3 %v7068_v46  ;;  %v7083_v43 = vld [vmem:[%s9387_s1 + $0x270] sm:$0xff]  ;;  %v7090_v45 = vld [vmem:[%s9387_s1 + $0x2a8] sm:$0xff]  ;;  %v7080_v63 = vld [vmem:[%s9387_s1 + $0x258] sm:$0xff] }
  0x25   :  { %3853 = vmatpush.bf16.msrb.mxu1 %v7052_v47  ;;  %v7098_v46 = vld [vmem:[%s9387_s1 + $0x2e8] sm:$0xff]  ;;  %v7123_v33 = vld [vmem:[%s9387_s1 + $0x3b0] sm:$0xff] }
  0x26   :  { %3835 = vmatpush.bf16.msrb.mxu0 %v7043_v48  ;;  %v7082_v47 = vld [vmem:[%s9387_s1 + $0x268] sm:$0xff]  ;;  %v7073_v48 = vld [vmem:[%s9387_s1 + $0x220] sm:$0xff]  ;;  %v7103_v60 = vld [vmem:[%s9387_s1 + $0x310] sm:$0xff] }
  0x27   :  { %3873 = vmatpush.bf16.msrb.mxu2 %v7059_v49  ;;  %v7089_v49 = vld [vmem:[%s9387_s1 + $0x2a0] sm:$0xff]  ;;  %v7119_v61 = vld [vmem:[%s9387_s1 + $0x390] sm:$0xff] }
  0x28   :  { %3892 = vmatpush.bf16.msrb.mxu3 %v7067_v50  ;;  %v7097_v50 = vld [vmem:[%s9387_s1 + $0x2e0] sm:$0xff]  ;;  %v7155_v25 = vld [vmem:[%s9387_s1 + $0x4b0] sm:$0xff] }
  0x29   :  { %3854 = vmatpush.bf16.msrb.mxu1 %v7051_v51  ;;  %v7081_v51 = vld [vmem:[%s9387_s1 + $0x260] sm:$0xff] }
  0x2a   :  { %3836 = vmatpush.bf16.msrb.mxu0 %v7042_v52  ;;  %v5097_v52 = vld [vmem:[%s9388_s0 + $0x198] sm:$0xf] }
  0x2b   :  { %3874 = vmatpush.bf16.msrb.mxu2 %v7058_v53  ;;  %v6982_v53 = vld [vmem:[%s9388_s0 + $0x258] sm:$0xf0] }
  0x2c   :  { %3893 = vmatpush.bf16.msrb.mxu3 %v7066_v54  ;;  %v5105_v54 = vld [vmem:[%s9388_s0 + $0x1a0] sm:$0xf]  ;;  %v5098_v0 = vor.u32 %v6982_v53, %v5097_v52  ;;  %v6960_v52 = vld [vmem:[%s9388_s0 + $0x1ac] sm:$0xf]  ;;  %v5115_v53 = vld [vmem:[%s9388_s0 + $0x26c] sm:$0xf0] }
  0x2d   :  { %3855 = vmatpush.bf16.msrb.mxu1 %v7050_v55  ;;  %v6983_v55 = vld [vmem:[%s9388_s0 + $0x260] sm:$0xf0] }
  0x2e   :  { %3837 = vmatpush.bf16.msrb.mxu0 %v7041_v56  ;;  %v6959_v56 = vld [vmem:[%s9388_s0 + $0x1a4] sm:$0xf]  ;;  %v5106_v1 = vor.u32 %v6983_v55, %v5105_v54  ;;  %v7128_v54 = vld [vmem:[%s9387_s1 + $0x3d8] sm:$0xff] }
  0x2f   :  { %3875 = vmatpush.bf16.msrb.mxu2 %v7057_v57  ;;  %v5107_v57 = vld [vmem:[%s9388_s0 + $0x264] sm:$0xf0]  ;;  %v7112_v55 = vld [vmem:[%s9387_s1 + $0x358] sm:$0xff] }
  0x30   :  { %3894 = vmatpush.bf16.msrb.mxu3 %v7065_v58  ;;  %v7072_v58 = vld [vmem:[%s9387_s1 + $0x218] sm:$0xff]  ;;  %v5110_v2 = vor.u32 %v6959_v56, %v5107_v57 }
  0x31   :  { %3856 = vmatpush.bf16.msrb.mxu1 %v7049_v59  ;;  %3771 = vmatmul.bf16.gmra.mxu0 %v5082_v6  ;;  %v7088_v59 = vld [vmem:[%s9387_s1 + $0x298] sm:$0xff]  ;;  %v7095_v6 = vld [vmem:[%s9387_s1 + $0x2d0] sm:$0xff] }
  0x32   :  { %3838 = vmatpush.bf16.msrb.mxu0 %v7040_v4  ;;  %3809 = vmatmul.bf16.gmra.mxu2 %v5090_v7  ;;  %v7071_v4 = vld [vmem:[%s9387_s1 + $0x210] sm:$0xff] }
  0x33   :  { %3876 = vmatpush.bf16.msrb.mxu2 %v7056_v5  ;;  %3828 = vmatmul.bf16.gmra.mxu3 %v5094_v8  ;;  %v7087_v5 = vld [vmem:[%s9387_s1 + $0x290] sm:$0xff]  ;;  %v7070_v8 = vld [vmem:[%s9387_s1 + $0x208] sm:$0xff] }
  0x34   :  { %3790 = vmatmul.bf16.gmra.mxu1 %v5086_v9  ;;  %3895 = vmatpush.bf16.msrb.mxu3 %v7064_v10  ;;  %v7079_v7 = vld [vmem:[%s9387_s1 + $0x250] sm:$0xff]  ;;  %v7086_v9 = vld [vmem:[%s9387_s1 + $0x288] sm:$0xff] }
  0x35   :  { %3857 = vmatpush.bf16.msrb.mxu1 %v7048_v11  ;;  %v7094_v10 = vld [vmem:[%s9387_s1 + $0x2c8] sm:$0xff] }
  0x36   :  { %3839 = vmatpush.bf16.msrb.mxu0 %v7039_v12  ;;  %v7078_v11 = vld [vmem:[%s9387_s1 + $0x248] sm:$0xff]  ;;  %v7069_v12 = vld [vmem:[%s9387_s1 + $0x200] sm:$0xff] }
  0x37   :  { %3877 = vmatpush.bf16.msrb.mxu2 %v7055_v13  ;;  %v7085_v13 = vld [vmem:[%s9387_s1 + $0x280] sm:$0xff] }
  0x38   :  { %3896 = vmatpush.bf16.msrb.mxu3 %v7063_v14  ;;  %v7093_v14 = vld [vmem:[%s9387_s1 + $0x2c0] sm:$0xff] }
  0x39   :  { %3858 = vmatpush.bf16.msrb.mxu1 %v7047_v15  ;;  %v7077_v15 = vld [vmem:[%s9387_s1 + $0x240] sm:$0xff] }
  0x3a   :  { %3840 = vmatpush.bf16.msrb.mxu0 %v7038_v16  ;;  %v4917_v16 = vld [vmem:[%s9388_s0 + $0x20] sm:$0xf] }
  0x3b   :  { %3878 = vmatpush.bf16.msrb.mxu2 %v7054_v17  ;;  %v6935_v17 = vld [vmem:[%s9388_s0 + $0xe0] sm:$0xf0] }
  0x3c   :  { %3897 = vmatpush.bf16.msrb.mxu3 %v7062_v18  ;;  %v4925_v18 = vld [vmem:[%s9388_s0 + $0x28] sm:$0xf]  ;;  %v4918_v28 = vor.u32 %v6935_v17, %v4917_v16  ;;  %v7148_v16 = vld [vmem:[%s9387_s1 + $0x478] sm:$0xff]  ;;  %v4943_v17 = vld [vmem:[%s9388_s0 + $0xfc] sm:$0xf0] }
  0x3d   :  { %3859 = vmatpush.bf16.msrb.mxu1 %v7046_v19  ;;  %v6936_v19 = vld [vmem:[%s9388_s0 + $0xe8] sm:$0xf0] }
  0x3e   :  { %3841 = vmatpush.bf16.msrb.mxu0 %v7037_v20  ;;  %v7108_v20 = vld [vmem:[%s9387_s1 + $0x338] sm:$0xff]  ;;  %v4926_v29 = vor.u32 %v6936_v19, %v4925_v18  ;;  %v6913_v18 = vld [vmem:[%s9388_s0 + $0x34] sm:$0xf] }
  0x3f   :  { %3879 = vmatpush.bf16.msrb.mxu2 %v7053_v21  ;;  %v7124_v21 = vld [vmem:[%s9387_s1 + $0x3b8] sm:$0xff] }
  0x40   :  { %3898 = vmatpush.bf16.msrb.mxu3 %v7061_v23  ;;  %v7132_v23 = vld [vmem:[%s9387_s1 + $0x3f8] sm:$0xff] }
  0x41   :  { %3860 = vmatpush.bf16.msrb.mxu1 %v7045_v24  ;;  %3842 = vmatmul.bf16.vlgmr.msrb.gmra.mxu0 %v4902_v36  ;;  %v7116_v24 = vld [vmem:[%s9387_s1 + $0x378] sm:$0xff]  ;;  %v7106_v36 = vld [vmem:[%s9387_s1 + $0x328] sm:$0xff] }
  0x42   :  { %3910 = vmatpush.bf16.msra.mxu0 %v7076_v26  ;;  %3880 = vmatmul.bf16.vlgmr.msrb.gmra.mxu2 %v4910_v37  ;;  %v6911_v26 = vld [vmem:[%s9388_s0 + $0x24] sm:$0xf]  ;;  %v7122_v37 = vld [vmem:[%s9387_s1 + $0x3a8] sm:$0xff]  ;;  %v4935_v19 = vld [vmem:[%s9388_s0 + $0xf4] sm:$0xf0] }
  0x43   :  { %3948 = vmatpush.bf16.msra.mxu2 %v7092_v27  ;;  %3899 = vmatmul.bf16.vlgmr.msrb.gmra.mxu3 %v4914_v38  ;;  %v4919_v27 = vld [vmem:[%s9388_s0 + $0xe4] sm:$0xf0] }
  0x44   :  { %3967 = vmatpush.bf16.msra.mxu3 %v7100_v34  ;;  %3861 = vmatmul.bf16.vlgmr.msrb.gmra.mxu1 %v4906_v39  ;;  %v4922_v31 = vor.u32 %v6911_v26, %v4919_v27  ;;  %v7131_v34 = vld [vmem:[%s9387_s1 + $0x3f0] sm:$0xff]  ;;  %v7130_v38 = vld [vmem:[%s9387_s1 + $0x3e8] sm:$0xff] }
  0x45   :  { %3929 = vmatpush.bf16.msra.mxu1 %v7084_v35  ;;  %v7115_v35 = vld [vmem:[%s9387_s1 + $0x370] sm:$0xff]  ;;  %v7114_v39 = vld [vmem:[%s9387_s1 + $0x368] sm:$0xff] }
  0x46   :  { %3911 = vmatpush.bf16.msra.mxu0 %v7075_v40  ;;  %v7105_v40 = vld [vmem:[%s9387_s1 + $0x320] sm:$0xff]  ;;  %v7163_v26 = vld [vmem:[%s9387_s1 + $0x4f0] sm:$0xff] }
  0x47   :  { %3949 = vmatpush.bf16.msra.mxu2 %v7091_v41  ;;  %v7121_v41 = vld [vmem:[%s9387_s1 + $0x3a0] sm:$0xff]  ;;  %v7147_v27 = vld [vmem:[%s9387_s1 + $0x470] sm:$0xff] }
  0x48   :  { %3968 = vmatpush.bf16.msra.mxu3 %v7099_v42  ;;  %v7129_v42 = vld [vmem:[%s9387_s1 + $0x3e0] sm:$0xff] }
  0x49   :  { %3930 = vmatpush.bf16.msra.mxu1 %v7083_v43  ;;  %v7113_v43 = vld [vmem:[%s9387_s1 + $0x360] sm:$0xff] }
  0x4a   :  { %3912 = vmatpush.bf16.msra.mxu0 %v7074_v44  ;;  %v5113_v44 = vld [vmem:[%s9388_s0 + $0x1a8] sm:$0xf] }
  0x4b   :  { %3950 = vmatpush.bf16.msra.mxu2 %v7090_v45  ;;  %v6984_v45 = vld [vmem:[%s9388_s0 + $0x268] sm:$0xf0] }
  0x4c   :  { %3969 = vmatpush.bf16.msra.mxu3 %v7098_v46  ;;  %v5121_v46 = vld [vmem:[%s9388_s0 + $0x1b0] sm:$0xf]  ;;  %v5114_v56 = vor.u32 %v6984_v45, %v5113_v44  ;;  %v6962_v44 = vld [vmem:[%s9388_s0 + $0x1bc] sm:$0xf]  ;;  %v5131_v45 = vld [vmem:[%s9388_s0 + $0x27c] sm:$0xf0] }
  0x4d   :  { %3931 = vmatpush.bf16.msra.mxu1 %v7082_v47  ;;  %v6985_v47 = vld [vmem:[%s9388_s0 + $0x270] sm:$0xf0] }
  0x4e   :  { %3913 = vmatpush.bf16.msra.mxu0 %v7073_v48  ;;  %v6961_v48 = vld [vmem:[%s9388_s0 + $0x1b4] sm:$0xf]  ;;  %v5122_v57 = vor.u32 %v6985_v47, %v5121_v46  ;;  %v7160_v46 = vld [vmem:[%s9387_s1 + $0x4d8] sm:$0xff] }
  0x4f   :  { %3951 = vmatpush.bf16.msra.mxu2 %v7089_v49  ;;  %v5123_v49 = vld [vmem:[%s9388_s0 + $0x274] sm:$0xf0] }
  0x50   :  { %3970 = vmatpush.bf16.msra.mxu3 %v7097_v50  ;;  %v7104_v50 = vld [vmem:[%s9387_s1 + $0x318] sm:$0xff] }
  0x51   :  { %3932 = vmatpush.bf16.msra.mxu1 %v7081_v51  ;;  %3847 = vmatmul.bf16.gmra.mxu0 %v5098_v0  ;;  %v7120_v51 = vld [vmem:[%s9387_s1 + $0x398] sm:$0xff]  ;;  %v7102_v0 = vld [vmem:[%s9387_s1 + $0x308] sm:$0xff] }
  0x52   :  { %3914 = vmatpush.bf16.msra.mxu0 %v7072_v58  ;;  %3885 = vmatmul.bf16.gmra.mxu2 %v5106_v1  ;;  %v5126_v58 = vor.u32 %v6961_v48, %v5123_v49  ;;  %v7118_v1 = vld [vmem:[%s9387_s1 + $0x388] sm:$0xff]  ;;  %v7144_v47 = vld [vmem:[%s9387_s1 + $0x458] sm:$0xff] }
  0x53   :  { %3952 = vmatpush.bf16.msra.mxu2 %v7088_v59  ;;  %3904 = vmatmul.bf16.gmra.mxu3 %v5110_v2  ;;  %v5118_v59 = vor.u32 %v6960_v52, %v5115_v53  ;;  %v7126_v2 = vld [vmem:[%s9387_s1 + $0x3c8] sm:$0xff]  ;;  %v7135_v52 = vld [vmem:[%s9387_s1 + $0x410] sm:$0xff] }
  0x54   :  { %3971 = vmatpush.bf16.msra.mxu3 %v7096_v62  ;;  %3866 = vmatmul.bf16.gmra.mxu1 %v5102_v3  ;;  %v7127_v62 = vld [vmem:[%s9387_s1 + $0x3d0] sm:$0xff]  ;;  %v7110_v3 = vld [vmem:[%s9387_s1 + $0x348] sm:$0xff] }
  0x55   :  { %3933 = vmatpush.bf16.msra.mxu1 %v7080_v63  ;;  %v7111_v63 = vld [vmem:[%s9387_s1 + $0x350] sm:$0xff] }
  0x56   :  { %3915 = vmatpush.bf16.msra.mxu0 %v7071_v4  ;;  %v7101_v4 = vld [vmem:[%s9387_s1 + $0x300] sm:$0xff]  ;;  %v7151_v53 = vld [vmem:[%s9387_s1 + $0x490] sm:$0xff] }
  0x57   :  { %3953 = vmatpush.bf16.msra.mxu2 %v7087_v5  ;;  %v7117_v5 = vld [vmem:[%s9387_s1 + $0x380] sm:$0xff] }
  0x58   :  { %3972 = vmatpush.bf16.msra.mxu3 %v7095_v6  ;;  %v7125_v6 = vld [vmem:[%s9387_s1 + $0x3c0] sm:$0xff] }
  0x59   :  { %3934 = vmatpush.bf16.msra.mxu1 %v7079_v7  ;;  %v7109_v7 = vld [vmem:[%s9387_s1 + $0x340] sm:$0xff] }
  0x5a   :  { %3916 = vmatpush.bf16.msra.mxu0 %v7070_v8  ;;  %v4933_v8 = vld [vmem:[%s9388_s0 + $0x30] sm:$0xf] }
  0x5b   :  { %3954 = vmatpush.bf16.msra.mxu2 %v7086_v9  ;;  %v6937_v9 = vld [vmem:[%s9388_s0 + $0xf0] sm:$0xf0] }
  0x5c   :  { %3973 = vmatpush.bf16.msra.mxu3 %v7094_v10  ;;  %v4941_v10 = vld [vmem:[%s9388_s0 + $0x38] sm:$0xf] }
  0x5d   :  { %3935 = vmatpush.bf16.msra.mxu1 %v7078_v11  ;;  %v6938_v11 = vld [vmem:[%s9388_s0 + $0xf8] sm:$0xf0] }
  0x5e   :  { %3917 = vmatpush.bf16.msra.mxu0 %v7069_v12  ;;  %v7140_v12 = vld [vmem:[%s9387_s1 + $0x438] sm:$0xff] }
  0x5f   :  { %3955 = vmatpush.bf16.msra.mxu2 %v7085_v13  ;;  %v7156_v13 = vld [vmem:[%s9387_s1 + $0x4b8] sm:$0xff] }
  0x60   :  { %3974 = vmatpush.bf16.msra.mxu3 %v7093_v14  ;;  %v6914_v14 = vld [vmem:[%s9388_s0 + $0x3c] sm:$0xf] }
  0x61   :  { %3936 = vmatpush.bf16.msra.mxu1 %v7077_v15  ;;  %3918 = vmatmul.bf16.vlgmr.msra.gmra.mxu0 %v4918_v28  ;;  %v7164_v15 = vld [vmem:[%s9387_s1 + $0x4f8] sm:$0xff]  ;;  %v4946_v22 = vor.u32 %v6914_v14, %v4943_v17  ;;  %v7138_v28 = vld [vmem:[%s9387_s1 + $0x428] sm:$0xff] }
  0x62   :  { %3986 = vmatpush.bf16.msrb.mxu0 %v7108_v20  ;;  %3956 = vmatmul.bf16.vlgmr.msra.gmra.mxu2 %v4926_v29  ;;  %v4934_v20 = vor.u32 %v6937_v9, %v4933_v8  ;;  %v7154_v29 = vld [vmem:[%s9387_s1 + $0x4a8] sm:$0xff]  ;;  %v7196_v8 = vld [vmem:[%s9387_s1 + $0x5f8] sm:$0xff] }
  0x63   :  { %4024 = vmatpush.bf16.msrb.mxu2 %v7124_v21  ;;  %3975 = vmatmul.bf16.vlgmr.msra.gmra.mxu3 %v4930_v30  ;;  %v4942_v21 = vor.u32 %v6938_v11, %v4941_v10  ;;  %v7162_v30 = vld [vmem:[%s9387_s1 + $0x4e8] sm:$0xff]  ;;  %v7180_v9 = vld [vmem:[%s9387_s1 + $0x578] sm:$0xff]  ;;  %v4959_v10 = vld [vmem:[%s9388_s0 + $0x10c] sm:$0xf0] }
  0x64   :  { %4043 = vmatpush.bf16.msrb.mxu3 %v7132_v23  ;;  %3937 = vmatmul.bf16.vlgmr.msra.gmra.mxu1 %v4922_v31  ;;  %v4938_v23 = vor.u32 %v6913_v18, %v4935_v19  ;;  %v7146_v31 = vld [vmem:[%s9387_s1 + $0x468] sm:$0xff]  ;;  %v6915_v11 = vld [vmem:[%s9388_s0 + $0x44] sm:$0xf] }
  0x65   :  { %4005 = vmatpush.bf16.msrb.mxu1 %v7116_v24  ;;  %v7139_v24 = vld [vmem:[%s9387_s1 + $0x430] sm:$0xff] }
  0x66   :  { %3987 = vmatpush.bf16.msrb.mxu0 %v7107_v32  ;;  %v7137_v32 = vld [vmem:[%s9387_s1 + $0x420] sm:$0xff] }
  0x67   :  { %4025 = vmatpush.bf16.msrb.mxu2 %v7123_v33  ;;  %v7153_v33 = vld [vmem:[%s9387_s1 + $0x4a0] sm:$0xff] }
  0x68   :  { %4044 = vmatpush.bf16.msrb.mxu3 %v7131_v34  ;;  %v7161_v34 = vld [vmem:[%s9387_s1 + $0x4e0] sm:$0xff] }
  0x69   :  { %4006 = vmatpush.bf16.msrb.mxu1 %v7115_v35  ;;  %v7145_v35 = vld [vmem:[%s9387_s1 + $0x460] sm:$0xff] }
  0x6a   :  { %3988 = vmatpush.bf16.msrb.mxu0 %v7106_v36  ;;  %v5129_v36 = vld [vmem:[%s9388_s0 + $0x1b8] sm:$0xf] }
  0x6b   :  { %4026 = vmatpush.bf16.msrb.mxu2 %v7122_v37  ;;  %v6986_v37 = vld [vmem:[%s9388_s0 + $0x278] sm:$0xf0] }
  0x6c   :  { %4045 = vmatpush.bf16.msrb.mxu3 %v7130_v38  ;;  %v5137_v38 = vld [vmem:[%s9388_s0 + $0x1c0] sm:$0xf]  ;;  %v5130_v48 = vor.u32 %v6986_v37, %v5129_v36 }
  0x6d   :  { %4007 = vmatpush.bf16.msrb.mxu1 %v7114_v39  ;;  %v6987_v39 = vld [vmem:[%s9388_s0 + $0x280] sm:$0xf0] }
  0x6e   :  { %3989 = vmatpush.bf16.msrb.mxu0 %v7105_v40  ;;  %v6963_v40 = vld [vmem:[%s9388_s0 + $0x1c4] sm:$0xf]  ;;  %v5138_v49 = vor.u32 %v6987_v39, %v5137_v38 }
  0x6f   :  { %4027 = vmatpush.bf16.msrb.mxu2 %v7121_v41  ;;  %v5139_v41 = vld [vmem:[%s9388_s0 + $0x284] sm:$0xf0]  ;;  %v7169_v36 = vld [vmem:[%s9387_s1 + $0x520] sm:$0xff] }
  0x70   :  { %4046 = vmatpush.bf16.msrb.mxu3 %v7129_v42  ;;  %v7136_v42 = vld [vmem:[%s9387_s1 + $0x418] sm:$0xff]  ;;  %v7185_v37 = vld [vmem:[%s9387_s1 + $0x5a0] sm:$0xff] }
  0x71   :  { %4008 = vmatpush.bf16.msrb.mxu1 %v7113_v43  ;;  %3923 = vmatmul.bf16.gmra.mxu0 %v5114_v56  ;;  %v7152_v43 = vld [vmem:[%s9387_s1 + $0x498] sm:$0xff]  ;;  %v7134_v56 = vld [vmem:[%s9387_s1 + $0x408] sm:$0xff]  ;;  %v7193_v38 = vld [vmem:[%s9387_s1 + $0x5e0] sm:$0xff] }
  0x72   :  { %3990 = vmatpush.bf16.msrb.mxu0 %v7104_v50  ;;  %3961 = vmatmul.bf16.gmra.mxu2 %v5122_v57  ;;  %v5142_v50 = vor.u32 %v6963_v40, %v5139_v41  ;;  %v7150_v57 = vld [vmem:[%s9387_s1 + $0x488] sm:$0xff]  ;;  %v7177_v39 = vld [vmem:[%s9387_s1 + $0x560] sm:$0xff] }
  0x73   :  { %4028 = vmatpush.bf16.msrb.mxu2 %v7120_v51  ;;  %3980 = vmatmul.bf16.gmra.mxu3 %v5126_v58  ;;  %v5134_v51 = vor.u32 %v6962_v44, %v5131_v45  ;;  %v7158_v58 = vld [vmem:[%s9387_s1 + $0x4c8] sm:$0xff]  ;;  %v6989_v44 = vld [vmem:[%s9388_s0 + $0x290] sm:$0xf0] }
  0x74   :  { %4047 = vmatpush.bf16.msrb.mxu3 %v7128_v54  ;;  %3942 = vmatmul.bf16.gmra.mxu1 %v5118_v59  ;;  %v7159_v54 = vld [vmem:[%s9387_s1 + $0x4d0] sm:$0xff]  ;;  %v7142_v59 = vld [vmem:[%s9387_s1 + $0x448] sm:$0xff] }
  0x75   :  { %4009 = vmatpush.bf16.msrb.mxu1 %v7112_v55  ;;  %v7143_v55 = vld [vmem:[%s9387_s1 + $0x450] sm:$0xff]  ;;  %v5145_v40 = vld [vmem:[%s9388_s0 + $0x1c8] sm:$0xf] }
  0x76   :  { %3991 = vmatpush.bf16.msrb.mxu0 %v7103_v60  ;;  %v7133_v60 = vld [vmem:[%s9387_s1 + $0x400] sm:$0xff]  ;;  %v6965_v45 = vld [vmem:[%s9388_s0 + $0x1d4] sm:$0xf] }
  0x77   :  { %4029 = vmatpush.bf16.msrb.mxu2 %v7119_v61  ;;  %v7149_v61 = vld [vmem:[%s9387_s1 + $0x480] sm:$0xff] }
  0x78   :  { %4048 = vmatpush.bf16.msrb.mxu3 %v7127_v62  ;;  %v7157_v62 = vld [vmem:[%s9387_s1 + $0x4c0] sm:$0xff] }
  0x79   :  { %4010 = vmatpush.bf16.msrb.mxu1 %v7111_v63  ;;  %v7141_v63 = vld [vmem:[%s9387_s1 + $0x440] sm:$0xff] }
  0x7a   :  { %3992 = vmatpush.bf16.msrb.mxu0 %v7102_v0  ;;  %v4949_v0 = vld [vmem:[%s9388_s0 + $0x40] sm:$0xf] }
  0x7b   :  { %4030 = vmatpush.bf16.msrb.mxu2 %v7118_v1  ;;  %v6939_v1 = vld [vmem:[%s9388_s0 + $0x100] sm:$0xf0] }
  0x7c   :  { %4049 = vmatpush.bf16.msrb.mxu3 %v7126_v2  ;;  %v4957_v2 = vld [vmem:[%s9388_s0 + $0x48] sm:$0xf] }
  0x7d   :  { %4011 = vmatpush.bf16.msrb.mxu1 %v7110_v3  ;;  %v8148_v3 = vld [vmem:[%s9389_s2] ss:$0 sm:$0xff] }
  0x7e   :  { %3993 = vmatpush.bf16.msrb.mxu0 %v7101_v4  ;;  %v6940_v4 = vld [vmem:[%s9388_s0 + $0x108] sm:$0xf0] }
  0x7f   :  { %4031 = vmatpush.bf16.msrb.mxu2 %v7117_v5  ;;  %v7172_v5 = vld [vmem:[%s9387_s1 + $0x538] sm:$0xff]  ;;  %v4958_v14 = vor.u32 %v6940_v4, %v4957_v2  ;;  %v7191_v2 = vld [vmem:[%s9387_s1 + $0x5d0] sm:$0xff] }
  0x80   :  { %4050 = vmatpush.bf16.msrb.mxu3 %v7125_v6  ;;  %v7188_v6 = vld [vmem:[%s9387_s1 + $0x5b8] sm:$0xff]  ;;  %v7175_v4 = vld [vmem:[%s9387_s1 + $0x550] sm:$0xff] }
  0x81   :  { %4012 = vmatpush.bf16.msrb.mxu1 %v7109_v7  ;;  %3994 = vmatmul.bf16.vlgmr.msrb.gmra.mxu0 %v4934_v20  ;;  %v6916_v7 = vld [vmem:[%s9388_s0 + $0x4c] sm:$0xf]  ;;  %v7171_v20 = vld [vmem:[%s9387_s1 + $0x530] sm:$0xff] }
  0x82   :  { %4062 = vmatpush.bf16.msra.mxu0 %v7140_v12  ;;  %4032 = vmatmul.bf16.vlgmr.msrb.gmra.mxu2 %v4942_v21  ;;  %v4951_v12 = vld [vmem:[%s9388_s0 + $0x104] sm:$0xf0]  ;;  %v7187_v21 = vld [vmem:[%s9387_s1 + $0x5b0] sm:$0xff] }
  0x83   :  { %4100 = vmatpush.bf16.msra.mxu2 %v7156_v13  ;;  %4051 = vmatmul.bf16.vlgmr.msrb.gmra.mxu3 %v4946_v22  ;;  %v4950_v13 = vor.u32 %v6939_v1, %v4949_v0  ;;  %v4954_v17 = vor.u32 %v6915_v11, %v4951_v12  ;;  %v7195_v22 = vld [vmem:[%s9387_s1 + $0x5f0] sm:$0xff] }
  0x84   :  { %4119 = vmatpush.bf16.msra.mxu3 %v7164_v15  ;;  %4013 = vmatmul.bf16.vlgmr.msrb.gmra.mxu1 %v4938_v23  ;;  %v7179_v23 = vld [vmem:[%s9387_s1 + $0x570] sm:$0xff] }
  0x85   :  { %4081 = vmatpush.bf16.msra.mxu1 %v7148_v16  ;;  %v4962_v16 = vor.u32 %v6916_v7, %v4959_v10  ;;  %v7167_v0 = vld [vmem:[%s9387_s1 + $0x510] sm:$0xff]  ;;  %v7182_v7 = vld [vmem:[%s9387_s1 + $0x588] sm:$0xff] }
  0x86   :  { %4063 = vmatpush.bf16.msra.mxu0 %v7139_v24  ;;  %v7183_v1 = vld [vmem:[%s9387_s1 + $0x590] sm:$0xff]  ;;  %v7174_v10 = vld [vmem:[%s9387_s1 + $0x548] sm:$0xff] }
  0x87   :  { %4101 = vmatpush.bf16.msra.mxu2 %v7155_v25  ;;  %v7170_v25 = vld [vmem:[%s9387_s1 + $0x528] sm:$0xff] }
  0x88   :  { %4120 = vmatpush.bf16.msra.mxu3 %v7163_v26  ;;  %v7186_v26 = vld [vmem:[%s9387_s1 + $0x5a8] sm:$0xff] }
  0x89   :  { %4082 = vmatpush.bf16.msra.mxu1 %v7147_v27 }
  0x8a   :  { %4064 = vmatpush.bf16.msra.mxu0 %v7138_v28  ;;  %v7194_v28 = vld [vmem:[%s9387_s1 + $0x5e8] sm:$0xff] }
  0x8b   :  { %4102 = vmatpush.bf16.msra.mxu2 %v7154_v29  ;;  %v7178_v29 = vld [vmem:[%s9387_s1 + $0x568] sm:$0xff] }
  0x8c   :  { %4121 = vmatpush.bf16.msra.mxu3 %v7162_v30 }
  0x8d   :  { %4083 = vmatpush.bf16.msra.mxu1 %v7146_v31 }
  0x8e   :  { %4065 = vmatpush.bf16.msra.mxu0 %v7137_v32 }
  0x8f   :  { %4103 = vmatpush.bf16.msra.mxu2 %v7153_v33 }
  0x90   :  { %4122 = vmatpush.bf16.msra.mxu3 %v7161_v34 }
  0x91   :  { %4084 = vmatpush.bf16.msra.mxu1 %v7145_v35  ;;  %3999 = vmatmul.bf16.gmra.mxu0 %v5130_v48  ;;  %v7184_v48 = vld [vmem:[%s9387_s1 + $0x598] sm:$0xff] }
  0x92   :  { %4066 = vmatpush.bf16.msra.mxu0 %v7136_v42  ;;  %4037 = vmatmul.bf16.gmra.mxu2 %v5138_v49  ;;  %v6988_v42 = vld [vmem:[%s9388_s0 + $0x288] sm:$0xf0] }
  0x93   :  { %4104 = vmatpush.bf16.msra.mxu2 %v7152_v43  ;;  %4056 = vmatmul.bf16.gmra.mxu3 %v5142_v50  ;;  %v5153_v43 = vld [vmem:[%s9388_s0 + $0x1d0] sm:$0xf]  ;;  %v6964_v49 = vld [vmem:[%s9388_s0 + $0x1cc] sm:$0xf] }
  0x94   :  { %4123 = vmatpush.bf16.msra.mxu3 %v7160_v46  ;;  %4018 = vmatmul.bf16.gmra.mxu1 %v5134_v51  ;;  %v5155_v46 = vld [vmem:[%s9388_s0 + $0x294] sm:$0xf0]  ;;  %v5147_v50 = vld [vmem:[%s9388_s0 + $0x28c] sm:$0xf0] }
  0x95   :  { %4085 = vmatpush.bf16.msra.mxu1 %v7144_v47  ;;  %v7168_v47 = vld [vmem:[%s9387_s1 + $0x518] sm:$0xff] }
  0x96   :  { %4067 = vmatpush.bf16.msra.mxu0 %v7135_v52  ;;  %v7192_v52 = vld [vmem:[%s9387_s1 + $0x5d8] sm:$0xff] }
  0x97   :  { %4105 = vmatpush.bf16.msra.mxu2 %v7151_v53  ;;  %v7176_v53 = vld [vmem:[%s9387_s1 + $0x558] sm:$0xff] }
  0x98   :  { %4124 = vmatpush.bf16.msra.mxu3 %v7159_v54 }
  0x99   :  { %4086 = vmatpush.bf16.msra.mxu1 %v7143_v55 }
  0x9a   :  { %4068 = vmatpush.bf16.msra.mxu0 %v7134_v56  ;;  %v5146_v56 = vor.u32 %v6988_v42, %v5145_v40 }
  0x9b   :  { %4106 = vmatpush.bf16.msra.mxu2 %v7150_v57  ;;  %v5154_v57 = vor.u32 %v6989_v44, %v5153_v43 }
  0x9c   :  { %4125 = vmatpush.bf16.msra.mxu3 %v7158_v58 }
  0x9d   :  { %4087 = vmatpush.bf16.msra.mxu1 %v7142_v59  ;;  %v5158_v59 = vor.u32 %v6965_v45, %v5155_v46  ;;  %v7203_v45 = vld [vmem:[%s9387_s1 + $0x630] sm:$0xff] }
  0x9e   :  { %4069 = vmatpush.bf16.msra.mxu0 %v7133_v60  ;;  %v3767_v15 = vpop.f32.mrf.mxu0  ;;  %v5150_v60 = vor.u32 %v6964_v49, %v5147_v50  ;;  %v7219_v46 = vld [vmem:[%s9387_s1 + $0x6b0] sm:$0xff]  ;;  %v7218_v50 = vld [vmem:[%s9387_s1 + $0x6a8] sm:$0xff] }
  0x9f   :  { %4107 = vmatpush.bf16.msra.mxu2 %v7149_v61  ;;  %v3768_v18 = vadd.f32 %v8148_v3, %v3767_v15 }
  0xa0   :  { %4126 = vmatpush.bf16.msra.mxu3 %v7157_v62 }
  0xa1   :  { %4088 = vmatpush.bf16.msra.mxu1 %v7141_v63  ;;  %v3786_v19 = vpop.f32.mrf.mxu1  ;;  %4070 = vmatmul.bf16.vlgmr.msra.gmra.mxu0 %v4950_v13 }
  0xa2   :  { %4138 = vmatpush.bf16.msrb.mxu0 %v7172_v5  ;;  %v3787_v24 = vadd.f32 %v3786_v19, %v3768_v18  ;;  %4108 = vmatmul.bf16.vlgmr.msra.gmra.mxu2 %v4958_v14  ;;  %v7165_v14 = vld [vmem:[%s9387_s1 + $0x500] sm:$0xff] }
  0xa3   :  { %4176 = vmatpush.bf16.msrb.mxu2 %v7188_v6  ;;  %4127 = vmatmul.bf16.vlgmr.msra.gmra.mxu3 %v4962_v16  ;;  %v7166_v6 = vld [vmem:[%s9387_s1 + $0x508] sm:$0xff]  ;;  %v7181_v18 = vld [vmem:[%s9387_s1 + $0x580] sm:$0xff] }
  0xa4   :  { %4195 = vmatpush.bf16.msrb.mxu3 %v7196_v8  ;;  %4089 = vmatmul.bf16.vlgmr.msra.gmra.mxu1 %v4954_v17  ;;  %v7189_v19 = vld [vmem:[%s9387_s1 + $0x5c0] sm:$0xff] }
  0xa5   :  { %4157 = vmatpush.bf16.msrb.mxu1 %v7180_v9  ;;  %v3805_v27 = vpop.f32.mrf.mxu2  ;;  %v7190_v9 = vld [vmem:[%s9387_s1 + $0x5c8] sm:$0xff] }
  0xa6   :  { %4139 = vmatpush.bf16.msrb.mxu0 %v7171_v20  ;;  %v3806_v30 = vadd.f32 %v3805_v27, %v3787_v24  ;;  %v3824_v31 = vpop.f32.mrf.mxu3  ;;  %v3769_v32 = vpop.f32.mrf.mxu0  ;;  %v7173_v20 = vld [vmem:[%s9387_s1 + $0x540] sm:$0xff]  ;;  %v6942_v24 = vld [vmem:[%s9388_s0 + $0x118] sm:$0xf0] }
  0xa7   :  { %4177 = vmatpush.bf16.msrb.mxu2 %v7187_v21  ;;  %v3770_v34 = vadd.f32 %v8148_v3, %v3769_v32  ;;  %v6941_v21 = vld [vmem:[%s9388_s0 + $0x110] sm:$0xf0]  ;;  %v6918_v27 = vld [vmem:[%s9388_s0 + $0x5c] sm:$0xf]  ;;  %v4967_v32 = vld [vmem:[%s9388_s0 + $0x114] sm:$0xf0] }
  0xa8   :  { %4196 = vmatpush.bf16.msrb.mxu3 %v7195_v22  ;;  %v8202_v33 = vadd.f32 %v3824_v31, %v3806_v30  ;;  %v4973_v22 = vld [vmem:[%s9388_s0 + $0x58] sm:$0xf]  ;;  %v4975_v30 = vld [vmem:[%s9388_s0 + $0x11c] sm:$0xf0]  ;;  %v6917_v31 = vld [vmem:[%s9388_s0 + $0x54] sm:$0xf] }
  0xa9   :  { %4158 = vmatpush.bf16.msrb.mxu1 %v7179_v23  ;;  %v3788_v35 = vpop.f32.mrf.mxu1  ;;  %v4978_v40 = vor.u32 %v6918_v27, %v4975_v30  ;;  %v7223_v27 = vld [vmem:[%s9387_s1 + $0x6d0] sm:$0xff]  ;;  %v7214_v30 = vld [vmem:[%s9387_s1 + $0x688] sm:$0xff] }
  0xaa   :  { %4140 = vmatpush.bf16.msrb.mxu0 %v7170_v25  ;;  %v3789_v41 = vadd.f32 %v3788_v35, %v3770_v34  ;;  %v7204_v25 = vld [vmem:[%s9387_s1 + $0x638] sm:$0xff] }
  0xab   :  { %4178 = vmatpush.bf16.msrb.mxu2 %v7186_v26  ;;  %v7220_v26 = vld [vmem:[%s9387_s1 + $0x6b8] sm:$0xff] }
  0xac   :  { %4197 = vmatpush.bf16.msrb.mxu3 %v7194_v28  ;;  %v7228_v28 = vld [vmem:[%s9387_s1 + $0x6f8] sm:$0xff] }
  0xad   :  { %4159 = vmatpush.bf16.msrb.mxu1 %v7178_v29  ;;  %v3807_v51 = vpop.f32.mrf.mxu2  ;;  %v7212_v29 = vld [vmem:[%s9387_s1 + $0x678] sm:$0xff] }
  0xae   :  { %4141 = vmatpush.bf16.msrb.mxu0 %v7169_v36  ;;  %v3808_v54 = vadd.f32 %v3807_v51, %v3789_v41  ;;  %v3826_v55 = vpop.f32.mrf.mxu3  ;;  %v3772_v58 = vpop.f32.mrf.mxu0  ;;  %v4970_v41 = vor.u32 %v6917_v31, %v4967_v32  ;;  %v7222_v32 = vld [vmem:[%s9387_s1 + $0x6c8] sm:$0xff] }
  0xaf   :  { %4179 = vmatpush.bf16.msrb.mxu2 %v7185_v37  ;;  %v3773_v62 = vadd.f32 %v8148_v3, %v3772_v58 }
  0xb0   :  { %4198 = vmatpush.bf16.msrb.mxu3 %v7193_v38  ;;  %v8253_v61 = vadd.f32 %v3826_v55, %v3808_v54  ;;  %v4974_v38 = vor.u32 %v6942_v24, %v4973_v22 }
  0xb1   :  { %4160 = vmatpush.bf16.msrb.mxu1 %v7177_v39  ;;  %v3791_v63 = vpop.f32.mrf.mxu1  ;;  %4075 = vmatmul.bf16.gmra.mxu0 %v5146_v56 }
  0xb2   :  { %4142 = vmatpush.bf16.msrb.mxu0 %v7168_v47  ;;  %v3792_v5 = vadd.f32 %v3791_v63, %v3773_v62  ;;  %4113 = vmatmul.bf16.gmra.mxu2 %v5154_v57  ;;  %v7227_v47 = vld [vmem:[%s9387_s1 + $0x6f0] sm:$0xff]  ;;  %v7217_v62 = vld [vmem:[%s9387_s1 + $0x6a0] sm:$0xff] }
  0xb3   :  { %4180 = vmatpush.bf16.msrb.mxu2 %v7184_v48  ;;  %4132 = vmatmul.bf16.gmra.mxu3 %v5158_v59  ;;  %v7211_v48 = vld [vmem:[%s9387_s1 + $0x670] sm:$0xff]  ;;  %v7225_v63 = vld [vmem:[%s9387_s1 + $0x6e0] sm:$0xff] }
  0xb4   :  { %4199 = vmatpush.bf16.msrb.mxu3 %v7192_v52  ;;  %4094 = vmatmul.bf16.gmra.mxu1 %v5150_v60  ;;  %v7226_v52 = vld [vmem:[%s9387_s1 + $0x6e8] sm:$0xff]  ;;  %v7201_v60 = vld [vmem:[%s9387_s1 + $0x620] sm:$0xff] }
  0xb5   :  { %4161 = vmatpush.bf16.msrb.mxu1 %v7176_v53  ;;  %v3810_v8 = vpop.f32.mrf.mxu2  ;;  %v7210_v53 = vld [vmem:[%s9387_s1 + $0x668] sm:$0xff] }
  0xb6   :  { %4143 = vmatpush.bf16.msrb.mxu0 %v7167_v0  ;;  %v3811_v11 = vadd.f32 %v3810_v8, %v3792_v5  ;;  %v3829_v12 = vpop.f32.mrf.mxu3  ;;  %v3774_v13 = vpop.f32.mrf.mxu0  ;;  %v5161_v0 = vld [vmem:[%s9388_s0 + $0x1d8] sm:$0xf]  ;;  %v6991_v5 = vld [vmem:[%s9388_s0 + $0x2a0] sm:$0xf0] }
  0xb7   :  { %4181 = vmatpush.bf16.msrb.mxu2 %v7183_v1  ;;  %v3775_v16 = vadd.f32 %v8148_v3, %v3774_v13  ;;  %v4965_v3 = vld [vmem:[%s9388_s0 + $0x50] sm:$0xf]  ;;  %v7200_v8 = vld [vmem:[%s9387_s1 + $0x618] sm:$0xff] }
  0xb8   :  { %4200 = vmatpush.bf16.msrb.mxu3 %v7191_v2  ;;  %v8283_v15 = vadd.f32 %v3829_v12, %v3811_v11  ;;  %v4966_v37 = vor.u32 %v6941_v21, %v4965_v3  ;;  %v6990_v2 = vld [vmem:[%s9388_s0 + $0x298] sm:$0xf0]  ;;  %v5163_v11 = vld [vmem:[%s9388_s0 + $0x29c] sm:$0xf0] }
  0xb9   :  { %4162 = vmatpush.bf16.msrb.mxu1 %v7175_v4  ;;  %v3793_v17 = vpop.f32.mrf.mxu1  ;;  %v5169_v4 = vld [vmem:[%s9388_s0 + $0x1e0] sm:$0xf]  ;;  %v7224_v13 = vld [vmem:[%s9387_s1 + $0x6d8] sm:$0xff] }
  0xba   :  { %4144 = vmatpush.bf16.msrb.mxu0 %v7166_v6  ;;  %v3794_v23 = vadd.f32 %v3793_v17, %v3775_v16  ;;  %v6967_v6 = vld [vmem:[%s9388_s0 + $0x1e4] sm:$0xf] }
  0xbb   :  { %4182 = vmatpush.bf16.msrb.mxu2 %v7182_v7  ;;  %v5171_v7 = vld [vmem:[%s9388_s0 + $0x2a4] sm:$0xf0] }
  0xbc   :  { %4201 = vmatpush.bf16.msrb.mxu3 %v7190_v9  ;;  %v7216_v9 = vld [vmem:[%s9387_s1 + $0x698] sm:$0xff]  ;;  %v5174_v3 = vor.u32 %v6967_v6, %v5171_v7  ;;  %v7235_v6 = vld [vmem:[%s9387_s1 + $0x730] sm:$0xff] }
  0xbd   :  { %4163 = vmatpush.bf16.msrb.mxu1 %v7174_v10  ;;  %v3812_v34 = vpop.f32.mrf.mxu2  ;;  %v6966_v10 = vld [vmem:[%s9388_s0 + $0x1dc] sm:$0xf]  ;;  %v7251_v7 = vld [vmem:[%s9387_s1 + $0x7b0] sm:$0xff] }
  0xbe   :  { %4145 = vmatpush.bf16.msrb.mxu0 %v7165_v14  ;;  %v3813_v35 = vadd.f32 %v3812_v34, %v3794_v23  ;;  %v3831_v36 = vpop.f32.mrf.mxu3  ;;  %v3843_v39 = vpop.f32.mrf.mxu0  ;;  %v7208_v14 = vld [vmem:[%s9387_s1 + $0x658] sm:$0xff]  ;;  %v5166_v21 = vor.u32 %v6966_v10, %v5163_v11  ;;  %v7206_v34 = vld [vmem:[%s9387_s1 + $0x648] sm:$0xff] }
  0xbf   :  { %4183 = vmatpush.bf16.msrb.mxu2 %v7181_v18  ;;  %v3844_v43 = vadd.f32 %v3843_v39, %v8202_v33  ;;  %v7202_v33 = vld [vmem:[%s9387_s1 + $0x628] sm:$0xff]  ;;  %v5162_v18 = vor.u32 %v6990_v2, %v5161_v0 }
  0xc0   :  { %4202 = vmatpush.bf16.msrb.mxu3 %v7189_v19  ;;  %v8331_v42 = vadd.f32 %v3831_v36, %v3813_v35  ;;  %v5170_v19 = vor.u32 %v6991_v5, %v5169_v4  ;;  %v7250_v11 = vld [vmem:[%s9387_s1 + $0x7a8] sm:$0xff] }
  0xc1   :  { %4164 = vmatpush.bf16.msrb.mxu1 %v7173_v20  ;;  %v3862_v44 = vpop.f32.mrf.mxu1  ;;  %4146 = vmatmul.bf16.vlgmr.msrb.gmra.mxu0 %v4966_v37 }
  0xc2   :  { %4214 = vmatpush.bf16.msra.mxu0 %v7204_v25  ;;  %v3863_v49 = vadd.f32 %v3862_v44, %v3844_v43  ;;  %4184 = vmatmul.bf16.vlgmr.msrb.gmra.mxu2 %v4974_v38  ;;  %v7199_v25 = vld [vmem:[%s9387_s1 + $0x610] sm:$0xff]  ;;  %v7197_v38 = vld [vmem:[%s9387_s1 + $0x600] sm:$0xff] }
  0xc3   :  { %4252 = vmatpush.bf16.msra.mxu2 %v7220_v26  ;;  %4203 = vmatmul.bf16.vlgmr.msrb.gmra.mxu3 %v4978_v40  ;;  %v7215_v26 = vld [vmem:[%s9387_s1 + $0x690] sm:$0xff]  ;;  %v7213_v43 = vld [vmem:[%s9387_s1 + $0x680] sm:$0xff] }
  0xc4   :  { %4271 = vmatpush.bf16.msra.mxu3 %v7228_v28  ;;  %4165 = vmatmul.bf16.vlgmr.msrb.gmra.mxu1 %v4970_v41  ;;  %v7221_v44 = vld [vmem:[%s9387_s1 + $0x6c0] sm:$0xff] }
  0xc5   :  { %4233 = vmatpush.bf16.msra.mxu1 %v7212_v29  ;;  %v3881_v51 = vpop.f32.mrf.mxu2  ;;  %v7198_v29 = vld [vmem:[%s9387_s1 + $0x608] sm:$0xff] }
  0xc6   :  { %4215 = vmatpush.bf16.msra.mxu0 %v7203_v45  ;;  %v3882_v54 = vadd.f32 %v3881_v51, %v3863_v49  ;;  %v3900_v55 = vpop.f32.mrf.mxu3  ;;  %v3845_v56 = vpop.f32.mrf.mxu0  ;;  %v7205_v45 = vld [vmem:[%s9387_s1 + $0x640] sm:$0xff]  ;;  %v6944_v49 = vld [vmem:[%s9388_s0 + $0x128] sm:$0xf0] }
  0xc7   :  { %4253 = vmatpush.bf16.msra.mxu2 %v7219_v46  ;;  %v3846_v58 = vadd.f32 %v3845_v56, %v8253_v61  ;;  %v7209_v61 = vld [vmem:[%s9387_s1 + $0x660] sm:$0xff]  ;;  %v6920_v51 = vld [vmem:[%s9388_s0 + $0x6c] sm:$0xf]  ;;  %v4983_v56 = vld [vmem:[%s9388_s0 + $0x124] sm:$0xf0] }
  0xc8   :  { %4272 = vmatpush.bf16.msra.mxu3 %v7227_v47  ;;  %v8358_v57 = vadd.f32 %v3900_v55, %v3882_v54  ;;  %v6943_v46 = vld [vmem:[%s9388_s0 + $0x120] sm:$0xf0]  ;;  %v4989_v47 = vld [vmem:[%s9388_s0 + $0x68] sm:$0xf]  ;;  %v4991_v54 = vld [vmem:[%s9388_s0 + $0x12c] sm:$0xf0] }
  0xc9   :  { %4234 = vmatpush.bf16.msra.mxu1 %v7211_v48  ;;  %v3864_v59 = vpop.f32.mrf.mxu1  ;;  %v6919_v55 = vld [vmem:[%s9388_s0 + $0x64] sm:$0xf]  ;;  %v4994_v0 = vor.u32 %v6920_v51, %v4991_v54  ;;  %v7255_v51 = vld [vmem:[%s9387_s1 + $0x7d0] sm:$0xff]  ;;  %v7246_v54 = vld [vmem:[%s9387_s1 + $0x788] sm:$0xff] }
  0xca   :  { %4216 = vmatpush.bf16.msra.mxu0 %v7202_v33  ;;  %v3865_v1 = vadd.f32 %v3864_v59, %v3846_v58  ;;  %v7236_v33 = vld [vmem:[%s9387_s1 + $0x738] sm:$0xff] }
  0xcb   :  { %4254 = vmatpush.bf16.msra.mxu2 %v7218_v50  ;;  %v7252_v50 = vld [vmem:[%s9387_s1 + $0x7b8] sm:$0xff] }
  0xcc   :  { %4273 = vmatpush.bf16.msra.mxu3 %v7226_v52  ;;  %v7260_v52 = vld [vmem:[%s9387_s1 + $0x7f8] sm:$0xff] }
  0xcd   :  { %4235 = vmatpush.bf16.msra.mxu1 %v7210_v53  ;;  %v3883_v12 = vpop.f32.mrf.mxu2  ;;  %v7244_v53 = vld [vmem:[%s9387_s1 + $0x778] sm:$0xff] }
  0xce   :  { %4217 = vmatpush.bf16.msra.mxu0 %v7201_v60  ;;  %v3884_v16 = vadd.f32 %v3883_v12, %v3865_v1  ;;  %v3902_v17 = vpop.f32.mrf.mxu3  ;;  %v3848_v20 = vpop.f32.mrf.mxu0  ;;  %v4986_v1 = vor.u32 %v6919_v55, %v4983_v56  ;;  %v7254_v56 = vld [vmem:[%s9387_s1 + $0x7c8] sm:$0xff] }
  0xcf   :  { %4255 = vmatpush.bf16.msra.mxu2 %v7217_v62  ;;  %v3849_v23 = vadd.f32 %v3848_v20, %v8283_v15  ;;  %v7207_v15 = vld [vmem:[%s9387_s1 + $0x650] sm:$0xff] }
  0xd0   :  { %4274 = vmatpush.bf16.msra.mxu3 %v7225_v63  ;;  %v8409_v22 = vadd.f32 %v3902_v17, %v3884_v16  ;;  %v4990_v63 = vor.u32 %v6944_v49, %v4989_v47 }
  0xd1   :  { %4236 = vmatpush.bf16.msra.mxu1 %v7209_v61  ;;  %v3867_v24 = vpop.f32.mrf.mxu1  ;;  %4151 = vmatmul.bf16.gmra.mxu0 %v5162_v18 }
  0xd2   :  { %4218 = vmatpush.bf16.msra.mxu0 %v7200_v8  ;;  %v3868_v28 = vadd.f32 %v3867_v24, %v3849_v23  ;;  %4189 = vmatmul.bf16.gmra.mxu2 %v5170_v19  ;;  %v7259_v8 = vld [vmem:[%s9387_s1 + $0x7f0] sm:$0xff]  ;;  %v7249_v23 = vld [vmem:[%s9387_s1 + $0x7a0] sm:$0xff] }
  0xd3   :  { %4256 = vmatpush.bf16.msra.mxu2 %v7216_v9  ;;  %4208 = vmatmul.bf16.gmra.mxu3 %v5174_v3  ;;  %v7243_v9 = vld [vmem:[%s9387_s1 + $0x770] sm:$0xff]  ;;  %v7257_v24 = vld [vmem:[%s9387_s1 + $0x7e0] sm:$0xff] }
  0xd4   :  { %4275 = vmatpush.bf16.msra.mxu3 %v7224_v13  ;;  %4170 = vmatmul.bf16.gmra.mxu1 %v5166_v21  ;;  %v7258_v13 = vld [vmem:[%s9387_s1 + $0x7e8] sm:$0xff]  ;;  %v7233_v21 = vld [vmem:[%s9387_s1 + $0x720] sm:$0xff] }
  0xd5   :  { %4237 = vmatpush.bf16.msra.mxu1 %v7208_v14  ;;  %v3886_v31 = vpop.f32.mrf.mxu2  ;;  %v7242_v14 = vld [vmem:[%s9387_s1 + $0x768] sm:$0xff] }
  0xd6   :  { %4219 = vmatpush.bf16.msra.mxu0 %v7199_v25  ;;  %v3887_v35 = vadd.f32 %v3886_v31, %v3868_v28  ;;  %v3905_v36 = vpop.f32.mrf.mxu3  ;;  %v3850_v37 = vpop.f32.mrf.mxu0  ;;  %v5177_v25 = vld [vmem:[%s9388_s0 + $0x1e8] sm:$0xf]  ;;  %v6993_v28 = vld [vmem:[%s9388_s0 + $0x2b0] sm:$0xf0]  ;;  %v7232_v31 = vld [vmem:[%s9387_s1 + $0x718] sm:$0xff] }
  0xd7   :  { %4257 = vmatpush.bf16.msra.mxu2 %v7215_v26  ;;  %v3851_v40 = vadd.f32 %v3850_v37, %v8331_v42  ;;  %v4981_v42 = vld [vmem:[%s9388_s0 + $0x60] sm:$0xf]  ;;  %v7256_v37 = vld [vmem:[%s9387_s1 + $0x7d8] sm:$0xff] }
  0xd8   :  { %4276 = vmatpush.bf16.msra.mxu3 %v7223_v27  ;;  %v8439_v39 = vadd.f32 %v3905_v36, %v3887_v35  ;;  %v4982_v62 = vor.u32 %v6943_v46, %v4981_v42  ;;  %v6992_v27 = vld [vmem:[%s9388_s0 + $0x2a8] sm:$0xf0]  ;;  %v5179_v35 = vld [vmem:[%s9388_s0 + $0x2ac] sm:$0xf0] }
  0xd9   :  { %4238 = vmatpush.bf16.msra.mxu1 %v7207_v15  ;;  %v3869_v41 = vpop.f32.mrf.mxu1  ;;  %v5185_v15 = vld [vmem:[%s9388_s0 + $0x1f0] sm:$0xf] }
  0xda   :  { %4220 = vmatpush.bf16.msra.mxu0 %v7198_v29  ;;  %v3870_v48 = vadd.f32 %v3869_v41, %v3851_v40  ;;  %v6969_v29 = vld [vmem:[%s9388_s0 + $0x1f4] sm:$0xf] }
  0xdb   :  { %4258 = vmatpush.bf16.msra.mxu2 %v7214_v30  ;;  %v5187_v30 = vld [vmem:[%s9388_s0 + $0x2b4] sm:$0xf0] }
  0xdc   :  { %4277 = vmatpush.bf16.msra.mxu3 %v7222_v32  ;;  %v7248_v32 = vld [vmem:[%s9387_s1 + $0x798] sm:$0xff]  ;;  %v5190_v42 = vor.u32 %v6969_v29, %v5187_v30  ;;  %v7267_v29 = vld [vmem:[%s9387_s1 + $0x830] sm:$0xff] }
  0xdd   :  { %4239 = vmatpush.bf16.msra.mxu1 %v7206_v34  ;;  %v3888_v58 = vpop.f32.mrf.mxu2  ;;  %v6968_v34 = vld [vmem:[%s9388_s0 + $0x1ec] sm:$0xf]  ;;  %v7283_v30 = vld [vmem:[%s9387_s1 + $0x8b0] sm:$0xff] }
  0xde   :  { %4221 = vmatpush.bf16.msra.mxu0 %v7197_v38  ;;  %v3889_v59 = vadd.f32 %v3888_v58, %v3870_v48  ;;  %v3907_v60 = vpop.f32.mrf.mxu3  ;;  %v3919_v61 = vpop.f32.mrf.mxu0  ;;  %v7240_v38 = vld [vmem:[%s9387_s1 + $0x758] sm:$0xff]  ;;  %v5182_v46 = vor.u32 %v6968_v34, %v5179_v35  ;;  %v7238_v58 = vld [vmem:[%s9387_s1 + $0x748] sm:$0xff] }
  0xdf   :  { %4259 = vmatpush.bf16.msra.mxu2 %v7213_v43  ;;  %v3920_v4 = vadd.f32 %v3919_v61, %v8358_v57  ;;  %v7234_v57 = vld [vmem:[%s9387_s1 + $0x728] sm:$0xff]  ;;  %v5178_v43 = vor.u32 %v6992_v27, %v5177_v25 }
  0xe0   :  { %4278 = vmatpush.bf16.msra.mxu3 %v7221_v44  ;;  %v8487_v2 = vadd.f32 %v3907_v60, %v3889_v59  ;;  %v5186_v44 = vor.u32 %v6993_v28, %v5185_v15  ;;  %v7282_v35 = vld [vmem:[%s9387_s1 + $0x8a8] sm:$0xff] }
  0xe1   :  { %4240 = vmatpush.bf16.msra.mxu1 %v7205_v45  ;;  %v3938_v5 = vpop.f32.mrf.mxu1  ;;  %4222 = vmatmul.bf16.vlgmr.msra.gmra.mxu0 %v4982_v62 }
  0xe2   :  { %4290 = vmatpush.bf16.msrb.mxu0 %v7236_v33  ;;  %v3939_v10 = vadd.f32 %v3938_v5, %v3920_v4  ;;  %4260 = vmatmul.bf16.vlgmr.msra.gmra.mxu2 %v4990_v63  ;;  %v7231_v33 = vld [vmem:[%s9387_s1 + $0x710] sm:$0xff]  ;;  %v7229_v63 = vld [vmem:[%s9387_s1 + $0x700] sm:$0xff] }
  0xe3   :  { %4328 = vmatpush.bf16.msrb.mxu2 %v7252_v50  ;;  %4279 = vmatmul.bf16.vlgmr.msra.gmra.mxu3 %v4994_v0  ;;  %v7247_v50 = vld [vmem:[%s9387_s1 + $0x790] sm:$0xff]  ;;  %v7245_v4 = vld [vmem:[%s9387_s1 + $0x780] sm:$0xff] }
  0xe4   :  { %4347 = vmatpush.bf16.msrb.mxu3 %v7260_v52  ;;  %4241 = vmatmul.bf16.vlgmr.msra.gmra.mxu1 %v4986_v1  ;;  %v7253_v5 = vld [vmem:[%s9387_s1 + $0x7c0] sm:$0xff] }
  0xe5   :  { %4309 = vmatpush.bf16.msrb.mxu1 %v7244_v53  ;;  %v3957_v12 = vpop.f32.mrf.mxu2  ;;  %v7230_v53 = vld [vmem:[%s9387_s1 + $0x708] sm:$0xff] }
  0xe6   :  { %4291 = vmatpush.bf16.msrb.mxu0 %v7235_v6  ;;  %v3958_v16 = vadd.f32 %v3957_v12, %v3939_v10  ;;  %v3976_v17 = vpop.f32.mrf.mxu3  ;;  %v3921_v18 = vpop.f32.mrf.mxu0  ;;  %v7237_v6 = vld [vmem:[%s9387_s1 + $0x740] sm:$0xff]  ;;  %v6946_v10 = vld [vmem:[%s9388_s0 + $0x138] sm:$0xf0] }
  0xe7   :  { %4329 = vmatpush.bf16.msrb.mxu2 %v7251_v7  ;;  %v3922_v20 = vadd.f32 %v3921_v18, %v8409_v22  ;;  %v7241_v22 = vld [vmem:[%s9387_s1 + $0x760] sm:$0xff]  ;;  %v6945_v7 = vld [vmem:[%s9388_s0 + $0x130] sm:$0xf0]  ;;  %v6922_v12 = vld [vmem:[%s9388_s0 + $0x7c] sm:$0xf] }
  0xe8   :  { %4348 = vmatpush.bf16.msrb.mxu3 %v7259_v8  ;;  %v8514_v19 = vadd.f32 %v3976_v17, %v3958_v16  ;;  %v5005_v8 = vld [vmem:[%s9388_s0 + $0x78] sm:$0xf]  ;;  %v5007_v16 = vld [vmem:[%s9388_s0 + $0x13c] sm:$0xf0]  ;;  %v6921_v17 = vld [vmem:[%s9388_s0 + $0x74] sm:$0xf] }
  0xe9   :  { %4310 = vmatpush.bf16.msrb.mxu1 %v7243_v9  ;;  %v3940_v3 = vpop.f32.mrf.mxu1  ;;  %v4999_v18 = vld [vmem:[%s9388_s0 + $0x134] sm:$0xf0]  ;;  %v5010_v25 = vor.u32 %v6922_v12, %v5007_v16  ;;  %v7287_v12 = vld [vmem:[%s9387_s1 + $0x8d0] sm:$0xff]  ;;  %v7278_v16 = vld [vmem:[%s9387_s1 + $0x888] sm:$0xff] }
  0xea   :  { %4292 = vmatpush.bf16.msrb.mxu0 %v7234_v57  ;;  %v3941_v26 = vadd.f32 %v3940_v3, %v3922_v20  ;;  %v7268_v57 = vld [vmem:[%s9387_s1 + $0x838] sm:$0xff] }
  0xeb   :  { %4330 = vmatpush.bf16.msrb.mxu2 %v7250_v11  ;;  %v7284_v11 = vld [vmem:[%s9387_s1 + $0x8b8] sm:$0xff] }
  0xec   :  { %4349 = vmatpush.bf16.msrb.mxu3 %v7258_v13  ;;  %v7292_v13 = vld [vmem:[%s9387_s1 + $0x8f8] sm:$0xff] }
  0xed   :  { %4311 = vmatpush.bf16.msrb.mxu1 %v7242_v14  ;;  %v3959_v36 = vpop.f32.mrf.mxu2  ;;  %v7276_v14 = vld [vmem:[%s9387_s1 + $0x878] sm:$0xff] }
  0xee   :  { %4293 = vmatpush.bf16.msrb.mxu0 %v7233_v21  ;;  %v3960_v40 = vadd.f32 %v3959_v36, %v3941_v26  ;;  %v3978_v41 = vpop.f32.mrf.mxu3  ;;  %v3924_v45 = vpop.f32.mrf.mxu0  ;;  %v5002_v26 = vor.u32 %v6921_v17, %v4999_v18  ;;  %v7286_v18 = vld [vmem:[%s9387_s1 + $0x8c8] sm:$0xff] }
  0xef   :  { %4331 = vmatpush.bf16.msrb.mxu2 %v7249_v23  ;;  %v3925_v48 = vadd.f32 %v3924_v45, %v8439_v39  ;;  %v7239_v39 = vld [vmem:[%s9387_s1 + $0x750] sm:$0xff] }
  0xf0   :  { %4350 = vmatpush.bf16.msrb.mxu3 %v7257_v24  ;;  %v8565_v47 = vadd.f32 %v3978_v41, %v3960_v40  ;;  %v5006_v24 = vor.u32 %v6946_v10, %v5005_v8 }
  0xf1   :  { %4312 = vmatpush.bf16.msrb.mxu1 %v7241_v22  ;;  %v3943_v49 = vpop.f32.mrf.mxu1  ;;  %4227 = vmatmul.bf16.gmra.mxu0 %v5178_v43 }
  0xf2   :  { %4294 = vmatpush.bf16.msrb.mxu0 %v7232_v31  ;;  %v3944_v52 = vadd.f32 %v3943_v49, %v3925_v48  ;;  %4265 = vmatmul.bf16.gmra.mxu2 %v5186_v44  ;;  %v7291_v31 = vld [vmem:[%s9387_s1 + $0x8f0] sm:$0xff]  ;;  %v7281_v48 = vld [vmem:[%s9387_s1 + $0x8a0] sm:$0xff] }
  0xf3   :  { %4332 = vmatpush.bf16.msrb.mxu2 %v7248_v32  ;;  %4284 = vmatmul.bf16.gmra.mxu3 %v5190_v42  ;;  %v7275_v32 = vld [vmem:[%s9387_s1 + $0x870] sm:$0xff]  ;;  %v7289_v49 = vld [vmem:[%s9387_s1 + $0x8e0] sm:$0xff] }
  0xf4   :  { %4351 = vmatpush.bf16.msrb.mxu3 %v7256_v37  ;;  %4246 = vmatmul.bf16.gmra.mxu1 %v5182_v46  ;;  %v7290_v37 = vld [vmem:[%s9387_s1 + $0x8e8] sm:$0xff]  ;;  %v7265_v46 = vld [vmem:[%s9387_s1 + $0x820] sm:$0xff] }
  0xf5   :  { %4313 = vmatpush.bf16.msrb.mxu1 %v7240_v38  ;;  %v3962_v55 = vpop.f32.mrf.mxu2  ;;  %v7274_v38 = vld [vmem:[%s9387_s1 + $0x868] sm:$0xff] }
  0xf6   :  { %4295 = vmatpush.bf16.msrb.mxu0 %v7231_v33  ;;  %v3963_v59 = vadd.f32 %v3962_v55, %v3944_v52  ;;  %v3981_v60 = vpop.f32.mrf.mxu3  ;;  %v3926_v62 = vpop.f32.mrf.mxu0  ;;  %v5193_v33 = vld [vmem:[%s9388_s0 + $0x1f8] sm:$0xf]  ;;  %v6995_v52 = vld [vmem:[%s9388_s0 + $0x2c0] sm:$0xf0] }
  0xf7   :  { %4333 = vmatpush.bf16.msrb.mxu2 %v7247_v50  ;;  %v3927_v0 = vadd.f32 %v3926_v62, %v8487_v2  ;;  %v4997_v2 = vld [vmem:[%s9388_s0 + $0x70] sm:$0xf]  ;;  %v7264_v55 = vld [vmem:[%s9387_s1 + $0x818] sm:$0xff] }
  0xf8   :  { %4352 = vmatpush.bf16.msrb.mxu3 %v7255_v51  ;;  %v8595_v61 = vadd.f32 %v3981_v60, %v3963_v59  ;;  %v4998_v23 = vor.u32 %v6945_v7, %v4997_v2  ;;  %v6994_v51 = vld [vmem:[%s9388_s0 + $0x2b8] sm:$0xf0]  ;;  %v5195_v59 = vld [vmem:[%s9388_s0 + $0x2bc] sm:$0xf0] }
  0xf9   :  { %4314 = vmatpush.bf16.msrb.mxu1 %v7239_v39  ;;  %v3945_v1 = vpop.f32.mrf.mxu1  ;;  %v5201_v39 = vld [vmem:[%s9388_s0 + $0x200] sm:$0xf]  ;;  %v7288_v62 = vld [vmem:[%s9387_s1 + $0x8d8] sm:$0xff] }
  0xfa   :  { %4296 = vmatpush.bf16.msrb.mxu0 %v7230_v53  ;;  %v3946_v9 = vadd.f32 %v3945_v1, %v3927_v0  ;;  %v6971_v53 = vld [vmem:[%s9388_s0 + $0x204] sm:$0xf] }
  0xfb   :  { %4334 = vmatpush.bf16.msrb.mxu2 %v7246_v54  ;;  %v5203_v54 = vld [vmem:[%s9388_s0 + $0x2c4] sm:$0xf0] }
  0xfc   :  { %4353 = vmatpush.bf16.msrb.mxu3 %v7254_v56  ;;  %v7280_v56 = vld [vmem:[%s9387_s1 + $0x898] sm:$0xff]  ;;  %v5206_v2 = vor.u32 %v6971_v53, %v5203_v54  ;;  %v7299_v53 = vld [vmem:[%s9387_s1 + $0x930] sm:$0xff] }
  0xfd   :  { %4315 = vmatpush.bf16.msrb.mxu1 %v7238_v58  ;;  %v3964_v20 = vpop.f32.mrf.mxu2  ;;  %v6970_v58 = vld [vmem:[%s9388_s0 + $0x1fc] sm:$0xf]  ;;  %v7315_v54 = vld [vmem:[%s9387_s1 + $0x9b0] sm:$0xff] }
  0xfe   :  { %4297 = vmatpush.bf16.msrb.mxu0 %v7229_v63  ;;  %v3965_v3 = vadd.f32 %v3964_v20, %v3946_v9  ;;  %v3983_v21 = vpop.f32.mrf.mxu3  ;;  %v3995_v22 = vpop.f32.mrf.mxu0  ;;  %v7272_v63 = vld [vmem:[%s9387_s1 + $0x858] sm:$0xff]  ;;  %v5198_v7 = vor.u32 %v6970_v58, %v5195_v59  ;;  %v7270_v20 = vld [vmem:[%s9387_s1 + $0x848] sm:$0xff] }
  0xff   :  { %4335 = vmatpush.bf16.msrb.mxu2 %v7245_v4  ;;  %v3996_v15 = vadd.f32 %v3995_v22, %v8514_v19  ;;  %v7266_v19 = vld [vmem:[%s9387_s1 + $0x828] sm:$0xff]  ;;  %v5194_v4 = vor.u32 %v6994_v51, %v5193_v33 }
 0x100   :  { %4354 = vmatpush.bf16.msrb.mxu3 %v7253_v5  ;;  %v8643_v27 = vadd.f32 %v3983_v21, %v3965_v3  ;;  %v5202_v5 = vor.u32 %v6995_v52, %v5201_v39  ;;  %v7314_v59 = vld [vmem:[%s9387_s1 + $0x9a8] sm:$0xff] }
 0x101   :  { %4316 = vmatpush.bf16.msrb.mxu1 %v7237_v6  ;;  %v4014_v28 = vpop.f32.mrf.mxu1  ;;  %4298 = vmatmul.bf16.vlgmr.msrb.gmra.mxu0 %v4998_v23 }
 0x102   :  { %4366 = vmatpush.bf16.msra.mxu0 %v7268_v57  ;;  %v4015_v34 = vadd.f32 %v4014_v28, %v3996_v15  ;;  %4336 = vmatmul.bf16.vlgmr.msrb.gmra.mxu2 %v5006_v24  ;;  %v7263_v57 = vld [vmem:[%s9387_s1 + $0x810] sm:$0xff]  ;;  %v7261_v24 = vld [vmem:[%s9387_s1 + $0x800] sm:$0xff] }
 0x103   :  { %4404 = vmatpush.bf16.msra.mxu2 %v7284_v11  ;;  %4355 = vmatmul.bf16.vlgmr.msrb.gmra.mxu3 %v5010_v25  ;;  %v7279_v11 = vld [vmem:[%s9387_s1 + $0x890] sm:$0xff]  ;;  %v7277_v15 = vld [vmem:[%s9387_s1 + $0x880] sm:$0xff] }
 0x104   :  { %4423 = vmatpush.bf16.msra.mxu3 %v7292_v13  ;;  %4317 = vmatmul.bf16.vlgmr.msrb.gmra.mxu1 %v5002_v26  ;;  %v7285_v28 = vld [vmem:[%s9387_s1 + $0x8c0] sm:$0xff] }
 0x105   :  { %4385 = vmatpush.bf16.msra.mxu1 %v7276_v14  ;;  %v4033_v36 = vpop.f32.mrf.mxu2  ;;  %v7262_v14 = vld [vmem:[%s9387_s1 + $0x808] sm:$0xff] }
 0x106   :  { %4367 = vmatpush.bf16.msra.mxu0 %v7267_v29  ;;  %v4034_v40 = vadd.f32 %v4033_v36, %v4015_v34  ;;  %v4052_v41 = vpop.f32.mrf.mxu3  ;;  %v3997_v43 = vpop.f32.mrf.mxu0  ;;  %v7269_v29 = vld [vmem:[%s9387_s1 + $0x840] sm:$0xff]  ;;  %v6948_v34 = vld [vmem:[%s9388_s0 + $0x148] sm:$0xf0] }
 0x107   :  { %4405 = vmatpush.bf16.msra.mxu2 %v7283_v30  ;;  %v3998_v45 = vadd.f32 %v3997_v43, %v8565_v47  ;;  %v7273_v47 = vld [vmem:[%s9387_s1 + $0x860] sm:$0xff]  ;;  %v6924_v36 = vld [vmem:[%s9388_s0 + $0x8c] sm:$0xf]  ;;  %v5015_v43 = vld [vmem:[%s9388_s0 + $0x144] sm:$0xf0] }
 0x108   :  { %4424 = vmatpush.bf16.msra.mxu3 %v7291_v31  ;;  %v8670_v44 = vadd.f32 %v4052_v41, %v4034_v40  ;;  %v6947_v30 = vld [vmem:[%s9388_s0 + $0x140] sm:$0xf0]  ;;  %v5021_v31 = vld [vmem:[%s9388_s0 + $0x88] sm:$0xf]  ;;  %v5023_v40 = vld [vmem:[%s9388_s0 + $0x14c] sm:$0xf0] }
 0x109   :  { %4386 = vmatpush.bf16.msra.mxu1 %v7275_v32  ;;  %v4016_v42 = vpop.f32.mrf.mxu1  ;;  %v6923_v41 = vld [vmem:[%s9388_s0 + $0x84] sm:$0xf]  ;;  %v5026_v33 = vor.u32 %v6924_v36, %v5023_v40  ;;  %v7319_v36 = vld [vmem:[%s9387_s1 + $0x9d0] sm:$0xff]  ;;  %v7310_v40 = vld [vmem:[%s9387_s1 + $0x988] sm:$0xff] }
 0x10a   :  { %4368 = vmatpush.bf16.msra.mxu0 %v7266_v19  ;;  %v4017_v50 = vadd.f32 %v4016_v42, %v3998_v45  ;;  %v7300_v19 = vld [vmem:[%s9387_s1 + $0x938] sm:$0xff] }
 0x10b   :  { %4406 = vmatpush.bf16.msra.mxu2 %v7282_v35  ;;  %v7316_v35 = vld [vmem:[%s9387_s1 + $0x9b8] sm:$0xff] }
 0x10c   :  { %4425 = vmatpush.bf16.msra.mxu3 %v7290_v37  ;;  %v7324_v37 = vld [vmem:[%s9387_s1 + $0x9f8] sm:$0xff] }
 0x10d   :  { %4387 = vmatpush.bf16.msra.mxu1 %v7274_v38  ;;  %v4035_v60 = vpop.f32.mrf.mxu2  ;;  %v7308_v38 = vld [vmem:[%s9387_s1 + $0x978] sm:$0xff] }
 0x10e   :  { %4369 = vmatpush.bf16.msra.mxu0 %v7265_v46  ;;  %v4036_v0 = vadd.f32 %v4035_v60, %v4017_v50  ;;  %v4054_v1 = vpop.f32.mrf.mxu3  ;;  %v4000_v6 = vpop.f32.mrf.mxu0  ;;  %v5018_v50 = vor.u32 %v6923_v41, %v5015_v43  ;;  %v7318_v43 = vld [vmem:[%s9387_s1 + $0x9c8] sm:$0xff] }
 0x10f   :  { %4407 = vmatpush.bf16.msra.mxu2 %v7281_v48  ;;  %v4001_v9 = vadd.f32 %v4000_v6, %v8595_v61  ;;  %v7271_v61 = vld [vmem:[%s9387_s1 + $0x850] sm:$0xff] }
 0x110   :  { %4426 = vmatpush.bf16.msra.mxu3 %v7289_v49  ;;  %v8721_v8 = vadd.f32 %v4054_v1, %v4036_v0  ;;  %v5022_v49 = vor.u32 %v6948_v34, %v5021_v31 }
 0x111   :  { %4388 = vmatpush.bf16.msra.mxu1 %v7273_v47  ;;  %v4019_v10 = vpop.f32.mrf.mxu1  ;;  %4303 = vmatmul.bf16.gmra.mxu0 %v5194_v4 }
 0x112   :  { %4370 = vmatpush.bf16.msra.mxu0 %v7264_v55  ;;  %v4020_v13 = vadd.f32 %v4019_v10, %v4001_v9  ;;  %4341 = vmatmul.bf16.gmra.mxu2 %v5202_v5  ;;  %v7323_v55 = vld [vmem:[%s9387_s1 + $0x9f0] sm:$0xff]  ;;  %v7313_v9 = vld [vmem:[%s9387_s1 + $0x9a0] sm:$0xff] }
 0x113   :  { %4408 = vmatpush.bf16.msra.mxu2 %v7280_v56  ;;  %4360 = vmatmul.bf16.gmra.mxu3 %v5206_v2  ;;  %v7307_v56 = vld [vmem:[%s9387_s1 + $0x970] sm:$0xff]  ;;  %v7321_v10 = vld [vmem:[%s9387_s1 + $0x9e0] sm:$0xff] }
 0x114   :  { %4427 = vmatpush.bf16.msra.mxu3 %v7288_v62  ;;  %4322 = vmatmul.bf16.gmra.mxu1 %v5198_v7  ;;  %v7322_v62 = vld [vmem:[%s9387_s1 + $0x9e8] sm:$0xff]  ;;  %v7297_v7 = vld [vmem:[%s9387_s1 + $0x920] sm:$0xff] }
 0x115   :  { %4389 = vmatpush.bf16.msra.mxu1 %v7272_v63  ;;  %v4038_v17 = vpop.f32.mrf.mxu2  ;;  %v7306_v63 = vld [vmem:[%s9387_s1 + $0x968] sm:$0xff] }
 0x116   :  { %4371 = vmatpush.bf16.msra.mxu0 %v7263_v57  ;;  %v4039_v3 = vadd.f32 %v4038_v17, %v4020_v13  ;;  %v4057_v21 = vpop.f32.mrf.mxu3  ;;  %v4002_v23 = vpop.f32.mrf.mxu0  ;;  %v5209_v57 = vld [vmem:[%s9388_s0 + $0x208] sm:$0xf]  ;;  %v6997_v13 = vld [vmem:[%s9388_s0 + $0x2d0] sm:$0xf0]  ;;  %v7296_v17 = vld [vmem:[%s9387_s1 + $0x918] sm:$0xff] }
 0x117   :  { %4409 = vmatpush.bf16.msra.mxu2 %v7279_v11  ;;  %v4003_v25 = vadd.f32 %v4002_v23, %v8643_v27  ;;  %v5013_v27 = vld [vmem:[%s9388_s0 + $0x80] sm:$0xf]  ;;  %v7320_v23 = vld [vmem:[%s9387_s1 + $0x9d8] sm:$0xff] }
 0x118   :  { %4428 = vmatpush.bf16.msra.mxu3 %v7287_v12  ;;  %v8751_v22 = vadd.f32 %v4057_v21, %v4039_v3  ;;  %v5014_v48 = vor.u32 %v6947_v30, %v5013_v27  ;;  %v6996_v12 = vld [vmem:[%s9388_s0 + $0x2c8] sm:$0xf0]  ;;  %v5211_v3 = vld [vmem:[%s9388_s0 + $0x2cc] sm:$0xf0] }
 0x119   :  { %4390 = vmatpush.bf16.msra.mxu1 %v7271_v61  ;;  %v4021_v26 = vpop.f32.mrf.mxu1  ;;  %v5217_v61 = vld [vmem:[%s9388_s0 + $0x210] sm:$0xf] }
 0x11a   :  { %4372 = vmatpush.bf16.msra.mxu0 %v7262_v14  ;;  %v4022_v32 = vadd.f32 %v4021_v26, %v4003_v25  ;;  %v6973_v14 = vld [vmem:[%s9388_s0 + $0x214] sm:$0xf] }
 0x11b   :  { %4410 = vmatpush.bf16.msra.mxu2 %v7278_v16  ;;  %v5219_v16 = vld [vmem:[%s9388_s0 + $0x2d4] sm:$0xf0] }
 0x11c   :  { %4429 = vmatpush.bf16.msra.mxu3 %v7286_v18  ;;  %v7312_v18 = vld [vmem:[%s9387_s1 + $0x998] sm:$0xff]  ;;  %v5222_v27 = vor.u32 %v6973_v14, %v5219_v16  ;;  %v7331_v14 = vld [vmem:[%s9387_s1 + $0xa30] sm:$0xff] }
 0x11d   :  { %4391 = vmatpush.bf16.msra.mxu1 %v7270_v20  ;;  %v4040_v45 = vpop.f32.mrf.mxu2  ;;  %v6972_v20 = vld [vmem:[%s9388_s0 + $0x20c] sm:$0xf]  ;;  %v7347_v16 = vld [vmem:[%s9387_s1 + $0xab0] sm:$0xff] }
 0x11e   :  { %4373 = vmatpush.bf16.msra.mxu0 %v7261_v24  ;;  %v4041_v42 = vadd.f32 %v4040_v45, %v4022_v32  ;;  %v4059_v46 = vpop.f32.mrf.mxu3  ;;  %v4071_v47 = vpop.f32.mrf.mxu0  ;;  %v7304_v24 = vld [vmem:[%s9387_s1 + $0x958] sm:$0xff]  ;;  %v5214_v30 = vor.u32 %v6972_v20, %v5211_v3  ;;  %v7302_v45 = vld [vmem:[%s9387_s1 + $0x948] sm:$0xff] }
 0x11f   :  { %4411 = vmatpush.bf16.msra.mxu2 %v7277_v15  ;;  %v4072_v39 = vadd.f32 %v4071_v47, %v8670_v44  ;;  %v7298_v44 = vld [vmem:[%s9387_s1 + $0x928] sm:$0xff]  ;;  %v5210_v15 = vor.u32 %v6996_v12, %v5209_v57 }
 0x120   :  { %4430 = vmatpush.bf16.msra.mxu3 %v7285_v28  ;;  %v8799_v51 = vadd.f32 %v4059_v46, %v4041_v42  ;;  %v5218_v28 = vor.u32 %v6997_v13, %v5217_v61  ;;  %v7346_v3 = vld [vmem:[%s9387_s1 + $0xaa8] sm:$0xff] }
 0x121   :  { %4392 = vmatpush.bf16.msra.mxu1 %v7269_v29  ;;  %v4090_v52 = vpop.f32.mrf.mxu1  ;;  %4374 = vmatmul.bf16.vlgmr.msra.gmra.mxu0 %v5014_v48 }
 0x122   :  { %4442 = vmatpush.bf16.msrb.mxu0 %v7300_v19  ;;  %v4091_v58 = vadd.f32 %v4090_v52, %v4072_v39  ;;  %4412 = vmatmul.bf16.vlgmr.msra.gmra.mxu2 %v5022_v49  ;;  %v7295_v19 = vld [vmem:[%s9387_s1 + $0x910] sm:$0xff]  ;;  %v7293_v49 = vld [vmem:[%s9387_s1 + $0x900] sm:$0xff] }
 0x123   :  { %4480 = vmatpush.bf16.msrb.mxu2 %v7316_v35  ;;  %4431 = vmatmul.bf16.vlgmr.msra.gmra.mxu3 %v5026_v33  ;;  %v7311_v35 = vld [vmem:[%s9387_s1 + $0x990] sm:$0xff]  ;;  %v7309_v39 = vld [vmem:[%s9387_s1 + $0x980] sm:$0xff] }
 0x124   :  { %4499 = vmatpush.bf16.msrb.mxu3 %v7324_v37  ;;  %4393 = vmatmul.bf16.vlgmr.msra.gmra.mxu1 %v5018_v50  ;;  %v7317_v52 = vld [vmem:[%s9387_s1 + $0x9c0] sm:$0xff] }
 0x125   :  { %4461 = vmatpush.bf16.msrb.mxu1 %v7308_v38  ;;  %v4109_v60 = vpop.f32.mrf.mxu2  ;;  %v7294_v38 = vld [vmem:[%s9387_s1 + $0x908] sm:$0xff] }
 0x126   :  { %4443 = vmatpush.bf16.msrb.mxu0 %v7299_v53  ;;  %v4110_v0 = vadd.f32 %v4109_v60, %v4091_v58  ;;  %v4128_v1 = vpop.f32.mrf.mxu3  ;;  %v4073_v4 = vpop.f32.mrf.mxu0  ;;  %v7301_v53 = vld [vmem:[%s9387_s1 + $0x940] sm:$0xff]  ;;  %v6950_v58 = vld [vmem:[%s9388_s0 + $0x158] sm:$0xf0] }
 0x127   :  { %4481 = vmatpush.bf16.msrb.mxu2 %v7315_v54  ;;  %v4074_v6 = vadd.f32 %v4073_v4, %v8721_v8  ;;  %v7305_v8 = vld [vmem:[%s9387_s1 + $0x960] sm:$0xff]  ;;  %v6949_v54 = vld [vmem:[%s9388_s0 + $0x150] sm:$0xf0]  ;;  %v6926_v60 = vld [vmem:[%s9388_s0 + $0x9c] sm:$0xf] }
 0x128   :  { %4500 = vmatpush.bf16.msrb.mxu3 %v7323_v55  ;;  %v8826_v5 = vadd.f32 %v4128_v1, %v4110_v0  ;;  %v5037_v55 = vld [vmem:[%s9388_s0 + $0x98] sm:$0xf]  ;;  %v5039_v0 = vld [vmem:[%s9388_s0 + $0x15c] sm:$0xf0]  ;;  %v6925_v1 = vld [vmem:[%s9388_s0 + $0x94] sm:$0xf] }
 0x129   :  { %4462 = vmatpush.bf16.msrb.mxu1 %v7307_v56  ;;  %v4092_v2 = vpop.f32.mrf.mxu1  ;;  %v5031_v4 = vld [vmem:[%s9388_s0 + $0x154] sm:$0xf0]  ;;  %v5042_v57 = vor.u32 %v6926_v60, %v5039_v0  ;;  %v7351_v60 = vld [vmem:[%s9387_s1 + $0xad0] sm:$0xff]  ;;  %v7342_v0 = vld [vmem:[%s9387_s1 + $0xa88] sm:$0xff] }
 0x12a   :  { %4444 = vmatpush.bf16.msrb.mxu0 %v7298_v44  ;;  %v4093_v11 = vadd.f32 %v4092_v2, %v4074_v6  ;;  %v7332_v44 = vld [vmem:[%s9387_s1 + $0xa38] sm:$0xff] }
 0x12b   :  { %4482 = vmatpush.bf16.msrb.mxu2 %v7314_v59  ;;  %v7348_v59 = vld [vmem:[%s9387_s1 + $0xab8] sm:$0xff] }
 0x12c   :  { %4501 = vmatpush.bf16.msrb.mxu3 %v7322_v62  ;;  %v7356_v62 = vld [vmem:[%s9387_s1 + $0xaf8] sm:$0xff] }
 0x12d   :  { %4463 = vmatpush.bf16.msrb.mxu1 %v7306_v63  ;;  %v4111_v21 = vpop.f32.mrf.mxu2  ;;  %v7340_v63 = vld [vmem:[%s9387_s1 + $0xa78] sm:$0xff] }
 0x12e   :  { %4445 = vmatpush.bf16.msrb.mxu0 %v7297_v7  ;;  %v4112_v25 = vadd.f32 %v4111_v21, %v4093_v11  ;;  %v4130_v26 = vpop.f32.mrf.mxu3  ;;  %v4076_v29 = vpop.f32.mrf.mxu0  ;;  %v5034_v11 = vor.u32 %v6925_v1, %v5031_v4  ;;  %v7350_v4 = vld [vmem:[%s9387_s1 + $0xac8] sm:$0xff] }
 0x12f   :  { %4483 = vmatpush.bf16.msrb.mxu2 %v7313_v9  ;;  %v4077_v32 = vadd.f32 %v4076_v29, %v8751_v22  ;;  %v7303_v22 = vld [vmem:[%s9387_s1 + $0x950] sm:$0xff] }
 0x130   :  { %4502 = vmatpush.bf16.msrb.mxu3 %v7321_v10  ;;  %v8877_v31 = vadd.f32 %v4130_v26, %v4112_v25  ;;  %v5038_v10 = vor.u32 %v6950_v58, %v5037_v55 }
 0x131   :  { %4464 = vmatpush.bf16.msrb.mxu1 %v7305_v8  ;;  %v4095_v34 = vpop.f32.mrf.mxu1  ;;  %4379 = vmatmul.bf16.gmra.mxu0 %v5210_v15 }
 0x132   :  { %4446 = vmatpush.bf16.msrb.mxu0 %v7296_v17  ;;  %v4096_v37 = vadd.f32 %v4095_v34, %v4077_v32  ;;  %4417 = vmatmul.bf16.gmra.mxu2 %v5218_v28  ;;  %v7355_v17 = vld [vmem:[%s9387_s1 + $0xaf0] sm:$0xff]  ;;  %v7345_v32 = vld [vmem:[%s9387_s1 + $0xaa0] sm:$0xff] }
 0x133   :  { %4484 = vmatpush.bf16.msrb.mxu2 %v7312_v18  ;;  %4436 = vmatmul.bf16.gmra.mxu3 %v5222_v27  ;;  %v7339_v18 = vld [vmem:[%s9387_s1 + $0xa70] sm:$0xff]  ;;  %v7353_v34 = vld [vmem:[%s9387_s1 + $0xae0] sm:$0xff] }
 0x134   :  { %4503 = vmatpush.bf16.msrb.mxu3 %v7320_v23  ;;  %4398 = vmatmul.bf16.gmra.mxu1 %v5214_v30  ;;  %v7354_v23 = vld [vmem:[%s9387_s1 + $0xae8] sm:$0xff]  ;;  %v7329_v30 = vld [vmem:[%s9387_s1 + $0xa20] sm:$0xff] }
 0x135   :  { %4465 = vmatpush.bf16.msrb.mxu1 %v7304_v24  ;;  %v4114_v41 = vpop.f32.mrf.mxu2  ;;  %v7338_v24 = vld [vmem:[%s9387_s1 + $0xa68] sm:$0xff] }
 0x136   :  { %4447 = vmatpush.bf16.msrb.mxu0 %v7295_v19  ;;  %v4115_v42 = vadd.f32 %v4114_v41, %v4096_v37  ;;  %v4133_v46 = vpop.f32.mrf.mxu3  ;;  %v4078_v48 = vpop.f32.mrf.mxu0  ;;  %v5225_v19 = vld [vmem:[%s9388_s0 + $0x218] sm:$0xf]  ;;  %v6999_v37 = vld [vmem:[%s9388_s0 + $0x2e0] sm:$0xf0] }
 0x137   :  { %4485 = vmatpush.bf16.msrb.mxu2 %v7311_v35  ;;  %v4079_v33 = vadd.f32 %v4078_v48, %v8799_v51  ;;  %v5029_v51 = vld [vmem:[%s9388_s0 + $0x90] sm:$0xf]  ;;  %v7328_v41 = vld [vmem:[%s9387_s1 + $0xa18] sm:$0xff] }
 0x138   :  { %4504 = vmatpush.bf16.msrb.mxu3 %v7319_v36  ;;  %v8907_v47 = vadd.f32 %v4133_v46, %v4115_v42  ;;  %v5030_v9 = vor.u32 %v6949_v54, %v5029_v51  ;;  %v6998_v36 = vld [vmem:[%s9388_s0 + $0x2d8] sm:$0xf0]  ;;  %v5227_v42 = vld [vmem:[%s9388_s0 + $0x2dc] sm:$0xf0] }
 0x139   :  { %4466 = vmatpush.bf16.msrb.mxu1 %v7303_v22  ;;  %v4097_v50 = vpop.f32.mrf.mxu1  ;;  %v5233_v22 = vld [vmem:[%s9388_s0 + $0x220] sm:$0xf]  ;;  %v7352_v48 = vld [vmem:[%s9387_s1 + $0xad8] sm:$0xff] }
 0x13a   :  { %4448 = vmatpush.bf16.msrb.mxu0 %v7294_v38  ;;  %v4098_v56 = vadd.f32 %v4097_v50, %v4079_v33  ;;  %v6975_v38 = vld [vmem:[%s9388_s0 + $0x224] sm:$0xf] }
 0x13b   :  { %4486 = vmatpush.bf16.msrb.mxu2 %v7310_v40  ;;  %v5235_v40 = vld [vmem:[%s9388_s0 + $0x2e4] sm:$0xf0] }
 0x13c   :  { %4505 = vmatpush.bf16.msrb.mxu3 %v7318_v43  ;;  %v7344_v43 = vld [vmem:[%s9387_s1 + $0xa98] sm:$0xff]  ;;  %v5238_v51 = vor.u32 %v6975_v38, %v5235_v40  ;;  %v7363_v38 = vld [vmem:[%s9387_s1 + $0xb30] sm:$0xff] }
 0x13d   :  { %4467 = vmatpush.bf16.msrb.mxu1 %v7302_v45  ;;  %v4116_v6 = vpop.f32.mrf.mxu2  ;;  %v6974_v45 = vld [vmem:[%s9388_s0 + $0x21c] sm:$0xf]  ;;  %v7379_v40 = vld [vmem:[%s9387_s1 + $0xbb0] sm:$0xff] }
 0x13e   :  { %4449 = vmatpush.bf16.msrb.mxu0 %v7293_v49  ;;  %v4117_v2 = vadd.f32 %v4116_v6, %v4098_v56  ;;  %v4135_v7 = vpop.f32.mrf.mxu3  ;;  %v4147_v8 = vpop.f32.mrf.mxu0  ;;  %v7336_v49 = vld [vmem:[%s9387_s1 + $0xa58] sm:$0xff]  ;;  %v5230_v54 = vor.u32 %v6974_v45, %v5227_v42  ;;  %v7334_v6 = vld [vmem:[%s9387_s1 + $0xa48] sm:$0xff] }
 0x13f   :  { %4487 = vmatpush.bf16.msrb.mxu2 %v7309_v39  ;;  %v4148_v61 = vadd.f32 %v4147_v8, %v8826_v5  ;;  %v7330_v5 = vld [vmem:[%s9387_s1 + $0xa28] sm:$0xff]  ;;  %v5226_v39 = vor.u32 %v6998_v36, %v5225_v19 }
 0x140   :  { %4506 = vmatpush.bf16.msrb.mxu3 %v7317_v52  ;;  %v8955_v12 = vadd.f32 %v4135_v7, %v4117_v2  ;;  %v5234_v52 = vor.u32 %v6999_v37, %v5233_v22  ;;  %v7378_v42 = vld [vmem:[%s9387_s1 + $0xba8] sm:$0xff] }
 0x141   :  { %4468 = vmatpush.bf16.msrb.mxu1 %v7301_v53  ;;  %v4166_v13 = vpop.f32.mrf.mxu1  ;;  %4450 = vmatmul.bf16.vlgmr.msrb.gmra.mxu0 %v5030_v9 }
 0x142   :  { %4518 = vmatpush.bf16.msra.mxu0 %v7332_v44  ;;  %v4167_v20 = vadd.f32 %v4166_v13, %v4148_v61  ;;  %4488 = vmatmul.bf16.vlgmr.msrb.gmra.mxu2 %v5038_v10  ;;  %v7327_v44 = vld [vmem:[%s9387_s1 + $0xa10] sm:$0xff]  ;;  %v7325_v10 = vld [vmem:[%s9387_s1 + $0xa00] sm:$0xff] }
 0x143   :  { %4556 = vmatpush.bf16.msra.mxu2 %v7348_v59  ;;  %4507 = vmatmul.bf16.vlgmr.msrb.gmra.mxu3 %v5042_v57  ;;  %v7343_v59 = vld [vmem:[%s9387_s1 + $0xa90] sm:$0xff]  ;;  %v7341_v61 = vld [vmem:[%s9387_s1 + $0xa80] sm:$0xff] }
 0x144   :  { %4575 = vmatpush.bf16.msra.mxu3 %v7356_v62  ;;  %4469 = vmatmul.bf16.vlgmr.msrb.gmra.mxu1 %v5034_v11  ;;  %v7349_v13 = vld [vmem:[%s9387_s1 + $0xac0] sm:$0xff] }
 0x145   :  { %4537 = vmatpush.bf16.msra.mxu1 %v7340_v63  ;;  %v4185_v21 = vpop.f32.mrf.mxu2  ;;  %v7326_v63 = vld [vmem:[%s9387_s1 + $0xa08] sm:$0xff] }
 0x146   :  { %4519 = vmatpush.bf16.msra.mxu0 %v7331_v14  ;;  %v4186_v25 = vadd.f32 %v4185_v21, %v4167_v20  ;;  %v4204_v26 = vpop.f32.mrf.mxu3  ;;  %v4149_v15 = vpop.f32.mrf.mxu0  ;;  %v7333_v14 = vld [vmem:[%s9387_s1 + $0xa40] sm:$0xff]  ;;  %v6952_v20 = vld [vmem:[%s9388_s0 + $0x168] sm:$0xf0] }
 0x147   :  { %4557 = vmatpush.bf16.msra.mxu2 %v7347_v16  ;;  %v4150_v29 = vadd.f32 %v4149_v15, %v8877_v31  ;;  %v7337_v31 = vld [vmem:[%s9387_s1 + $0xa60] sm:$0xff]  ;;  %v6928_v21 = vld [vmem:[%s9388_s0 + $0xac] sm:$0xf]  ;;  %v5047_v15 = vld [vmem:[%s9388_s0 + $0x164] sm:$0xf0] }
 0x148   :  { %4576 = vmatpush.bf16.msra.mxu3 %v7355_v17  ;;  %v8982_v28 = vadd.f32 %v4204_v26, %v4186_v25  ;;  %v6951_v16 = vld [vmem:[%s9388_s0 + $0x160] sm:$0xf0]  ;;  %v5053_v17 = vld [vmem:[%s9388_s0 + $0xa8] sm:$0xf]  ;;  %v5055_v25 = vld [vmem:[%s9388_s0 + $0x16c] sm:$0xf0] }
 0x149   :  { %4538 = vmatpush.bf16.msra.mxu1 %v7339_v18  ;;  %v4168_v27 = vpop.f32.mrf.mxu1  ;;  %v6927_v26 = vld [vmem:[%s9388_s0 + $0xa4] sm:$0xf]  ;;  %v5058_v19 = vor.u32 %v6928_v21, %v5055_v25  ;;  %v7383_v21 = vld [vmem:[%s9387_s1 + $0xbd0] sm:$0xff]  ;;  %v7374_v25 = vld [vmem:[%s9387_s1 + $0xb88] sm:$0xff] }
 0x14a   :  { %4520 = vmatpush.bf16.msra.mxu0 %v7330_v5  ;;  %v4169_v35 = vadd.f32 %v4168_v27, %v4150_v29  ;;  %v7364_v5 = vld [vmem:[%s9387_s1 + $0xb38] sm:$0xff] }
 0x14b   :  { %4558 = vmatpush.bf16.msra.mxu2 %v7346_v3  ;;  %v7380_v3 = vld [vmem:[%s9387_s1 + $0xbb8] sm:$0xff] }
 0x14c   :  { %4577 = vmatpush.bf16.msra.mxu3 %v7354_v23  ;;  %v7388_v23 = vld [vmem:[%s9387_s1 + $0xbf8] sm:$0xff] }
 0x14d   :  { %4539 = vmatpush.bf16.msra.mxu1 %v7338_v24  ;;  %v4187_v46 = vpop.f32.mrf.mxu2  ;;  %v7372_v24 = vld [vmem:[%s9387_s1 + $0xb78] sm:$0xff] }
 0x14e   :  { %4521 = vmatpush.bf16.msra.mxu0 %v7329_v30  ;;  %v4188_v33 = vadd.f32 %v4187_v46, %v4169_v35  ;;  %v4206_v50 = vpop.f32.mrf.mxu3  ;;  %v4152_v53 = vpop.f32.mrf.mxu0  ;;  %v5050_v35 = vor.u32 %v6927_v26, %v5047_v15  ;;  %v7382_v15 = vld [vmem:[%s9387_s1 + $0xbc8] sm:$0xff] }
 0x14f   :  { %4559 = vmatpush.bf16.msra.mxu2 %v7345_v32  ;;  %v4153_v56 = vadd.f32 %v4152_v53, %v8907_v47  ;;  %v7335_v47 = vld [vmem:[%s9387_s1 + $0xa50] sm:$0xff] }
 0x150   :  { %4578 = vmatpush.bf16.msra.mxu3 %v7353_v34  ;;  %v9033_v55 = vadd.f32 %v4206_v50, %v4188_v33  ;;  %v5054_v34 = vor.u32 %v6952_v20, %v5053_v17 }
 0x151   :  { %4540 = vmatpush.bf16.msra.mxu1 %v7337_v31  ;;  %v4171_v58 = vpop.f32.mrf.mxu1  ;;  %4455 = vmatmul.bf16.gmra.mxu0 %v5226_v39 }
 0x152   :  { %4522 = vmatpush.bf16.msra.mxu0 %v7328_v41  ;;  %v4172_v62 = vadd.f32 %v4171_v58, %v4153_v56  ;;  %4493 = vmatmul.bf16.gmra.mxu2 %v5234_v52  ;;  %v7387_v41 = vld [vmem:[%s9387_s1 + $0xbf0] sm:$0xff]  ;;  %v7377_v56 = vld [vmem:[%s9387_s1 + $0xba0] sm:$0xff] }
 0x153   :  { %4560 = vmatpush.bf16.msra.mxu2 %v7344_v43  ;;  %4512 = vmatmul.bf16.gmra.mxu3 %v5238_v51  ;;  %v7371_v43 = vld [vmem:[%s9387_s1 + $0xb70] sm:$0xff]  ;;  %v7385_v58 = vld [vmem:[%s9387_s1 + $0xbe0] sm:$0xff] }
 0x154   :  { %4579 = vmatpush.bf16.msra.mxu3 %v7352_v48  ;;  %4474 = vmatmul.bf16.gmra.mxu1 %v5230_v54  ;;  %v7386_v48 = vld [vmem:[%s9387_s1 + $0xbe8] sm:$0xff]  ;;  %v7361_v54 = vld [vmem:[%s9387_s1 + $0xb20] sm:$0xff] }
 0x155   :  { %4541 = vmatpush.bf16.msra.mxu1 %v7336_v49  ;;  %v4190_v1 = vpop.f32.mrf.mxu2  ;;  %v7370_v49 = vld [vmem:[%s9387_s1 + $0xb68] sm:$0xff] }
 0x156   :  { %4523 = vmatpush.bf16.msra.mxu0 %v7327_v44  ;;  %v4191_v2 = vadd.f32 %v4190_v1, %v4172_v62  ;;  %v4209_v7 = vpop.f32.mrf.mxu3  ;;  %v4154_v9 = vpop.f32.mrf.mxu0  ;;  %v5241_v44 = vld [vmem:[%s9388_s0 + $0x228] sm:$0xf]  ;;  %v6977_v62 = vld [vmem:[%s9388_s0 + $0x234] sm:$0xf] }
 0x157   :  { %4561 = vmatpush.bf16.msra.mxu2 %v7343_v59  ;;  %v4155_v57 = vadd.f32 %v4154_v9, %v8955_v12  ;;  %v5045_v12 = vld [vmem:[%s9388_s0 + $0xa0] sm:$0xf]  ;;  %v7000_v59 = vld [vmem:[%s9388_s0 + $0x2e8] sm:$0xf0]  ;;  %v7384_v9 = vld [vmem:[%s9387_s1 + $0xbd8] sm:$0xff] }
 0x158   :  { %4580 = vmatpush.bf16.msra.mxu3 %v7351_v60  ;;  %v9063_v8 = vadd.f32 %v4209_v7, %v4191_v2  ;;  %v5046_v32 = vor.u32 %v6951_v16, %v5045_v12  ;;  %v5249_v60 = vld [vmem:[%s9388_s0 + $0x230] sm:$0xf] }
 0x159   :  { %4542 = vmatpush.bf16.msra.mxu1 %v7335_v47  ;;  %v4173_v11 = vpop.f32.mrf.mxu1  ;;  %v7001_v47 = vld [vmem:[%s9388_s0 + $0x2f0] sm:$0xf0]  ;;  %v5243_v2 = vld [vmem:[%s9388_s0 + $0x2ec] sm:$0xf0] }
 0x15a   :  { %4524 = vmatpush.bf16.msra.mxu0 %v7326_v63  ;;  %v4174_v18 = vadd.f32 %v4173_v11, %v4155_v57  ;;  %v5251_v63 = vld [vmem:[%s9388_s0 + $0x2f4] sm:$0xf0] }
 0x15b   :  { %4562 = vmatpush.bf16.msra.mxu2 %v7342_v0  ;;  %v7360_v0 = vld [vmem:[%s9387_s1 + $0xb18] sm:$0xff]  ;;  %v5254_v12 = vor.u32 %v6977_v62, %v5251_v63  ;;  %v7394_v62 = vld [vmem:[%s9387_s1 + $0xc28] sm:$0xff] }
 0x15c   :  { %4581 = vmatpush.bf16.msra.mxu3 %v7350_v4  ;;  %v7376_v4 = vld [vmem:[%s9387_s1 + $0xb98] sm:$0xff] }
 0x15d   :  { %4543 = vmatpush.bf16.msra.mxu1 %v7334_v6  ;;  %v4192_v29 = vpop.f32.mrf.mxu2  ;;  %v6976_v6 = vld [vmem:[%s9388_s0 + $0x22c] sm:$0xf] }
 0x15e   :  { %4525 = vmatpush.bf16.msra.mxu0 %v7325_v10  ;;  %v4193_v27 = vadd.f32 %v4192_v29, %v4174_v18  ;;  %v4211_v30 = vpop.f32.mrf.mxu3  ;;  %v4223_v31 = vpop.f32.mrf.mxu0  ;;  %v7368_v10 = vld [vmem:[%s9387_s1 + $0xb58] sm:$0xff]  ;;  %v5246_v16 = vor.u32 %v6976_v6, %v5243_v2  ;;  %v7366_v29 = vld [vmem:[%s9387_s1 + $0xb48] sm:$0xff] }
 0x15f   :  { %4563 = vmatpush.bf16.msra.mxu2 %v7341_v61  ;;  %v4224_v22 = vadd.f32 %v4223_v31, %v8982_v28  ;;  %v7362_v28 = vld [vmem:[%s9387_s1 + $0xb28] sm:$0xff]  ;;  %v5242_v61 = vor.u32 %v7000_v59, %v5241_v44 }
 0x160   :  { %4582 = vmatpush.bf16.msra.mxu3 %v7349_v13  ;;  %v9111_v36 = vadd.f32 %v4211_v30, %v4193_v27  ;;  %v5250_v13 = vor.u32 %v7001_v47, %v5249_v60  ;;  %v7395_v60 = vld [vmem:[%s9387_s1 + $0xc30] sm:$0xff] }
 0x161   :  { %4544 = vmatpush.bf16.msra.mxu1 %v7333_v14  ;;  %v4242_v37 = vpop.f32.mrf.mxu1  ;;  %4526 = vmatmul.bf16.vlgmr.msra.gmra.mxu0 %v5046_v32 }
 0x162   :  { %4594 = vmatpush.bf16.msrb.mxu0 %v7364_v5  ;;  %v4243_v45 = vadd.f32 %v4242_v37, %v4224_v22  ;;  %4564 = vmatmul.bf16.vlgmr.msra.gmra.mxu2 %v5054_v34  ;;  %v7359_v5 = vld [vmem:[%s9387_s1 + $0xb10] sm:$0xff]  ;;  %v7373_v22 = vld [vmem:[%s9387_s1 + $0xb80] sm:$0xff] }
 0x163   :  { %4632 = vmatpush.bf16.msrb.mxu2 %v7380_v3  ;;  %4583 = vmatmul.bf16.vlgmr.msra.gmra.mxu3 %v5058_v19  ;;  %v7375_v3 = vld [vmem:[%s9387_s1 + $0xb90] sm:$0xff]  ;;  %v7381_v37 = vld [vmem:[%s9387_s1 + $0xbc0] sm:$0xff] }
 0x164   :  { %4651 = vmatpush.bf16.msrb.mxu3 %v7388_v23  ;;  %4545 = vmatmul.bf16.vlgmr.msra.gmra.mxu1 %v5050_v35  ;;  %v7357_v35 = vld [vmem:[%s9387_s1 + $0xb00] sm:$0xff] }
 0x165   :  { %4613 = vmatpush.bf16.msrb.mxu1 %v7372_v24  ;;  %v4261_v46 = vpop.f32.mrf.mxu2  ;;  %v7358_v24 = vld [vmem:[%s9387_s1 + $0xb08] sm:$0xff] }
 0x166   :  { %4595 = vmatpush.bf16.msrb.mxu0 %v7363_v38  ;;  %v4262_v33 = vadd.f32 %v4261_v46, %v4243_v45  ;;  %v4280_v50 = vpop.f32.mrf.mxu3  ;;  %v4225_v39 = vpop.f32.mrf.mxu0  ;;  %v5061_v38 = vld [vmem:[%s9388_s0 + $0xb0] sm:$0xf]  ;;  %v6954_v45 = vld [vmem:[%s9388_s0 + $0x178] sm:$0xf0]  ;;  %v5071_v46 = vld [vmem:[%s9388_s0 + $0x17c] sm:$0xf0] }
 0x167   :  { %4633 = vmatpush.bf16.msrb.mxu2 %v7379_v40  ;;  %v4226_v53 = vadd.f32 %v4225_v39, %v9033_v55  ;;  %v7369_v55 = vld [vmem:[%s9387_s1 + $0xb60] sm:$0xff]  ;;  %v6953_v40 = vld [vmem:[%s9388_s0 + $0x170] sm:$0xf0] }
 0x168   :  { %4652 = vmatpush.bf16.msrb.mxu3 %v7387_v41  ;;  %v9138_v52 = vadd.f32 %v4280_v50, %v4262_v33  ;;  %v7396_v41 = vld [vmem:[%s9387_s1 + $0xc38] sm:$0xff] }
 0x169   :  { %4614 = vmatpush.bf16.msrb.mxu1 %v7371_v43  ;;  %v4244_v51 = vpop.f32.mrf.mxu1  ;;  %v5069_v43 = vld [vmem:[%s9388_s0 + $0xb8] sm:$0xf] }
 0x16a   :  { %4596 = vmatpush.bf16.msrb.mxu0 %v7362_v28  ;;  %v4245_v1 = vadd.f32 %v4244_v51, %v4226_v53  ;;  %v6930_v28 = vld [vmem:[%s9388_s0 + $0xbc] sm:$0xf]  ;;  %v5062_v53 = vor.u32 %v6953_v40, %v5061_v38  ;;  %v5070_v51 = vor.u32 %v6954_v45, %v5069_v43  ;;  %v5077_v40 = vld [vmem:[%s9388_s0 + $0xc0] sm:$0xf]  ;;  %v5273_v43 = vld [vmem:[%s9388_s0 + $0x248] sm:$0xf] }
 0x16b   :  { %4634 = vmatpush.bf16.msrb.mxu2 %v7378_v42  ;;  %v7004_v45 = vld [vmem:[%s9388_s0 + $0x308] sm:$0xf0] }
 0x16c   :  { %4653 = vmatpush.bf16.msrb.mxu3 %v7386_v48  ;;  %v6929_v48 = vld [vmem:[%s9388_s0 + $0xb4] sm:$0xf] }
 0x16d   :  { %4615 = vmatpush.bf16.msrb.mxu1 %v7370_v49  ;;  %v4263_v7 = vpop.f32.mrf.mxu2  ;;  %v5063_v49 = vld [vmem:[%s9388_s0 + $0x174] sm:$0xf0] }
 0x16e   :  { %4597 = vmatpush.bf16.msrb.mxu0 %v7361_v54  ;;  %v4264_v57 = vadd.f32 %v4263_v7, %v4245_v1  ;;  %v4282_v11 = vpop.f32.mrf.mxu3  ;;  %v4228_v14 = vpop.f32.mrf.mxu0  ;;  %v7393_v7 = vld [vmem:[%s9387_s1 + $0xc20] sm:$0xff] }
 0x16f   :  { %4635 = vmatpush.bf16.msrb.mxu2 %v7377_v56  ;;  %v4229_v18 = vadd.f32 %v4228_v14, %v9063_v8  ;;  %v7367_v8 = vld [vmem:[%s9387_s1 + $0xb50] sm:$0xff]  ;;  %v5074_v56 = vor.u32 %v6930_v28, %v5071_v46  ;;  %v5267_v14 = vld [vmem:[%s9388_s0 + $0x304] sm:$0xf0] }
 0x170   :  { %4654 = vmatpush.bf16.msrb.mxu3 %v7385_v58  ;;  %v9189_v17 = vadd.f32 %v4282_v11, %v4264_v57  ;;  %v5066_v58 = vor.u32 %v6929_v48, %v5063_v49  ;;  %v7002_v57 = vld [vmem:[%s9388_s0 + $0x2f8] sm:$0xf0]  ;;  %v5265_v11 = vld [vmem:[%s9388_s0 + $0x240] sm:$0xf] }
 0x171   :  { %4616 = vmatpush.bf16.msrb.mxu1 %v7369_v55  ;;  %v4247_v20 = vpop.f32.mrf.mxu1  ;;  %4531 = vmatmul.bf16.gmra.mxu0 %v5242_v61  ;;  %v7003_v61 = vld [vmem:[%s9388_s0 + $0x300] sm:$0xf0] }
 0x172   :  { %4598 = vmatpush.bf16.msrb.mxu0 %v7360_v0  ;;  %v4248_v23 = vadd.f32 %v4247_v20, %v4229_v18  ;;  %4569 = vmatmul.bf16.gmra.mxu2 %v5250_v13  ;;  %v6979_v13 = vld [vmem:[%s9388_s0 + $0x244] sm:$0xf] }
 0x173   :  { %4636 = vmatpush.bf16.msrb.mxu2 %v7376_v4  ;;  %4588 = vmatmul.bf16.gmra.mxu3 %v5254_v12  ;;  %v7392_v12 = vld [vmem:[%s9387_s1 + $0xc18] sm:$0xff] }
 0x174   :  { %4655 = vmatpush.bf16.msrb.mxu3 %v7384_v9  ;;  %4550 = vmatmul.bf16.gmra.mxu1 %v5246_v16  ;;  %v6978_v16 = vld [vmem:[%s9388_s0 + $0x23c] sm:$0xf] }
 0x175   :  { %4617 = vmatpush.bf16.msrb.mxu1 %v7368_v10  ;;  %v4266_v26 = vpop.f32.mrf.mxu2  ;;  %v5257_v10 = vld [vmem:[%s9388_s0 + $0x238] sm:$0xf] }
 0x176   :  { %4599 = vmatpush.bf16.msrb.mxu0 %v7359_v5  ;;  %v4267_v27 = vadd.f32 %v4266_v26, %v4248_v23  ;;  %v4285_v30 = vpop.f32.mrf.mxu3  ;;  %v4230_v32 = vpop.f32.mrf.mxu0  ;;  %v5270_v23 = vor.u32 %v6979_v13, %v5267_v14 }
 0x177   :  { %4637 = vmatpush.bf16.msrb.mxu2 %v7375_v3  ;;  %v4231_v31 = vadd.f32 %v4230_v32, %v9111_v36  ;;  %v7365_v36 = vld [vmem:[%s9387_s1 + $0xb40] sm:$0xff]  ;;  %v5258_v3 = vor.u32 %v7002_v57, %v5257_v10 }
 0x178   :  { %4656 = vmatpush.bf16.msrb.mxu3 %v7383_v21  ;;  %v9216_v34 = vadd.f32 %v4285_v30, %v4267_v27  ;;  %v5266_v21 = vor.u32 %v7003_v61, %v5265_v11  ;;  %v7390_v30 = vld [vmem:[%s9387_s1 + $0xc08] sm:$0xff] }
 0x179   :  { %4618 = vmatpush.bf16.msrb.mxu1 %v7367_v8  ;;  %v4249_v19 = vpop.f32.mrf.mxu1 }
 0x17a   :  { %4600 = vmatpush.bf16.msrb.mxu0 %v7358_v24  ;;  %v4250_v42 = vadd.f32 %v4249_v19, %v4231_v31 }
 0x17b   :  { %4638 = vmatpush.bf16.msrb.mxu2 %v7374_v25 }
 0x17c   :  { %4657 = vmatpush.bf16.msrb.mxu3 %v7382_v15 }
 0x17d   :  { %4619 = vmatpush.bf16.msrb.mxu1 %v7366_v29  ;;  %v4268_v33 = vpop.f32.mrf.mxu2  ;;  %v7391_v29 = vld [vmem:[%s9387_s1 + $0xc10] sm:$0xff] }
 0x17e   :  { %4601 = vmatpush.bf16.msrb.mxu0 %v7357_v35  ;;  %v4269_v50 = vadd.f32 %v4268_v33, %v4250_v42  ;;  %v4287_v39 = vpop.f32.mrf.mxu3  ;;  %v4299_v54 = vpop.f32.mrf.mxu0  ;;  %v5274_v33 = vor.u32 %v7004_v45, %v5273_v43 }
 0x17f   :  { %4639 = vmatpush.bf16.msrb.mxu2 %v7373_v22  ;;  %v4300_v44 = vadd.f32 %v4299_v54, %v9138_v52 }
 0x180   :  { %4658 = vmatpush.bf16.msrb.mxu3 %v7381_v37  ;;  %v4288_v55 = vadd.f32 %v4287_v39, %v4269_v50 }
 0x181   :  { %4620 = vmatpush.bf16.msrb.mxu1 %v7365_v36  ;;  %v4318_v59 = vpop.f32.mrf.mxu1  ;;  %4602 = vmatmul.bf16.vlgmr.msrb.gmra.mxu0 %v5062_v53  ;;  %v7389_v36 = vld [vmem:[%s9387_s1 + $0xc00] sm:$0xff] }
 0x182   :  { %4670 = vmatpush.bf16.msra.mxu0 %v7396_v41  ;;  %v4319_v47 = vadd.f32 %v4318_v59, %v4300_v44  ;;  %4640 = vmatmul.bf16.vlgmr.msrb.gmra.mxu2 %v5070_v51 }
 0x183   :  { %4659 = vmatmul.bf16.vlgmr.msrb.gmra.mxu3 %v5074_v56 }
 0x184   :  { %7413 = vmatpush.bf16.msra.mxu3 %v7396_v41  ;;  %4621 = vmatmul.bf16.vlgmr.msrb.gmra.mxu1 %v5066_v58  ;;  %v6955_v41 = vld [vmem:[%s9388_s0 + $0x180] sm:$0xf0] }
 0x185   :  { %v4337_v63 = vpop.f32.mrf.mxu2  ;;  %v5078_v48 = vor.u32 %v6955_v41, %v5077_v40 }
 0x186   :  { %4671 = vmatpush.bf16.msra.mxu0 %v7395_v60  ;;  %v4338_v0 = vadd.f32 %v4337_v63, %v4319_v47  ;;  %v4356_v1 = vpop.f32.mrf.mxu3  ;;  %v4301_v52 = vpop.f32.mrf.mxu0 }
 0x187   :  { %v4302_v6 = vadd.f32 %v4301_v52, %v9189_v17  ;;  %v5259_v17 = vld [vmem:[%s9388_s0 + $0x2fc] sm:$0xf0] }
 0x188   :  { %7414 = vmatpush.bf16.msra.mxu3 %v7395_v60  ;;  %v9265_v4 = vadd.f32 %v4356_v1, %v4338_v0  ;;  %v5262_v24 = vor.u32 %v6978_v16, %v5259_v17 }
 0x189   :  { %v4320_v2 = vpop.f32.mrf.mxu1 }
 0x18a   :  { %4672 = vmatpush.bf16.msra.mxu0 %v7394_v62  ;;  %v4321_v9 = vadd.f32 %v4320_v2, %v4302_v6 }
 0x18c   :  { %7415 = vmatpush.bf16.msra.mxu3 %v7394_v62 }
 0x18d   :  { %v4339_v18 = vpop.f32.mrf.mxu2 }
 0x18e   :  { %4673 = vmatpush.bf16.msra.mxu0 %v7393_v7  ;;  %v4340_v20 = vadd.f32 %v4339_v18, %v4321_v9  ;;  %v4358_v5 = vpop.f32.mrf.mxu3  ;;  %v4304_v8 = vpop.f32.mrf.mxu0 }
 0x18f   :  { %v4305_v26 = vadd.f32 %v4304_v8, %v9216_v34 }
 0x190   :  { %7416 = vmatpush.bf16.msra.mxu3 %v7393_v7  ;;  %v4359_v25 = vadd.f32 %v4358_v5, %v4340_v20 }
 0x191   :  { %v4323_v15 = vpop.f32.mrf.mxu1  ;;  %4607 = vmatmul.bf16.gmra.mxu0 %v5258_v3 }
 0x192   :  { %4674 = vmatpush.bf16.msra.mxu0 %v7392_v12  ;;  %v4324_v27 = vadd.f32 %v4323_v15, %v4305_v26  ;;  %4645 = vmatmul.bf16.gmra.mxu2 %v5266_v21 }
 0x193   :  { %4664 = vmatmul.bf16.gmra.mxu3 %v5270_v23 }
 0x194   :  { %7417 = vmatpush.bf16.msra.mxu3 %v7392_v12  ;;  %4626 = vmatmul.bf16.gmra.mxu1 %v5262_v24 }
 0x195   :  { %v4342_v32 = vpop.f32.mrf.mxu2 }
 0x196   :  { %4675 = vmatpush.bf16.msra.mxu0 %v7391_v29  ;;  %v4343_v34 = vadd.f32 %v4342_v32, %v4324_v27  ;;  %v4361_v31 = vpop.f32.mrf.mxu3  ;;  %v4306_v19 = vpop.f32.mrf.mxu0 }
 0x197   :  { %v4307_v22 = vadd.f32 %v4306_v19, %v4288_v55 }
 0x198   :  { %7418 = vmatpush.bf16.msra.mxu3 %v7391_v29  ;;  %v4362_v35 = vadd.f32 %v4361_v31, %v4343_v34 }
 0x199   :  { %v4325_v37 = vpop.f32.mrf.mxu1 }
 0x19a   :  { %4676 = vmatpush.bf16.msra.mxu0 %v7390_v30  ;;  %v4326_v38 = vadd.f32 %v4325_v37, %v4307_v22 }
 0x19c   :  { %7419 = vmatpush.bf16.msra.mxu3 %v7390_v30 }
 0x19d   :  { %v4344_v28 = vpop.f32.mrf.mxu2 }
 0x19e   :  { %4677 = vmatpush.bf16.msra.mxu0 %v7389_v36  ;;  %v4345_v42 = vadd.f32 %v4344_v28, %v4326_v38  ;;  %v4363_v46 = vpop.f32.mrf.mxu3  ;;  %v4375_v49 = vpop.f32.mrf.mxu0 }
 0x19f   :  { %v4376_v39 = vadd.f32 %v4375_v49, %v9265_v4 }
 0x1a0   :  { %7420 = vmatpush.bf16.msra.mxu3 %v7389_v36  ;;  %v4364_v50 = vadd.f32 %v4363_v46, %v4345_v42 }
 0x1a1   :  { %v4394_v53 = vpop.f32.mrf.mxu1  ;;  %4678 = vmatmul.bf16.vlgmr.msra.gmra.mxu0 %v5078_v48 }
 0x1a2   :  { %v4395_v51 = vadd.f32 %v4394_v53, %v4376_v39  ;;  %v7404_v53 = vld [vmem:[%s9391_s3 + $0x38] sm:$0xff] }
 0x1a3   :  { %4683 = vmatmul.bf16.vlgmr.msra.gmra.mxu3 %v5274_v33  ;;  %4763 = vmatpush.bf16.msra.mxu1 %v7404_v53 }
 0x1a5   :  { %v4413_v54 = vpop.f32.mrf.mxu2 }
 0x1a6   :  { %v4414_v56 = vadd.f32 %v4413_v54, %v4395_v51  ;;  %v4432_v58 = vpop.f32.mrf.mxu3  ;;  %v4377_v55 = vpop.f32.mrf.mxu0 }
 0x1a7   :  { %v4378_v59 = vadd.f32 %v4377_v55, %v4359_v25 }
 0x1a8   :  { %v4433_v44 = vadd.f32 %v4432_v58, %v4414_v56  ;;  %v7403_v56 = vld [vmem:[%s9391_s3 + $0x30] sm:$0xff] }
 0x1a9   :  { %v4396_v60 = vpop.f32.mrf.mxu1  ;;  %4764 = vmatpush.bf16.msra.mxu1 %v7403_v56 }
 0x1aa   :  { %v4397_v47 = vadd.f32 %v4396_v60, %v4378_v59  ;;  %v7401_v60 = vld [vmem:[%s9391_s3 + $0x20] sm:$0xff] }
 0x1ad   :  { %v4415_v62 = vpop.f32.mrf.mxu2 }
 0x1ae   :  { %v4416_v63 = vadd.f32 %v4415_v62, %v4397_v47  ;;  %v4434_v0 = vpop.f32.mrf.mxu3  ;;  %v4380_v1 = vpop.f32.mrf.mxu0 }
 0x1af   :  { %v4381_v6 = vadd.f32 %v4380_v1, %v4362_v35 }
 0x1b0   :  { %v4435_v52 = vadd.f32 %v4434_v0, %v4416_v63  ;;  %v7400_v0 = vld [vmem:[%s9391_s3 + $0x18] sm:$0xff] }
 0x1b1   :  { %v4399_v2 = vpop.f32.mrf.mxu1 }
 0x1b2   :  { %v4400_v4 = vadd.f32 %v4399_v2, %v4381_v6 }
 0x1b5   :  { %v4418_v7 = vpop.f32.mrf.mxu2 }
 0x1b6   :  { %v4419_v9 = vadd.f32 %v4418_v7, %v4400_v4  ;;  %v4437_v10 = vpop.f32.mrf.mxu3  ;;  %v4382_v57 = vpop.f32.mrf.mxu0  ;;  %v7398_v4 = vld [vmem:[%s9391_s3 + $0x8] sm:$0xff] }
 0x1b7   :  { %v4383_v61 = vadd.f32 %v4382_v57, %v4364_v50 }
 0x1b8   :  { %v4438_v11 = vadd.f32 %v4437_v10, %v4419_v9 }
 0x1b9   :  { %v4401_v13 = vpop.f32.mrf.mxu1 }
 0x1ba   :  { %v4402_v14 = vadd.f32 %v4401_v13, %v4383_v61 }
 0x1bd   :  { %v4420_v12 = vpop.f32.mrf.mxu2 }
 0x1be   :  { %v4421_v16 = vadd.f32 %v4420_v12, %v4402_v14  ;;  %v4439_v17 = vpop.f32.mrf.mxu3  ;;  %v4451_v18 = vpop.f32.mrf.mxu0 }
 0x1bf   :  { %v4452_v5 = vadd.f32 %v4451_v18, %v4433_v44  ;;  %v7402_v44 = vld [vmem:[%s9391_s3 + $0x28] sm:$0xff] }
 0x1c0   :  { %v4440_v20 = vadd.f32 %v4439_v17, %v4421_v16  ;;  %4765 = vmatpush.bf16.msra.mxu1 %v7402_v44 }
 0x1c1   :  { %v4470_v3 = vpop.f32.mrf.mxu1 }
 0x1c2   :  { %v4471_v21 = vadd.f32 %v4470_v3, %v4452_v5 }
 0x1c4   :  { %4766 = vmatpush.bf16.msra.mxu1 %v7401_v60 }
 0x1c5   :  { %v4489_v8 = vpop.f32.mrf.mxu2 }
 0x1c6   :  { %v4490_v23 = vadd.f32 %v4489_v8, %v4471_v21  ;;  %v4508_v24 = vpop.f32.mrf.mxu3  ;;  %v4453_v25 = vpop.f32.mrf.mxu0 }
 0x1c7   :  { %v4454_v15 = vadd.f32 %v4453_v25, %v4435_v52  ;;  %v7399_v52 = vld [vmem:[%s9391_s3 + $0x10] sm:$0xff] }
 0x1c8   :  { %v4509_v26 = vadd.f32 %v4508_v24, %v4490_v23  ;;  %4767 = vmatpush.bf16.msra.mxu1 %v7400_v0 }
 0x1c9   :  { %v4472_v29 = vpop.f32.mrf.mxu1 }
 0x1ca   :  { %v4473_v9 = vadd.f32 %v4472_v29, %v4454_v15 }
 0x1cc   :  { %4768 = vmatpush.bf16.msra.mxu1 %v7399_v52 }
 0x1cd   :  { %v4491_v27 = vpop.f32.mrf.mxu2 }
 0x1ce   :  { %v4510_v30 = vpop.f32.mrf.mxu3  ;;  %v4456_v32 = vpop.f32.mrf.mxu0  ;;  %v4492_v57 = vadd.f32 %v4491_v27, %v4473_v9 }
 0x1cf   :  { %v4457_v34 = vadd.f32 %v4456_v32, %v4438_v11  ;;  %v7397_v11 = vld [vmem:[%s9391_s3] sm:$0xff] }
 0x1d0   :  { %4769 = vmatpush.bf16.msra.mxu1 %v7398_v4  ;;  %v4511_v61 = vadd.f32 %v4510_v30, %v4492_v57  ;;  %v7408_v4 = vld [vmem:[%s9392_s5 + $0x18] sm:$0xff] }
 0x1d1   :  { %v4475_v31 = vpop.f32.mrf.mxu1 }
 0x1d2   :  { %v4476_v19 = vadd.f32 %v4475_v31, %v4457_v34 }
 0x1d4   :  { %4770 = vmatpush.bf16.msra.mxu1 %v7397_v11 }
 0x1d5   :  { %v4494_v35 = vpop.f32.mrf.mxu2 }
 0x1d6   :  { %v4495_v22 = vadd.f32 %v4494_v35, %v4476_v19  ;;  %v4513_v37 = vpop.f32.mrf.mxu3  ;;  %v4458_v36 = vpop.f32.mrf.mxu0 }
 0x1d7   :  { %v4459_v40 = vadd.f32 %v4458_v36, %v4440_v20 }
 0x1d8   :  { %v4514_v38 = vadd.f32 %v4513_v37, %v4495_v22 }
 0x1d9   :  { %v4477_v41 = vpop.f32.mrf.mxu1 }
 0x1da   :  { %v4478_v12 = vadd.f32 %v4477_v41, %v4459_v40 }
 0x1dd   :  { %v4496_v43 = vpop.f32.mrf.mxu2 }
 0x1de   :  { %v4515_v45 = vpop.f32.mrf.mxu3  ;;  %v4527_v28 = vpop.f32.mrf.mxu0  ;;  %v4497_v20 = vadd.f32 %v4496_v43, %v4478_v12  ;;  %v7406_v12 = vld [vmem:[%s9392_s5 + $0x8] sm:$0xff] }
 0x1df   :  { %v4528_v13 = vadd.f32 %v4527_v28, %v4509_v26 }
 0x1e0   :  { %v4516_v23 = vadd.f32 %v4515_v45, %v4497_v20 }
 0x1e1   :  { %v4546_v42 = vpop.f32.mrf.mxu1 }
 0x1e2   :  { %v4547_v5 = vadd.f32 %v4546_v42, %v4528_v13 }
 0x1e5   :  { %v4565_v46 = vpop.f32.mrf.mxu2 }
 0x1e6   :  { %v4584_v48 = vpop.f32.mrf.mxu3  ;;  %v4529_v49 = vpop.f32.mrf.mxu0  ;;  %v4566_v21 = vadd.f32 %v4565_v46, %v4547_v5  ;;  %v7411_v46 = vld [vmem:[%s9392_s5 + $0x30] sm:$0xff] }
 0x1e7   :  { %v4530_v17 = vadd.f32 %v4529_v49, %v4511_v61 }
 0x1e8   :  { %v4585_v32 = vadd.f32 %v4584_v48, %v4566_v21 }
 0x1e9   :  { %v4548_v33 = vpop.f32.mrf.mxu1 }
 0x1ea   :  { %v4549_v8 = vadd.f32 %v4548_v33, %v4530_v17 }
 0x1ed   :  { %v4567_v50 = vpop.f32.mrf.mxu2 }
 0x1ee   :  { %v4586_v39 = vpop.f32.mrf.mxu3  ;;  %v4532_v51 = vpop.f32.mrf.mxu0  ;;  %v4568_v25 = vadd.f32 %v4567_v50, %v4549_v8 }
 0x1ef   :  { %v4533_v24 = vadd.f32 %v4532_v51, %v4514_v38  ;;  %v7412_v38 = vld [vmem:[%s9392_s5 + $0x38] sm:$0xff]  ;;  %v7410_v51 = vld [vmem:[%s9392_s5 + $0x28] sm:$0xff] }
 0x1f0   :  { %v4587_v30 = vadd.f32 %v4586_v39, %v4568_v25  ;;  %4856 = vmatpush.bf16.msra.mxu2 %v7412_v38 }
 0x1f1   :  { %v4551_v54 = vpop.f32.mrf.mxu1 }
 0x1f2   :  { %v4552_v34 = vadd.f32 %v4551_v54, %v4533_v24 }
 0x1f4   :  { %4857 = vmatpush.bf16.msra.mxu2 %v7411_v46 }
 0x1f5   :  { %v4570_v58 = vpop.f32.mrf.mxu2 }
 0x1f6   :  { %v4589_v55 = vpop.f32.mrf.mxu3  ;;  %v4534_v59 = vpop.f32.mrf.mxu0  ;;  %v4571_v19 = vadd.f32 %v4570_v58, %v4552_v34 }
 0x1f7   :  { %v4535_v29 = vadd.f32 %v4534_v59, %v4516_v23 }
 0x1f8   :  { %v4590_v43 = vadd.f32 %v4589_v55, %v4571_v19  ;;  %4858 = vmatpush.bf16.msra.mxu2 %v7410_v51 }
 0x1f9   :  { %v4553_v47 = vpop.f32.mrf.mxu1 }
 0x1fa   :  { %v4554_v35 = vadd.f32 %v4553_v47, %v4535_v29 }
 0x1fd   :  { %v4572_v62 = vpop.f32.mrf.mxu2 }
 0x1fe   :  { %v4591_v63 = vpop.f32.mrf.mxu3  ;;  %v4603_v1 = vpop.f32.mrf.mxu0  ;;  %v4573_v36 = vadd.f32 %v4572_v62, %v4554_v35 }
 0x1ff   :  { %v4604_v26 = vadd.f32 %v4603_v1, %v4585_v32 }
 0x200   :  { %v4592_v48 = vadd.f32 %v4591_v63, %v4573_v36  ;;  %v7409_v63 = vld [vmem:[%s9392_s5 + $0x20] sm:$0xff] }
 0x201   :  { %v4622_v6 = vpop.f32.mrf.mxu1  ;;  %4859 = vmatpush.bf16.msra.mxu2 %v7409_v63 }
 0x202   :  { %v4623_v40 = vadd.f32 %v4622_v6, %v4604_v26 }
 0x205   :  { %v4641_v10 = vpop.f32.mrf.mxu2  ;;  %4860 = vmatpush.bf16.msra.mxu2 %v7408_v4 }
 0x206   :  { %v4660_v2 = vpop.f32.mrf.mxu3  ;;  %v4605_v7 = vpop.f32.mrf.mxu0  ;;  %v4642_v28 = vadd.f32 %v4641_v10, %v4623_v40 }
 0x207   :  { %v4606_v22 = vadd.f32 %v4605_v7, %v4587_v30  ;;  %v7423_v30 = vld [vmem:[%s9393_s6] ss:$0 sm:$0xff] }
 0x208   :  { %v4661_v39 = vadd.f32 %v4660_v2, %v4642_v28 }
 0x209   :  { %v4624_v18 = vpop.f32.mrf.mxu1 }
 0x20a   :  { %v4625_v42 = vadd.f32 %v4624_v18, %v4606_v22  ;;  %v7422_v18 = vld [vmem:[%s9390_s4] ss:$0 sm:$0xff] }
 0x20d   :  { %v4643_v3 = vpop.f32.mrf.mxu2 }
 0x20e   :  { %v4662_v14 = vpop.f32.mrf.mxu3  ;;  %v4608_v16 = vpop.f32.mrf.mxu0  ;;  %v4644_v33 = vadd.f32 %v4643_v3, %v4625_v42 }
 0x20f   :  { %v4609_v49 = vadd.f32 %v4608_v16, %v4590_v43  ;;  %v7405_v16 = vld [vmem:[%s9392_s5] sm:$0xff] }
 0x210   :  { %v4663_v56 = vadd.f32 %v4662_v14, %v4644_v33  ;;  %v7407_v14 = vld [vmem:[%s9392_s5 + $0x10] sm:$0xff] }
 0x211   :  { %v4627_v31 = vpop.f32.mrf.mxu1  ;;  %4861 = vmatpush.bf16.msra.mxu2 %v7407_v14 }
 0x212   :  { %v4628_v54 = vadd.f32 %v4627_v31, %v4609_v49 }
 0x215   :  { %v4646_v37 = vpop.f32.mrf.mxu2  ;;  %4862 = vmatpush.bf16.msra.mxu2 %v7406_v12 }
 0x216   :  { %v4665_v15 = vpop.f32.mrf.mxu3  ;;  %v4610_v27 = vpop.f32.mrf.mxu0  ;;  %v4647_v59 = vadd.f32 %v4646_v37, %v4628_v54 }
 0x217   :  { %v4611_v50 = vadd.f32 %v4610_v27, %v4592_v48 }
 0x218   :  { %v4666_v6 = vadd.f32 %v4665_v15, %v4647_v59 }
 0x219   :  { %v4629_v53 = vpop.f32.mrf.mxu1  ;;  %4863 = vmatpush.bf16.msra.mxu2 %v7405_v16 }
 0x21a   :  { %v4630_v60 = vadd.f32 %v4629_v53, %v4611_v50 }
 0x21d   :  { %v4648_v58 = vpop.f32.mrf.mxu2 }
 0x21e   :  { %v4667_v41 = vpop.f32.mrf.mxu3  ;;  %v4679_v45 = vpop.f32.mrf.mxu0  ;;  %v4649_v0 = vadd.f32 %v4648_v58, %v4630_v60 }
 0x21f   :  { %v4680_v55 = vadd.f32 %v4679_v45, %v4661_v39 }
 0x220   :  { %v4668_v7 = vadd.f32 %v4667_v41, %v4649_v0 }
 0x221   :  { %v4689_v1 = vmax.f32 %v4680_v55, 0.0 }
 0x226   :  { %v4684_v44 = vpop.f32.mrf.mxu3  ;;  %v4681_v47 = vpop.f32.mrf.mxu0 }
 0x227   :  { %v4682_v62 = vadd.f32 %v4681_v47, %v4663_v56  ;;  %v4685_v9 = vadd.f32 %v4684_v44, %v4666_v6 }
 0x229   :  { %v4690_v52 = vmax.f32 %v4682_v62, 0.0  ;;  %v4691_v11 = vmax.f32 %v4685_v9, 0.0 }
 0x22b   :  { %v4693_v2 = vpack.c.bf16 %v4690_v52, %v4689_v1 }
 0x22d   :  { %4771 = vmatmul.bf16.vlgmr.msra.gmra.mxu1 %v4693_v2 }
 0x22e   :  { %v4686_v10 = vpop.f32.mrf.mxu3 }
 0x22f   :  { %v4687_v57 = vadd.f32 %v4686_v10, %v4668_v7 }
 0x231   :  { %v4692_v61 = vmax.f32 %v4687_v57, 0.0 }
 0x233   :  { %v4694_v13 = vpack.c.bf16 %v4692_v61, %v4691_v11 }
 0x23d   :  { %4776 = vmatmul.bf16.gmra.mxu1 %v4694_v13 }
 0x2aa   :  { %v4772_v17 = vpop.f32.mrf.mxu1 }
 0x2ab   :  { %v4773_v20 = vadd.f32 %v7422_v18, %v4772_v17 }
 0x2ad   :  { %v4782_v21 = vmax.f32 %v4773_v20, 0.0 }
 0x2b2   :  { %v4774_v5 = vpop.f32.mrf.mxu1 }
 0x2b3   :  { %v4775_v3 = vadd.f32 %v7422_v18, %v4774_v5 }
 0x2b5   :  { %v4783_v8 = vmax.f32 %v4775_v3, 0.0 }
 0x2b7   :  { %v4786_v23 = vpack.c.bf16 %v4783_v8, %v4782_v21 }
 0x2b9   :  { %4864 = vmatmul.bf16.vlgmr.msra.gmra.mxu2 %v4786_v23 }
 0x2ba   :  { %v4777_v24 = vpop.f32.mrf.mxu1 }
 0x2bb   :  { %v4778_v25 = vadd.f32 %v7422_v18, %v4777_v24 }
 0x2bd   :  { %v4784_v27 = vmax.f32 %v4778_v25, 0.0 }
 0x2c2   :  { %v4779_v15 = vpop.f32.mrf.mxu1 }
 0x2c3   :  { %v4780_v29 = vadd.f32 %v7422_v18, %v4779_v15 }
 0x2c5   :  { %v4785_v32 = vmax.f32 %v4780_v29, 0.0 }
 0x2c7   :  { %v4787_v34 = vpack.c.bf16 %v4785_v32, %v4784_v27 }
 0x2c9   :  { %4869 = vmatmul.bf16.gmra.mxu2 %v4787_v34 }
 0x33c   :  { %v4865_v26 = vpop.f32.mrf.mxu2 }
 0x33d   :  { %v4866_v31 = vadd.f32 %v7423_v30, %v4865_v26 }
 0x33f   :  { %4875 = vst [vmem:[%s9394_s7] sm:$0xff] %v4866_v31 }
 0x344   :  { %v4867_v19 = vpop.f32.mrf.mxu2 }
 0x345   :  { %v4868_v35 = vadd.f32 %v7423_v30, %v4867_v19 }
 0x347   :  { %4876 = vst [vmem:[%s9394_s7 + $0x8] sm:$0xff] %v4868_v35 }
 0x34c   :  { %v4870_v22 = vpop.f32.mrf.mxu2 }
 0x34d   :  { %v4871_v37 = vadd.f32 %v7423_v30, %v4870_v22 }
 0x34f   :  { %4877 = vst [vmem:[%s9394_s7 + $0x10] sm:$0xff] %v4871_v37 }
 0x354   :  { %v4872_v36 = vpop.f32.mrf.mxu2 }
 0x355   :  { %v4873_v40 = vadd.f32 %v7423_v30, %v4872_v36 }
 0x357   :  { %4878 = vst [vmem:[%s9394_s7 + $0x18] sm:$0xff] %v4873_v40 }

</bundles_post_ra>
